<compile_context>
chip_gen: v5e
topology: v5e:2x2
jax: 0.10.0
libtpu: 0.0.40
codegen_flags: <defaults>
</compile_context>

<pallas_src>
import functools

import jax
import jax.numpy as jnp
from jax import lax
from jax.experimental import pallas as pl
from jax.experimental.pallas import tpu as pltpu

# ----------------------------- configuration (module defaults) ----------------
CELL_SIDE = 2.0
N_CELLS = 4            # n
POOL_SIZE = 1
BLUR_SIZE = 1
CONSTANT = 0.0
POOLING_DIM = 1        # occupancy
HIDDEN_DIM = 128
OUT_DIM = HIDDEN_DIM   # out_dim=None -> hidden_dim
GRID_DIM = N_CELLS * N_CELLS * POOLING_DIM  # 16

# TODO(synk): blur_size > 1 (avg_pool2d) and pool_size > 1 (lp_pool2d sum-pool)
#             are not implemented; defaults (1, 1) make them identities.
# TODO(synk): num_tracks == 1 branch (constant grid), 'directional'/'social'
#             pooling types, front=True rotation and the 'lstm_layer' embedding
#             arch are not implemented.


def _gridpool_kernel(obs_rows_ref, obs_cols_ref, w_ref, b_ref, out_ref, *,
                     batch_tile, num_tracks, n, cell_side, pool_size, constant):
    TB, N = batch_tile, num_tracks
    np_side = n * pool_size                 # grid side length in cells
    C = np_side * np_side                   # cells per grid (pooling_dim == 1)

    rows = obs_rows_ref[...]                # [TB, 2, N]  x/y along lanes (j index)
    cols = obs_cols_ref[...]                # [TB, N, 2]  x/y along sublanes (i index)

    xj, yj = rows[:, 0:1, :], rows[:, 1:2, :]      # [TB, 1, N]
    xi, yi = cols[:, :, 0:1], cols[:, :, 1:2]      # [TB, N, 1]

    # obs[isnan(obs).any(-1)] = -500.0
    nan_j = jnp.isnan(xj) | jnp.isnan(yj)
    xj = jnp.where(nan_j, -500.0, xj)
    yj = jnp.where(nan_j, -500.0, yj)
    nan_i = jnp.isnan(xi) | jnp.isnan(yi)
    xi = jnp.where(nan_i, -500.0, xi)
    yi = jnp.where(nan_i, -500.0, yi)

    # relative[b, i, j] = obs[b, j] - obs[b, i]   (i on sublanes, j on lanes)
    rel_x = xj - xi                          # [TB, N, N]
    rel_y = yj - yi

    scale = cell_side / pool_size
    off = n * pool_size / 2.0
    ox = rel_x / scale + off
    oy = rel_y / scale + off

    in_range = (ox >= 0.0) & (ox < np_side) & (oy >= 0.0) & (oy < np_side)
    # oij[~range_mask] = 0 ; .long() (trunc == floor for the non-negative values)
    cx = jnp.where(in_range, ox, 0.0).astype(jnp.int32)
    cy = jnp.where(in_range, oy, 0.0).astype(jnp.int32)

    shape3 = (TB, N, N)
    i_iota = lax.broadcasted_iota(jnp.int32, shape3, 1)
    j_iota = lax.broadcasted_iota(jnp.int32, shape3, 2)
    # Fold self-exclusion into the target as a -1 sentinel (never matches a
    # cell), so the 4-D one-hot below needs no extra mask op.
    target = jnp.where(i_iota != j_iota, cx * np_side + cy, -1)   # [TB, N, N]

    # Occupancy build, (TB, N_i, N_j, C) orientation: every in-range write is
    # 1.0, so last-write-wins collapses to "any j hit this cell".  The j
    # reduce runs over the sublane axis inside each vreg and the result is
    # already C-minor.  Integer select + sum (instead of bool any / f32 max)
    # keeps the reduction on a natively supported kind.
    c4 = lax.broadcasted_iota(jnp.int32, (TB, N, N, C), 3)
    hits = jnp.where(target[:, :, :, None] == c4, 1, 0)           # [TB,N,N,C] i32
    written = jnp.sum(hits, axis=2)                               # [TB, N, C]
    grid = jnp.where(written > 0, 1.0, constant)                  # [TB, N, C] f32

    # Cell-0 fixup: out-of-range neighbours also write `constant` to cell 0 and
    # the *last* writer (largest j) wins.  Encode 2*(j+1) + in_range, take one
    # max over j: the low bit of the max says whether the last writer was
    # in range (single fused reduce, no redundant guard).
    enc = jnp.where(target == 0,
                    2 * (j_iota + 1) + in_range.astype(jnp.int32), 0)
    last_w = jnp.max(enc, axis=-1, keepdims=True)                 # [TB, N, 1]
    grid0 = jnp.where(jnp.bitwise_and(last_w, 1) == 1, 1.0, constant)

    cell_iota = lax.broadcasted_iota(jnp.int32, (TB, N, C), 2)
    grid = jnp.where(cell_iota == 0, grid0, grid)                 # [TB, N, C]

    # [TB*N, C]: only leading dims merge -> no tile-crossing reshape.
    grid_flat = grid.reshape(TB * N, C).astype(jnp.float32)

    # one_layer embedding: ReLU(grid @ W + b); kept f32 to match torch numerics.
    # (Cast grid_flat/W to bf16 here if MXU time ever shows in the profile —
    # grid values are exactly {0, 1} so the LHS cast is lossless.)
    emb = jnp.dot(grid_flat, w_ref[...], preferred_element_type=jnp.float32)
    emb = jnp.maximum(emb + b_ref[...], 0.0)
    out_ref[...] = emb.astype(out_ref.dtype)


def _pick_batch_tile(B, N):
    """Largest TB in {128, 64, 32, 16} dividing B with >= 8 grid steps if
    possible, else >= 2 steps (v7x megacore wants >= 2 parallel steps and
    pipelining likes more); small-B fallback keeps >= 2 steps.  Guarantees the
    (TB*N, 128) output block stays (8, 128)-aligned (or TB == B)."""
    tb = None
    for min_steps in (8, 2):
        for cand in (128, 64, 32, 16):
            if B % cand == 0 and B // cand >= min_steps:
                tb = cand
                break
        if tb is not None:
            break
    if tb is None:
        for cand in range(max(B // 2, 1), 0, -1):
            if B % cand == 0:
                tb = cand
                break
    if tb is None:
        tb = B
    if (tb * N) % 8 != 0 and tb != B:
        tb = B   # single full-array block is always layout-legal
    return tb


def grid_based_pooling(hidden_state, obs1, obs2, weight, bias, *, batch_tile=None):
    """hidden_state: [B, N, hidden_dim] (unused for 'occupancy');
       obs1, obs2: [B, N, 2];  weight: [GRID_DIM, OUT_DIM];  bias: [OUT_DIM].
       Returns [B*N, OUT_DIM]."""
    del hidden_state, obs1  # unused for occupancy pooling with front=False
    B, N, _ = obs2.shape
    TB = _pick_batch_tile(B, N) if batch_tile is None else batch_tile
    assert B % TB == 0, "batch_tile must divide the batch size"
    num_steps = B // TB

    obs_cols = obs2.astype(jnp.float32)              # [B, N, 2]  (i-index layout)
    obs_rows = jnp.transpose(obs_cols, (0, 2, 1))    # [B, 2, N]  (j-index layout)
    weight = weight.astype(jnp.float32)
    bias2d = bias.reshape(1, OUT_DIM).astype(jnp.float32)

    kernel = functools.partial(
        _gridpool_kernel, batch_tile=TB, num_tracks=N, n=N_CELLS,
        cell_side=CELL_SIDE, pool_size=POOL_SIZE, constant=float(CONSTANT))

    # VMEM budget derived from TB: double-buffered in/out blocks + the padded
    # (8,128)-tiled one-hot intermediate, clamped to [16, 32] MiB so it stays
    # comfortable inside v7x's 64 MiB physical VMEM per core.
    out_block = TB * N * OUT_DIM * 4
    in_block = 2 * (TB * 2 * N * 4)
    interm = TB * N * 8 * 128 * 4
    vmem_limit = int(min(32 * 1024 * 1024,
                         max(16 * 1024 * 1024,
                             2 * (out_block + in_block) + interm + (2 << 20))))

    return pl.pallas_call(
        kernel,
        out_shape=jax.ShapeDtypeStruct((B * N, OUT_DIM), jnp.float32),
        grid=(num_steps,),
        in_specs=[
            pl.BlockSpec((TB, 2, N), lambda b: (b, 0, 0)),
            pl.BlockSpec((TB, N, 2), lambda b: (b, 0, 0)),
            pl.BlockSpec((GRID_DIM, OUT_DIM), lambda b: (0, 0)),   # resident
            pl.BlockSpec((1, OUT_DIM), lambda b: (0, 0)),          # resident
        ],
        out_specs=pl.BlockSpec((TB * N, OUT_DIM), lambda b: (b, 0)),
        compiler_params=pltpu.CompilerParams(
            dimension_semantics=("parallel",),
            vmem_limit_bytes=vmem_limit),
    )(obs_rows, obs_cols, weight, bias2d)


if __name__ == "__main__":
    key = jax.random.PRNGKey(0)
    k_hs, k_o1, k_vel, k_w, k_b = jax.random.split(key, 5)

    # B=64, N=8 -> auto-picked batch_tile=32 -> 2 pipelined, megacore-parallel
    # grid steps of (256, 128) output blocks.
    B, N = 64, 8

    hidden_state = jax.random.normal(k_hs, (B, N, HIDDEN_DIM), dtype=jnp.float32)
    obs1 = jax.random.uniform(k_o1, (B, N, 2), minval=-4.0, maxval=4.0,
                              dtype=jnp.float32)
    obs2 = obs1 + 0.2 * jax.random.normal(k_vel, (B, N, 2), dtype=jnp.float32)
    # exercise the NaN-handling path for one track
    obs2 = obs2.at[0, 3, :].set(jnp.nan)

    # Deterministic Linear(GRID_DIM -> OUT_DIM) init (torch-default-like uniform)
    bound = 1.0 / jnp.sqrt(jnp.float32(GRID_DIM))
    weight = jax.random.uniform(k_w, (GRID_DIM, OUT_DIM),
                                minval=-bound, maxval=bound, dtype=jnp.float32)
    bias = jax.random.uniform(k_b, (OUT_DIM,),
                              minval=-bound, maxval=bound, dtype=jnp.float32)

    out = grid_based_pooling(hidden_state, obs1, obs2, weight, bias)
    out = jax.block_until_ready(out)
    assert out.shape == (B * N, OUT_DIM) and out.dtype == jnp.float32
    assert bool(jnp.all(jnp.isfinite(out)))
    print("KERNEL_OK")
</pallas_src>

<mosaic_0001>
module attributes {stable_mosaic.version = 11 : i64} {
  func.func @_gridpool_kernel(%arg0: i32, %arg1: memref<32x2x8xf32, #tpu.memory_space<vmem>>, %arg2: memref<32x8x2xf32, #tpu.memory_space<vmem>>, %arg3: memref<16x128xf32, #tpu.memory_space<vmem>>, %arg4: memref<1x128xf32, #tpu.memory_space<vmem>>, %arg5: memref<256x128xf32, #tpu.memory_space<vmem>>) attributes {dimension_semantics = [#tpu.dimension_semantics<parallel>], iteration_bounds = array<i64: 2>, scalar_prefetch = 0 : i64, scratch_operands = 0 : i64, tpu.core_type = #tpu.core_type<tc>, window_params = [{transform_indices = @transform_0, window_bounds = array<i64: 32, 2, 8>}, {transform_indices = @transform_1, window_bounds = array<i64: 32, 8, 2>}, {pipeline_mode = #tpu.pipeline_mode<synchronous>, transform_indices = @transform_2, window_bounds = array<i64: 16, 128>}, {pipeline_mode = #tpu.pipeline_mode<synchronous>, transform_indices = @transform_3, window_bounds = array<i64: 1, 128>}, {transform_indices = @transform_4, window_bounds = array<i64: 256, 128>}]} {
    %c0 = arith.constant 0 : index
    %c0_0 = arith.constant 0 : index
    %c0_1 = arith.constant 0 : index
    %0 = vector.load %arg1[%c0, %c0_0, %c0_1] : memref<32x2x8xf32, #tpu.memory_space<vmem>>, vector<32x2x8xf32>
    %c0_2 = arith.constant 0 : index
    %c0_3 = arith.constant 0 : index
    %c0_4 = arith.constant 0 : index
    %1 = vector.load %arg2[%c0_2, %c0_3, %c0_4] : memref<32x8x2xf32, #tpu.memory_space<vmem>>, vector<32x8x2xf32>
    %2 = vector.extract_strided_slice %0 {offsets = [0, 0, 0], sizes = [32, 1, 8], strides = [1, 1, 1]} : vector<32x2x8xf32> to vector<32x1x8xf32>
    %3 = vector.extract_strided_slice %0 {offsets = [0, 1, 0], sizes = [32, 1, 8], strides = [1, 1, 1]} : vector<32x2x8xf32> to vector<32x1x8xf32>
    %4 = vector.extract_strided_slice %1 {offsets = [0, 0, 0], sizes = [32, 8, 1], strides = [1, 1, 1]} : vector<32x8x2xf32> to vector<32x8x1xf32>
    %5 = vector.extract_strided_slice %1 {offsets = [0, 0, 1], sizes = [32, 8, 1], strides = [1, 1, 1]} : vector<32x8x2xf32> to vector<32x8x1xf32>
    %6 = arith.cmpf one, %2, %2 : vector<32x1x8xf32>
    %7 = arith.cmpf one, %3, %3 : vector<32x1x8xf32>
    %8 = arith.ori %6, %7 : vector<32x1x8xi1>
    %cst = arith.constant -5.000000e+02 : f32
    %9 = vector.broadcast %cst : f32 to vector<32x1x8xf32>
    %10 = arith.select %8, %9, %2 : vector<32x1x8xi1>, vector<32x1x8xf32>
    %cst_5 = arith.constant -5.000000e+02 : f32
    %11 = vector.broadcast %cst_5 : f32 to vector<32x1x8xf32>
    %12 = arith.select %8, %11, %3 : vector<32x1x8xi1>, vector<32x1x8xf32>
    %13 = arith.cmpf one, %4, %4 : vector<32x8x1xf32>
    %14 = arith.cmpf one, %5, %5 : vector<32x8x1xf32>
    %15 = arith.ori %13, %14 : vector<32x8x1xi1>
    %cst_6 = arith.constant -5.000000e+02 : f32
    %16 = vector.broadcast %cst_6 : f32 to vector<32x8x1xf32>
    %17 = arith.select %15, %16, %4 : vector<32x8x1xi1>, vector<32x8x1xf32>
    %cst_7 = arith.constant -5.000000e+02 : f32
    %18 = vector.broadcast %cst_7 : f32 to vector<32x8x1xf32>
    %19 = arith.select %15, %18, %5 : vector<32x8x1xi1>, vector<32x8x1xf32>
    %20 = vector.broadcast %10 : vector<32x1x8xf32> to vector<32x8x8xf32>
    %21 = vector.broadcast %17 : vector<32x8x1xf32> to vector<32x8x8xf32>
    %22 = arith.subf %20, %21 : vector<32x8x8xf32>
    %23 = vector.broadcast %12 : vector<32x1x8xf32> to vector<32x8x8xf32>
    %24 = vector.broadcast %19 : vector<32x8x1xf32> to vector<32x8x8xf32>
    %25 = arith.subf %23, %24 : vector<32x8x8xf32>
    %cst_8 = arith.constant 2.000000e+00 : f32
    %26 = vector.broadcast %cst_8 : f32 to vector<32x8x8xf32>
    %27 = arith.divf %22, %26 : vector<32x8x8xf32>
    %cst_9 = arith.constant 2.000000e+00 : f32
    %28 = vector.broadcast %cst_9 : f32 to vector<32x8x8xf32>
    %29 = arith.addf %27, %28 : vector<32x8x8xf32>
    %cst_10 = arith.constant 2.000000e+00 : f32
    %30 = vector.broadcast %cst_10 : f32 to vector<32x8x8xf32>
    %31 = arith.divf %25, %30 : vector<32x8x8xf32>
    %cst_11 = arith.constant 2.000000e+00 : f32
    %32 = vector.broadcast %cst_11 : f32 to vector<32x8x8xf32>
    %33 = arith.addf %31, %32 : vector<32x8x8xf32>
    %cst_12 = arith.constant 0.000000e+00 : f32
    %34 = vector.broadcast %cst_12 : f32 to vector<32x8x8xf32>
    %35 = arith.cmpf oge, %29, %34 : vector<32x8x8xf32>
    %cst_13 = arith.constant 4.000000e+00 : f32
    %36 = vector.broadcast %cst_13 : f32 to vector<32x8x8xf32>
    %37 = arith.cmpf olt, %29, %36 : vector<32x8x8xf32>
    %38 = arith.andi %35, %37 : vector<32x8x8xi1>
    %cst_14 = arith.constant 0.000000e+00 : f32
    %39 = vector.broadcast %cst_14 : f32 to vector<32x8x8xf32>
    %40 = arith.cmpf oge, %33, %39 : vector<32x8x8xf32>
    %41 = arith.andi %38, %40 : vector<32x8x8xi1>
    %cst_15 = arith.constant 4.000000e+00 : f32
    %42 = vector.broadcast %cst_15 : f32 to vector<32x8x8xf32>
    %43 = arith.cmpf olt, %33, %42 : vector<32x8x8xf32>
    %44 = arith.andi %41, %43 : vector<32x8x8xi1>
    %cst_16 = arith.constant 0.000000e+00 : f32
    %45 = vector.broadcast %cst_16 : f32 to vector<32x8x8xf32>
    %46 = arith.select %44, %29, %45 : vector<32x8x8xi1>, vector<32x8x8xf32>
    %47 = arith.fptosi %46 : vector<32x8x8xf32> to vector<32x8x8xi32>
    %cst_17 = arith.constant 0.000000e+00 : f32
    %48 = vector.broadcast %cst_17 : f32 to vector<32x8x8xf32>
    %49 = arith.select %44, %33, %48 : vector<32x8x8xi1>, vector<32x8x8xf32>
    %50 = arith.fptosi %49 : vector<32x8x8xf32> to vector<32x8x8xi32>
    %51 = tpu.iota {dimensions = array<i32: 1>} : vector<32x8x8xi32>
    %52 = tpu.iota {dimensions = array<i32: 2>} : vector<32x8x8xi32>
    %53 = arith.cmpi ne, %51, %52 : vector<32x8x8xi32>
    %c4_i32 = arith.constant 4 : i32
    %54 = vector.broadcast %c4_i32 : i32 to vector<32x8x8xi32>
    %55 = arith.muli %47, %54 : vector<32x8x8xi32>
    %56 = arith.addi %55, %50 : vector<32x8x8xi32>
    %c-1_i32 = arith.constant -1 : i32
    %57 = vector.broadcast %c-1_i32 : i32 to vector<32x8x8xi32>
    %58 = arith.select %53, %56, %57 : vector<32x8x8xi1>, vector<32x8x8xi32>
    %59 = tpu.iota {dimensions = array<i32: 3>} : vector<32x8x8x16xi32>
    %60 = vector.shape_cast %58 : vector<32x8x8xi32> to vector<32x8x8x1xi32>
    %61 = vector.broadcast %60 : vector<32x8x8x1xi32> to vector<32x8x8x16xi32>
    %62 = arith.cmpi eq, %61, %59 : vector<32x8x8x16xi32>
    %c1_i32 = arith.constant 1 : i32
    %c0_i32 = arith.constant 0 : i32
    %63 = vector.broadcast %c1_i32 : i32 to vector<32x8x8x16xi32>
    %64 = vector.broadcast %c0_i32 : i32 to vector<32x8x8x16xi32>
    %65 = arith.select %62, %63, %64 : vector<32x8x8x16xi1>, vector<32x8x8x16xi32>
    %cst_18 = arith.constant dense<0> : vector<32x8x16xi32>
    %66 = vector.multi_reduction <add>, %65, %cst_18 [2] : vector<32x8x8x16xi32> to vector<32x8x16xi32>
    %c0_i32_19 = arith.constant 0 : i32
    %67 = vector.broadcast %c0_i32_19 : i32 to vector<32x8x16xi32>
    %68 = arith.cmpi sgt, %66, %67 : vector<32x8x16xi32>
    %cst_20 = arith.constant 1.000000e+00 : f32
    %cst_21 = arith.constant 0.000000e+00 : f32
    %69 = vector.broadcast %cst_20 : f32 to vector<32x8x16xf32>
    %70 = vector.broadcast %cst_21 : f32 to vector<32x8x16xf32>
    %71 = arith.select %68, %69, %70 : vector<32x8x16xi1>, vector<32x8x16xf32>
    %c0_i32_22 = arith.constant 0 : i32
    %72 = vector.broadcast %c0_i32_22 : i32 to vector<32x8x8xi32>
    %73 = arith.cmpi eq, %58, %72 : vector<32x8x8xi32>
    %c1_i32_23 = arith.constant 1 : i32
    %74 = vector.broadcast %c1_i32_23 : i32 to vector<32x8x8xi32>
    %75 = arith.addi %52, %74 : vector<32x8x8xi32>
    %c2_i32 = arith.constant 2 : i32
    %76 = vector.broadcast %c2_i32 : i32 to vector<32x8x8xi32>
    %77 = arith.muli %76, %75 : vector<32x8x8xi32>
    %78 = arith.extui %44 : vector<32x8x8xi1> to vector<32x8x8xi32>
    %79 = arith.addi %77, %78 : vector<32x8x8xi32>
    %c0_i32_24 = arith.constant 0 : i32
    %80 = vector.broadcast %c0_i32_24 : i32 to vector<32x8x8xi32>
    %81 = arith.select %73, %79, %80 : vector<32x8x8xi1>, vector<32x8x8xi32>
    %cst_25 = arith.constant dense<-2147483648> : vector<32x8xi32>
    %82 = vector.multi_reduction <maxsi>, %81, %cst_25 [2] : vector<32x8x8xi32> to vector<32x8xi32>
    %83 = vector.shape_cast %82 : vector<32x8xi32> to vector<32x8x1xi32>
    %c1_i32_26 = arith.constant 1 : i32
    %84 = vector.broadcast %c1_i32_26 : i32 to vector<32x8x1xi32>
    %85 = arith.andi %83, %84 : vector<32x8x1xi32>
    %c1_i32_27 = arith.constant 1 : i32
    %86 = vector.broadcast %c1_i32_27 : i32 to vector<32x8x1xi32>
    %87 = arith.cmpi eq, %85, %86 : vector<32x8x1xi32>
    %cst_28 = arith.constant 1.000000e+00 : f32
    %cst_29 = arith.constant 0.000000e+00 : f32
    %88 = vector.broadcast %cst_28 : f32 to vector<32x8x1xf32>
    %89 = vector.broadcast %cst_29 : f32 to vector<32x8x1xf32>
    %90 = arith.select %87, %88, %89 : vector<32x8x1xi1>, vector<32x8x1xf32>
    %91 = tpu.iota {dimensions = array<i32: 2>} : vector<32x8x16xi32>
    %c0_i32_30 = arith.constant 0 : i32
    %92 = vector.broadcast %c0_i32_30 : i32 to vector<32x8x16xi32>
    %93 = arith.cmpi eq, %91, %92 : vector<32x8x16xi32>
    %94 = vector.shape_cast %90 : vector<32x8x1xf32> to vector<32x8x1xf32>
    %95 = vector.broadcast %94 : vector<32x8x1xf32> to vector<32x8x16xf32>
    %96 = arith.select %93, %95, %71 : vector<32x8x16xi1>, vector<32x8x16xf32>
    %97 = vector.shape_cast %96 : vector<32x8x16xf32> to vector<256x16xf32>
    %c0_31 = arith.constant 0 : index
    %c0_32 = arith.constant 0 : index
    %98 = vector.load %arg3[%c0_31, %c0_32] : memref<16x128xf32, #tpu.memory_space<vmem>>, vector<16x128xf32>
    %cst_33 = arith.constant dense<0.000000e+00> : vector<256x128xf32>
    %99 = tpu.matmul %97, %98, %cst_33 {dimension_numbers = #tpu.dot_dimension_numbers<[1], [0], [0], [1], [0, 0, 1, 1], [], []>} : vector<256x16xf32>, vector<16x128xf32>, vector<256x128xf32> -> vector<256x128xf32>
    %c0_34 = arith.constant 0 : index
    %c0_35 = arith.constant 0 : index
    %100 = vector.load %arg4[%c0_34, %c0_35] : memref<1x128xf32, #tpu.memory_space<vmem>>, vector<1x128xf32>
    %101 = vector.broadcast %100 : vector<1x128xf32> to vector<256x128xf32>
    %102 = arith.addf %99, %101 : vector<256x128xf32>
    %cst_36 = arith.constant 0.000000e+00 : f32
    %103 = vector.broadcast %cst_36 : f32 to vector<256x128xf32>
    %104 = arith.maximumf %102, %103 : vector<256x128xf32>
    %c0_37 = arith.constant 0 : index
    %c0_38 = arith.constant 0 : index
    %105 = vector.load %arg5[%c0_37, %c0_38] : memref<256x128xf32, #tpu.memory_space<vmem>>, vector<256x128xf32>
    tpu.vector_store %arg5[%c0_37, %c0_38], %104 {strides = array<i32>} : memref<256x128xf32, #tpu.memory_space<vmem>>, vector<256x128xf32>,
    return
  }
  func.func @transform_0(%arg0: i32) -> (i32, i32, i32) {
    %c0_i32 = arith.constant 0 : i32
    %c0_i32_0 = arith.constant 0 : i32
    %c0_i32_1 = arith.constant 0 : i32
    return %arg0, %c0_i32, %c0_i32_0 : i32, i32, i32
  }
  func.func @transform_1(%arg0: i32) -> (i32, i32, i32) {
    %c0_i32 = arith.constant 0 : i32
    %c0_i32_0 = arith.constant 0 : i32
    %c0_i32_1 = arith.constant 0 : i32
    return %arg0, %c0_i32, %c0_i32_0 : i32, i32, i32
  }
  func.func @transform_2(%arg0: i32) -> (i32, i32) {
    %c0_i32 = arith.constant 0 : i32
    %c0_i32_0 = arith.constant 0 : i32
    %c0_i32_1 = arith.constant 0 : i32
    return %c0_i32, %c0_i32_0 : i32, i32
  }
  func.func @transform_3(%arg0: i32) -> (i32, i32) {
    %c0_i32 = arith.constant 0 : i32
    %c0_i32_0 = arith.constant 0 : i32
    %c0_i32_1 = arith.constant 0 : i32
    return %c0_i32, %c0_i32_0 : i32, i32
  }
  func.func @transform_4(%arg0: i32) -> (i32, i32) {
    %c0_i32 = arith.constant 0 : i32
    %c0_i32_0 = arith.constant 0 : i32
    return %arg0, %c0_i32 : i32, i32
  }
}

</mosaic_0001>

<bundles_post_ra>
// kernel: tpu_custom_call.1
= control target key start
LH: loop header
LB: loop body
LE: loop exit
PB: predicated region body
PF: predicated region fallthrough
CT: control target
= control target key end

     0   :  { %9 = vsyncpa [#allocation3], 0  ;;  %s16212_s0 = inlined_call_operand.vmem [shape: f32[64,2,8], index: 0, kind: input, shape index: {}]   ;;  %s16213_s1 = inlined_call_operand.vmem [shape: f32[64,8,2], index: 1, kind: input, shape index: {}]   ;;  %s16214_s2 = inlined_call_operand.vmem [shape: f32[16,128], index: 2, kind: input, shape index: {}]   ;;  %s16215_s3 = inlined_call_operand.vmem [shape: f32[1,128], index: 3, kind: input, shape index: {}]   ;;  %s16216_s4 = inlined_call_operand.hbm [shape: f32[512,128], index: 4, kind: output, shape index: {}]  }
   0x1   :  { %11 = vsyncpa [#allocation3 + $0x1], 0  ;;  %s8797_s15 = smov 0   ;;  %s8799_s16 = smov 0  }
   0x2   :  { %s8801_s17 = smov 0   ;;  %s8803_s18 = smov 0  }
   0x3 LB: > { %s8818_s19 = sadd.s32 4294967295, %s8764_s18   ;;  %s8262_s20 = sadd.s32 4294967294, %s8764_s18   ;;  %s8764_s18 = sphi %s8803_s18, %s17585_s18   ;;  %s8760_s17 = sphi %s8801_s17, %s17584_s17   ;;  %s8756_s16 = sphi %s8799_s16, %s17583_s16   ;;  %s8752_s15 = sphi %s8797_s15, %s17582_s15  }
   0x4   : > { %s8822_s21 = sadd.s32 1, %s8764_s18   ;;  %s118_s22 = sadd.s32 1, %s8760_s17 }
   0x5   : > { %s115_s23 = ssub.s32 %s8764_s18, %s8822_s21  ;;  %p128_p0 = scmp.ne.s32.totalorder %s8760_s17, %s8756_s16 }
   0x6   : > { %p116_p1 = scmp.eq.s32.totalorder %s115_s23, 0  ;;  %p129_p2 = scmp.eq.s32.totalorder %s8818_s19, 1 }
   0x7   : > { %p134_p3 = scmp.ne.s32.totalorder %s8756_s16, %s8752_s15  ;;  %p135_p4 = scmp.eq.s32.totalorder %s8262_s20, 1 }
   0x8   : > { %s8833_s24 = scalar_select %p116_p1, %s8760_s17, %s118_s22  }
   0x9   : > { %p8835_p5 = por %p129_p2, %p128_p0  ;;  %p8839_p6 = por %p135_p4, %p134_p3 }
   0xa   : > { %p8265_p7 = scmp.ge.s32.totalorder %s8764_s18, 1  ;;  %p177_p8 = scmp.lt.s32.totalorder %s8764_s18, 3 }
   0xc   : > { %p178_p9 = pnand %p8265_p7, %p177_p8 }
   0xe   : > { %181 = sbr.rel (%p178_p9) target bundleno = 1950 (0x79e), region = 36 }
  0x13   : > { %s8267_s27 = sshll.u32 %s8818_s19, 5  ;;  %v16265_v0 = vmov 0   ;;  %s8767_s6 = smov 127  }
  0x14   : > { %p209_p10 = scmp.lt.s32.totalorder %s8267_s27, 63  ;;  %8681 = vset.pattern.permute.xlu2 %v16265_v0  ;;  %8680 = vset.pattern.permute.xlu1 %v16265_v0  ;;  %s205_s20 = sand.u32 1, %s8756_s16  }
  0x15   : > { %8682 = vset.pattern.permute.xlu0 %v16265_v0  ;;  %s8308_s11 = sshll.u32 %s8818_s19, 8  ;;  %s8173_s23 = scalar_lea.sflag [#allocation3], %s205_s20 }
  0x16   : > { %s17587_s27 = smov (!%p209_p10, %s8267_s27), 63  ;;  %s8184_s14 = scalar_lea.hbm %s16216_s4, %s8308_s11 }
  0x17   : > { %s8270_s28 = sshll.u32 %s17587_s27, 3  ;;  %s8268_s7 = sshll.u32 %s17587_s27, 1 }
  0x18   : > { %s8855_s5 = scalar_lea.vmem %s16213_s1, %s8270_s28  ;;  %s9797_s10 = scalar_lea.vmem %s16212_s0, %s8268_s7 }
  0x19   : > { %v8858_v1 = vld [vmem:[%s8855_s5 + $0x20] sm:$0xff]  ;;  %v8861_v2 = vld [vmem:[%s8855_s5 + $0x10] sm:$0xff]  ;;  %v8885_v7 = vld [vmem:[%s8855_s5 + $0x28] sm:$0xff]  ;;  %s8266_s27 = sshll.u32 %s205_s20, 8  ;;  %s8187_s22 = sshll.u32 %s8184_s14, 4  ;;  %s8188_s22 = int_to_ptr.hbm [resolvable:$true] %s8187_s22 }
  0x1a   : > { %v8864_v3 = vld [vmem:[%s8855_s5] sm:$0xff]  ;;  %vm609_vm0 = vcmp.ne.f32.partialorder %v8858_v1, %v8858_v1  ;;  %vm607_vm1 = vcmp.ne.f32.partialorder %v8861_v2, %v8861_v2  ;;  %v8888_v8 = vld [vmem:[%s8855_s5 + $0x18] sm:$0xff]  ;;  %v8893_v9 = vld [vmem:[%s8855_s5 + $0x8] sm:$0xff]  ;;  %vm610_vm3 = vcmp.ne.f32.partialorder %v8885_v7, %v8885_v7  ;;  %s13569_s28 = scalar_lea.vmem [#allocation2], %s8266_s27  ;;  %s8716_s27 = sshra.s32 %s8188_s22, 4  ;;  %s8717_s27 = int_to_ptr.hbm [resolvable:$true] %s8716_s27 }
  0x1b   : > { %vm605_vm2 = vcmp.ne.f32.partialorder %v8864_v3, %v8864_v3  ;;  %v641_v4 = vsel %vm609_vm0, 1, %v16265_v0  ;;  %v639_v5 = vsel %vm607_vm1, 1, %v16265_v0  ;;  %vm608_vm4 = vcmp.ne.f32.partialorder %v8888_v8, %v8888_v8  ;;  %v8915_v13 = vld [vmem:[%s8855_s5 + $0x40] sm:$0xff]  ;;  %v8918_v14 = vld [vmem:[%s8855_s5 + $0x38] sm:$0xff]  ;;  %v8923_v15 = vld [vmem:[%s8855_s5 + $0x30] sm:$0xff]  ;;  %s8185_s19 = sshll.u32 %s13569_s28, 4  ;;  %p8723_p0 = scmp.lt.s32.totalorder %s8717_s27, %s16216_s4  ;;  %s8186_s19 = int_to_ptr.vmem [resolvable:$true] %s8185_s19 }
  0x1c   : > { %v637_v6 = vsel %vm605_vm2, 1, %v16265_v0  ;;  %677 = vrot.lane.b32.xlu2 %v641_v4, %s8767_s6  ;;  %673 = vrot.lane.b32.xlu1 %v639_v5, %s8767_s6  ;;  %vm606_vm5 = vcmp.ne.f32.partialorder %v8893_v9, %v8893_v9  ;;  %v642_v10 = vsel %vm610_vm3, 1, %v16265_v0  ;;  %v640_v11 = vsel %vm608_vm4, 1, %v16265_v0  ;;  %v8945_v19 = vld [vmem:[%s8855_s5 + $0x58] sm:$0xff]  ;;  %v8948_v20 = vld [vmem:[%s8855_s5 + $0x50] sm:$0xff]  ;;  %s8718_s29 = scalar_lea.hbm %s8717_s27, 256 }
  0x1d   : > { %669 = vrot.lane.b32.xlu0 %v637_v6, %s8767_s6  ;;  %v638_v12 = vsel %vm606_vm5, 1, %v16265_v0  ;;  %vm613_vm6 = vcmp.ne.f32.partialorder %v8915_v13, %v8915_v13  ;;  %vm612_vm7 = vcmp.ne.f32.partialorder %v8918_v14, %v8918_v14  ;;  %vm611_vm8 = vcmp.ne.f32.partialorder %v8923_v15, %v8923_v15  ;;  %v8953_v21 = vld [vmem:[%s8855_s5 + $0x48] sm:$0xff]  ;;  %v8975_v25 = vld [vmem:[%s8855_s5 + $0x70] sm:$0xff]  ;;  %v8983_v27 = vld [vmem:[%s8855_s5 + $0x60] sm:$0xff]  ;;  %p8719_p11 = scmp.ne.s32.totalorder %s8717_s27, %s8718_s29 }
  0x1e   : > { %v645_v16 = vsel %vm613_vm6, 1, %v16265_v0  ;;  %v644_v17 = vsel %vm612_vm7, 1, %v16265_v0  ;;  %v643_v18 = vsel %vm611_vm8, 1, %v16265_v0  ;;  %vm16237_vm9 = vcmp.ne.f32.partialorder %v8945_v19, %v8945_v19  ;;  %v8978_v26 = vld [vmem:[%s8855_s5 + $0x68] sm:$0xff]  ;;  %v9008_v32 = vld [vmem:[%s8855_s5 + $0x80] sm:$0xff]  ;;  %v9013_v33 = vld [vmem:[%s8855_s5 + $0x78] sm:$0xff] }
  0x1f   : > { %vm16238_vm10 = vcmp.ne.f32.partialorder %v8948_v20, %v8948_v20  ;;  %vm614_vm11 = vcmp.ne.f32.partialorder %v8953_v21, %v8953_v21  ;;  %v648_v22 = vsel %vm16237_vm9, 1, %v16265_v0  ;;  %vm16217_vm12 = vcmp.ne.f32.partialorder %v8975_v25, %v8975_v25  ;;  %v9005_v31 = vld [vmem:[%s8855_s5 + $0x88] sm:$0xff]  ;;  %v9035_v37 = vld [vmem:[%s8855_s5 + $0xa0] sm:$0xff]  ;;  %v9038_v38 = vld [vmem:[%s8855_s5 + $0x98] sm:$0xff]  ;;  %p8720_p12 = pnand %p8719_p11, %p8835_p5 }
  0x20   : > { %v647_v23 = vsel %vm16238_vm10, 1, %v16265_v0  ;;  %v646_v24 = vsel %vm614_vm11, 1, %v16265_v0  ;;  %vm16218_vm13 = vcmp.ne.f32.partialorder %v8978_v26, %v8978_v26  ;;  %vm16236_vm14 = vcmp.ne.f32.partialorder %v8983_v27, %v8983_v27  ;;  %v9043_v39 = vld [vmem:[%s8855_s5 + $0x90] sm:$0xff]  ;;  %v9065_v43 = vld [vmem:[%s8855_s5 + $0xb8] sm:$0xff]  ;;  %v9073_v45 = vld [vmem:[%s8855_s5 + $0xa8] sm:$0xff] }
  0x21   : > { %v651_v28 = vsel %vm16217_vm12, 1, %v16265_v0  ;;  %v650_v29 = vsel %vm16218_vm13, 1, %v16265_v0  ;;  %v649_v30 = vsel %vm16236_vm14, 1, %v16265_v0  ;;  %vm16219_vm15 = vcmp.ne.f32.partialorder %v9005_v31, %v9005_v31  ;;  %v9068_v44 = vld [vmem:[%s8855_s5 + $0xb0] sm:$0xff]  ;;  %v9098_v50 = vld [vmem:[%s8855_s5 + $0xc8] sm:$0xff]  ;;  %v9103_v51 = vld [vmem:[%s8855_s5 + $0xc0] sm:$0xff]  ;;  %p8721_p13 = pneg %p8720_p12 }
  0x22   : > { %vm16220_vm12 = vcmp.ne.f32.partialorder %v9008_v32, %v9008_v32  ;;  %vm16221_vm13 = vcmp.ne.f32.partialorder %v9013_v33, %v9013_v33  ;;  %v654_v34 = vsel %vm16219_vm15, 1, %v16265_v0  ;;  %vm16222_vm15 = vcmp.ne.f32.partialorder %v9035_v37, %v9035_v37  ;;  %v9095_v49 = vld [vmem:[%s8855_s5 + $0xd0] sm:$0xff]  ;;  %v9125_v55 = vld [vmem:[%s8855_s5 + $0xe8] sm:$0xff]  ;;  %v9128_v56 = vld [vmem:[%s8855_s5 + $0xe0] sm:$0xff] }
  0x23   : > { %v653_v35 = vsel %vm16220_vm12, 1, %v16265_v0  ;;  %v652_v36 = vsel %vm16221_vm13, 1, %v16265_v0  ;;  %vm16223_vm12 = vcmp.ne.f32.partialorder %v9038_v38, %v9038_v38  ;;  %vm16224_vm13 = vcmp.ne.f32.partialorder %v9043_v39, %v9043_v39  ;;  %v9133_v57 = vld [vmem:[%s8855_s5 + $0xd8] sm:$0xff]  ;;  %v9160_v62 = vld [vmem:[%s8855_s5 + $0xf0] sm:$0xff] }
  0x24   : > { %679 = vrot.lane.b32.xlu2 %v642_v10, %s8767_s6  ;;  %675 = vrot.lane.b32.xlu1 %v640_v11, %s8767_s6  ;;  %v657_v40 = vsel %vm16222_vm15, 1, %v16265_v0  ;;  %v656_v41 = vsel %vm16223_vm12, 1, %v16265_v0  ;;  %v655_v42 = vsel %vm16224_vm13, 1, %v16265_v0  ;;  %vm16225_vm15 = vcmp.ne.f32.partialorder %v9065_v43, %v9065_v43  ;;  %v9155_v61 = vld [vmem:[%s8855_s5 + $0xf8] sm:$0xff] }
  0x25   : > { %671 = vrot.lane.b32.xlu0 %v638_v12, %s8767_s6  ;;  %vm16226_vm12 = vcmp.ne.f32.partialorder %v9068_v44, %v9068_v44  ;;  %vm16227_vm13 = vcmp.ne.f32.partialorder %v9073_v45, %v9073_v45  ;;  %v660_v46 = vsel %vm16225_vm15, 1, %v16265_v0  ;;  %vm16228_vm15 = vcmp.ne.f32.partialorder %v9095_v49, %v9095_v49 }
  0x26   : > { %v659_v47 = vsel %vm16226_vm12, 1, %v16265_v0  ;;  %v658_v48 = vsel %vm16227_vm13, 1, %v16265_v0  ;;  %vm16229_vm12 = vcmp.ne.f32.partialorder %v9098_v50, %v9098_v50  ;;  %vm16230_vm13 = vcmp.ne.f32.partialorder %v9103_v51, %v9103_v51 }
  0x27   : > { %v663_v52 = vsel %vm16228_vm15, 1, %v16265_v0  ;;  %v662_v53 = vsel %vm16229_vm12, 1, %v16265_v0  ;;  %v661_v54 = vsel %vm16230_vm13, 1, %v16265_v0  ;;  %vm16231_vm15 = vcmp.ne.f32.partialorder %v9125_v55, %v9125_v55 }
  0x28   : > { %vm16232_vm12 = vcmp.ne.f32.partialorder %v9128_v56, %v9128_v56  ;;  %vm16235_vm13 = vcmp.ne.f32.partialorder %v9133_v57, %v9133_v57  ;;  %v666_v58 = vsel %vm16231_vm15, 1, %v16265_v0  ;;  %vm16233_vm15 = vcmp.ne.f32.partialorder %v9155_v61, %v9155_v61 }
  0x29   : > { %v665_v59 = vsel %vm16232_vm12, 1, %v16265_v0  ;;  %v664_v60 = vsel %vm16235_vm13, 1, %v16265_v0  ;;  %vm16234_vm12 = vcmp.ne.f32.partialorder %v9160_v62, %v9160_v62  ;;  %v668_v63 = vsel %vm16233_vm15, 1, %v16265_v0 }
  0x2a   : > { %v667_v4 = vsel %vm16234_vm12, 1, %v16265_v0 }
  0x2c   : > { %685 = vrot.lane.b32.xlu2 %v645_v16, %s8767_s6  ;;  %683 = vrot.lane.b32.xlu1 %v644_v17, %s8767_s6 }
  0x2d   : > { %681 = vrot.lane.b32.xlu0 %v643_v18, %s8767_s6 }
  0x34   : > { %691 = vrot.lane.b32.xlu2 %v648_v22, %s8767_s6  ;;  %689 = vrot.lane.b32.xlu1 %v647_v23, %s8767_s6 }
  0x35   : > { %687 = vrot.lane.b32.xlu0 %v646_v24, %s8767_s6 }
  0x3c   : > { %697 = vrot.lane.b32.xlu2 %v651_v28, %s8767_s6  ;;  %695 = vrot.lane.b32.xlu1 %v650_v29, %s8767_s6 }
  0x3d   : > { %693 = vrot.lane.b32.xlu0 %v649_v30, %s8767_s6 }
  0x44   : > { %703 = vrot.lane.b32.xlu2 %v654_v34, %s8767_s6  ;;  %701 = vrot.lane.b32.xlu1 %v653_v35, %s8767_s6 }
  0x45   : > { %699 = vrot.lane.b32.xlu0 %v652_v36, %s8767_s6 }
  0x4c   : > { %709 = vrot.lane.b32.xlu2 %v657_v40, %s8767_s6  ;;  %707 = vrot.lane.b32.xlu1 %v656_v41, %s8767_s6 }
  0x4d   : > { %705 = vrot.lane.b32.xlu0 %v655_v42, %s8767_s6 }
  0x54   : > { %715 = vrot.lane.b32.xlu2 %v660_v46, %s8767_s6  ;;  %713 = vrot.lane.b32.xlu1 %v659_v47, %s8767_s6 }
  0x55   : > { %711 = vrot.lane.b32.xlu0 %v658_v48, %s8767_s6 }
  0x5c   : > { %721 = vrot.lane.b32.xlu2 %v663_v52, %s8767_s6  ;;  %719 = vrot.lane.b32.xlu1 %v662_v53, %s8767_s6 }
  0x5d   : > { %717 = vrot.lane.b32.xlu0 %v661_v54, %s8767_s6 }
  0x64   : > { %727 = vrot.lane.b32.xlu2 %v666_v58, %s8767_s6  ;;  %725 = vrot.lane.b32.xlu1 %v665_v59, %s8767_s6 }
  0x65   : > { %723 = vrot.lane.b32.xlu0 %v664_v60, %s8767_s6 }
  0x6c   : > { %731 = vrot.lane.b32.xlu1 %v668_v63, %s8767_s6  ;;  %861 = vrot.lane.b32.xlu2 %v8864_v3, %s8767_s6 }
  0x6d   : > { %729 = vrot.lane.b32.xlu0 %v667_v4, %s8767_s6 }
  0x74   : > { %865 = vrot.lane.b32.xlu1 %v8861_v2, %s8767_s6  ;;  %867 = vrot.lane.b32.xlu2 %v8888_v8, %s8767_s6 }
  0x75   : > { %863 = vrot.lane.b32.xlu0 %v8893_v9, %s8767_s6 }
  0x76   : > { %v9185_v5 = vpop.permute.xlu2 %677 }
  0x7c   : > { %871 = vrot.lane.b32.xlu1 %v8885_v7, %s8767_s6  ;;  %873 = vrot.lane.b32.xlu2 %v8923_v15, %s8767_s6 }
  0x7d   : > { %869 = vrot.lane.b32.xlu0 %v8858_v1, %s8767_s6 }
  0x7e   : > { %v9193_v6 = vpop.permute.xlu2 %679 }
  0x84   : > { %877 = vrot.lane.b32.xlu1 %v8915_v13, %s8767_s6  ;;  %879 = vrot.lane.b32.xlu2 %v8953_v21, %s8767_s6 }
  0x85   : > { %875 = vrot.lane.b32.xlu0 %v8918_v14, %s8767_s6 }
  0x86   : > { %v9201_v10 = vpop.permute.xlu2 %685 }
  0x8c   : > { %883 = vrot.lane.b32.xlu1 %v8945_v19, %s8767_s6  ;;  %885 = vrot.lane.b32.xlu2 %v8983_v27, %s8767_s6 }
  0x8d   : > { %881 = vrot.lane.b32.xlu0 %v8948_v20, %s8767_s6 }
  0x8e   : > { %v9209_v11 = vpop.permute.xlu2 %691  ;;  %v674_v12 = vpop.permute.xlu1 %673 }
  0x8f   : > { %v670_v16 = vpop.permute.xlu0 %669 }
  0x90   : > { %vm733_vm15 = vcmp.ne.s32.totalorder %v670_v16, 0 }
  0x91   : > { %vm9278_vm13 = vmor %vm605_vm2, %vm733_vm15  ;;  %vm737_vm2 = vcmp.ne.s32.totalorder %v9185_v5, 0 }
  0x92   : > { %v797_v58 = vsel %vm9278_vm13, -500.0, %v8864_v3 }
  0x94   : > { %889 = vrot.lane.b32.xlu1 %v8975_v25, %s8767_s6  ;;  %891 = vrot.lane.b32.xlu2 %v9013_v33, %s8767_s6 }
  0x95   : > { %887 = vrot.lane.b32.xlu0 %v8978_v26, %s8767_s6 }
  0x96   : > { %v9217_v17 = vpop.permute.xlu2 %697  ;;  %v676_v18 = vpop.permute.xlu1 %675 }
  0x97   : > { %v672_v22 = vpop.permute.xlu0 %671  ;;  %vm736_vm15 = vcmp.ne.s32.totalorder %v676_v18, 0 }
  0x98   : > { %vm734_vm12 = vcmp.ne.s32.totalorder %v672_v22, 0  ;;  %vm9314_vm9 = vmor %vm608_vm4, %vm736_vm15 }
  0x99   : > { %vm9285_vm14 = vmor %vm606_vm5, %vm734_vm12  ;;  %vm735_vm5 = vcmp.ne.s32.totalorder %v674_v12, 0  ;;  %v800_v12 = vsel %vm9314_vm9, -500.0, %v8888_v8 }
  0x9a   : > { %v798_v59 = vsel %vm9285_vm14, -500.0, %v8893_v9  ;;  %vm9307_vm12 = vmor %vm609_vm0, %vm737_vm2  ;;  %vm738_vm0 = vcmp.ne.s32.totalorder %v9193_v6, 0  ;;  %v16498_v6 = vmov 0 }
  0x9b   : > { %vm9321_vm10 = vmor %vm607_vm1, %vm735_vm5  ;;  %v801_v16 = vsel %vm9307_vm12, -500.0, %v8858_v1 }
  0x9c   : > { %895 = vrot.lane.b32.xlu1 %v9005_v31, %s8767_s6  ;;  %897 = vrot.lane.b32.xlu2 %v9043_v39, %s8767_s6  ;;  %v799_v18 = vsel %vm9321_vm10, -500.0, %v8861_v2  ;;  %vm9344_vm2 = vmor %vm610_vm3, %vm738_vm0  ;;  %vm741_vm3 = vcmp.ne.s32.totalorder %v9201_v10, 0  ;;  %v16505_v10 = vmov 0 }
  0x9d   : > { %893 = vrot.lane.b32.xlu0 %v9008_v32, %s8767_s6  ;;  %vm9383_vm0 = vmor %vm613_vm6, %vm741_vm3  ;;  %vm744_vm6 = vcmp.ne.s32.totalorder %v9209_v11, 0  ;;  %v16514_v11 = vmov 0 }
  0x9e   : > { %v9225_v23 = vpop.permute.xlu2 %703  ;;  %v684_v24 = vpop.permute.xlu1 %683 }
  0x9f   : > { %v682_v28 = vpop.permute.xlu0 %681  ;;  %vm740_vm4 = vcmp.ne.s32.totalorder %v684_v24, 0  ;;  %v802_v24 = vsel %vm9344_vm2, -500.0, %v8885_v7 }
  0xa0   : > { %vm739_vm1 = vcmp.ne.s32.totalorder %v682_v28, 0  ;;  %vm9358_vm5 = vmor %vm612_vm7, %vm740_vm4  ;;  %vm16504_vm4 = vcmp.ne.f32.partialorder %v8948_v20, %v8948_v20 }
  0xa1   : > { %vm9351_vm15 = vmor %vm611_vm8, %vm739_vm1  ;;  %v16499_v6 = vsel %vm9358_vm5, 4294967295, %v16498_v6 }
  0xa2   : > { %v803_v28 = vsel %vm9351_vm15, -500.0, %v8923_v15  ;;  %v16500_v15 = vmov 0 }
  0xa3   : > { %v16501_v15 = vsel %vm9383_vm0, 4294967295, %v16500_v15 }
  0xa4   : > { %901 = vrot.lane.b32.xlu1 %v9035_v37, %s8767_s6  ;;  %903 = vrot.lane.b32.xlu2 %v9073_v45, %s8767_s6 }
  0xa5   : > { %899 = vrot.lane.b32.xlu0 %v9038_v38, %s8767_s6 }
  0xa6   : > { %v9233_v29 = vpop.permute.xlu2 %709  ;;  %v9235_v30 = vpop.permute.xlu1 %689 }
  0xa7   : > { %v9237_v34 = vpop.permute.xlu0 %687  ;;  %vm743_vm8 = vcmp.ne.s32.totalorder %v9235_v30, 0  ;;  %v805_v30 = vsel %vm9383_vm0, -500.0, %v8915_v13 }
  0xa8   : > { %vm742_vm7 = vcmp.ne.s32.totalorder %v9237_v34, 0 }
  0xa9   : > { %vm9390_vm1 = vmor %vm614_vm11, %vm742_vm7  ;;  %vm16507_vm7 = vcmp.ne.f32.partialorder %v8945_v19, %v8945_v19 }
  0xaa   : > { %v806_v34 = vsel %vm9390_vm1, -500.0, %v8953_v21  ;;  %v16508_v21 = vmov 0 }
  0xac   : > { %907 = vrot.lane.b32.xlu1 %v9065_v43, %s8767_s6  ;;  %909 = vrot.lane.b32.xlu2 %v9103_v51, %s8767_s6 }
  0xad   : > { %905 = vrot.lane.b32.xlu0 %v9068_v44, %s8767_s6 }
  0xae   : > { %v9245_v35 = vpop.permute.xlu2 %715  ;;  %v9247_v36 = vpop.permute.xlu1 %695 }
  0xaf   : > { %v9249_v40 = vpop.permute.xlu0 %693  ;;  %vm746_vm3 = vcmp.ne.s32.totalorder %v9247_v36, 0 }
  0xb0   : > { %vm745_vm11 = vcmp.ne.s32.totalorder %v9249_v40, 0 }
  0xb4   : > { %913 = vrot.lane.b32.xlu1 %v9095_v49, %s8767_s6  ;;  %915 = vrot.lane.b32.xlu2 %v9133_v57, %s8767_s6 }
  0xb5   : > { %911 = vrot.lane.b32.xlu0 %v9098_v50, %s8767_s6 }
  0xb6   : > { %v9257_v41 = vpop.permute.xlu2 %721  ;;  %v9259_v42 = vpop.permute.xlu1 %701 }
  0xb7   : > { %v9261_v46 = vpop.permute.xlu0 %699 }
  0xbc   : > { %919 = vrot.lane.b32.xlu1 %v9125_v55, %s8767_s6  ;;  %921 = vrot.lane.b32.xlu2 %v9160_v62, %s8767_s6 }
  0xbd   : > { %917 = vrot.lane.b32.xlu0 %v9128_v56, %s8767_s6 }
  0xbe   : > { %v9269_v47 = vpop.permute.xlu2 %727  ;;  %v9271_v48 = vpop.permute.xlu1 %707 }
  0xbf   : > { %v9273_v52 = vpop.permute.xlu0 %705 }
  0xc4   : > { %1023 = vperm.xlu1 %8680, %v797_v58   ;;  %1028 = vperm.xlu2 %8681, %v798_v59   ;;  %v804_v59 = vsel %vm9358_vm5, -500.0, %v8918_v14  ;;  %v16502_v14 = vmov 0  ;;  %vm9397_vm5 = vmor %vm16504_vm4, %vm743_vm8  ;;  %vm16510_vm4 = vcmp.ne.f32.partialorder %v8983_v27, %v8983_v27 }
  0xc5   : > { %923 = vrot.lane.b32.xlu0 %v9155_v61, %s8767_s6  ;;  %v16503_v14 = vsel %vm9390_vm1, 4294967295, %v16502_v14  ;;  %v16506_v10 = vsel %vm9397_vm5, 4294967295, %v16505_v10  ;;  %vm9422_vm8 = vmor %vm16507_vm7, %vm744_vm6  ;;  %vm16513_vm1 = vcmp.ne.f32.partialorder %v8978_v26, %v8978_v26  ;;  %vm747_vm6 = vcmp.ne.s32.totalorder %v9217_v17, 0  ;;  %s8722_s6 = scalar_lea.hbm %s16216_s4, 512 }
  0xc6   : > { %v9298_v60 = vpop.permute.xlu1 %713  ;;  %v9300_v63 = vpop.permute.xlu2 %861  ;;  %v16509_v21 = vsel %vm9422_vm8, 4294967295, %v16508_v21  ;;  %vm9436_vm0 = vmor %vm16513_vm1, %vm746_vm3  ;;  %v808_v36 = vsel %vm9422_vm8, -500.0, %v8945_v19  ;;  %vm748_vm1 = vcmp.ne.s32.totalorder %v9261_v46, 0  ;;  %vm16516_vm3 = vcmp.ne.f32.partialorder %v8975_v25, %v8975_v25  ;;  %p8724_p1 = scmp.lt.s32.totalorder %s8722_s6, %s8718_s29 }
  0xc7   : > { %v9302_v4 = vpop.permute.xlu0 %711  ;;  %v16515_v11 = vsel %vm9436_vm0, 4294967295, %v16514_v11  ;;  %vm9461_vm7 = vmor %vm16516_vm3, %vm747_vm6  ;;  %v16523_v17 = vmov 0  ;;  %vm750_vm6 = vcmp.ne.s32.totalorder %v9225_v23, 0  ;;  %v16532_v23 = vmov 0 }
  0xc8   : > { %p8725_p2 = por %p8724_p1, %p8723_p0 }
  0xca   : > { %p8726_p3 = pnand %p8725_p2, %p8721_p13 }
  0xcc   : > { %1038 = vperm.xlu1 %8680, %v800_v12   ;;  %1043 = vperm.xlu2 %8681, %v801_v16  }
  0xcd   : > { %1033 = vperm.xlu0 %8682, %v799_v18   ;;  %v807_v18 = vsel %vm9397_vm5, -500.0, %v8948_v20  ;;  %vm9429_vm5 = vmor %vm16510_vm4, %vm745_vm11  ;;  %v16511_v20 = vmov 0  ;;  %vm749_vm11 = vcmp.ne.s32.totalorder %v9259_v42, 0  ;;  %vm16519_vm4 = vcmp.ne.f32.partialorder %v9013_v33, %v9013_v33 }
  0xce   : > { %v9335_v22 = vpop.permute.xlu1 %719  ;;  %v9337_v58 = vpop.permute.xlu2 %867  ;;  %v16512_v20 = vsel %vm9429_vm5, 4294967295, %v16511_v20  ;;  %v809_v40 = vsel %vm9429_vm5, -500.0, %v8983_v27  ;;  %v16517_v27 = vmov 0  ;;  %vm16522_vm5 = vcmp.ne.f32.partialorder %v9008_v32, %v9008_v32 }
  0xcf   : > { %v9339_v8 = vpop.permute.xlu0 %717  ;;  %v16518_v27 = vsel %vm9461_vm7, 4294967295, %v16517_v27  ;;  %vm9475_vm8 = vmor %vm16522_vm5, %vm749_vm11  ;;  %v811_v42 = vsel %vm9461_vm7, -500.0, %v8975_v25  ;;  %vm751_vm5 = vcmp.ne.s32.totalorder %v9273_v52, 0  ;;  %vm16525_vm11 = vcmp.ne.f32.partialorder %v9005_v31, %v9005_v31 }
  0xd0   : > { %v16524_v17 = vsel %vm9475_vm8, 4294967295, %v16523_v17  ;;  %vm9500_vm3 = vmor %vm16525_vm11, %vm750_vm6  ;;  %vm753_vm6 = vcmp.ne.s32.totalorder %v9233_v29, 0  ;;  %v960_v53 = vsel %vm9314_vm9, -500.0, %v9337_v58  ;;  %vm16570_vm9 = vnez %v16499_v6 }
  0xd4   : > { %1048 = vperm.xlu1 %8680, %v802_v24   ;;  %1053 = vperm.xlu2 %8681, %v803_v28  }
  0xd5   : > { %1058 = vperm.xlu0 %8682, %v804_v59   ;;  %v810_v59 = vsel %vm9436_vm0, -500.0, %v8978_v26  ;;  %vm9468_vm0 = vmor %vm16519_vm4, %vm748_vm1  ;;  %v16520_v26 = vmov 0  ;;  %vm752_vm1 = vcmp.ne.s32.totalorder %v9271_v48, 0  ;;  %vm16528_vm4 = vcmp.ne.f32.partialorder %v9043_v39, %v9043_v39 }
  0xd6   : > { %v9374_v12 = vpop.permute.xlu1 %725  ;;  %v9376_v7 = vpop.permute.xlu2 %873  ;;  %v16521_v26 = vsel %vm9468_vm0, 4294967295, %v16520_v26  ;;  %v812_v46 = vsel %vm9468_vm0, -500.0, %v9013_v33  ;;  %v16526_v33 = vmov 0  ;;  %vm16531_vm0 = vcmp.ne.f32.partialorder %v9038_v38, %v9038_v38 }
  0xd7   : > { %v9378_v16 = vpop.permute.xlu0 %723  ;;  %v16527_v33 = vsel %vm9500_vm3, 4294967295, %v16526_v33  ;;  %vm9514_vm7 = vmor %vm16531_vm0, %vm752_vm1  ;;  %v814_v48 = vsel %vm9500_vm3, -500.0, %v9005_v31  ;;  %vm754_vm0 = vcmp.ne.s32.totalorder %v9302_v4, 0  ;;  %vm16534_vm1 = vcmp.ne.f32.partialorder %v9035_v37, %v9035_v37 }
  0xd8   : > { %v16533_v23 = vsel %vm9514_vm7, 4294967295, %v16532_v23  ;;  %vm9537_vm11 = vmor %vm16534_vm1, %vm753_vm6  ;;  %vm756_vm6 = vcmp.ne.s32.totalorder %v9245_v35, 0  ;;  %v16550_v35 = vmov 0 }
  0xd9   : > { %v817_v4 = vsel %vm9537_vm11, -500.0, %v9035_v37 }
  0xdc   : > { %1063 = vperm.xlu1 %8680, %v805_v30   ;;  %1068 = vperm.xlu2 %8681, %v806_v34  }
  0xdd   : > { %1073 = vperm.xlu0 %8682, %v807_v18   ;;  %v813_v18 = vsel %vm9475_vm8, -500.0, %v9008_v32  ;;  %vm9507_vm8 = vmor %vm16528_vm4, %vm751_vm5  ;;  %v16529_v32 = vmov 0  ;;  %vm755_vm5 = vcmp.ne.s32.totalorder %v9298_v60, 0  ;;  %vm16537_vm4 = vcmp.ne.f32.partialorder %v9073_v45, %v9073_v45 }
  0xde   : > { %v9413_v24 = vpop.permute.xlu1 %731  ;;  %v9415_v13 = vpop.permute.xlu2 %879  ;;  %v16530_v32 = vsel %vm9507_vm8, 4294967295, %v16529_v32  ;;  %v815_v52 = vsel %vm9507_vm8, -500.0, %v9043_v39  ;;  %v16535_v39 = vmov 0  ;;  %vm16540_vm8 = vcmp.ne.f32.partialorder %v9068_v44, %v9068_v44 }
  0xdf   : > { %v9417_v28 = vpop.permute.xlu0 %729  ;;  %v16536_v39 = vsel %vm9537_vm11, 4294967295, %v16535_v39  ;;  %vm9553_vm3 = vmor %vm16540_vm8, %vm755_vm5  ;;  %v16541_v60 = vmov 0  ;;  %vm757_vm8 = vcmp.ne.s32.totalorder %v9339_v8, 0  ;;  %vm16543_vm5 = vcmp.ne.f32.partialorder %v9065_v43, %v9065_v43 }
  0xe0   : > { %v16542_v60 = vsel %vm9553_vm3, 4294967295, %v16541_v60  ;;  %vm9576_vm1 = vmor %vm16543_vm5, %vm756_vm6  ;;  %vm759_vm6 = vcmp.ne.s32.totalorder %v9257_v41, 0  ;;  %v16559_v41 = vmov 0 }
  0xe1   : > { %v820_v8 = vsel %vm9576_vm1, -500.0, %v9065_v43 }
  0xe4   : > { %1078 = vperm.xlu1 %8680, %v808_v36   ;;  %1083 = vperm.xlu2 %8681, %v809_v40  }
  0xe5   : > { %1088 = vperm.xlu0 %8682, %v810_v59   ;;  %v816_v59 = vsel %vm9514_vm7, -500.0, %v9038_v38  ;;  %vm9544_vm7 = vmor %vm16537_vm4, %vm754_vm0  ;;  %v16538_v38 = vmov 0  ;;  %vm758_vm0 = vcmp.ne.s32.totalorder %v9335_v22, 0  ;;  %vm16546_vm4 = vcmp.ne.f32.partialorder %v9103_v51, %v9103_v51 }
  0xe6   : > { %v9452_v30 = vpop.permute.xlu1 %865  ;;  %v9454_v19 = vpop.permute.xlu2 %885  ;;  %v16539_v38 = vsel %vm9544_vm7, 4294967295, %v16538_v38 }
  0xe7   : > { %v9456_v34 = vpop.permute.xlu0 %863 }
  0xec   : > { %1093 = vperm.xlu1 %8680, %v811_v42   ;;  %1098 = vperm.xlu2 %8681, %v812_v46   ;;  %v818_v46 = vsel %vm9544_vm7, -500.0, %v9073_v45  ;;  %v16544_v45 = vmov 0  ;;  %vm16549_vm7 = vcmp.ne.f32.partialorder %v9098_v50, %v9098_v50 }
  0xed   : > { %1103 = vperm.xlu0 %8682, %v813_v18   ;;  %v819_v18 = vsel %vm9553_vm3, -500.0, %v9068_v44  ;;  %v16545_v45 = vsel %vm9576_vm1, 4294967295, %v16544_v45  ;;  %vm9583_vm3 = vmor %vm16546_vm4, %vm757_vm8  ;;  %v16547_v44 = vmov 0  ;;  %vm761_vm8 = vcmp.ne.s32.totalorder %v9374_v12, 0 }
  0xee   : > { %v9491_v36 = vpop.permute.xlu1 %871  ;;  %v9493_v25 = vpop.permute.xlu2 %891  ;;  %v16548_v44 = vsel %vm9583_vm3, 4294967295, %v16547_v44  ;;  %vm9590_vm11 = vmor %vm16549_vm7, %vm758_vm0  ;;  %vm760_vm7 = vcmp.ne.s32.totalorder %v9378_v16, 0  ;;  %vm16552_vm0 = vcmp.ne.f32.partialorder %v9095_v49, %v9095_v49  ;;  %vm16555_vm4 = vcmp.ne.f32.partialorder %v9133_v57, %v9133_v57 }
  0xef   : > { %v9495_v40 = vpop.permute.xlu0 %869  ;;  %v16551_v35 = vsel %vm9590_vm11, 4294967295, %v16550_v35  ;;  %vm9615_vm5 = vmor %vm16552_vm0, %vm759_vm6  ;;  %vm762_vm6 = vcmp.ne.s32.totalorder %v9269_v47, 0 }
  0xf0   : > { %v823_v12 = vsel %vm9615_vm5, -500.0, %v9095_v49  ;;  %v961_v54 = vsel %vm9307_vm12, -500.0, %v9495_v40  ;;  %vm16575_vm12 = vnez %v16509_v21 }
  0xf4   : > { %1108 = vperm.xlu1 %8680, %v814_v48   ;;  %1113 = vperm.xlu2 %8681, %v815_v52   ;;  %v821_v52 = vsel %vm9583_vm3, -500.0, %v9103_v51  ;;  %v16553_v51 = vmov 0  ;;  %vm16558_vm3 = vcmp.ne.f32.partialorder %v9128_v56, %v9128_v56 }
  0xf5   : > { %1118 = vperm.xlu0 %8682, %v816_v59   ;;  %v822_v59 = vsel %vm9590_vm11, -500.0, %v9098_v50  ;;  %v16554_v51 = vsel %vm9615_vm5, 4294967295, %v16553_v51  ;;  %vm9622_vm11 = vmor %vm16555_vm4, %vm760_vm7  ;;  %v16556_v50 = vmov 0  ;;  %vm764_vm7 = vcmp.ne.s32.totalorder %v9413_v24, 0 }
  0xf6   : > { %v9530_v42 = vpop.permute.xlu1 %877  ;;  %v9532_v31 = vpop.permute.xlu2 %897  ;;  %v16557_v50 = vsel %vm9622_vm11, 4294967295, %v16556_v50  ;;  %vm9629_vm1 = vmor %vm16558_vm3, %vm761_vm8  ;;  %v824_v16 = vsel %vm9622_vm11, -500.0, %v9133_v57  ;;  %vm763_vm3 = vcmp.ne.s32.totalorder %v9417_v28, 0  ;;  %vm16561_vm8 = vcmp.ne.f32.partialorder %v9125_v55, %v9125_v55 }
  0xf7   : > { %v9548_v29 = vpop.permute.xlu0 %875  ;;  %v16560_v41 = vsel %vm9629_vm1, 4294967295, %v16559_v41  ;;  %vm9652_vm0 = vmor %vm16561_vm8, %vm762_vm6  ;;  %vm16564_vm4 = vcmp.ne.f32.partialorder %v9160_v62, %v9160_v62  ;;  %vm16567_vm11 = vcmp.ne.f32.partialorder %v9155_v61, %v9155_v61  ;;  %vm16579_vm6 = vnez %v16521_v26 }
  0xf8   : > { %vm9666_vm5 = vmor %vm16567_vm11, %vm764_vm7  ;;  %v826_v24 = vsel %vm9652_vm0, -500.0, %v9125_v55  ;;  %v958_v55 = vsel %vm9285_vm14, -500.0, %v9456_v34  ;;  %v963_v34 = vsel %vm9351_vm15, -500.0, %v9376_v7  ;;  %v964_v9 = vsel %vm16570_vm9, -500.0, %v9548_v29 }
  0xf9   : > { %vm16574_vm14 = vnez %v16506_v10  ;;  %vm16577_vm15 = vnez %v16515_v11  ;;  %vm16578_vm11 = vnez %v16518_v27  ;;  %vm16581_vm7 = vnez %v16527_v33 }
  0xfa   : > { %vm16582_vm8 = vnez %v16530_v32  ;;  %vm16584_vm9 = vnez %v16536_v39 }
  0xfb   : > { %v975_v26 = vsel %vm16582_vm8, -500.0, %v9532_v31 }
  0xfc   : > { %1123 = vperm.xlu1 %8680, %v817_v4   ;;  %1128 = vperm.xlu2 %8681, %v818_v46   ;;  %v825_v46 = vsel %vm9629_vm1, -500.0, %v9128_v56  ;;  %vm9659_vm1 = vmor %vm16564_vm4, %vm763_vm3  ;;  %vm16580_vm3 = vnez %v16524_v17  ;;  %vm16583_vm4 = vnez %v16533_v23 }
  0xfd   : > { %1133 = vperm.xlu0 %8682, %v819_v18   ;;  %v827_v28 = vsel %vm9659_vm1, -500.0, %v9160_v62  ;;  %v959_v62 = vsel %vm9321_vm10, -500.0, %v9452_v30  ;;  %vm16571_vm10 = vnez %v16501_v15 }
  0xfe   : > { %v9569_v48 = vpop.permute.xlu1 %883  ;;  %v9571_v37 = vpop.permute.xlu2 %903  ;;  %v965_v58 = vsel %vm16571_vm10, -500.0, %v9530_v42  ;;  %vm16586_vm10 = vnez %v16539_v38 }
  0xff   : > { %v9594_v22 = vpop.permute.xlu0 %881  ;;  %v968_v7 = vsel %vm16575_vm12, -500.0, %v9569_v48  ;;  %v972_v48 = vsel %vm16579_vm6, -500.0, %v9493_v25  ;;  %vm16589_vm12 = vnez %v16548_v44  ;;  %vm16595_vm6 = vnez %v16560_v41 }
 0x100   : > { %v967_v6 = vsel %vm16574_vm14, -500.0, %v9594_v22  ;;  %vm16588_vm14 = vnez %v16545_v45  ;;  %v16263_v41 = vlaneseq }
 0x104   : > { %1138 = vperm.xlu1 %8680, %v820_v8   ;;  %1143 = vperm.xlu2 %8681, %v821_v52   ;;  %v828_v52 = vsel %vm9666_vm5, -500.0, %v9155_v61 }
 0x105   : > { %1148 = vperm.xlu0 %8682, %v822_v59  }
 0x106   : > { %v9608_v4 = vpop.permute.xlu1 %889  ;;  %v9610_v43 = vpop.permute.xlu2 %909 }
 0x107   : > { %v888_v18 = vpop.permute.xlu0 %887  ;;  %v981_v38 = vsel %vm16589_vm12, -500.0, %v9610_v43 }
 0x108   : > { %v970_v10 = vsel %vm16577_vm15, -500.0, %v888_v18  ;;  %v978_v18 = vsel %vm16586_vm10, -500.0, %v9571_v37  ;;  %vm16591_vm15 = vnez %v16554_v51 }
 0x10c   : > { %1153 = vperm.xlu1 %8680, %v823_v12   ;;  %1158 = vperm.xlu2 %8681, %v824_v16  }
 0x10d   : > { %1163 = vperm.xlu0 %8682, %v825_v46   ;;  %v957_v46 = vsel %vm9278_vm13, -500.0, %v9300_v63  ;;  %v962_v63 = vsel %vm9344_vm2, -500.0, %v9491_v36  ;;  %vm16573_vm13 = vnez %v16503_v14  ;;  %vm16576_vm2 = vnez %v16512_v20 }
 0x10e   : > { %v9645_v8 = vpop.permute.xlu1 %895  ;;  %v9647_v49 = vpop.permute.xlu2 %915  ;;  %v966_v2 = vsel %vm16573_vm13, -500.0, %v9415_v13  ;;  %v969_v14 = vsel %vm16576_vm2, -500.0, %v9454_v19  ;;  %v971_v13 = vsel %vm16578_vm11, -500.0, %v9608_v4  ;;  %vm16587_vm13 = vnez %v16542_v60 }
 0x10f   : > { %v894_v16 = vpop.permute.xlu0 %893  ;;  %v974_v11 = vsel %vm16581_vm7, -500.0, %v9645_v8  ;;  %vm16590_vm2 = vnez %v16551_v35  ;;  %vm16594_vm11 = vnez %v16557_v50 }
 0x110   : > { %v973_v20 = vsel %vm16580_vm3, -500.0, %v894_v16  ;;  %v984_v44 = vsel %vm16594_vm11, -500.0, %v9647_v49  ;;  %v9804_v49 = vld [vmem:[%s9797_s10 + $0x2] sm:$0x3] }
 0x114   : > { %1168 = vperm.xlu1 %8680, %v826_v24   ;;  %1173 = vperm.xlu2 %8681, %v827_v28  }
 0x115   : > { %1178 = vperm.xlu0 %8682, %v828_v52  }
 0x116   : > { %v902_v59 = vpop.permute.xlu1 %901  ;;  %v9679_v12 = vpop.permute.xlu2 %921 }
 0x117   : > { %v900_v28 = vpop.permute.xlu0 %899  ;;  %v977_v25 = vsel %vm16584_vm9, -500.0, %v902_v59  ;;  %v987_v57 = vsel %vm9659_vm1, -500.0, %v9679_v12  ;;  %vm286_vm1 = vcmp.ne.f32.partialorder %v9804_v49, %v9804_v49  ;;  %v9831_v12 = vld [vmem:[%s9797_s10] sm:$0x3] }
 0x118   : > { %v976_v17 = vsel %vm16583_vm4, -500.0, %v900_v28  ;;  %v318_v56 = vsel %vm286_vm1, 1, %v16265_v0 }
 0x11c   : > { %1247 = vperm.xlu1 %8680, %v957_v46   ;;  %1252 = vperm.xlu2 %8681, %v958_v55   ;;  %v9812_v46 = vshrl.u32 %v16263_v41, 7  ;;  %v8768_v55 = vmov 2.0  }
 0x11d   : > { %1257 = vperm.xlu0 %8682, %v959_v62   ;;  %8687 = vrcp.f32 %v8768_v55 }
 0x11e   : > { %v908_v61 = vpop.permute.xlu1 %907  ;;  %v9690_v24 = vpop.permute.xlu2 %1028  ;;  %16596 = vst [vmem:[#allocation9_spill] sm:$0xff] %v9812_v46 }
 0x11f   : > { %v906_v3 = vpop.permute.xlu0 %905  ;;  %v980_v23 = vsel %vm16588_vm14, -500.0, %v908_v61  ;;  %v9817_v61 = vld [vmem:[%s9797_s10 + $0x8] sm:$0x3] }
 0x120   : > { %v979_v32 = vsel %vm16587_vm13, -500.0, %v906_v3  ;;  %v9853_v3 = vld [vmem:[%s9797_s10 + $0x18] sm:$0x3] }
 0x121   : > { %vm297_vm4 = vcmp.ne.f32.partialorder %v9853_v3, %v9853_v3 }
 0x123   : > { %v9828_v47 = vpop.eup %8687 }
 0x124   : > { %1262 = vperm.xlu1 %8680, %v960_v53   ;;  %1267 = vperm.xlu2 %8681, %v961_v54  }
 0x125   : > { %1272 = vperm.xlu0 %8682, %v962_v63   ;;  %v9842_v63 = vld [vmem:[%s9797_s10 + $0x12] sm:$0x3] }
 0x126   : > { %v914_v5 = vpop.permute.xlu1 %913  ;;  %v9701_v30 = vpop.permute.xlu2 %1043  ;;  %16597 = vst [vmem:[#allocation10_spill] sm:$0xff] %v9842_v63  ;;  %vm294_vm3 = vcmp.ne.f32.partialorder %v9842_v63, %v9842_v63 }
 0x127   : > { %v912_v15 = vpop.permute.xlu0 %911  ;;  %v983_v37 = vsel %vm16591_vm15, -500.0, %v914_v5  ;;  %v350_v5 = vrot.slane %v318_v56, 1 }
 0x128   : > { %v982_v60 = vsel %vm16590_vm2, -500.0, %v912_v15 }
 0x129   : > { %vm382_vm8 = vcmp.ne.s32.totalorder %v350_v5, 0 }
 0x12a   : > { %vm9886_vm13 = vmor %vm286_vm1, %vm382_vm8 }
 0x12c   : > { %1277 = vperm.xlu1 %8680, %v963_v34   ;;  %1282 = vperm.xlu2 %8681, %v964_v9   ;;  %v9845_v34 = vld [vmem:[%s9797_s10 + $0x6] sm:$0x3]  ;;  %v1438_v9 = vmul.f32 2.0, %v9828_v47 }
 0x12d   : > { %1287 = vperm.xlu0 %8682, %v965_v58   ;;  %vm288_vm7 = vcmp.ne.f32.partialorder %v9845_v34, %v9845_v34 }
 0x12e   : > { %v920_v1 = vpop.permute.xlu1 %919  ;;  %v9712_v36 = vpop.permute.xlu2 %1053  ;;  %v1439_v15 = vsub.f32 1.0, %v1438_v9 }
 0x12f   : > { %16572 = vst [vmem:[#allocation5_spill] sm:$0xff] %v9712_v36  ;;  %v918_v29 = vpop.permute.xlu0 %917  ;;  %v986_v43 = vsel %vm9652_vm0, -500.0, %v920_v1  ;;  %vm285_vm0 = vcmp.ne.f32.partialorder %v9831_v12, %v9831_v12  ;;  %v9858_v1 = vld [vmem:[%s9797_s10 + $0x4] sm:$0x3] }
 0x130   : > { %v985_v35 = vsel %vm16595_vm6, -500.0, %v918_v29  ;;  %vm287_vm9 = vcmp.ne.f32.partialorder %v9858_v1, %v9858_v1 }
 0x134   : > { %1292 = vperm.xlu1 %8680, %v966_v2   ;;  %1297 = vperm.xlu2 %8681, %v967_v6   ;;  %v317_v6 = vsel %vm285_vm0, 1, %v16265_v0 }
 0x135   : > { %1302 = vperm.xlu0 %8682, %v968_v7   ;;  %v9871_v7 = vld [vmem:[%s9797_s10 + $0xa] sm:$0x3]  ;;  %v349_v29 = vrot.slane %v317_v6, 1 }
 0x136   : > { %v9723_v40 = vpop.permute.xlu1 %1023  ;;  %v9725_v42 = vpop.permute.xlu2 %1068  ;;  %16598 = vst [vmem:[#allocation11_spill] sm:$0xff] %v9871_v7  ;;  %vm16261_vm14 = vcmp.ne.f32.partialorder %v9871_v7, %v9871_v7 }
 0x137   : > { %v924_v22 = vpop.permute.xlu0 %923  ;;  %vm381_vm15 = vcmp.ne.s32.totalorder %v349_v29, 0  ;;  %v16612_v29 = vmov 0 }
 0x138   : > { %v988_v16 = vsel %vm9666_vm5, -500.0, %v924_v22  ;;  %vm289_vm5 = vcmp.ne.f32.partialorder %v9817_v61, %v9817_v61  ;;  %v319_v22 = vsel %vm287_vm9, 1, %v16265_v0  ;;  %vm9950_vm8 = vmor %vm285_vm0, %vm381_vm15 }
 0x139   : > { %v321_v54 = vsel %vm289_vm5, 1, %v16265_v0 }
 0x13a   : > { %v353_v58 = vrot.slane %v321_v54, 1  ;;  %v9944_v54 = vld [vmem:[%s9797_s10 + $0x16] sm:$0x3] }
 0x13b   : > { %16606 = vst [vmem:[#allocation15_spill] sm:$0xff] %v9944_v54 }
 0x13c   : > { %1307 = vperm.xlu1 %8680, %v969_v14   ;;  %1312 = vperm.xlu2 %8681, %v970_v10   ;;  %v326_v14 = vsel %vm294_vm3, 1, %v16265_v0  ;;  %vm385_vm10 = vcmp.ne.s32.totalorder %v353_v58, 0  ;;  %v320_v10 = vsel %vm288_vm7, 1, %v16265_v0 }
 0x13d   : > { %1317 = vperm.xlu0 %8682, %v971_v13   ;;  %vm9914_vm12 = vmor %vm289_vm5, %vm385_vm10 }
 0x13e   : > { %v9735_v21 = vpop.permute.xlu1 %1038  ;;  %v9742_v19 = vpop.permute.xlu2 %1083 }
 0x13f   : > { %v9765_v31 = vpop.permute.xlu0 %1033 }
 0x144   : > { %1322 = vperm.xlu1 %8680, %v972_v48   ;;  %1327 = vperm.xlu2 %8681, %v973_v20   ;;  %v329_v48 = vsel %vm297_vm4, 1, %v16265_v0  ;;  %v9897_v20 = vld [vmem:[%s9797_s10 + $0x10] sm:$0x3] }
 0x145   : > { %1332 = vperm.xlu0 %8682, %v974_v11   ;;  %16601 = vst [vmem:[#allocation12_spill] sm:$0xff] %v9897_v20  ;;  %v358_v11 = vrot.slane %v326_v14, 1  ;;  %vm16262_vm2 = vcmp.ne.f32.partialorder %v9897_v20, %v9897_v20 }
 0x146   : > { %v9747_v27 = vpop.permute.xlu1 %1048  ;;  %v9756_v33 = vpop.permute.xlu2 %1098  ;;  %v325_v56 = vsel %vm16262_vm2, 1, %v16265_v0 }
 0x147   : > { %16585 = vst [vmem:[#allocation6_spill] sm:$0xff] %v9756_v33  ;;  %v9780_v45 = vpop.permute.xlu0 %1058  ;;  %vm390_vm6 = vcmp.ne.s32.totalorder %v358_v11, 0  ;;  %v9983_v11 = vld [vmem:[%s9797_s10 + $0x1a] sm:$0x3]  ;;  %v16654_v33 = vmov 0 }
 0x148   : > { %16592 = vst [vmem:[#allocation7_spill] sm:$0xff] %v9780_v45  ;;  %vm9962_vm2 = vmor %vm294_vm3, %vm390_vm6  ;;  %vm16264_vm3 = vcmp.ne.f32.partialorder %v9944_v54, %v9944_v54 }
 0x14c   : > { %1337 = vperm.xlu1 %8680, %v975_v26   ;;  %1342 = vperm.xlu2 %8681, %v976_v17   ;;  %v9904_v26 = vld [vmem:[%s9797_s10 + $0x24] sm:$0x3] }
 0x14d   : > { %1347 = vperm.xlu0 %8682, %v977_v25   ;;  %vm303_vm11 = vcmp.ne.f32.partialorder %v9904_v26, %v9904_v26 }
 0x14e   : > { %v9758_v4 = vpop.permute.xlu1 %1063  ;;  %v9771_v8 = vpop.permute.xlu2 %1113  ;;  %v335_v58 = vsel %vm303_vm11, 1, %v16265_v0 }
 0x14f   : > { %v9799_v51 = vpop.permute.xlu0 %1073 }
 0x154   : > { %1352 = vperm.xlu1 %8680, %v978_v18   ;;  %1357 = vperm.xlu2 %8681, %v979_v32   ;;  %v1440_v18 = vmul.f32 %v9828_v47, %v1439_v15  ;;  %v16609_v15 = vmov 0 }
 0x155   : > { %1362 = vperm.xlu0 %8682, %v980_v23   ;;  %v352_v23 = vrot.slane %v320_v10, 1  ;;  %v16610_v15 = vsel %vm9962_vm2, 4294967295, %v16609_v15  ;;  %v9971_v10 = vld [vmem:[%s9797_s10 + $0x2a] sm:$0x3] }
 0x156   : > { %v9769_v39 = vpop.permute.xlu1 %1078  ;;  %v9784_v59 = vpop.permute.xlu2 %1128  ;;  %v1441_v5 = vadd.f32 %v9828_v47, %v1440_v18  ;;  %16611 = vst [vmem:[#allocation16_spill] sm:$0xff] %v16610_v15  ;;  %v16615_v18 = vmov 0 }
 0x157   : > { %v9833_v28 = vpop.permute.xlu0 %1088  ;;  %vm384_vm5 = vcmp.ne.s32.totalorder %v352_v23, 0 }
 0x158   : > { %vm9976_vm15 = vmor %vm288_vm7, %vm384_vm5 }
 0x159   : > { %v16613_v29 = vsel %vm9976_vm15, 4294967295, %v16612_v29 }
 0x15a   : > { %16614 = vst [vmem:[#allocation17_spill] sm:$0xff] %v16613_v29 }
 0x15c   : > { %1367 = vperm.xlu1 %8680, %v981_v38   ;;  %1372 = vperm.xlu2 %8681, %v982_v60   ;;  %v9919_v38 = vld [vmem:[%s9797_s10 + $0x14] sm:$0x3]  ;;  %v446_v60 = vsel %vm9886_vm13, -500.0, %v9804_v49 }
 0x15d   : > { %1377 = vperm.xlu0 %8682, %v983_v37   ;;  %v361_v37 = vrot.slane %v329_v48, 1  ;;  %vm16268_vm1 = vcmp.ne.f32.partialorder %v9919_v38, %v9919_v38  ;;  %v357_v48 = vrot.slane %v325_v56, 1  ;;  %v10024_v56 = vld [vmem:[%s9797_s10 + $0x30] sm:$0x3] }
 0x15e   : > { %v9782_v52 = vpop.permute.xlu1 %1093  ;;  %v9814_v62 = vpop.permute.xlu2 %1143  ;;  %v327_v14 = vsel %vm16268_vm1, 1, %v16265_v0 }
 0x15f   : > { %16593 = vst [vmem:[#allocation8_spill] sm:$0xff] %v9782_v52  ;;  %v9906_v17 = vpop.permute.xlu0 %1103  ;;  %vm393_vm10 = vcmp.ne.s32.totalorder %v361_v37, 0 }
 0x160   : > { %vm9989_vm6 = vmor %vm297_vm4, %vm393_vm10  ;;  %vm16267_vm4 = vcmp.ne.f32.partialorder %v9971_v10, %v9971_v10 }
 0x161   : > { %v16616_v18 = vsel %vm9989_vm6, 4294967295, %v16615_v18 }
 0x162   : > { %16617 = vst [vmem:[#allocation18_spill] sm:$0xff] %v16616_v18 }
 0x164   : > { %1382 = vperm.xlu1 %8680, %v984_v44   ;;  %1387 = vperm.xlu2 %8681, %v985_v35   ;;  %v322_v44 = vsel %vm16261_vm14, 1, %v16265_v0  ;;  %v351_v35 = vrot.slane %v319_v22, 1  ;;  %vm1442_vm14 = vweird.f32 %v9828_v47 }
 0x165   : > { %1392 = vperm.xlu0 %8682, %v986_v43   ;;  %v449_v43 = vsel %vm9914_vm12, -500.0, %v9817_v61  ;;  %v354_v55 = vrot.slane %v322_v44, 1  ;;  %v9998_v37 = vsel %vm1442_vm14, %v9828_v47, %v1441_v5  ;;  %v359_v44 = vrot.slane %v327_v14, 1 }
 0x166   : > { %v9801_v50 = vpop.permute.xlu1 %1108  ;;  %v9860_v2 = vpop.permute.xlu2 %1158  ;;  %v993_v6 = vperm.slane %v449_v43, 0  ;;  %vm383_vm0 = vcmp.ne.s32.totalorder %v351_v35, 0  ;;  %v445_v47 = vsel %vm9950_vm8, -500.0, %v9831_v12  ;;  %v454_v5 = vsel %vm9962_vm2, -500.0, %v9842_v63  ;;  %v10095_v63 = vld [vmem:[%s9797_s10 + $0x36] sm:$0x3] }
 0x167   : > { %vm9993_vm7 = vcmp.ne.s32.totalorder %v354_v55, 0  ;;  %vm10003_vm5 = vmor %vm287_vm9, %vm383_vm0  ;;  %v10009_v35 = vpop.permute.xlu0 %1118  ;;  %v328_v55 = vsel %vm16264_vm3, 1, %v16265_v0  ;;  %vm16271_vm9 = vcmp.ne.f32.partialorder %v9983_v11, %v9983_v11  ;;  %vm16623_vm14 = vcmp.ne.f32.partialorder %v9871_v7, %v9871_v7 }
 0x168   : > { %vm10040_vm10 = vmor %vm16623_vm14, %vm9993_vm7  ;;  %vm389_vm0 = vcmp.ne.s32.totalorder %v357_v48, 0  ;;  %v447_v41 = vsel %vm10003_vm5, -500.0, %v9858_v1  ;;  %vm10056_vm7 = vcmp.ne.s32.totalorder %v359_v44, 0  ;;  %v360_v48 = vrot.slane %v328_v55, 1 }
 0x169   : > { %vm16274_vm14 = vcmp.ne.f32.partialorder %v10024_v56, %v10024_v56  ;;  %v989_v44 = vperm.slane %v445_v47, 0  ;;  %v450_v45 = vsel %vm10040_vm10, -500.0, %v9871_v7  ;;  %v16633_v55 = vmov 0 }
 0x16a   : > { %v998_v36 = vperm.slane %v454_v5, 0 }
 0x16c   : > { %1397 = vperm.xlu1 %8680, %v987_v57   ;;  %1402 = vperm.xlu2 %8681, %v988_v16   ;;  %v990_v16 = vperm.slane %v446_v60, 0  ;;  %v367_v60 = vrot.slane %v335_v58, 1  ;;  %v457_v58 = vsel %vm9989_vm6, -500.0, %v9853_v3  ;;  %v16629_v3 = vmov 0  }
 0x16d   : > { %8684 = vset.pattern.permute.xlu0 %v9812_v46  ;;  %v338_v23 = vsel %vm16267_vm4, 1, %v16629_v3  ;;  %vm16632_vm4 = vcmp.ne.f32.partialorder %v9897_v20, %v9897_v20  ;;  %v1001_v15 = vperm.slane %v457_v58, 0  ;;  %v10116_v58 = vperm.slane %v450_v45, 0  ;;  %v10135_v45 = vld [vmem:[%s9797_s10 + $0x26] sm:$0x3] }
 0x16e   : > { %v9835_v53 = vpop.permute.xlu1 %1123  ;;  %v9937_v57 = vpop.permute.xlu2 %1173  ;;  %v1182_v22 = vsub.f32 %v990_v16, %v9690_v24  ;;  %v1185_v16 = vsub.f32 %v993_v6, %v9701_v30  ;;  %v448_v30 = vsel %vm9976_vm15, -500.0, %v9845_v34  ;;  %v16624_v6 = vmov 0  ;;  %vm10078_vm1 = vmor %vm16632_vm4, %vm389_vm0 }
 0x16f   : > { %16605 = vst [vmem:[#allocation14_spill] sm:$0xff] %v9937_v57  ;;  %v16625_v6 = vsel %vm10040_vm10, 4294967295, %v16624_v6  ;;  %vm10048_vm3 = vcmp.ne.s32.totalorder %v367_v60, 0  ;;  %v10067_v60 = vld [vmem:[%s9797_s10 + $0x20] sm:$0x3]  ;;  %v16634_v55 = vsel %vm10078_vm1, 4294967295, %v16633_v55  ;;  %vm16639_vm4 = vcmp.ne.f32.partialorder %v9919_v38, %v9919_v38 }
 0x170   : > { %16626 = vst [vmem:[#allocation20_spill] sm:$0xff] %v16625_v6  ;;  %v1445_v14 = vmul.f32 %v9998_v37, %v1182_v22  ;;  %v330_v22 = vsel %vm16271_vm9, 1, %v16629_v3  ;;  %v1448_v52 = vmul.f32 %v9998_v37, %v1185_v16  ;;  %v10083_v57 = vld [vmem:[%s9797_s10 + $0x22] sm:$0x3]  ;;  %v992_v18 = vperm.slane %v448_v30, 0  ;;  %vm10090_vm9 = vmor %vm303_vm11, %vm10048_vm3 }
 0x171   : > { %16635 = vst [vmem:[#allocation21_spill] sm:$0xff] %v16634_v55  ;;  %v16636_v16 = vmov 0  ;;  %v370_v47 = vrot.slane %v338_v23, 1  ;;  %v10097_v6 = vperm.slane %v447_v41, 0  ;;  %vm10104_vm0 = vmor %vm16639_vm4, %vm10056_vm7  ;;  %v362_v5 = vrot.slane %v330_v22, 1 }
 0x172   : > { %v16637_v16 = vsel %vm10090_vm9, 4294967295, %v16636_v16  ;;  %v341_v30 = vsel %vm16274_vm14, 1, %v16629_v3  ;;  %vm16280_vm11 = vcmp.ne.f32.partialorder %v10067_v60, %v10067_v60  ;;  %v10114_v41 = vadd.f32 2.0, %v1445_v14 }
 0x173   : > { %16638 = vst [vmem:[#allocation22_spill] sm:$0xff] %v16637_v16  ;;  %vm10118_vm3 = vcmp.ne.s32.totalorder %v360_v48, 0  ;;  %v10124_v23 = vadd.f32 2.0, %v1448_v52  ;;  %v453_v22 = vsel %vm10078_vm1, -500.0, %v9897_v20  ;;  %v463_v14 = vsel %vm10090_vm9, -500.0, %v9904_v26  ;;  %v10148_v26 = vpop.permute.xlu0 %1133 }
 0x174   : > { %8683 = vset.pattern.permute.xlu1 %v9812_v46  ;;  %8685 = vset.pattern.permute.xlu2 %v9812_v46  ;;  %v455_v48 = vsel %vm10104_vm0, -500.0, %v9919_v38  ;;  %vm10140_vm14 = vcmp.ne.s32.totalorder %v370_v47, 0  ;;  %v373_v7 = vrot.slane %v341_v30, 1  ;;  %v333_v16 = vsel %vm16280_vm11, 1, %v16629_v3  ;;  %v10190_v46 = vld [vmem:[%s9797_s10 + $0x28] sm:$0x3] }
 0x175   : > { %v1181_v20 = vsub.f32 %v989_v44, %v9723_v40  ;;  %vm16647_vm4 = vcmp.ne.f32.partialorder %v9944_v54, %v9944_v54  ;;  %v16648_v47 = vmov 0  ;;  %vm394_vm9 = vcmp.ne.s32.totalorder %v362_v5, 0 }
 0x176   : > { %v9908_v25 = vpop.permute.xlu1 %1138  ;;  %vm10159_vm7 = vmor %vm16647_vm4, %vm10118_vm3  ;;  %vm16651_vm11 = vcmp.ne.f32.partialorder %v10083_v57, %v10083_v57  ;;  %vm16652_vm6 = vcmp.ne.f32.partialorder %v10095_v63, %v10095_v63  ;;  %vm16287_vm2 = vcmp.ne.f32.partialorder %v10135_v45, %v10135_v45  ;;  %v509_v40 = vrot.slane %v9831_v12, 1 }
 0x177   : > { %16602 = vst [vmem:[#allocation13_spill] sm:$0xff] %v9908_v25  ;;  %v10069_v25 = vpop.permute.xlu2 %1252  ;;  %v16649_v47 = vsel %vm10159_vm7, 4294967295, %v16648_v47  ;;  %v334_v30 = vsel %vm16651_vm11, 1, %v16629_v3  ;;  %v1193_v44 = vsub.f32 %v1001_v15, %v9742_v19  ;;  %v10178_v5 = vperm.slane %v463_v14, 0 }
 0x178   : > { %16650 = vst [vmem:[#allocation24_spill] sm:$0xff] %v16649_v47  ;;  %vm16653_vm11 = vcmp.ne.f32.partialorder %v9971_v10, %v9971_v10  ;;  %v10192_v12 = vperm.slane %v455_v48, 0  ;;  %v16658_v19 = vmov 0  ;;  %v1444_v14 = vmul.f32 %v9998_v37, %v1181_v20 }
 0x179   : > { %vm10185_vm3 = vmor %vm16653_vm11, %vm10140_vm14  ;;  %vm10204_vm14 = vcmp.ne.s32.totalorder %v373_v7, 0  ;;  %v336_v47 = vsel %vm16287_vm2, 1, %v16629_v3  ;;  %v1183_v7 = vsub.f32 %v10097_v6, %v9765_v31  ;;  %v573_v20 = vsel %vm9950_vm8, -500.0, %v509_v40  ;;  %v10321_v40 = vld [vmem:[%s9797_s10 + $0x34] sm:$0x3] }
 0x17a   : > { %v16655_v33 = vsel %vm10185_vm3, 4294967295, %v16654_v33  ;;  %vm16663_vm11 = vcmp.ne.f32.partialorder %v10024_v56, %v10024_v56  ;;  %v16664_v31 = vmov 0  ;;  %v1186_v9 = vsub.f32 %v10116_v58, %v9747_v27 }
 0x17b   : > { %16656 = vst [vmem:[#allocation25_spill] sm:$0xff] %v16655_v33  ;;  %v368_v6 = vrot.slane %v336_v47, 1  ;;  %v510_v27 = vrot.slane %v9804_v49, 1  ;;  %v1213_v58 = vperm.slane %v573_v20, 0  ;;  %v512_v24 = vrot.slane %v9845_v34, 1 }
 0x17e   : > { %v10011_v43 = vpop.permute.xlu1 %1153 }
 0x17f   : > { %16622 = vst [vmem:[#allocation19_spill] sm:$0xff] %v10011_v43  ;;  %v1190_v43 = vsub.f32 %v998_v36, %v9725_v42  ;;  %v344_v36 = vsel %vm16652_vm6, 1, %v16629_v3  ;;  %v1184_v42 = vsub.f32 %v992_v18, %v9735_v21  ;;  %v456_v21 = vsel %vm10159_vm7, -500.0, %v9944_v54  ;;  %v10217_v54 = vld [vmem:[%s9797_s10 + $0x2c] sm:$0x3] }
 0x180   : > { %vm16657_vm6 = vcmp.ne.f32.partialorder %v9983_v11, %v9983_v11  ;;  %v366_v18 = vrot.slane %v334_v30, 1  ;;  %v376_v52 = vrot.slane %v344_v36, 1  ;;  %v466_v30 = vsel %vm10185_vm3, -500.0, %v9971_v10 }
 0x181   : > { %vm10200_vm4 = vmor %vm16657_vm6, %vm394_vm9  ;;  %v1453_v48 = vmul.f32 %v9998_v37, %v1190_v43  ;;  %v1447_v43 = vmul.f32 %v9998_v37, %v1184_v42  ;;  %v1456_v36 = vmul.f32 %v9998_v37, %v1193_v44  ;;  %v1446_v44 = vmul.f32 %v9998_v37, %v1183_v7 }
 0x182   : > { %v16659_v19 = vsel %vm10200_vm4, 4294967295, %v16658_v19  ;;  %v458_v29 = vsel %vm10200_vm4, -500.0, %v9983_v11  ;;  %vm10238_vm6 = vmor %vm16663_vm11, %vm10204_vm14  ;;  %vm10244_vm8 = vcmp.ne.s32.totalorder %v366_v18, 0  ;;  %vm10250_vm3 = vcmp.ne.s32.totalorder %v376_v52, 0  ;;  %v10274_v52 = vpop.permute.xlu0 %1148 }
 0x183   : > { %16660 = vst [vmem:[#allocation26_spill] sm:$0xff] %v16659_v19  ;;  %v16665_v31 = vsel %vm10238_vm6, 4294967295, %v16664_v31  ;;  %vm16671_vm14 = vcmp.ne.f32.partialorder %v10190_v46, %v10190_v46  ;;  %v10262_v47 = vperm.slane %v466_v30, 0  ;;  %v469_v15 = vsel %vm10238_vm6, -500.0, %v10024_v56 }
 0x184   : > { %16666 = vst [vmem:[#allocation27_spill] sm:$0xff] %v16665_v31  ;;  %v337_v42 = vsel %vm16671_vm14, 1, %v16629_v3  ;;  %vm16672_vm11 = vcmp.ne.f32.partialorder %v10067_v60, %v10067_v60  ;;  %v10276_v7 = vadd.f32 2.0, %v1444_v14  ;;  %v10280_v30 = vperm.slane %v458_v29, 0  ;;  %v10296_v14 = vld [vmem:[%s9797_s10 + $0x32] sm:$0x3] }
 0x185   : > { %vm16676_vm14 = vcmp.ne.f32.partialorder %v10083_v57, %v10083_v57  ;;  %v16677_v56 = vmov 0  ;;  %v10300_v29 = vadd.f32 2.0, %v1456_v36  ;;  %v16683_v10 = vmov 0 }
 0x186   : > { %v10150_v55 = vpop.permute.xlu1 %1168  ;;  %vm10287_vm6 = vmor %vm16676_vm14, %vm10244_vm8  ;;  %vm10311_vm14 = vcmp.ne.s32.totalorder %v368_v6, 0  ;;  %v369_v31 = vrot.slane %v337_v42, 1  ;;  %v574_v36 = vsel %vm9886_vm13, -500.0, %v510_v27  ;;  %v10323_v19 = vadd.f32 2.0, %v1446_v44 }
 0x187   : > { %16646 = vst [vmem:[#allocation23_spill] sm:$0xff] %v10150_v55  ;;  %v10167_v55 = vperm.slane %v453_v22, 0  ;;  %v365_v22 = vrot.slane %v333_v16, 1  ;;  %v10208_v16 = vpop.permute.xlu2 %1267  ;;  %v16678_v56 = vsel %vm10287_vm6, 4294967295, %v16677_v56  ;;  %v462_v42 = vsel %vm10287_vm6, -500.0, %v10083_v57 }
 0x188   : > { %16681 = vst [vmem:[#allocation30_spill] sm:$0xff] %v10300_v29  ;;  %v513_v44 = vrot.slane %v9817_v61, 1 }
 0x189   : > { %vm397_vm2 = vcmp.ne.s32.totalorder %v365_v22, 0  ;;  %v10260_v22 = vperm.slane %v456_v21, 0  ;;  %v10278_v21 = vadd.f32 2.0, %v1453_v48  ;;  %v10298_v48 = vadd.f32 2.0, %v1447_v43 }
 0x18a   : > { %vm10270_vm9 = vmor %vm16672_vm11, %vm397_vm2  ;;  %vm16679_vm2 = vcmp.ne.f32.partialorder %v10217_v54, %v10217_v54  ;;  %vm16682_vm11 = vcmp.ne.f32.partialorder %v10095_v63, %v10095_v63  ;;  %v10316_v43 = vperm.slane %v469_v15, 0  ;;  %v1189_v13 = vsub.f32 %v10167_v55, %v9758_v4 }
 0x18b   : > { %16675 = vst [vmem:[#allocation28_spill] sm:$0xff] %v10278_v21  ;;  %v339_v20 = vsel %vm16679_vm2, 1, %v16629_v3  ;;  %vm10307_vm8 = vmor %vm16682_vm11, %vm10250_vm3  ;;  %v1449_v21 = vmul.f32 %v9998_v37, %v1186_v9  ;;  %v461_v6 = vsel %vm10270_vm9, -500.0, %v10067_v60  ;;  %vm16689_vm11 = vcmp.ne.f32.partialorder %v10135_v45, %v10135_v45 }
 0x18c   : > { %16680 = vst [vmem:[#allocation29_spill] sm:$0xff] %v10298_v48  ;;  %v16684_v10 = vsel %vm10307_vm8, 4294967295, %v16683_v10  ;;  %v371_v48 = vrot.slane %v339_v20, 1  ;;  %v472_v27 = vsel %vm10307_vm8, -500.0, %v10095_v63  ;;  %vm10347_vm3 = vmor %vm16689_vm11, %vm10311_vm14  ;;  %v1199_v4 = vsub.f32 %v10178_v5, %v9771_v8 }
 0x18d   : > { %16685 = vst [vmem:[#allocation31_spill] sm:$0xff] %v16684_v10  ;;  %vm401_vm2 = vcmp.ne.s32.totalorder %v369_v31, 0  ;;  %v1214_v55 = vperm.slane %v574_v36, 0  ;;  %v10356_v63 = vadd.f32 2.0, %v1449_v21  ;;  %v10358_v33 = vperm.slane %v461_v6, 0 }
 0x18e   : > { %v1248_v49 = vpop.permute.xlu1 %1247  ;;  %vm16692_vm14 = vcmp.ne.f32.partialorder %v10296_v14, %v10296_v14  ;;  %v1191_v8 = vsub.f32 %v10192_v12, %v9799_v51  ;;  %v10370_v5 = vperm.slane %v462_v42, 0  ;;  %v464_v31 = vsel %vm10347_vm3, -500.0, %v10135_v45  ;;  %v10397_v42 = vpop.permute.xlu0 %1163 }
 0x18f   : > { %v1405_v29 = vsub.f32 %v1213_v58, %v1248_v49  ;;  %v10330_v9 = vpop.permute.xlu2 %1282  ;;  %v16690_v58 = vmov 0  ;;  %v342_v15 = vsel %vm16692_vm14, 1, %v16629_v3  ;;  %v10365_v49 = vld [vmem:[%s9797_s10 + $0x38] sm:$0x3]  ;;  %vm10375_vm11 = vcmp.ne.s32.totalorder %v371_v48, 0 }
 0x190   : > { %16688 = vst [vmem:[#allocation32_spill] sm:$0xff] %v10330_v9  ;;  %v16691_v58 = vsel %vm10347_vm3, 4294967295, %v16690_v58  ;;  %v1452_v20 = vmul.f32 %v9998_v37, %v1189_v13  ;;  %v10380_v36 = vperm.slane %v472_v27, 0  ;;  %vm16695_vm14 = vcmp.ne.f32.partialorder %v10190_v46, %v10190_v46  ;;  %v10402_v27 = vld [vmem:[%s9797_s10 + $0x3a] sm:$0x3] }
 0x191   : > { %v1508_v61 = vmul.f32 %v9998_v37, %v1405_v29  ;;  %vm10385_vm13 = vmor %vm16695_vm14, %vm401_vm2  ;;  %v16696_v29 = vmov 0  ;;  %vm16698_vm8 = vcmp.ne.f32.partialorder %v10321_v40, %v10321_v40  ;;  %v577_v12 = vsel %vm9914_vm12, -500.0, %v513_v44 }
 0x192   : > { %v16697_v29 = vsel %vm10385_vm13, 4294967295, %v16696_v29  ;;  %v343_v51 = vsel %vm16698_vm8, 1, %v16629_v3  ;;  %v1462_v48 = vmul.f32 %v9998_v37, %v1199_v4  ;;  %v1406_v6 = vsub.f32 %v1214_v55, %v10069_v25 }
 0x193   : > { %v374_v13 = vrot.slane %v342_v15, 1  ;;  %v1192_v9 = vsub.f32 %v10260_v22, %v9769_v39  ;;  %v1202_v10 = vsub.f32 %v10262_v47, %v9784_v59  ;;  %v10408_v32 = vperm.slane %v464_v31, 0 }
 0x194   : > { %vm16699_vm12 = vcmp.ne.f32.partialorder %v10217_v54, %v10217_v54  ;;  %v16700_v25 = vmov 0  ;;  %v10419_v44 = vadd.f32 2.0, %v1508_v61  ;;  %v1454_v4 = vmul.f32 %v9998_v37, %v1191_v8 }
 0x195   : > { %vm10415_vm8 = vmor %vm16699_vm12, %vm10375_vm11  ;;  %v465_v39 = vsel %vm10385_vm13, -500.0, %v10190_v46  ;;  %v375_v59 = vrot.slane %v343_v51, 1  ;;  %v1217_v22 = vperm.slane %v577_v12, 0  ;;  %v10427_v47 = vadd.f32 2.0, %v1452_v20 }
 0x196   : > { %v16701_v25 = vsel %vm10415_vm8, 4294967295, %v16700_v25  ;;  %v1194_v55 = vsub.f32 %v10280_v30, %v9833_v28  ;;  %vm16702_vm11 = vcmp.ne.f32.partialorder %v10365_v49, %v10365_v49  ;;  %v10437_v46 = vadd.f32 2.0, %v1462_v48 }
 0x197   : > { %v345_v15 = vsel %vm16702_vm11, 1, %v16629_v3  ;;  %v467_v61 = vsel %vm10415_vm8, -500.0, %v10217_v54  ;;  %v1509_v8 = vmul.f32 %v9998_v37, %v1406_v6  ;;  %vm406_vm14 = vcmp.ne.s32.totalorder %v374_v13, 0  ;;  %v10443_v31 = vpop.permute.xlu2 %1297 }
 0x198   : > { %v1455_v28 = vmul.f32 %v9998_v37, %v1192_v9  ;;  %v1465_v30 = vmul.f32 %v9998_v37, %v1202_v10  ;;  %v1205_v21 = vsub.f32 %v10316_v43, %v9814_v62  ;;  %vm1668_vm11 = vcmp.ge.f32.partialorder %v10419_v44, 0.0 }
 0x199   : > { %vm16703_vm2 = vcmp.lt.f32.partialorder %v10276_v7, 4.0  ;;  %vm16704_vm12 = vcmp.ge.f32.partialorder %v10276_v7, 0.0  ;;  %vm10454_vm8 = vcmp.ne.s32.totalorder %v375_v59, 0  ;;  %v1409_v51 = vsub.f32 %v1217_v22, %v10208_v16 }
 0x19a   : > { %vm1636_vm13 = vmand %vm16704_vm12, %vm16703_vm2  ;;  %v377_v12 = vrot.slane %v345_v15, 1  ;;  %vm16707_vm6 = vcmp.ne.f32.partialorder %v10402_v27, %v10402_v27  ;;  %v1457_v62 = vmul.f32 %v9998_v37, %v1194_v55  ;;  %v1197_v43 = vsub.f32 %v10358_v33, %v9906_v17 }
 0x19b   : > { %v346_v10 = vsel %vm16707_vm6, 1, %v16629_v3  ;;  %v10466_v9 = vperm.slane %v465_v39, 0  ;;  %vm16708_vm2 = vcmp.ne.f32.partialorder %v10296_v14, %v10296_v14  ;;  %v519_v16 = vrot.slane %v9919_v38, 1  ;;  %vm10482_vm6 = vmand %vm1636_vm13, %vm1668_vm11 }
 0x19c   : > { %vm10471_vm12 = vmor %vm16708_vm2, %vm406_vm14  ;;  %v10476_v6 = vadd.f32 2.0, %v1454_v4  ;;  %v10478_v13 = vperm.slane %v467_v61, 0  ;;  %v10480_v59 = vadd.f32 2.0, %v1509_v8  ;;  %vm1732_vm7 = vcmp.lt.f32.partialorder %v10419_v44, 4.0 }
 0x19d   : > { %v10489_v17 = vadd.f32 2.0, %v1455_v28  ;;  %v10491_v33 = vadd.f32 2.0, %v1465_v30  ;;  %v1198_v38 = vsub.f32 %v10370_v5, %v9801_v50  ;;  %vm16714_vm13 = vcmp.ne.f32.partialorder %v10321_v40, %v10321_v40  ;;  %v10509_v50 = vpop.permute.xlu0 %1178 }
 0x19e   : > { %vm10500_vm11 = vmor %vm16714_vm13, %vm10454_vm8  ;;  %v16715_v4 = vmov 0  ;;  %v378_v39 = vrot.slane %v346_v10, 1  ;;  %v1468_v55 = vmul.f32 %v9998_v37, %v1205_v21  ;;  %v470_v15 = vsel %vm10471_vm12, -500.0, %v10296_v14  ;;  %16717 = vst [vmem:[#allocation34_spill] sm:$0xff] %v10509_v50 }
 0x19f   : > { %16713 = vst [vmem:[#allocation33_spill] sm:$0xff] %v10491_v33  ;;  %v16716_v4 = vsel %vm10500_vm11, 4294967295, %v16715_v4  ;;  %v1512_v61 = vmul.f32 %v9998_v37, %v1409_v51  ;;  %vm409_vm2 = vcmp.ne.s32.totalorder %v377_v12, 0  ;;  %v10511_v5 = vadd.f32 2.0, %v1457_v62  ;;  %vm10520_vm8 = vmand %vm10482_vm6, %vm1732_vm7 }
 0x1a0   : > { %v1460_v8 = vmul.f32 %v9998_v37, %v1197_v43  ;;  %v1208_v28 = vsub.f32 %v10380_v36, %v9860_v2  ;;  %v583_v21 = vsel %vm10104_vm0, -500.0, %v519_v16  ;;  %v1200_v20 = vsub.f32 %v10408_v32, %v10009_v35  ;;  %v10557_v43 = vpop.permute.xlu2 %1312 }
 0x1a1   : > { %v471_v2 = vsel %vm10500_vm11, -500.0, %v10321_v40  ;;  %v511_v36 = vrot.slane %v9858_v1, 1  ;;  %v1461_v51 = vmul.f32 %v9998_v37, %v1198_v38  ;;  %v16720_v12 = vlaneseq }
 0x1a2   : > { %v10537_v62 = vperm.slane %v470_v15, 0  ;;  %vm16722_vm0 = vcmp.ne.f32.partialorder %v10365_v49, %v10365_v49  ;;  %v16723_v35 = vmov 0  ;;  %vm410_vm6 = vcmp.ne.s32.totalorder %v378_v39, 0 }
 0x1a3   : > { %v10535_v10 = vand.u32 127, %v16720_v12  ;;  %vm10542_vm7 = vmor %vm16722_vm0, %vm409_vm2  ;;  %vm16725_vm3 = vcmp.lt.f32.partialorder %v10114_v41, 4.0  ;;  %vm16726_vm14 = vcmp.ge.f32.partialorder %v10114_v41, 0.0  ;;  %v10550_v1 = vadd.f32 2.0, %v1468_v55 }
 0x1a4   : > { %v16724_v35 = vsel %vm10542_vm7, 4294967295, %v16723_v35  ;;  %vm1637_vm13 = vmand %vm16726_vm14, %vm16725_vm3  ;;  %v10552_v0 = vadd.f32 2.0, %v1512_v61  ;;  %v1796_v40 = vsel %vm10520_vm8, %v10276_v7, 0.0  ;;  %v1223_v32 = vperm.slane %v583_v21, 0 }
 0x1a5   : > { %16721 = vst [vmem:[#allocation35_spill] sm:$0xff] %v10535_v10  ;;  %v10559_v16 = vadd.f32 2.0, %v1460_v8  ;;  %v1471_v22 = vmul.f32 %v9998_v37, %v1208_v28  ;;  %vm16727_vm2 = vcmp.ge.f32.partialorder %v10480_v59, 0.0  ;;  %vm1733_vm3 = vcmp.lt.f32.partialorder %v10480_v59, 4.0  ;;  %v1258_v12 = vpop.permute.xlu0 %1257 }
 0x1a6   : > { %vm1701_vm0 = vmand %vm1637_vm13, %vm16727_vm2  ;;  %v10565_v38 = vperm.slane %v471_v2, 0  ;;  %v1463_v39 = vmul.f32 %v9998_v37, %v1200_v20  ;;  %v473_v7 = vsel %vm10542_vm7, -500.0, %v10365_v49  ;;  %vm16728_vm14 = vcmp.ne.f32.partialorder %v10402_v27, %v10402_v27 }
 0x1a7   : > { %vm10574_vm11 = vmor %vm16728_vm14, %vm410_vm6  ;;  %v16729_v55 = vmov 0  ;;  %v575_v15 = vsel %vm10003_vm5, -500.0, %v511_v36  ;;  %v525_v61 = vrot.slane %v10067_v60, 1  ;;  %v10581_v8 = vadd.f32 2.0, %v1461_v51 }
 0x1a8   : > { %v16730_v55 = vsel %vm10574_vm11, 4294967295, %v16729_v55  ;;  %v1201_v28 = vsub.f32 %v10466_v9, %v9835_v53  ;;  %v8316_v21 = vceil.f32 %v1796_v40  ;;  %v8317_v20 = vfloor.f32 %v1796_v40  ;;  %vm10585_vm13 = vmand %vm1701_vm0, %vm1733_vm3 }
 0x1a9   : > { %16731 = vst [vmem:[#allocation36_spill] sm:$0xff] %v16730_v55  ;;  %vm1672_vm6 = vcmp.ge.f32.partialorder %v10552_v0, 0.0  ;;  %v1415_v2 = vsub.f32 %v1223_v32, %v10443_v31  ;;  %v10592_v36 = vadd.f32 2.0, %v1471_v22  ;;  %v10594_v60 = vperm.slane %v473_v7, 0 }
 0x1aa   : > { %v474_v53 = vsel %vm10574_vm11, -500.0, %v10402_v27  ;;  %v1215_v9 = vperm.slane %v575_v15, 0  ;;  %vm16734_vm5 = vcmp.lt.f32.partialorder %v10124_v23, 4.0  ;;  %vm16735_vm0 = vcmp.ge.f32.partialorder %v10124_v23, 0.0 }
 0x1ab   : > { %vm1640_vm3 = vmand %vm16735_vm0, %vm16734_vm5  ;;  %v10603_v51 = vadd.f32 2.0, %v1463_v39  ;;  %v1203_v31 = vsub.f32 %v10478_v13, %v10148_v26  ;;  %v1860_v34 = vsel %vm10520_vm8, %v10419_v44, 0.0  ;;  %v589_v32 = vsel %vm10270_vm9, -500.0, %v525_v61 }
 0x1ac   : > { %vm1614_vm2 = vcmp.lt.f32.partialorder %v10476_v6, 4.0  ;;  %v1464_v27 = vmul.f32 %v9998_v37, %v1201_v28  ;;  %v1797_v22 = vsel %vm10585_vm13, %v10114_v41, 0.0  ;;  %vm1704_vm5 = vmand %vm1640_vm3, %vm1672_vm6  ;;  %vm1736_vm0 = vcmp.lt.f32.partialorder %v10552_v0, 4.0 }
 0x1ad   : > { %vm16736_vm11 = vcmp.lt.s32.totalorder %v1796_v40, 0  ;;  %v1206_v18 = vsub.f32 %v10537_v62, %v10274_v52  ;;  %v10624_v44 = vperm.slane %v474_v53, 0  ;;  %v1518_v13 = vmul.f32 %v9998_v37, %v1415_v2  ;;  %vm10629_vm9 = vmand %vm1704_vm5, %vm1736_vm0  ;;  %v1328_v52 = vpop.permute.xlu2 %1327 }
 0x1ae   : > { %v8318_v26 = vsel %vm16736_vm11, %v8316_v21, %v8317_v20  ;;  %v576_v7 = vsel %vm9976_vm15, -500.0, %v512_v24  ;;  %v8476_v15 = vceil.f32 %v1860_v34  ;;  %v8477_v61 = vfloor.f32 %v1860_v34 }
 0x1af   : > { %v1407_v41 = vsub.f32 %v1215_v9, %v1258_v12  ;;  %v1229_v28 = vperm.slane %v589_v32, 0  ;;  %v8321_v50 = vceil.f32 %v1797_v22  ;;  %v8322_v33 = vfloor.f32 %v1797_v22  ;;  %v1263_v9 = vpop.permute.xlu1 %1262  ;;  %v16741_v12 = vld [vmem:[#allocation9_spill] sm:$0xff] }
 0x1b0   : > { %v16738_v55 = vmov 0  ;;  %v8319_v40 = vcvt.f32.s32 %v8318_v26  ;;  %vm8475_vm11 = vcmp.lt.s32.totalorder %v1860_v34, 0  ;;  %v10633_v62 = vadd.f32 2.0, %v1464_v27 }
 0x1b1   : > { %v16739_v55 = vsel %vm10629_vm9, 4294967295, %v16738_v55  ;;  %v1466_v21 = vmul.f32 %v9998_v37, %v1203_v31  ;;  %vm8320_vm6 = vcmp.lt.s32.totalorder %v1797_v22, 0  ;;  %v1216_v20 = vperm.slane %v576_v7, 0 }
 0x1b2   : > { %16740 = vst [vmem:[#allocation17_spill] sm:$0xff] %v16739_v55  ;;  %v1861_v2 = vsel %vm10585_vm13, %v10480_v59, 0.0  ;;  %v1469_v24 = vmul.f32 %v9998_v37, %v1206_v18  ;;  %v10642_v53 = vadd.f32 2.0, %v1518_v13  ;;  %v522_v34 = vrot.slane %v9983_v11, 1  ;;  %v16744_v18 = vld [vmem:[#allocation19_spill] sm:$0xff] }
 0x1b3   : > { %vm10647_vm5 = vcmp.ne.s32.totalorder %v16741_v12, %v10535_v10  ;;  %v16742_v31 = vmov 0  ;;  %v1800_v32 = vsel %vm10629_vm9, %v10124_v23, 0.0  ;;  %v8478_v27 = vsel %vm8475_vm11, %v8476_v15, %v8477_v61 }
 0x1b4   : > { %v16743_v31 = vsel %vm10647_vm5, 4294967295, %v16742_v31  ;;  %v1510_v59 = vmul.f32 %v9998_v37, %v1407_v41  ;;  %v1421_v22 = vsub.f32 %v1229_v28, %v1328_v52  ;;  %v8323_v26 = vsel %vm8320_vm6, %v8321_v50, %v8322_v33  ;;  %v16753_v52 = vld [vmem:[#allocation23_spill] sm:$0xff] }
 0x1b5   : > { %v1207_v13 = vsub.f32 %v10565_v38, %v16744_v18  ;;  %v1209_v11 = vsub.f32 %v10594_v60, %v10397_v42  ;;  %v1929_v39 = vmul.u32 4, %v8319_v40  ;;  %v8481_v7 = vceil.f32 %v1861_v2  ;;  %v16745_v38 = vld [vmem:[#allocation29_spill] sm:$0xff] }
 0x1b6   : > { %v8482_v12 = vfloor.f32 %v1861_v2  ;;  %v1408_v23 = vsub.f32 %v1216_v20, %v1263_v9  ;;  %v8336_v15 = vceil.f32 %v1800_v32  ;;  %v8337_v61 = vfloor.f32 %v1800_v32 }
 0x1b7   : > { %v8479_v41 = vcvt.f32.s32 %v8478_v27  ;;  %vm1678_vm11 = vcmp.ge.f32.partialorder %v10642_v53, 0.0  ;;  %v8324_v33 = vcvt.f32.s32 %v8323_v26  ;;  %v10662_v50 = vadd.f32 2.0, %v1510_v59  ;;  %v16752_v26 = vld [vmem:[#allocation11_spill] sm:$0xff] }
 0x1b8   : > { %v1524_v42 = vmul.f32 %v9998_v37, %v1421_v22  ;;  %vm16746_vm15 = vcmp.ge.f32.partialorder %v10476_v6, 0.0  ;;  %v10671_v60 = vadd.f32 2.0, %v1466_v21  ;;  %v10673_v28 = vadd.f32 2.0, %v1469_v24 }
 0x1b9   : > { %vm1646_vm3 = vmand %vm16746_vm15, %vm1614_vm2  ;;  %v1961_v40 = vadd.s32 %v8479_v41, %v1929_v39  ;;  %v586_v20 = vsel %vm10200_vm4, -500.0, %v522_v34  ;;  %vm16748_vm6 = vcmp.lt.s32.totalorder %v1861_v2, 0  ;;  %v1864_v27 = vsel %vm10629_vm9, %v10552_v0, 0.0  ;;  %v1273_v0 = vpop.permute.xlu0 %1272 }
 0x1ba   : > { %v8483_v9 = vsel %vm16748_vm6, %v8481_v7, %v8482_v12  ;;  %vm10681_vm14 = vmand %vm1646_vm3, %vm1678_vm11  ;;  %vm1742_vm2 = vcmp.lt.f32.partialorder %v10642_v53, 4.0  ;;  %v1511_v21 = vmul.f32 %v9998_v37, %v1408_v23  ;;  %v1470_v24 = vmul.f32 %v9998_v37, %v1207_v13 }
 0x1bb   : > { %vm16751_vm15 = vcmp.lt.s32.totalorder %v1800_v32, 0  ;;  %v514_v34 = vrot.slane %v16752_v26, 1  ;;  %v6666_v2 = vadd.s32 1, %v10535_v10  ;;  %v1930_v18 = vmul.u32 4, %v8324_v33  ;;  %vm10705_vm3 = vmand %vm10681_vm14, %vm1742_vm2 }
 0x1bc   : > { %v8338_v22 = vsel %vm16751_vm15, %v8336_v15, %v8337_v61  ;;  %v1472_v39 = vmul.f32 %v9998_v37, %v1209_v11  ;;  %vm1670_vm4 = vcmp.ge.f32.partialorder %v10662_v50, 0.0  ;;  %v10693_v7 = vadd.f32 2.0, %v1524_v42 }
 0x1bd   : > { %v8484_v12 = vcvt.f32.s32 %v8483_v9  ;;  %v8496_v41 = vceil.f32 %v1864_v27  ;;  %v1210_v23 = vsub.f32 %v10624_v44, %v16753_v52  ;;  %v10699_v32 = vsel %vm10647_vm5, %v1961_v40, 4294967295 }
 0x1be   : > { %16754 = vst [vmem:[#allocation9_spill] sm:$0xff] %v10699_v32  ;;  %v16755_v13 = vmov 0  ;;  %vm16758_vm11 = vcmp.lt.f32.partialorder %v10323_v19, 4.0  ;;  %vm16759_vm6 = vcmp.ge.f32.partialorder %v10323_v19, 0.0  ;;  %v8339_v11 = vcvt.f32.s32 %v8338_v22 }
 0x1bf   : > { %v16756_v13 = vsel %vm10705_vm3, 4294967295, %v16755_v13  ;;  %vm1638_vm15 = vmand %vm16759_vm6, %vm16758_vm11  ;;  %v8497_v15 = vfloor.f32 %v1864_v27  ;;  %v10713_v44 = vadd.f32 2.0, %v1511_v21  ;;  %v6668_v61 = vsel %vm10520_vm8, 1, %v16629_v3 }
 0x1c0   : > { %16757 = vst [vmem:[#allocation19_spill] sm:$0xff] %v16756_v13  ;;  %vm8495_vm0 = vcmp.lt.s32.totalorder %v1864_v27, 0  ;;  %vm10718_vm9 = vmand %vm1638_vm15, %vm1670_vm4  ;;  %vm1734_vm14 = vcmp.lt.f32.partialorder %v10662_v50, 4.0  ;;  %v578_v40 = vsel %vm10040_vm10, -500.0, %v514_v34  ;;  %v10725_v9 = vmul.u32 2, %v6666_v2 }
 0x1c1   : > { %v1962_v59 = vadd.s32 %v8484_v12, %v1930_v18  ;;  %v1806_v21 = vsel %vm10705_vm3, %v10476_v6, 0.0  ;;  %vm1684_vm2 = vcmp.ge.f32.partialorder %v10693_v7, 0.0  ;;  %vm6634_vm8 = vcmp.eq.s32.totalorder %v10699_v32, 0  ;;  %vm10742_vm10 = vmand %vm10718_vm9, %vm1734_vm14  ;;  %v10816_v32 = vpop.permute.xlu1 %1277 }
 0x1c2   : > { %vm16763_vm4 = vcmp.lt.f32.partialorder %v10559_v16, 4.0  ;;  %vm16764_vm11 = vcmp.ge.f32.partialorder %v10559_v16, 0.0  ;;  %v10736_v30 = vadd.f32 2.0, %v1470_v24  ;;  %v1473_v27 = vmul.f32 %v9998_v37, %v1210_v23  ;;  %16782 = vst [vmem:[#allocation20_spill] sm:$0xff] %v10816_v32 }
 0x1c3   : > { %vm1652_vm6 = vmand %vm16764_vm11, %vm16763_vm4  ;;  %v1226_v22 = vperm.slane %v586_v20, 0  ;;  %v6700_v26 = vadd.s32 %v6668_v61, %v10725_v9  ;;  %v8498_v34 = vsel %vm8495_vm0, %v8496_v41, %v8497_v15  ;;  %v1933_v2 = vmul.u32 4, %v8339_v11 }
 0x1c4   : > { %v16765_v6 = vmov 0  ;;  %vm1671_vm15 = vcmp.ge.f32.partialorder %v10713_v44, 0.0  ;;  %v1218_v18 = vperm.slane %v578_v40, 0  ;;  %v8366_v12 = vceil.f32 %v1806_v21  ;;  %vm10747_vm4 = vmand %vm1652_vm6, %vm1684_vm2 }
 0x1c5   : > { %v16766_v6 = vsel %vm10742_vm10, 4294967295, %v16765_v6  ;;  %v8367_v52 = vfloor.f32 %v1806_v21  ;;  %vm1748_vm11 = vcmp.lt.f32.partialorder %v10693_v7, 4.0  ;;  %v6732_v20 = vsel %vm6634_vm8, %v6700_v26, 0 }
 0x1c6   : > { %16767 = vst [vmem:[#allocation29_spill] sm:$0xff] %v16766_v6  ;;  %vm16770_vm0 = vcmp.lt.f32.partialorder %v16745_v38, 4.0  ;;  %vm16771_vm7 = vcmp.ge.f32.partialorder %v16745_v38, 0.0  ;;  %v10758_v41 = vsel %vm10647_vm5, %v1962_v59, 4294967295  ;;  %v10760_v23 = vadd.f32 2.0, %v1472_v39  ;;  %vm10780_vm6 = vmand %vm10747_vm4, %vm1748_vm11  ;;  %v10784_v59 = vpop.permute.xlu0 %1287 }
 0x1c7   : > { %vm1639_vm9 = vmand %vm16771_vm7, %vm16770_vm0  ;;  %16772 = vst [vmem:[#allocation26_spill] sm:$0xff] %v10758_v41  ;;  %vm8365_vm14 = vcmp.lt.s32.totalorder %v1806_v21, 0  ;;  %v1870_v11 = vsel %vm10705_vm3, %v10642_v53, 0.0  ;;  %v8499_v15 = vcvt.f32.s32 %v8498_v34  ;;  %v10765_v61 = vadd.f32 2.0, %v1473_v27  ;;  %v16778_v34 = vld [vmem:[#allocation12_spill] sm:$0xff] }
 0x1c8   : > { %vm10767_vm2 = vmand %vm1639_vm9, %vm1671_vm15  ;;  %v1418_v42 = vsub.f32 %v1226_v22, %v10557_v43  ;;  %vm16309_vm7 = vcmask 64512   ;;  %v1798_v39 = vsel %vm10742_vm10, %v10323_v19, 0.0  ;;  %vm1735_vm8 = vcmp.lt.f32.partialorder %v10713_v44, 4.0 }
 0x1c9   : > { %v1410_v40 = vsub.f32 %v1218_v18, %v1273_v0  ;;  %v10787_v43 = vsel %vm16309_vm7, %v6732_v20, 2147483648  ;;  %vm1577_vm15 = vcmp.ge.f32.partialorder %v10356_v63, 0.0  ;;  %vm1609_vm0 = vcmp.lt.f32.partialorder %v10356_v63, 4.0 }
 0x1ca   : > { %16777 = vst [vmem:[#allocation11_spill] sm:$0xff] %v10787_v43  ;;  %v10791_v19 = vadd.s32 %v8499_v15, %v1933_v2  ;;  %v8368_v0 = vsel %vm8365_vm14, %v8366_v12, %v8367_v52  ;;  %v8526_v27 = vceil.f32 %v1870_v11  ;;  %v8527_v22 = vfloor.f32 %v1870_v11  ;;  %vm10805_vm14 = vmand %vm10767_vm2, %vm1735_vm8 }
 0x1cb   : > { %vm1617_vm11 = vcmp.lt.f32.partialorder %v10511_v5, 4.0  ;;  %vm8525_vm9 = vcmp.lt.s32.totalorder %v1870_v11, 0  ;;  %v1862_v26 = vsel %vm10742_vm10, %v10662_v50, 0.0  ;;  %v517_v18 = vrot.slane %v16778_v34, 1  ;;  %vm10846_vm8 = vmand %vm1577_vm15, %vm1609_vm0 }
 0x1cc   : > { %v6767_v24 = vshra.s32 %v10787_v43, 16  ;;  %v8326_v20 = vceil.f32 %v1798_v39  ;;  %v8327_v2 = vfloor.f32 %v1798_v39  ;;  %v16779_v21 = vmov 0 }
 0x1cd   : > { %v16780_v21 = vsel %vm10805_vm14, 4294967295, %v16779_v21  ;;  %v1521_v12 = vmul.f32 %v9998_v37, %v1418_v42  ;;  %v1812_v50 = vsel %vm10780_vm6, %v10559_v16, 0.0  ;;  %v8369_v52 = vcvt.f32.s32 %v8368_v0  ;;  %v16784_v0 = vld [vmem:[#allocation10_spill] sm:$0xff] }
 0x1ce   : > { %vm8325_vm7 = vcmp.lt.s32.totalorder %v1798_v39, 0  ;;  %v1513_v11 = vmul.f32 %v9998_v37, %v1410_v40  ;;  %v10814_v15 = vcvt.s32.f32 %v6767_v24  ;;  %v8528_v34 = vsel %vm8525_vm9, %v8526_v27, %v8527_v22 }
 0x1cf   : > { %vm8485_vm4 = vcmp.lt.s32.totalorder %v1862_v26, 0  ;;  %v8486_v10 = vceil.f32 %v1862_v26  ;;  %v8487_v33 = vfloor.f32 %v1862_v26  ;;  %v1799_v42 = vsel %vm10805_vm14, %v16745_v38, 0.0 }
 0x1d0   : > { %16781 = vst [vmem:[#allocation23_spill] sm:$0xff] %v10814_v15  ;;  %v8396_v43 = vceil.f32 %v1812_v50  ;;  %v8397_v13 = vfloor.f32 %v1812_v50  ;;  %v581_v16 = vsel %vm10078_vm1, -500.0, %v517_v18  ;;  %6770 = vmax.xlane.f32.xlu0 %v10814_v15  ;;  %v8328_v39 = vsel %vm8325_vm7, %v8326_v20, %v8327_v2 }
 0x1d1   : > { %v10824_v40 = vadd.f32 2.0, %v1521_v12  ;;  %vm8395_vm2 = vcmp.lt.s32.totalorder %v1812_v50, 0  ;;  %v518_v27 = vrot.slane %v16784_v0, 1  ;;  %v8529_v22 = vcvt.f32.s32 %v8528_v34  ;;  %v10837_v34 = vpop.permute.xlu0 %1302 }
 0x1d2   : > { %v1863_v24 = vsel %vm10805_vm14, %v10713_v44, 0.0  ;;  %v10830_v32 = vadd.f32 2.0, %v1513_v11  ;;  %v528_v38 = vrot.slane %v10135_v45, 1  ;;  %v1939_v6 = vmul.u32 4, %v8369_v52  ;;  %v16785_v44 = vld [vmem:[#allocation16_spill] sm:$0xff] }
 0x1d3   : > { %v1876_v55 = vsel %vm10780_vm6, %v10693_v7, 0.0  ;;  %v1221_v18 = vperm.slane %v581_v16, 0  ;;  %v8329_v20 = vcvt.f32.s32 %v8328_v39  ;;  %v8488_v2 = vsel %vm8485_vm4, %v8486_v10, %v8487_v33  ;;  %v16804_v16 = vld [vmem:[#allocation28_spill] sm:$0xff] }
 0x1d4   : > { %v8331_v12 = vceil.f32 %v1799_v42  ;;  %v8398_v50 = vsel %vm8395_vm2, %v8396_v43, %v8397_v13  ;;  %v8332_v0 = vfloor.f32 %v1799_v42  ;;  %vm1681_vm7 = vcmp.ge.f32.partialorder %v10824_v40, 0.0 }
 0x1d5   : > { %vm16786_vm9 = vnez %v16785_v44  ;;  %vm1673_vm4 = vcmp.ge.f32.partialorder %v10830_v32, 0.0  ;;  %v8556_v10 = vceil.f32 %v1876_v55  ;;  %v8557_v13 = vfloor.f32 %v1876_v55 }
 0x1d6   : > { %v582_v45 = vsel %vm16786_vm9, -500.0, %v518_v27  ;;  %vm16789_vm2 = vnez %v16691_v58  ;;  %vm16790_vm1 = vcmp.ge.f32.partialorder %v10511_v5, 0.0  ;;  %v8491_v26 = vceil.f32 %v1863_v24 }
 0x1d7   : > { %v592_v43 = vsel %vm16789_vm2, -500.0, %v528_v38  ;;  %vm1649_vm9 = vmand %vm16790_vm1, %vm1617_vm11  ;;  %v8399_v52 = vcvt.f32.s32 %v8398_v50  ;;  %vm8555_vm14 = vcmp.lt.s32.totalorder %v1876_v55, 0  ;;  %v1413_v11 = vsub.f32 %v1221_v18, %v10784_v59  ;;  %v1293_v38 = vpop.permute.xlu1 %1292  ;;  %v16796_v50 = vld [vmem:[#allocation15_spill] sm:$0xff] }
 0x1d8   : > { %v8492_v33 = vfloor.f32 %v1863_v24  ;;  %vm10858_vm15 = vmand %vm1649_vm9, %vm1681_vm7  ;;  %vm1745_vm0 = vcmp.lt.f32.partialorder %v10824_v40, 4.0  ;;  %v1222_v39 = vperm.slane %v582_v45, 0  ;;  %v6669_v58 = vsel %vm10585_vm13, 1, %v16629_v3 }
 0x1d9   : > { %vm16793_vm2 = vcmp.lt.s32.totalorder %v1799_v42, 0  ;;  %vm10871_vm11 = vmand %vm10846_vm8, %vm1673_vm4  ;;  %vm1737_vm1 = vcmp.lt.f32.partialorder %v10830_v32, 4.0  ;;  %v1232_v18 = vperm.slane %v592_v43, 0  ;;  %v520_v44 = vrot.slane %v16796_v50, 1  ;;  %v10923_v59 = vpop.permute.xlu0 %1317 }
 0x1da   : > { %v8333_v27 = vsel %vm16793_vm2, %v8331_v12, %v8332_v0  ;;  %vm1580_vm7 = vcmp.ge.f32.partialorder %v10427_v47, 0.0  ;;  %vm1612_vm13 = vcmp.lt.f32.partialorder %v10427_v47, 4.0  ;;  %v1971_v49 = vadd.s32 %v8529_v22, %v1939_v6  ;;  %v1343_v0 = vpop.permute.xlu2 %1342  ;;  %vm10890_vm4 = vmand %vm10858_vm15, %vm1745_vm0  ;;  %16808 = vst [vmem:[#allocation16_spill] sm:$0xff] %v10923_v59 }
 0x1db   : > { %v1931_v42 = vmul.u32 4, %v8329_v20  ;;  %v8558_v12 = vsel %vm8555_vm14, %v8556_v10, %v8557_v13  ;;  %vm6635_vm8 = vcmp.eq.s32.totalorder %v10758_v41, 0  ;;  %v10884_v45 = vsel %vm10647_vm5, %v10791_v19, 4294967295  ;;  %vm10903_vm9 = vmand %vm10871_vm11, %vm1737_vm1 }
 0x1dc   : > { %16797 = vst [vmem:[#allocation12_spill] sm:$0xff] %v10884_v45  ;;  %v16798_v7 = vmov 0  ;;  %v1945_v6 = vmul.u32 4, %v8399_v52  ;;  %v1516_v22 = vmul.f32 %v9998_v37, %v1413_v11  ;;  %v6701_v55 = vadd.s32 %v6669_v58, %v10725_v9  ;;  %vm1644_vm11 = vmand %vm1580_vm7, %vm1612_vm13 }
 0x1dd   : > { %v16799_v7 = vsel %vm10890_vm4, 4294967295, %v16798_v7  ;;  %v8489_v20 = vcvt.f32.s32 %v8488_v2  ;;  %v8334_v10 = vcvt.f32.s32 %v8333_v27  ;;  %vm16801_vm14 = vcmp.lt.s32.totalorder %v1863_v24, 0  ;;  %v16805_v2 = vld [vmem:[#allocation24_spill] sm:$0xff] }
 0x1de   : > { %16800 = vst [vmem:[#allocation21_spill] sm:$0xff] %v16799_v7  ;;  %v10897_v13 = vsel %vm16801_vm14, %v8491_v26, %v8492_v33  ;;  %v16802_v19 = vmov 0  ;;  %v1414_v43 = vsub.f32 %v1222_v39, %v1293_v38  ;;  %v8559_v52 = vcvt.f32.s32 %v8558_v12 }
 0x1df   : > { %v16803_v19 = vsel %vm10903_vm9, 4294967295, %v16802_v19  ;;  %v1424_v11 = vsub.f32 %v1232_v18, %v1343_v0  ;;  %vm16806_vm2 = vnez %v16805_v2  ;;  %v6733_v26 = vsel %vm6635_vm8, %v6701_v55, 0 }
 0x1e0   : > { %v584_v24 = vsel %vm16806_vm2, -500.0, %v520_v44  ;;  %v10915_v33 = vsel %vm10647_vm5, %v1971_v49, 4294967295  ;;  %v1963_v58 = vadd.s32 %v8489_v20, %v1931_v42  ;;  %v1809_v39 = vsel %vm10890_vm4, %v10511_v5, 0.0  ;;  %v8689_v5 = vld [vmem:[%s9797_s10 + $0x18] sm:$0x3] }
 0x1e1   : > { %16807 = vst [vmem:[#allocation10_spill] sm:$0xff] %v10915_v33  ;;  %v1873_v27 = vsel %vm10890_vm4, %v10824_v40, 0.0  ;;  %v1801_v38 = vsel %vm10903_vm9, %v10356_v63, 0.0  ;;  %v1977_v18 = vadd.s32 %v8559_v52, %v1945_v6  ;;  %v10930_v50 = vadd.f32 2.0, %v1516_v22 }
 0x1e2   : > { %vm16809_vm8 = vcmask 64512   ;;  %v10936_v49 = vmul.u32 4, %v8334_v10  ;;  %v1517_v40 = vmul.f32 %v9998_v37, %v1414_v43  ;;  %v1224_v42 = vperm.slane %v584_v24, 0  ;;  %v11032_v53 = vpop.permute.xlu2 %1357 }
 0x1e3   : > { %v10933_v44 = vsel %vm16809_vm8, %v6733_v26, 2147483648  ;;  %vm8380_vm14 = vcmp.lt.s32.totalorder %v1809_v39, 0  ;;  %v8381_v12 = vceil.f32 %v1809_v39  ;;  %v8382_v0 = vfloor.f32 %v1809_v39 }
 0x1e4   : > { %16810 = vst [vmem:[#allocation15_spill] sm:$0xff] %v10933_v44  ;;  %v1527_v55 = vmul.f32 %v9998_v37, %v1424_v11  ;;  %v8541_v63 = vceil.f32 %v1873_v27  ;;  %v8542_v6 = vfloor.f32 %v1873_v27  ;;  %v8341_v22 = vceil.f32 %v1801_v38 }
 0x1e5   : > { %v6782_v20 = vshra.s32 %v10933_v44, 16  ;;  %v8342_v52 = vfloor.f32 %v1801_v38  ;;  %v10943_v2 = vsel %vm10647_vm5, %v1977_v18, 4294967295  ;;  %vm1676_vm2 = vcmp.ge.f32.partialorder %v10930_v50, 0.0 }
 0x1e6   : > { %16811 = vst [vmem:[#allocation28_spill] sm:$0xff] %v10943_v2  ;;  %v526_v10 = vrot.slane %v10083_v57, 1  ;;  %v10947_v43 = vadd.f32 2.0, %v1517_v40  ;;  %v1416_v11 = vsub.f32 %v1224_v42, %v10837_v34  ;;  %v8383_v26 = vsel %vm8380_vm14, %v8381_v12, %v8382_v0  ;;  %vm10962_vm0 = vmand %vm1644_vm11, %vm1676_vm2 }
 0x1e7   : > { %v10950_v24 = vcvt.s32.f32 %v6782_v20  ;;  %v10957_v18 = vadd.f32 2.0, %v1527_v55  ;;  %v521_v41 = vrot.slane %v8689_v5, 1  ;;  %vm16813_vm1 = vnez %v16678_v56  ;;  %v1308_v5 = vpop.permute.xlu1 %1307  ;;  %v1333_v55 = vpop.permute.xlu0 %1332 }
 0x1e8   : > { %v590_v57 = vsel %vm16813_vm1, -500.0, %v526_v10  ;;  %vm8540_vm15 = vcmp.lt.s32.totalorder %v1873_v27, 0  ;;  %vm1740_vm8 = vcmp.lt.f32.partialorder %v10930_v50, 4.0  ;;  %v6684_v34 = vsel %vm10780_vm6, 1, %v16629_v3 }
 0x1e9   : > { %16812 = vst [vmem:[#allocation24_spill] sm:$0xff] %v10950_v24  ;;  %6785 = vmax.xlane.f32.xlu0 %v10950_v24  ;;  %vm16816_vm1 = vcmp.lt.s32.totalorder %v1801_v38, 0  ;;  %v1865_v39 = vsel %vm10903_vm9, %v10830_v32, 0.0  ;;  %v1230_v42 = vperm.slane %v590_v57, 0  ;;  %v6716_v12 = vadd.s32 %v6684_v34, %v10725_v9 }
 0x1ea   : > { %v8343_v56 = vsel %vm16816_vm1, %v8341_v22, %v8342_v52  ;;  %vm16817_vm11 = vcmp.lt.f32.partialorder %v16804_v16, 4.0  ;;  %vm16818_vm2 = vcmp.ge.f32.partialorder %v16804_v16, 0.0  ;;  %v10989_v38 = vsel %vm10647_vm5, %v1963_v58, 4294967295  ;;  %vm10998_vm1 = vmand %vm10962_vm0, %vm1740_vm8  ;;  %v16824_v58 = vld [vmem:[#allocation18_spill] sm:$0xff] }
 0x1eb   : > { %vm10983_vm7 = vmand %vm16818_vm2, %vm16817_vm11  ;;  %16821 = vst [vmem:[#allocation37_spill] sm:$0xff] %v10989_v38  ;;  %v8384_v0 = vcvt.f32.s32 %v8383_v26  ;;  %vm1677_vm6 = vcmp.ge.f32.partialorder %v10947_v43, 0.0  ;;  %v1519_v32 = vmul.f32 %v9998_v37, %v1416_v11  ;;  %v8543_v22 = vsel %vm8540_vm15, %v8541_v63, %v8542_v6 }
 0x1ec   : > { %v16822_v20 = vmov 0  ;;  %vm1687_vm11 = vcmp.ge.f32.partialorder %v10957_v18, 0.0  ;;  %vm16825_vm2 = vnez %v16824_v58  ;;  %vm16826_vm13 = vcmp.eq.s32.totalorder %v10943_v2, 0  ;;  %vm11016_vm9 = vmand %vm10983_vm7, %vm1677_vm6 }
 0x1ed   : > { %v16823_v20 = vsel %vm10998_vm1, 4294967295, %v16822_v20  ;;  %v585_v52 = vsel %vm16825_vm2, -500.0, %v521_v41  ;;  %v6748_v10 = vsel %vm16826_vm13, %v6716_v12, 0  ;;  %vm16827_vm14 = vcmp.lt.f32.partialorder %v10603_v51, 4.0 }
 0x1ee   : > { %vm16828_vm15 = vcmp.ge.f32.partialorder %v10603_v51, 0.0  ;;  %v8344_v27 = vcvt.f32.s32 %v8343_v56  ;;  %v8501_v63 = vceil.f32 %v1865_v39  ;;  %v8502_v6 = vfloor.f32 %v1865_v39 }
 0x1ef   : > { %vm1655_vm4 = vmand %vm16828_vm15, %vm16827_vm14  ;;  %vm16829_vm0 = vcmask 64512   ;;  %vm8500_vm8 = vcmp.lt.s32.totalorder %v1865_v39, 0  ;;  %vm1741_vm13 = vcmp.lt.f32.partialorder %v10947_v43, 4.0  ;;  %v1422_v41 = vsub.f32 %v1230_v42, %v1333_v55  ;;  %v11072_v34 = vpop.permute.xlu1 %1322 }
 0x1f0   : > { %v11012_v11 = vsel %vm16829_vm0, %v6748_v10, 2147483648  ;;  %v1804_v40 = vsel %vm10998_vm1, %v10427_v47, 0.0  ;;  %vm11025_vm14 = vmand %vm1655_vm4, %vm1687_vm11  ;;  %vm1751_vm2 = vcmp.lt.f32.partialorder %v10957_v18, 4.0  ;;  %v11030_v56 = vadd.f32 2.0, %v1519_v32  ;;  %16842 = vst [vmem:[#allocation40_spill] sm:$0xff] %v11072_v34 }
 0x1f1   : > { %16830 = vst [vmem:[#allocation18_spill] sm:$0xff] %v11012_v11  ;;  %v7007_v57 = vshra.s32 %v11012_v11, 16  ;;  %v1225_v12 = vperm.slane %v585_v52, 0  ;;  %v16835_v42 = vcvt.f32.s32 %v10897_v13  ;;  %v8544_v58 = vcvt.f32.s32 %v8543_v22  ;;  %vm11047_vm6 = vmand %vm11016_vm9, %vm1741_vm13  ;;  %v16926_v11 = vld [vmem:[#allocation25_spill] sm:$0xff] }
 0x1f2   : > { %v1942_v10 = vmul.u32 4, %v8384_v0  ;;  %v1868_v47 = vsel %vm10998_vm1, %v10930_v50, 0.0  ;;  %v8503_v32 = vsel %vm8500_vm8, %v8501_v63, %v8502_v6  ;;  %v1934_v2 = vmul.u32 4, %v8344_v27  ;;  %vm11058_vm11 = vmand %vm11025_vm14, %vm1751_vm2 }
 0x1f3   : > { %v1964_v55 = vadd.s32 %v16835_v42, %v10936_v49  ;;  %v534_v49 = vrot.slane %v10296_v14, 1  ;;  %v11052_v0 = vcvt.s32.f32 %v7007_v57  ;;  %v8356_v50 = vceil.f32 %v1804_v40  ;;  %v16845_v42 = vld [vmem:[#allocation30_spill] sm:$0xff] }
 0x1f4   : > { %v8357_v22 = vfloor.f32 %v1804_v40  ;;  %v16839_v39 = vmov 0  ;;  %v531_v52 = vrot.slane %v10217_v54, 1  ;;  %v1525_v27 = vmul.f32 %v9998_v37, %v1422_v41 }
 0x1f5   : > { %16838 = vst [vmem:[#allocation38_spill] sm:$0xff] %v11052_v0  ;;  %v16840_v39 = vsel %vm11058_vm11, 4294967295, %v16839_v39  ;;  %v8516_v63 = vceil.f32 %v1868_v47  ;;  %v8517_v6 = vfloor.f32 %v1868_v47  ;;  %vm1679_vm9 = vcmp.ge.f32.partialorder %v11030_v56, 0.0  ;;  %7010 = vmax.xlane.f32.xlu1 %v11052_v0 }
 0x1f6   : > { %v1417_v14 = vsub.f32 %v1225_v12, %v1308_v5  ;;  %v11068_v26 = vsel %vm10647_vm5, %v1964_v55, 4294967295  ;;  %v11070_v57 = vadd.s32 %v8544_v58, %v1942_v10  ;;  %vm8355_vm15 = vcmp.lt.s32.totalorder %v1804_v40, 0 }
 0x1f7   : > { %16841 = vst [vmem:[#allocation39_spill] sm:$0xff] %v11068_v26  ;;  %vm8515_vm0 = vcmp.lt.s32.totalorder %v1868_v47, 0  ;;  %vm16843_vm8 = vcmp.lt.f32.partialorder %v10489_v17, 4.0  ;;  %vm16844_vm13 = vcmp.ge.f32.partialorder %v10489_v17, 0.0  ;;  %v8504_v54 = vcvt.f32.s32 %v8503_v32  ;;  %v1373_v47 = vpop.permute.xlu2 %1372 }
 0x1f8   : > { %vm1647_vm14 = vmand %vm16844_vm13, %vm16843_vm8  ;;  %v1805_v5 = vsel %vm11047_vm6, %v16804_v16, 0.0  ;;  %v1815_v41 = vsel %vm11058_vm11, %v10603_v51, 0.0  ;;  %v598_v12 = vsel %vm10471_vm12, -500.0, %v534_v49  ;;  %vm1743_vm8 = vcmp.lt.f32.partialorder %v11030_v56, 4.0  ;;  %v8690_v51 = vld [vmem:[%s9797_s10 + $0x24] sm:$0x3] }
 0x1f9   : > { %vm11090_vm7 = vmand %vm1647_vm14, %vm1679_vm9  ;;  %vm16848_vm13 = vnez %v16701_v25  ;;  %v11097_v58 = vadd.f32 2.0, %v1525_v27  ;;  %v527_v48 = vrot.slane %v8690_v51, 1  ;;  %v11100_v10 = vadd.s32 %v8504_v54, %v1934_v2 }
 0x1fa   : > { %v595_v16 = vsel %vm16848_vm13, -500.0, %v531_v52  ;;  %v8358_v32 = vsel %vm8355_vm15, %v8356_v50, %v8357_v22  ;;  %v11104_v49 = vsel %vm8515_vm0, %v8516_v63, %v8517_v6  ;;  %v1520_v24 = vmul.f32 %v9998_v37, %v1417_v14  ;;  %vm11114_vm9 = vmand %vm11090_vm7, %vm1743_vm8  ;;  %v16851_v22 = vld [vmem:[#allocation22_spill] sm:$0xff] }
 0x1fb   : > { %v8361_v44 = vceil.f32 %v1805_v5  ;;  %v8362_v15 = vfloor.f32 %v1805_v5  ;;  %v1869_v25 = vsel %vm11047_vm6, %v10947_v43, 0.0  ;;  %v1238_v52 = vperm.slane %v598_v12, 0 }
 0x1fc   : > { %vm8360_vm12 = vcmp.lt.s32.totalorder %v1805_v5, 0  ;;  %v8411_v27 = vceil.f32 %v1815_v41  ;;  %v8412_v34 = vfloor.f32 %v1815_v41  ;;  %v16849_v2 = vmov 0 }
 0x1fd   : > { %v16850_v2 = vsel %vm11114_vm9, 4294967295, %v16849_v2  ;;  %v1235_v40 = vperm.slane %v595_v16, 0  ;;  %v8359_v50 = vcvt.f32.s32 %v8358_v32  ;;  %vm8410_vm15 = vcmp.lt.s32.totalorder %v1815_v41, 0 }
 0x1fe   : > { %vm1685_vm0 = vcmp.ge.f32.partialorder %v11097_v58, 0.0  ;;  %vm16852_vm14 = vnez %v16851_v22  ;;  %v8521_v6 = vceil.f32 %v1869_v25  ;;  %v1879_v14 = vsel %vm11058_vm11, %v10957_v18, 0.0 }
 0x1ff   : > { %v591_v43 = vsel %vm16852_vm14, -500.0, %v527_v48  ;;  %v11125_v54 = vadd.f32 2.0, %v1520_v24  ;;  %vm16853_vm7 = vcmp.lt.f32.partialorder %v10581_v8, 4.0  ;;  %vm16854_vm8 = vcmp.ge.f32.partialorder %v10581_v8, 0.0 }
 0x200   : > { %vm1653_vm13 = vmand %vm16854_vm8, %vm16853_vm7  ;;  %v8363_v41 = vsel %vm8360_vm12, %v8361_v44, %v8362_v15  ;;  %v8522_v12 = vfloor.f32 %v1869_v25  ;;  %v1807_v55 = vsel %vm11114_vm9, %v10489_v17, 0.0  ;;  %v1430_v16 = vsub.f32 %v1238_v52, %v1373_v47  ;;  %v1338_v17 = vpop.permute.xlu1 %1337  ;;  %v11158_v47 = vpop.permute.xlu0 %1347 }
 0x201   : > { %v8413_v51 = vsel %vm8410_vm15, %v8411_v27, %v8412_v34  ;;  %v1427_v48 = vsub.f32 %v1235_v40, %v11032_v53  ;;  %vm11136_vm14 = vmand %vm1653_vm13, %vm1685_vm0  ;;  %vm1749_vm2 = vcmp.lt.f32.partialorder %v11097_v58, 4.0  ;;  %v1231_v24 = vperm.slane %v591_v43, 0 }
 0x202   : > { %vm8520_vm8 = vcmp.lt.s32.totalorder %v1869_v25, 0  ;;  %vm8570_vm4 = vcmp.lt.s32.totalorder %v1879_v14, 0  ;;  %v8571_v15 = vceil.f32 %v1879_v14  ;;  %v8572_v44 = vfloor.f32 %v1879_v14  ;;  %vm11154_vm15 = vmand %vm11136_vm14, %vm1749_vm2  ;;  %v8691_v25 = vld [vmem:[%s9797_s10 + $0x38] sm:$0x3]  ;;  %v8692_v14 = vld [vmem:[%s9797_s10 + $0x28] sm:$0x3] }
 0x203   : > { %v8371_v53 = vceil.f32 %v1807_v55  ;;  %v8372_v34 = vfloor.f32 %v1807_v55  ;;  %v1871_v5 = vsel %vm11114_vm9, %v11030_v56, 0.0  ;;  %vm1680_vm0 = vcmp.ge.f32.partialorder %v11125_v54, 0.0 }
 0x204   : > { %v8364_v32 = vcvt.f32.s32 %v8363_v41  ;;  %v8414_v52 = vcvt.f32.s32 %v8413_v51  ;;  %v1533_v27 = vmul.f32 %v9998_v37, %v1430_v16  ;;  %vm16859_vm3 = vcmp.lt.f32.partialorder %v16845_v42, 4.0 }
 0x205   : > { %vm16860_vm7 = vcmp.ge.f32.partialorder %v16845_v42, 0.0  ;;  %v1937_v56 = vmul.u32 4, %v8359_v50  ;;  %v8523_v22 = vsel %vm8520_vm8, %v8521_v6, %v8522_v12  ;;  %v1530_v43 = vmul.f32 %v9998_v37, %v1427_v48 }
 0x206   : > { %vm1648_vm12 = vmand %vm16860_vm7, %vm16859_vm3  ;;  %v1423_v41 = vsub.f32 %v1231_v24, %v1338_v17  ;;  %v8573_v16 = vsel %vm8570_vm4, %v8571_v15, %v8572_v44  ;;  %v8531_v51 = vceil.f32 %v1871_v5  ;;  %vm1744_vm3 = vcmp.lt.f32.partialorder %v11125_v54, 4.0 }
 0x207   : > { %vm11171_vm14 = vmand %vm1648_vm12, %vm1680_vm0  ;;  %v537_v50 = vrot.slane %v8691_v25, 1  ;;  %vm16863_vm7 = vcmp.lt.s32.totalorder %v1807_v55, 0  ;;  %v8532_v12 = vfloor.f32 %v1871_v5  ;;  %v1813_v48 = vsel %vm11154_vm15, %v10581_v8, 0.0 }
 0x208   : > { %v8373_v6 = vsel %vm16863_vm7, %v8371_v53, %v8372_v34  ;;  %v529_v24 = vrot.slane %v8692_v14, 1  ;;  %v1938_v15 = vmul.u32 4, %v8364_v32  ;;  %v1948_v44 = vmul.u32 4, %v8414_v52  ;;  %vm11186_vm12 = vmand %vm11171_vm14, %vm1744_vm3 }
 0x209   : > { %vm8530_vm4 = vcmp.lt.s32.totalorder %v1871_v5, 0  ;;  %v11182_v17 = vadd.f32 2.0, %v1533_v27  ;;  %v8524_v63 = vcvt.f32.s32 %v8523_v22  ;;  %v8574_v59 = vcvt.f32.s32 %v8573_v16 }
 0x20a   : > { %v16864_v25 = vmov 0  ;;  %v11190_v55 = vadd.f32 2.0, %v1530_v43  ;;  %v1526_v53 = vmul.f32 %v9998_v37, %v1423_v41  ;;  %v8374_v8 = vcvt.f32.s32 %v8373_v6  ;;  %v11223_v6 = vpop.permute.xlu0 %1362 }
 0x20b   : > { %v16865_v25 = vsel %vm11186_vm12, 4294967295, %v16864_v25  ;;  %v8401_v34 = vceil.f32 %v1813_v48  ;;  %v8402_v14 = vfloor.f32 %v1813_v48  ;;  %vm16866_vm8 = vnez %v16724_v35  ;;  %16875 = vst [vmem:[#allocation30_spill] sm:$0xff] %v11223_v6  ;;  %v8694_v35 = vld [vmem:[%s9797_s10 + $0x34] sm:$0x3]  ;;  %v8696_v6 = vld [vmem:[%s9797_s10 + $0x36] sm:$0x3] }
 0x20c   : > { %v601_v5 = vsel %vm16866_vm8, -500.0, %v537_v50  ;;  %v16867_v32 = vcvt.f32.s32 %v11104_v49  ;;  %v8533_v27 = vsel %vm8530_vm4, %v8531_v51, %v8532_v12  ;;  %vm8400_vm0 = vcmp.lt.s32.totalorder %v1813_v48, 0  ;;  %v1388_v51 = vpop.permute.xlu2 %1387 }
 0x20d   : > { %vm16868_vm14 = vnez %v16697_v29  ;;  %v1970_v16 = vadd.s32 %v8524_v63, %v1938_v15  ;;  %v1980_v18 = vadd.s32 %v8574_v59, %v1948_v44  ;;  %v1808_v43 = vsel %vm11186_vm12, %v16845_v42, 0.0  ;;  %v11217_v42 = vpop.permute.xlu1 %1352  ;;  %v16899_v15 = vld [vmem:[#allocation27_spill] sm:$0xff] }
 0x20e   : > { %v1969_v52 = vadd.s32 %v16867_v32, %v1937_v56  ;;  %v593_v22 = vsel %vm16868_vm14, -500.0, %v529_v24  ;;  %vm16869_vm7 = vcmp.lt.f32.partialorder %v10671_v60, 4.0  ;;  %vm16870_vm8 = vcmp.ge.f32.partialorder %v10671_v60, 0.0 }
 0x20f   : > { %vm11207_vm13 = vmand %vm16870_vm8, %vm16869_vm7  ;;  %v1877_v29 = vsel %vm11154_vm15, %v11097_v58, 0.0  ;;  %v11215_v59 = vadd.f32 2.0, %v1526_v53  ;;  %v1241_v49 = vperm.slane %v601_v5, 0  ;;  %vm16873_vm14 = vcmp.lt.f32.partialorder %v10673_v28, 4.0 }
 0x210   : > { %vm16874_vm2 = vcmp.ge.f32.partialorder %v10673_v28, 0.0  ;;  %v8534_v63 = vcvt.f32.s32 %v8533_v27  ;;  %v1940_v56 = vmul.u32 4, %v8374_v8  ;;  %v8403_v41 = vsel %vm8400_vm0, %v8401_v34, %v8402_v14  ;;  %v8693_v27 = vld [vmem:[%s9797_s10 + $0x30] sm:$0x3] }
 0x211   : > { %vm1661_vm3 = vmand %vm16874_vm2, %vm16873_vm14  ;;  %v1233_v50 = vperm.slane %v593_v22, 0  ;;  %v8376_v12 = vceil.f32 %v1808_v43  ;;  %v1872_v58 = vsel %vm11186_vm12, %v11125_v54, 0.0  ;;  %vm16876_vm8 = vcmp.ge.f32.partialorder %v11182_v17, 0.0 }
 0x212   : > { %vm11230_vm4 = vmand %vm1661_vm3, %vm16876_vm8  ;;  %vm1757_vm2 = vcmp.lt.f32.partialorder %v11182_v17, 4.0  ;;  %v8377_v24 = vfloor.f32 %v1808_v43  ;;  %vm16879_vm0 = vcmp.ge.f32.partialorder %v11190_v55, 0.0  ;;  %v8561_v54 = vceil.f32 %v1877_v29 }
 0x213   : > { %vm11239_vm14 = vmand %vm11207_vm13, %vm16879_vm0  ;;  %v8562_v44 = vfloor.f32 %v1877_v29  ;;  %vm16882_vm3 = vcmp.lt.f32.partialorder %v10437_v46, 4.0  ;;  %vm16883_vm8 = vcmp.ge.f32.partialorder %v10437_v46, 0.0  ;;  %v8404_v8 = vcvt.f32.s32 %v8403_v41 }
 0x214   : > { %vm11248_vm12 = vmand %vm16883_vm8, %vm16882_vm3  ;;  %vm8560_vm9 = vcmp.lt.s32.totalorder %v1877_v29, 0  ;;  %vm1686_vm13 = vcmp.ge.f32.partialorder %v11215_v59, 0.0  ;;  %v1433_v34 = vsub.f32 %v1241_v49, %v1388_v51  ;;  %v1972_v14 = vadd.s32 %v8534_v63, %v1940_v56 }
 0x215   : > { %vm11257_vm7 = vmand %vm11230_vm4, %vm1757_vm2  ;;  %v16886_v5 = vmov 0  ;;  %v1425_v32 = vsub.f32 %v1233_v50, %v11158_v47  ;;  %v533_v22 = vrot.slane %v8693_v27, 1  ;;  %v535_v41 = vrot.slane %v8694_v35, 1 }
 0x216   : > { %v16887_v5 = vsel %vm11257_vm7, 4294967295, %v16886_v5  ;;  %v11268_v49 = vsel %vm10647_vm5, %v1969_v52, 4294967295  ;;  %v11272_v63 = vsel %vm10647_vm5, %v1970_v16, 4294967295  ;;  %v8536_v56 = vceil.f32 %v1872_v58  ;;  %vm11290_vm1 = vmand %vm11248_vm12, %vm1686_vm13 }
 0x217   : > { %16888 = vst [vmem:[#allocation22_spill] sm:$0xff] %v11268_v49  ;;  %v8537_v51 = vfloor.f32 %v1872_v58  ;;  %vm16890_vm4 = vcmp.lt.f32.partialorder %v11190_v55, 4.0  ;;  %v16891_v47 = vmov 0  ;;  %vm1600_vm3 = vcmp.ge.f32.partialorder %v10760_v23, 0.0 }
 0x218   : > { %16889 = vst [vmem:[#allocation41_spill] sm:$0xff] %v11272_v63  ;;  %vm11278_vm2 = vmand %vm11239_vm14, %vm16890_vm4  ;;  %vm1632_vm8 = vcmp.lt.f32.partialorder %v10760_v23, 4.0  ;;  %vm16894_vm0 = vcmp.lt.s32.totalorder %v1808_v43, 0  ;;  %vm8535_vm11 = vcmp.lt.s32.totalorder %v1872_v58, 0  ;;  %v8563_v16 = vsel %vm8560_vm9, %v8561_v54, %v8562_v44 }
 0x219   : > { %v16892_v47 = vsel %vm11278_vm2, 4294967295, %v16891_v47  ;;  %v8378_v52 = vsel %vm16894_vm0, %v8376_v12, %v8377_v24  ;;  %vm1750_vm14 = vcmp.lt.f32.partialorder %v11215_v59, 4.0  ;;  %v11297_v48 = vsel %vm10647_vm5, %v1980_v18, 4294967295 }
 0x21a   : > { %16893 = vst [vmem:[#allocation42_spill] sm:$0xff] %v16892_v47  ;;  %v1821_v43 = vsel %vm11257_vm7, %v10673_v28, 0.0  ;;  %v1946_v29 = vmul.u32 4, %v8404_v8  ;;  %v1536_v12 = vmul.f32 %v9998_v37, %v1433_v34  ;;  %v11305_v58 = vsel %vm10647_vm5, %v1972_v14, 4294967295  ;;  %vm11325_vm4 = vmand %vm11290_vm1, %vm1750_vm14  ;;  %v1368_v34 = vpop.permute.xlu1 %1367 }
 0x21b   : > { %16897 = vst [vmem:[#allocation43_spill] sm:$0xff] %v11297_v48  ;;  %v1528_v24 = vmul.f32 %v9998_v37, %v1425_v32  ;;  %vm16900_vm9 = vnez %v16899_v15  ;;  %vm16901_vm12 = vnez %v16716_v4  ;;  %v8379_v28 = vcvt.f32.s32 %v8378_v52 }
 0x21c   : > { %16898 = vst [vmem:[#allocation44_spill] sm:$0xff] %v11305_v58  ;;  %v597_v54 = vsel %vm16900_vm9, -500.0, %v533_v22  ;;  %v599_v18 = vsel %vm16901_vm12, -500.0, %v535_v41  ;;  %v11314_v44 = vsel %vm8535_vm11, %v8536_v56, %v8537_v51  ;;  %v11319_v53 = vsel %vm11278_vm2, %v10671_v60, 0.0  ;;  %v1378_v22 = vpop.permute.xlu0 %1377 }
 0x21d   : > { %v8564_v8 = vcvt.f32.s32 %v8563_v16  ;;  %v16902_v4 = vmov 0  ;;  %v8441_v14 = vceil.f32 %v1821_v43  ;;  %v8442_v32 = vfloor.f32 %v1821_v43 }
 0x21e   : > { %v16903_v4 = vsel %vm11325_vm4, 4294967295, %v16902_v4  ;;  %v1237_v27 = vperm.slane %v597_v54, 0  ;;  %v1239_v35 = vperm.slane %v599_v18, 0  ;;  %vm8440_vm11 = vcmp.lt.s32.totalorder %v1821_v43, 0 }
 0x21f   : > { %v1885_v60 = vsel %vm11257_vm7, %v11182_v17, 0.0  ;;  %v1978_v41 = vadd.s32 %v8564_v8, %v1946_v29  ;;  %v11332_v56 = vadd.f32 2.0, %v1536_v12  ;;  %v8539_v51 = vcvt.f32.s32 %v11314_v44 }
 0x220   : > { %v1814_v52 = vsel %vm11325_vm4, %v10437_v46, 0.0  ;;  %v11338_v16 = vadd.f32 2.0, %v1528_v24  ;;  %v1429_v50 = vsub.f32 %v1237_v27, %v1368_v34  ;;  %v1941_v15 = vmul.u32 4, %v8379_v28 }
 0x221   : > { %v8426_v54 = vceil.f32 %v11319_v53  ;;  %v11344_v43 = vsel %vm11278_vm2, %v11190_v55, 0.0  ;;  %v1431_v17 = vsub.f32 %v1239_v35, %v1378_v22  ;;  %v8443_v29 = vsel %vm8440_vm11, %v8441_v14, %v8442_v32  ;;  %v8695_v32 = vld [vmem:[%s9797_s10 + $0x2a] sm:$0x3] }
 0x222   : > { %v8601_v12 = vceil.f32 %v1885_v60  ;;  %v8602_v18 = vfloor.f32 %v1885_v60  ;;  %vm16904_vm14 = vcmp.lt.f32.partialorder %v10550_v1, 4.0  ;;  %vm16905_vm9 = vcmp.ge.f32.partialorder %v10550_v1, 0.0 }
 0x223   : > { %vm11350_vm12 = vmand %vm16905_vm9, %vm16904_vm14  ;;  %v11356_v24 = vsel %vm10647_vm5, %v1978_v41, 4294967295  ;;  %v8406_v55 = vceil.f32 %v1814_v52  ;;  %v1878_v28 = vsel %vm11325_vm4, %v11215_v59, 0.0  ;;  %vm1696_vm11 = vcmp.ge.f32.partialorder %v11332_v56, 0.0 }
 0x224   : > { %16908 = vst [vmem:[#allocation27_spill] sm:$0xff] %v11356_v24  ;;  %vm16909_vm13 = vcmp.lt.f32.partialorder %v10633_v62, 4.0  ;;  %vm16910_vm0 = vcmp.ge.f32.partialorder %v10633_v62, 0.0  ;;  %v8407_v8 = vfloor.f32 %v1814_v52  ;;  %v1532_v34 = vmul.f32 %v9998_v37, %v1429_v50  ;;  %vm1664_vm9 = vmand %vm1600_vm3, %vm1632_vm8 }
 0x225   : > { %vm11366_vm1 = vmand %vm16910_vm0, %vm16909_vm13  ;;  %v6685_v14 = vsel %vm11154_vm15, 1, %v16629_v3  ;;  %v8444_v59 = vcvt.f32.s32 %v8443_v29  ;;  %vm8405_vm2 = vcmp.lt.s32.totalorder %v1814_v52, 0  ;;  %v530_v27 = vrot.slane %v8695_v32, 1 }
 0x226   : > { %v1534_v22 = vmul.f32 %v9998_v37, %v1431_v17  ;;  %v8427_v35 = vfloor.f32 %v11319_v53  ;;  %vm16913_vm13 = vcmp.lt.s32.totalorder %v1885_v60, 0  ;;  %vm11383_vm0 = vmand %vm1664_vm9, %vm1696_vm11  ;;  %vm6651_vm14 = vcmp.eq.s32.totalorder %v11356_v24, 0 }
 0x227   : > { %v8603_v41 = vsel %vm16913_vm13, %v8601_v12, %v8602_v18  ;;  %v8566_v40 = vceil.f32 %v1878_v28  ;;  %v8567_v29 = vfloor.f32 %v1878_v28  ;;  %vm16916_vm3 = vcmp.ge.f32.partialorder %v11338_v16, 0.0 }
 0x228   : > { %vm11393_vm8 = vmand %vm11366_vm1, %vm16916_vm3  ;;  %v6717_v60 = vadd.s32 %v6685_v14, %v10725_v9  ;;  %vm16919_vm11 = vcmp.lt.f32.partialorder %v10736_v30, 4.0  ;;  %vm16920_vm9 = vcmp.ge.f32.partialorder %v10736_v30, 0.0  ;;  %v8408_v18 = vsel %vm8405_vm2, %v8406_v55, %v8407_v8 }
 0x229   : > { %vm11403_vm15 = vmand %vm16920_vm9, %vm16919_vm11  ;;  %v1564_v32 = vadd.f32 2.0, %v1532_v34  ;;  %v1566_v44 = vadd.f32 2.0, %v1534_v22  ;;  %v536_v47 = vrot.slane %v8696_v6, 1  ;;  %v1954_v0 = vmul.u32 4, %v8444_v59  ;;  %v16934_v34 = vld [vmem:[#allocation31_spill] sm:$0xff] }
 0x22a   : > { %vm8565_vm1 = vcmp.lt.s32.totalorder %v1878_v28, 0  ;;  %vm16923_vm3 = vcmp.lt.f32.partialorder %v11332_v56, 4.0  ;;  %vm16927_vm11 = vnez %v16926_v11  ;;  %v6749_v52 = vsel %vm6651_vm14, %v6717_v60, 0 }
 0x22b   : > { %vm11413_vm13 = vmand %vm11383_vm0, %vm16923_vm3  ;;  %v594_v7 = vsel %vm16927_vm11, -500.0, %v530_v27  ;;  %v11421_v55 = vadd.s32 %v8539_v51, %v1941_v15  ;;  %vm8425_vm2 = vcmp.lt.s32.totalorder %v11319_v53, 0  ;;  %v8604_v6 = vcvt.f32.s32 %v8603_v41 }
 0x22c   : > { %vm16928_vm9 = vcmp.lt.f32.partialorder %v11338_v16, 4.0  ;;  %vm1692_vm0 = vcmp.ge.f32.partialorder %v1564_v32, 0.0  ;;  %v8409_v11 = vcvt.f32.s32 %v8408_v18  ;;  %vm1756_vm14 = vcmp.lt.f32.partialorder %v1564_v32, 4.0  ;;  %v1383_v18 = vpop.permute.xlu1 %1382 }
 0x22d   : > { %vm11428_vm4 = vmand %vm11393_vm8, %vm16928_vm9  ;;  %vm1694_vm11 = vcmp.ge.f32.partialorder %v1566_v44, 0.0  ;;  %vm1758_vm7 = vcmp.lt.f32.partialorder %v1566_v44, 4.0  ;;  %v11434_v51 = vsel %vm8565_vm1, %v8566_v40, %v8567_v29  ;;  %v1234_v53 = vperm.slane %v594_v7, 0  ;;  %v8697_v7 = vld [vmem:[%s9797_s10 + $0x3a] sm:$0x3] }
 0x22e   : > { %vm1724_vm3 = vmand %vm11350_vm12, %vm1692_vm0  ;;  %vm16933_vm8 = vcmask 64512   ;;  %vm16935_vm9 = vnez %v16934_v34  ;;  %v11445_v27 = vsel %vm8425_vm2, %v8426_v54, %v8427_v35  ;;  %v11447_v46 = vadd.s32 %v8604_v6, %v1954_v0  ;;  %v16938_v6 = vld [vmem:[#allocation36_spill] sm:$0xff] }
 0x22f   : > { %vm11436_vm5 = vmand %vm1724_vm3, %vm1756_vm14  ;;  %v11441_v8 = vsel %vm16933_vm8, %v6749_v52, 2147483648  ;;  %v600_v59 = vsel %vm16935_vm9, -500.0, %v536_v47  ;;  %v538_v41 = vrot.slane %v8697_v7, 1  ;;  %vm1599_vm1 = vcmp.ge.f32.partialorder %v10592_v36, 0.0 }
 0x230   : > { %v1820_v22 = vsel %vm11436_vm5, %v10550_v1, 0.0  ;;  %vm1726_vm12 = vmand %vm11403_vm15, %vm1694_vm11  ;;  %vm1631_vm0 = vcmp.lt.f32.partialorder %v10592_v36, 4.0  ;;  %v1816_v47 = vsel %vm11428_vm4, %v10633_v62, 0.0  ;;  %v1884_v50 = vsel %vm11436_vm5, %v1564_v32, 0.0 }
 0x231   : > { %vm8435_vm2 = vcmp.lt.s32.totalorder %v1820_v22, 0  ;;  %v8436_v0 = vceil.f32 %v1820_v22  ;;  %v8437_v54 = vfloor.f32 %v1820_v22  ;;  %vm11461_vm3 = vmand %vm1726_vm12, %vm1758_vm7  ;;  %v7022_v40 = vshra.s32 %v11441_v8, 16 }
 0x232   : > { %v1240_v29 = vperm.slane %v600_v59, 0  ;;  %v11469_v17 = vmul.u32 4, %v8409_v11  ;;  %v11474_v62 = vsel %vm11413_vm13, %v10760_v23, 0.0  ;;  %v11477_v60 = vsub.f32 %v1234_v53, %v11217_v42 }
 0x233   : > { %v8438_v12 = vsel %vm8435_vm2, %v8436_v0, %v8437_v54  ;;  %vm8415_vm7 = vcmp.lt.s32.totalorder %v1816_v47, 0  ;;  %v11482_v32 = vsel %vm11428_vm4, %v11338_v16, 0.0  ;;  %v1822_v52 = vsel %vm11461_vm3, %v10736_v30, 0.0  ;;  %v1393_v0 = vpop.permute.xlu0 %1392 }
 0x234   : > { %vm16939_vm15 = vnez %v16938_v6  ;;  %v8416_v23 = vceil.f32 %v1816_v47  ;;  %v8417_v34 = vfloor.f32 %v1816_v47  ;;  %v8596_v59 = vceil.f32 %v1884_v50 }
 0x235   : > { %v602_v11 = vsel %vm16939_vm15, -500.0, %v538_v41  ;;  %v8597_v42 = vfloor.f32 %v1884_v50  ;;  %v8439_v53 = vcvt.f32.s32 %v8438_v12  ;;  %vm8595_vm14 = vcmp.lt.s32.totalorder %v1884_v50, 0 }
 0x236   : > { %v11489_v22 = vcvt.s32.f32 %v7022_v40  ;;  %v1432_v7 = vsub.f32 %v1240_v29, %v1383_v18  ;;  %v8446_v54 = vceil.f32 %v1822_v52  ;;  %v8447_v16 = vfloor.f32 %v1822_v52 }
 0x237   : > { %v1886_v1 = vsel %vm11461_vm3, %v1566_v44, 0.0  ;;  %v1242_v24 = vperm.slane %v602_v11, 0  ;;  %vm8445_vm11 = vcmp.lt.s32.totalorder %v1822_v52, 0  ;;  %vm6643_vm8 = vcmp.eq.s32.totalorder %v11272_v63, 0 }
 0x238   : > { %7025 = vmax.xlane.f32.xlu1 %v11489_v22  ;;  %v1535_v30 = vmul.f32 %v9998_v37, %v1432_v7  ;;  %v6677_v41 = vsel %vm11047_vm6, 1, %v16629_v3  ;;  %v8418_v50 = vsel %vm8415_vm7, %v8416_v23, %v8417_v34  ;;  %vm8575_vm9 = vcmp.lt.s32.totalorder %v11482_v32, 0  ;;  %vm1663_vm6 = vmand %vm1599_vm1, %vm1631_vm0 }
 0x239   : > { %v8598_v40 = vsel %vm8595_vm14, %v8596_v59, %v8597_v42  ;;  %v1434_v29 = vsub.f32 %v1242_v24, %v1393_v0  ;;  %v6709_v44 = vadd.s32 %v6677_v41, %v10725_v9  ;;  %vm1633_vm2 = vcmp.lt.f32.partialorder %v10765_v61, 4.0 }
 0x23a   : > { %v1953_v12 = vmul.u32 4, %v8439_v53  ;;  %v8606_v18 = vceil.f32 %v1886_v1  ;;  %v8607_v6 = vfloor.f32 %v1886_v1  ;;  %v1567_v11 = vadd.f32 2.0, %v1535_v30 }
 0x23b   : > { %v8448_v7 = vsel %vm8445_vm11, %v8446_v54, %v8447_v16  ;;  %vm8605_vm15 = vcmp.lt.s32.totalorder %v1886_v1, 0  ;;  %v1537_v13 = vmul.f32 %v9998_v37, %v1434_v29  ;;  %v6741_v47 = vsel %vm6643_vm8, %v6709_v44, 0 }
 0x23c   : > { %v8599_v24 = vcvt.f32.s32 %v8598_v40  ;;  %vm1695_vm7 = vcmp.ge.f32.partialorder %v1567_v11, 0.0  ;;  %vm1759_vm14 = vcmp.lt.f32.partialorder %v1567_v11, 4.0  ;;  %vm16940_vm12 = vcmask 64512  }
 0x23d   : > { %v11513_v23 = vsel %vm16940_vm12, %v6741_v47, 2147483648  ;;  %v8576_v52 = vceil.f32 %v11482_v32  ;;  %v8577_v34 = vfloor.f32 %v11482_v32  ;;  %vm1727_vm11 = vmand %vm1663_vm6, %vm1695_vm7  ;;  %v6670_v53 = vsel %vm10742_vm10, 1, %v16629_v3 }
 0x23e   : > { %v6902_v59 = vshra.s32 %v11513_v23, 16  ;;  %v8419_v0 = vcvt.f32.s32 %v8418_v50  ;;  %v1985_v54 = vadd.s32 %v8599_v24, %v1953_v12  ;;  %v8449_v16 = vcvt.f32.s32 %v8448_v7  ;;  %vm11522_vm1 = vmand %vm1727_vm11, %vm1759_vm14 }
 0x23f   : > { %v8608_v30 = vsel %vm8605_vm15, %v8606_v18, %v8607_v6  ;;  %v1823_v40 = vsel %vm11522_vm1, %v10592_v36, 0.0  ;;  %v1887_v29 = vsel %vm11522_vm1, %v1567_v11, 0.0  ;;  %v1569_v44 = vadd.f32 2.0, %v1537_v13 }
 0x240   : > { %vm6636_vm0 = vcmp.eq.s32.totalorder %v10989_v38, 0  ;;  %vm8450_vm10 = vcmp.lt.s32.totalorder %v1823_v40, 0  ;;  %v8451_v50 = vceil.f32 %v1823_v40  ;;  %v8452_v12 = vfloor.f32 %v1823_v40 }
 0x241   : > { %v6702_v1 = vadd.s32 %v6670_v53, %v10725_v9  ;;  %vm8610_vm8 = vcmp.lt.s32.totalorder %v1887_v29, 0  ;;  %v8611_v18 = vceil.f32 %v1887_v29  ;;  %v8612_v6 = vfloor.f32 %v1887_v29 }
 0x242   : > { %v11533_v7 = vcvt.s32.f32 %v6902_v59  ;;  %vm16944_vm12 = vnez %v16743_v31  ;;  %v1955_v36 = vmul.u32 4, %v8449_v16  ;;  %v8453_v24 = vsel %vm8450_vm10, %v8451_v50, %v8452_v12  ;;  %v16946_v50 = vld [vmem:[#allocation33_spill] sm:$0xff] }
 0x243   : > { %v11537_v47 = vsel %vm16944_vm12, %v1985_v54, 4294967295  ;;  %v6734_v11 = vsel %vm6636_vm0, %v6702_v1, 0  ;;  %v11542_v13 = vsel %vm11413_vm13, %v11332_v56, 0.0  ;;  %v8454_v42 = vcvt.f32.s32 %v8453_v24 }
 0x244   : > { %16945 = vst [vmem:[#allocation25_spill] sm:$0xff] %v11537_v47  ;;  %vm1697_vm15 = vcmp.ge.f32.partialorder %v1569_v44, 0.0  ;;  %6905 = vmax.xlane.f32.xlu1 %v11533_v7  ;;  %v6692_v59 = vsel %vm11436_vm5, 1, %v16629_v3  ;;  %v8578_v53 = vsel %vm8575_vm9, %v8576_v52, %v8577_v34  ;;  %v1529_v54 = vmul.f32 %v9998_v37, %v11477_v60 }
 0x245   : > { %v8609_v16 = vcvt.f32.s32 %v8608_v30  ;;  %v8613_v40 = vsel %vm8610_vm8, %v8611_v18, %v8612_v6  ;;  %vm1593_vm6 = vcmp.ge.f32.partialorder %v16946_v50, 0.0  ;;  %vm1625_vm7 = vcmp.lt.f32.partialorder %v16946_v50, 4.0 }
 0x246   : > { %vm16947_vm14 = vcmp.ge.f32.partialorder %v10765_v61, 0.0  ;;  %v1949_v56 = vmul.u32 4, %v8419_v0  ;;  %v1956_v15 = vmul.u32 4, %v8454_v42  ;;  %vm16948_vm5 = vcmask 64512  }
 0x247   : > { %vm1665_vm11 = vmand %vm16947_vm14, %vm1633_vm2  ;;  %v11560_v32 = vsel %vm16948_vm5, %v6734_v11, 2147483648  ;;  %vm6658_vm9 = vcmp.eq.s32.totalorder %v11537_v47, 0  ;;  %v1987_v60 = vadd.s32 %v8609_v16, %v1955_v36  ;;  %vm1761_vm10 = vcmp.lt.f32.partialorder %v1569_v44, 4.0 }
 0x248   : > { %vm1729_vm0 = vmand %vm1665_vm11, %vm1697_vm15  ;;  %v6797_v52 = vshra.s32 %v11560_v32, 16  ;;  %v6724_v34 = vadd.s32 %v6692_v59, %v10725_v9  ;;  %v16949_v30 = vcvt.f32.s32 %v11434_v51  ;;  %v8456_v0 = vceil.f32 %v11474_v62 }
 0x249   : > { %v8457_v12 = vfloor.f32 %v11474_v62  ;;  %v8614_v1 = vcvt.f32.s32 %v8613_v40  ;;  %vm8455_vm2 = vcmp.lt.s32.totalorder %v11474_v62, 0  ;;  %v8579_v18 = vcvt.f32.s32 %v8578_v53  ;;  %vm11579_vm8 = vmand %vm1729_vm0, %vm1761_vm10 }
 0x24a   : > { %v1979_v29 = vadd.s32 %v16949_v30, %v11469_v17  ;;  %v11572_v6 = vadd.f32 2.0, %v1529_v54  ;;  %v6756_v36 = vsel %vm6658_vm9, %v6724_v34, 0  ;;  %v11577_v24 = vsel %vm16944_vm12, %v11421_v55, 4294967295  ;;  %vm16953_vm15 = vmmov %vm16948_vm5 }
 0x24b   : > { %16950 = vst [vmem:[#allocation31_spill] sm:$0xff] %v11577_v24  ;;  %v1988_v11 = vadd.s32 %v8614_v1, %v1956_v15  ;;  %v11583_v17 = vcvt.s32.f32 %v6797_v52  ;;  %v11586_v42 = vsel %vm16953_vm15, %v6756_v36, 2147483648  ;;  %v11591_v62 = vsel %vm16944_vm12, %v11447_v46, 4294967295 }
 0x24c   : > { %16954 = vst [vmem:[#allocation36_spill] sm:$0xff] %v11591_v62  ;;  %v1981_v59 = vadd.s32 %v8579_v18, %v1949_v56  ;;  %v11595_v55 = vsel %vm16944_vm12, %v1987_v60, 4294967295  ;;  %v7127_v53 = vshra.s32 %v11586_v42, 16  ;;  %v11600_v54 = vsel %vm16944_vm12, %v1979_v29, 4294967295 }
 0x24d   : > { %16955 = vst [vmem:[#allocation29_spill] sm:$0xff] %v11595_v55  ;;  %v11602_v16 = vsel %vm8455_vm2, %v8456_v0, %v8457_v12  ;;  %6800 = vmax.xlane.f32.xlu1 %v11583_v17  ;;  %vm1689_vm14 = vcmp.ge.f32.partialorder %v11572_v6, 0.0  ;;  %vm1753_vm11 = vcmp.lt.f32.partialorder %v11572_v6, 4.0  ;;  %v1825_v46 = vsel %vm11579_vm8, %v10765_v61, 0.0 }
 0x24e   : > { %16956 = vst [vmem:[#allocation33_spill] sm:$0xff] %v11600_v54  ;;  %v11612_v56 = vcvt.s32.f32 %v7127_v53  ;;  %v11616_v60 = vsel %vm16944_vm12, %v1988_v11, 4294967295  ;;  %v1889_v52 = vsel %vm11579_vm8, %v1569_v44, 0.0  ;;  %vm6660_vm5 = vcmp.eq.s32.totalorder %v11595_v55, 0 }
 0x24f   : > { %16957 = vst [vmem:[#allocation45_spill] sm:$0xff] %v11616_v60  ;;  %v6694_v34 = vsel %vm11461_vm3, 1, %v16629_v3  ;;  %v11626_v30 = vsel %vm16944_vm12, %v1981_v59, 4294967295  ;;  %vm6642_vm9 = vcmp.eq.s32.totalorder %v11268_v49, 0  ;;  %vm16959_vm0 = vnez %v16823_v20  ;;  %vm1657_vm3 = vmand %vm1593_vm6, %vm1625_vm7 }
 0x250   : > { %16958 = vst [vmem:[#allocation46_spill] sm:$0xff] %v11626_v30  ;;  %7130 = vmax.xlane.f32.xlu2 %v11612_v56  ;;  %v6726_v61 = vadd.s32 %v6694_v34, %v10725_v9  ;;  %v6676_v44 = vsel %vm16959_vm0, 1, %v16629_v3  ;;  %v8461_v29 = vceil.f32 %v1825_v46  ;;  %v6695_v35 = vsel %vm11522_vm1, 1, %v16629_v3  ;;  %vm1721_vm0 = vmand %vm1657_vm3, %vm1689_vm14 }
 0x251   : > { %v6708_v0 = vadd.s32 %v6676_v44, %v10725_v9  ;;  %v8462_v12 = vfloor.f32 %v1825_v46  ;;  %vm8620_vm2 = vcmp.lt.s32.totalorder %v1889_v52, 0  ;;  %vm6661_vm15 = vcmp.eq.s32.totalorder %v11616_v60, 0  ;;  %vm11661_vm14 = vmand %vm1721_vm0, %vm1753_vm11 }
 0x252   : > { %v6758_v1 = vsel %vm6660_vm5, %v6726_v61, 0  ;;  %vm16960_vm10 = vcmask 64512   ;;  %v6727_v41 = vadd.s32 %v6695_v35, %v10725_v9  ;;  %vm16961_vm1 = vnez %v16840_v39 }
 0x253   : > { %v11646_v20 = vsel %vm16960_vm10, %v6758_v1, 2147483648  ;;  %v6740_v18 = vsel %vm6642_vm9, %v6708_v0, 0  ;;  %v6687_v36 = vsel %vm16961_vm1, 1, %v16629_v3  ;;  %v8621_v11 = vceil.f32 %v1889_v52  ;;  %vm16962_vm6 = vmmov %vm16960_vm10 }
 0x254   : > { %v7157_v59 = vshra.s32 %v11646_v20, 16  ;;  %v11654_v53 = vsel %vm16962_vm6, %v6740_v18, 2147483648  ;;  %vm6653_vm7 = vcmp.eq.s32.totalorder %v11297_v48, 0  ;;  %v8622_v34 = vfloor.f32 %v1889_v52  ;;  %vm16966_vm9 = vmmov %vm16962_vm6 }
 0x255   : > { %v6887_v61 = vshra.s32 %v11654_v53, 16  ;;  %v6759_v44 = vsel %vm6661_vm15, %v6727_v41, 0  ;;  %v6719_v0 = vadd.s32 %v6687_v36, %v10725_v9  ;;  %vm16965_vm5 = vcmp.lt.s32.totalorder %v1825_v46, 0  ;;  %vm16968_vm3 = vmmov %vm16962_vm6 }
 0x256   : > { %v8463_v39 = vsel %vm16965_vm5, %v8461_v29, %v8462_v12  ;;  %v11666_v1 = vcvt.s32.f32 %v7157_v59  ;;  %v11669_v18 = vsel %vm16966_vm9, %v6759_v44, 2147483648  ;;  %vm16967_vm10 = vnez %v16887_v5  ;;  %vm16970_vm6 = vmmov %vm16968_vm3 }
 0x257   : > { %v6693_v40 = vsel %vm16967_vm10, 1, %v16629_v3  ;;  %v11674_v41 = vcvt.s32.f32 %v6887_v61  ;;  %v7172_v36 = vshra.s32 %v11669_v18, 16  ;;  %v6751_v15 = vsel %vm6653_vm7, %v6719_v0, 0  ;;  %vm16971_vm7 = vmmov %vm16968_vm3 }
 0x258   : > { %vm6659_vm11 = vcmp.eq.s32.totalorder %v11591_v62, 0  ;;  %7160 = vmax.xlane.f32.xlu0 %v11666_v1  ;;  %v11680_v46 = vsel %vm16968_vm3, %v6751_v15, 2147483648  ;;  %v6725_v29 = vadd.s32 %v6693_v40, %v10725_v9  ;;  %vm6654_vm15 = vcmp.eq.s32.totalorder %v11626_v30, 0 }
 0x259   : > { %v6688_v5 = vsel %vm11428_vm4, 1, %v16629_v3  ;;  %v11690_v12 = vsel %vm11661_vm14, %v16946_v50, 0.0  ;;  %v8464_v59 = vcvt.f32.s32 %v8463_v39  ;;  %6890 = vmax.xlane.f32.xlu2 %v11674_v41  ;;  %v11693_v61 = vcvt.s32.f32 %v7172_v36 }
 0x25a   : > { %v6720_v15 = vadd.s32 %v6688_v5, %v10725_v9  ;;  %v7052_v40 = vshra.s32 %v11680_v46, 16  ;;  %v6757_v44 = vsel %vm6659_vm11, %v6725_v29, 0  ;;  %vm6645_vm0 = vcmp.eq.s32.totalorder %v11305_v58, 0 }
 0x25b   : > { %vm16969_vm4 = vnez %v16850_v2  ;;  %vm8615_vm1 = vcmp.lt.s32.totalorder %v11542_v13, 0  ;;  %v8623_v50 = vsel %vm8620_vm2, %v8621_v11, %v8622_v34  ;;  %7175 = vmax.xlane.f32.xlu1 %v11693_v61  ;;  %v11705_v0 = vsel %vm16970_vm6, %v6757_v44, 2147483648  ;;  %vm16974_vm2 = vmmov %vm16968_vm3 }
 0x25c   : > { %v6679_v28 = vsel %vm16969_vm4, 1, %v16629_v3  ;;  %v6752_v39 = vsel %vm6654_vm15, %v6720_v15, 0  ;;  %v7142_v29 = vshra.s32 %v11705_v0, 16  ;;  %vm6652_vm5 = vcmp.eq.s32.totalorder %v11600_v54, 0  ;;  %vm16977_vm15 = vmmov %vm16974_vm2 }
 0x25d   : > { %v6711_v36 = vadd.s32 %v6679_v28, %v10725_v9  ;;  %v11710_v5 = vsel %vm16971_vm7, %v6752_v39, 2147483648  ;;  %vm16973_vm9 = vnez %v16903_v4  ;;  %v1958_v52 = vmul.u32 4, %v8464_v59 }
 0x25e   : > { %16972 = vst [vmem:[#allocation47_spill] sm:$0xff] %v11710_v5  ;;  %v6686_v2 = vsel %vm16973_vm9, 1, %v16629_v3  ;;  %v7067_v11 = vshra.s32 %v11710_v5, 16  ;;  %v8459_v15 = vcvt.f32.s32 %v11602_v16  ;;  %v11719_v28 = vcvt.s32.f32 %v7052_v40 }
 0x25f   : > { %v6743_v34 = vsel %vm6645_vm0, %v6711_v36, 0  ;;  %v6718_v44 = vadd.s32 %v6686_v2, %v10725_v9  ;;  %vm16976_vm10 = vnez %v16865_v25  ;;  %v8624_v55 = vcvt.f32.s32 %v8623_v50  ;;  %v16978_v25 = vld [vmem:[#allocation17_spill] sm:$0xff] }
 0x260   : > { %v11722_v60 = vsel %vm16974_vm2, %v6743_v34, 2147483648  ;;  %v6680_v39 = vsel %vm16976_vm10, 1, %v16629_v3  ;;  %v11727_v4 = vcvt.s32.f32 %v7142_v29  ;;  %vm6646_vm11 = vcmp.eq.s32.totalorder %v11577_v24, 0  ;;  %7055 = vmax.xlane.f32.xlu0 %v11719_v28 }
 0x261   : > { %16975 = vst [vmem:[#allocation48_spill] sm:$0xff] %v11722_v60  ;;  %v6750_v59 = vsel %vm6652_vm5, %v6718_v44, 0  ;;  %vm8585_vm3 = vcmp.lt.s32.totalorder %v11344_v43, 0  ;;  %v8421_v36 = vceil.f32 %v11690_v12  ;;  %v6712_v40 = vadd.s32 %v6680_v39, %v10725_v9  ;;  %v16981_v39 = vld [vmem:[#allocation19_spill] sm:$0xff]  ;;  %vm16983_vm5 = vmmov %vm16974_vm2 }
 0x262   : > { %v11734_v16 = vsel %vm16977_vm15, %v6750_v59, 2147483648  ;;  %vm16979_vm0 = vnez %v16978_v25  ;;  %v1990_v29 = vadd.s32 %v8624_v55, %v1958_v52  ;;  %7145 = vmax.xlane.f32.xlu2 %v11727_v4  ;;  %v11741_v2 = vcvt.s32.f32 %v7067_v11 }
 0x263   : > { %v6672_v50 = vsel %vm16979_vm0, 1, %v16629_v3  ;;  %v6932_v34 = vshra.s32 %v11722_v60, 16  ;;  %vm6638_vm4 = vcmp.eq.s32.totalorder %v10884_v45, 0  ;;  %v6744_v44 = vsel %vm6646_vm11, %v6712_v40, 0 }
 0x264   : > { %16980 = vst [vmem:[#allocation17_spill] sm:$0xff] %v11741_v2  ;;  %v6704_v62 = vadd.s32 %v6672_v50, %v10725_v9  ;;  %vm6644_vm6 = vcmp.eq.s32.totalorder %v10915_v33, 0  ;;  %vm16982_vm7 = vnez %v16981_v39  ;;  %v8422_v25 = vfloor.f32 %v11690_v12  ;;  %7070 = vmax.xlane.f32.xlu1 %v11741_v2 }
 0x265   : > { %v6678_v59 = vsel %vm16982_vm7, 1, %v16629_v3  ;;  %v7037_v55 = vshra.s32 %v11734_v16, 16  ;;  %v11754_v52 = vsel %vm16983_vm5, %v6744_v44, 2147483648  ;;  %v8586_v40 = vceil.f32 %v11344_v43 }
 0x266   : > { %16984 = vst [vmem:[#allocation19_spill] sm:$0xff] %v11754_v52  ;;  %v6710_v11 = vadd.s32 %v6678_v59, %v10725_v9  ;;  %v8587_v50 = vfloor.f32 %v11344_v43  ;;  %vm8420_vm9 = vcmp.lt.s32.totalorder %v11690_v12, 0  ;;  %v6736_v47 = vsel %vm6638_vm4, %v6704_v62, 0 }
 0x267   : > { %v8429_v39 = vcvt.f32.s32 %v11445_v27  ;;  %v1881_v30 = vsel %vm11661_vm14, %v11572_v6, 0.0  ;;  %v6947_v54 = vshra.s32 %v11754_v52, 16  ;;  %v16985_v44 = vfloor.f32 %v11542_v13  ;;  %v17034_v52 = vld [vmem:[#allocation14_spill] sm:$0xff] }
 0x268   : > { %v6742_v48 = vsel %vm6644_vm6, %v6710_v11, 0  ;;  %v16986_v59 = vceil.f32 %v11542_v13  ;;  %v1957_v58 = vmul.u32 4, %v8459_v15  ;;  %v11773_v62 = vsel %vm16944_vm12, %v1990_v29, 4294967295 }
 0x269   : > { %16987 = vst [vmem:[#allocation49_spill] sm:$0xff] %v11773_v62  ;;  %v11775_v27 = vcvt.s32.f32 %v6932_v34  ;;  %v8423_v12 = vsel %vm8420_vm9, %v8421_v36, %v8422_v25  ;;  %v11777_v33 = vcvt.s32.f32 %v7037_v55  ;;  %v11780_v6 = vsel %vm16974_vm2, %v6736_v47, 2147483648 }
 0x26a   : > { %v8618_v24 = vsel %vm8615_vm1, %v16986_v59, %v16985_v44  ;;  %16989 = vst [vmem:[#allocation51_spill] sm:$0xff] %v11780_v6  ;;  %v6697_v11 = vsel %vm11579_vm8, 1, %v16629_v3  ;;  %v8581_v63 = vceil.f32 %v1881_v30  ;;  %v8582_v13 = vfloor.f32 %v1881_v30  ;;  %vm16990_vm1 = vmmov %vm16974_vm2 }
 0x26b   : > { %16988 = vst [vmem:[#allocation50_spill] sm:$0xff] %v11775_v27  ;;  %6935 = vmax.xlane.f32.xlu0 %v11775_v27  ;;  %v11787_v15 = vsel %vm16990_vm1, %v6742_v48, 2147483648  ;;  %vm16991_vm10 = vnez %v16780_v21  ;;  %v8619_v29 = vcvt.f32.s32 %v8618_v24  ;;  %vm8580_vm11 = vcmp.lt.s32.totalorder %v1881_v30, 0  ;;  %7040 = vmax.xlane.f32.xlu2 %v11777_v33  ;;  %vm16998_vm0 = vmmov %vm16990_vm1 }
 0x26c   : > { %v6671_v36 = vsel %vm16991_vm10, 1, %v16629_v3  ;;  %v11793_v47 = vcvt.s32.f32 %v6947_v54  ;;  %vm6663_vm15 = vcmp.eq.s32.totalorder %v11773_v62, 0  ;;  %v8424_v51 = vcvt.f32.s32 %v8423_v12  ;;  %vm17000_vm4 = vmmov %vm16998_vm0 }
 0x26d   : > { %v6827_v34 = vshra.s32 %v11780_v6, 16  ;;  %v6729_v25 = vadd.s32 %v6697_v11, %v10725_v9  ;;  %vm6637_vm8 = vcmp.eq.s32.totalorder %v11068_v26, 0  ;;  %v8588_v48 = vsel %vm8585_vm3, %v8586_v40, %v8587_v50  ;;  %vm17011_vm1 = vmmov %vm16998_vm0 }
 0x26e   : > { %16992 = vst [vmem:[#allocation52_spill] sm:$0xff] %v11793_v47  ;;  %v1989_v21 = vadd.s32 %v8619_v29, %v1957_v58  ;;  %6950 = vmax.xlane.f32.xlu1 %v11793_v47  ;;  %v6917_v24 = vshra.s32 %v11787_v15, 16  ;;  %v6703_v54 = vadd.s32 %v6671_v36, %v10725_v9  ;;  %v8583_v30 = vsel %vm8580_vm11, %v8581_v63, %v8582_v13  ;;  %v11814_v58 = vpop.permute.xlu1 %1397  ;;  %v17001_v29 = vld [vmem:[#allocation21_spill] sm:$0xff]  ;;  %vm17015_vm11 = vmmov %vm16998_vm0 }
 0x26f   : > { %v6761_v55 = vsel %vm6663_vm15, %v6729_v25, 0  ;;  %v11807_v44 = vsel %vm16944_vm12, %v11070_v57, 4294967295  ;;  %v11812_v59 = vsel %vm16944_vm12, %v11100_v10, 4294967295  ;;  %v1951_v43 = vmul.u32 4, %v8429_v39  ;;  %v17003_v25 = vld [vmem:[#allocation18_spill] sm:$0xff] }
 0x270   : > { %16993 = vst [vmem:[#allocation53_spill] sm:$0xff] %v11807_v44  ;;  %v6735_v40 = vsel %vm6637_vm8, %v6703_v54, 0  ;;  %v8589_v50 = vcvt.f32.s32 %v8588_v48  ;;  %v1950_v12 = vmul.u32 4, %v8424_v51  ;;  %v11816_v11 = vcvt.s32.f32 %v6827_v34 }
 0x271   : > { %16994 = vst [vmem:[#allocation54_spill] sm:$0xff] %v11812_v59  ;;  %vm16996_vm3 = vnez %v16803_v19  ;;  %v11823_v57 = vsel %vm16944_vm12, %v1989_v21, 4294967295  ;;  %v8584_v13 = vcvt.f32.s32 %v8583_v30  ;;  %v11825_v36 = vcvt.s32.f32 %v6917_v24 }
 0x272   : > { %16995 = vst [vmem:[#allocation55_spill] sm:$0xff] %v11816_v11  ;;  %v6673_v63 = vsel %vm16996_vm3, 1, %v16629_v3  ;;  %v11828_v10 = vsel %vm16998_vm0, %v6761_v55, 2147483648  ;;  %v11832_v39 = vsel %vm17000_vm4, %v6735_v40, 2147483648  ;;  %vm6639_vm6 = vcmp.eq.s32.totalorder %v11812_v59, 0 }
 0x273   : > { %16997 = vst [vmem:[#allocation56_spill] sm:$0xff] %v11823_v57  ;;  %6830 = vmax.xlane.f32.xlu0 %v11816_v11  ;;  %v6696_v19 = vsel %vm11413_vm13, 1, %v16629_v3  ;;  %vm17002_vm7 = vnez %v17001_v29  ;;  %v1983_v34 = vadd.s32 %v8589_v50, %v1951_v43  ;;  %v7006_v48 = vand.u32 65535, %v17003_v25  ;;  %6920 = vmax.xlane.f32.xlu2 %v11825_v36  ;;  %vm17008_vm13 = vmmov %vm16998_vm0  ;;  %v17033_v11 = vld [vmem:[#allocation5_spill] sm:$0xff] }
 0x274   : > { %16999 = vst [vmem:[#allocation57_spill] sm:$0xff] %v11828_v10  ;;  %v6681_v51 = vsel %vm17002_vm7, 1, %v16629_v3  ;;  %v6705_v21 = vadd.s32 %v6673_v63, %v10725_v9  ;;  %vm6647_vm5 = vcmp.eq.s32.totalorder %v11807_v44, 0  ;;  %v1982_v24 = vadd.s32 %v8584_v13, %v1950_v12  ;;  %v11941_v44 = vld [vmem:[%s9797_s10 + $0x1e] sm:$0x3] }
 0x275   : > { %v7202_v54 = vshra.s32 %v11828_v10, 16  ;;  %vm6662_vm9 = vcmp.eq.s32.totalorder %v11823_v57, 0  ;;  %v6713_v14 = vadd.s32 %v6681_v51, %v10725_v9  ;;  %v6812_v30 = vshra.s32 %v11832_v39, 16 }
 0x276   : > { %v6737_v55 = vsel %vm6639_vm6, %v6705_v21, 0  ;;  %v6728_v43 = vadd.s32 %v6696_v19, %v10725_v9  ;;  %v11852_v50 = vsel %vm16944_vm12, %v1983_v34, 4294967295  ;;  %v11854_v29 = vpop.xlane.xlu1 %7010  ;;  %v7008_v12 = vcvt.s32.f32 %v7006_v48  ;;  %v17010_v19 = vld [vmem:[#allocation38_spill] sm:$0xff] }
 0x277   : > { %v6745_v40 = vsel %vm6647_vm5, %v6713_v14, 0  ;;  %17004 = vst [vmem:[#allocation21_spill] sm:$0xff] %v11852_v50  ;;  %v11858_v13 = vsel %vm16944_vm12, %v1982_v24, 4294967295  ;;  %v11860_v25 = vcvt.s32.f32 %v7202_v54  ;;  %v11863_v51 = vsel %vm17008_vm13, %v6737_v55, 2147483648  ;;  %v17013_v48 = vld [vmem:[#allocation42_spill] sm:$0xff] }
 0x278   : > { %v6760_v63 = vsel %vm6662_vm9, %v6728_v43, 0  ;;  %17005 = vst [vmem:[#allocation18_spill] sm:$0xff] %v11854_v29  ;;  %vm7012_vm2 = vcmp.eq.f32.partialorder %v17010_v19, %v11854_v29  ;;  %v11867_v21 = vcvt.s32.f32 %v6812_v30  ;;  %v11870_v14 = vsel %vm17011_vm1, %v6745_v40, 2147483648  ;;  %v11891_v19 = vld [vmem:[%s9797_s10 + $0xc] sm:$0x3] }
 0x279   : > { %17006 = vst [vmem:[#allocation58_spill] sm:$0xff] %v11858_v13  ;;  %v7013_v34 = vsel %vm7012_vm2, %v7008_v12, -inf  ;;  %vm17014_vm10 = vnez %v17013_v48  ;;  %v11877_v54 = vsel %vm17015_vm11, %v6760_v63, 2147483648  ;;  %v6689_v30 = vsel %vm11661_vm14, 1, %v16629_v3  ;;  %v251_v48 = vld [vmem:[%s9797_s10 + $0x3c] sm:$0x3]  ;;  %vm17020_vm14 = vmmov %vm16998_vm0 }
 0x27a   : > { %17007 = vst [vmem:[#allocation59_spill] sm:$0xff] %v11860_v25  ;;  %v6690_v24 = vsel %vm17014_vm10, 1, %v16629_v3  ;;  %7014 = vmax.xlane.f32.xlu1 %v7013_v34  ;;  %vm6656_vm15 = vcmp.eq.s32.totalorder %v11852_v50, 0  ;;  %v6842_v55 = vshra.s32 %v11863_v51, 16  ;;  %vm6655_vm8 = vcmp.eq.s32.totalorder %v11858_v13, 0 }
 0x27b   : > { %17009 = vst [vmem:[#allocation60_spill] sm:$0xff] %v11863_v51  ;;  %7205 = vmax.xlane.f32.xlu0 %v11860_v25  ;;  %6815 = vmax.xlane.f32.xlu2 %v11867_v21  ;;  %v6962_v43 = vshra.s32 %v11870_v14, 16  ;;  %v6722_v40 = vadd.s32 %v6690_v24, %v10725_v9  ;;  %v7187_v63 = vshra.s32 %v11877_v54, 16  ;;  %v6721_v12 = vadd.s32 %v6689_v30, %v10725_v9  ;;  %v11906_v24 = vld [vmem:[%s9797_s10 + $0xe] sm:$0x3] }
 0x27c   : > { %17012 = vst [vmem:[#allocation38_spill] sm:$0xff] %v11870_v14  ;;  %v11894_v62 = vcvt.s32.f32 %v6842_v55  ;;  %vm291_vm3 = vcmp.ne.f32.partialorder %v11891_v19, %v11891_v19  ;;  %vm315_vm4 = vcmp.ne.f32.partialorder %v251_v48, %v251_v48  ;;  %vm292_vm6 = vcmp.ne.f32.partialorder %v11906_v24, %v11906_v24  ;;  %v11938_v50 = vld [vmem:[%s9797_s10 + $0x3e] sm:$0x3] }
 0x27d   : > { %17016 = vst [vmem:[#allocation42_spill] sm:$0xff] %v11877_v54  ;;  %v6754_v35 = vsel %vm6656_vm15, %v6722_v40, 0  ;;  %v6753_v34 = vsel %vm6655_vm8, %v6721_v12, 0  ;;  %v11896_v57 = vcvt.s32.f32 %v6962_v43  ;;  %v11898_v51 = vcvt.s32.f32 %v7187_v63  ;;  %v235_v63 = vld [vmem:[%s9797_s10 + $0x1c] sm:$0x3] }
 0x27e   : > { %17017 = vst [vmem:[#allocation61_spill] sm:$0xff] %v11894_v62  ;;  %v11901_v14 = vsel %vm17020_vm14, %v6754_v35, 2147483648  ;;  %v11910_v30 = vsel %vm16998_vm0, %v6753_v34, 2147483648  ;;  %v323_v43 = vsel %vm291_vm3, 1, %v16629_v3  ;;  %v347_v12 = vsel %vm315_vm4, 1, %v16629_v3 }
 0x27f   : > { %17018 = vst [vmem:[#allocation62_spill] sm:$0xff] %v11896_v57  ;;  %v7097_v55 = vshra.s32 %v11901_v14, 16  ;;  %v7082_v40 = vshra.s32 %v11910_v30, 16  ;;  %v355_v35 = vrot.slane %v323_v43, 1  ;;  %v324_v34 = vsel %vm292_vm6, 1, %v16629_v3 }
 0x280   : > { %17019 = vst [vmem:[#allocation63_spill] sm:$0xff] %v11898_v51  ;;  %vm299_vm7 = vcmp.ne.f32.partialorder %v235_v63, %v235_v63  ;;  %v356_v13 = vrot.slane %v324_v34, 1  ;;  %vm316_vm1 = vcmp.ne.f32.partialorder %v11938_v50, %v11938_v50  ;;  %vm300_vm11 = vcmp.ne.f32.partialorder %v11941_v44, %v11941_v44 }
 0x281   : > { %17021 = vst [vmem:[#allocation64_spill] sm:$0xff] %v11901_v14  ;;  %v11929_v14 = vcvt.s32.f32 %v7097_v55  ;;  %vm387_vm5 = vcmp.ne.s32.totalorder %v355_v35, 0  ;;  %v331_v43 = vsel %vm299_vm7, 1, %v16629_v3  ;;  %v332_v49 = vsel %vm300_vm11, 1, %v16629_v3 }
 0x282   : > { %17022 = vst [vmem:[#allocation65_spill] sm:$0xff] %v11910_v30  ;;  %6965 = vmax.xlane.f32.xlu1 %v11896_v57  ;;  %v379_v57 = vrot.slane %v347_v12, 1  ;;  %vm11946_vm13 = vmor %vm291_vm3, %vm387_vm5  ;;  %vm388_vm2 = vcmp.ne.s32.totalorder %v356_v13, 0  ;;  %v11951_v12 = vld [vmem:[%s9797_s10 + $0x2e] sm:$0x3]  ;;  %v515_v59 = vrot.slane %v11891_v19, 1 }
 0x283   : > { %6845 = vmax.xlane.f32.xlu0 %v11894_v62  ;;  %7190 = vmax.xlane.f32.xlu2 %v11898_v51  ;;  %17023 = vst [vmem:[#allocation66_spill] sm:$0xff] %v11929_v14  ;;  %v11931_v62 = vcvt.s32.f32 %v7082_v40  ;;  %v363_v40 = vrot.slane %v331_v43, 1  ;;  %v451_v34 = vsel %vm11946_vm13, -500.0, %v11891_v19  ;;  %vm11968_vm15 = vmor %vm292_vm6, %vm388_vm2  ;;  %vm308_vm8 = vcmp.ne.f32.partialorder %v11951_v12, %v11951_v12  ;;  %v17043_v13 = vld [vmem:[#allocation8_spill] sm:$0xff] }
 0x284   : > { %vm411_vm9 = vcmp.ne.s32.totalorder %v379_v57, 0  ;;  %v539_v57 = vrot.slane %v251_v48, 1  ;;  %v348_v43 = vsel %vm316_vm1, 1, %v16629_v3  ;;  %v995_v29 = vperm.slane %v451_v34, 0 }
 0x285   : > { %17024 = vst [vmem:[#allocation67_spill] sm:$0xff] %v11931_v62  ;;  %vm11956_vm10 = vmor %vm315_vm4, %vm411_vm9  ;;  %vm395_vm14 = vcmp.ne.s32.totalorder %v363_v40, 0  ;;  %v452_v26 = vsel %vm11968_vm15, -500.0, %v11906_v24  ;;  %v380_v40 = vrot.slane %v348_v43, 1  ;;  %v523_v25 = vrot.slane %v235_v63, 1 }
 0x286   : > { %v603_v45 = vsel %vm11956_vm10, -500.0, %v539_v57  ;;  %vm11995_vm3 = vmor %vm299_vm7, %vm395_vm14  ;;  %v364_v35 = vrot.slane %v332_v49, 1  ;;  %v996_v34 = vperm.slane %v452_v26, 0  ;;  %v579_v47 = vsel %vm11946_vm13, -500.0, %v515_v59  ;;  %v17035_v49 = vld [vmem:[#allocation7_spill] sm:$0xff] }
 0x287   : > { %v1243_v57 = vperm.slane %v603_v45, 0  ;;  %v1187_v30 = vsub.f32 %v995_v29, %v17033_v11  ;;  %v459_v43 = vsel %vm11995_vm3, -500.0, %v235_v63  ;;  %vm412_vm0 = vcmp.ne.s32.totalorder %v380_v40, 0  ;;  %v17046_v11 = vld [vmem:[#allocation34_spill] sm:$0xff] }
 0x288   : > { %vm396_vm4 = vcmp.ne.s32.totalorder %v364_v35, 0  ;;  %v1219_v45 = vperm.slane %v579_v47, 0  ;;  %vm12015_vm7 = vmor %vm316_vm1, %vm412_vm0  ;;  %v7126_v54 = vand.u32 65535, %v11586_v42 }
 0x289   : > { %v1435_v26 = vsub.f32 %v1243_v57, %v11814_v58  ;;  %v1450_v38 = vmul.f32 %v9998_v37, %v1187_v30  ;;  %vm12023_vm5 = vmor %vm300_vm11, %vm396_vm4  ;;  %v17042_v30 = vld [vmem:[#allocation20_spill] sm:$0xff] }
 0x28a   : > { %7100 = vmax.xlane.f32.xlu1 %v11929_v14  ;;  %v475_v14 = vsel %vm11956_vm10, -500.0, %v251_v48  ;;  %v340_v48 = vsel %vm308_vm8, 1, %v16629_v3  ;;  %v1411_v63 = vsub.f32 %v1219_v45, %v17042_v30  ;;  %v460_v57 = vsel %vm12023_vm5, -500.0, %v11941_v44 }
 0x28b   : > { %7085 = vmax.xlane.f32.xlu2 %v11931_v62  ;;  %v1019_v19 = vperm.slane %v475_v14, 0  ;;  %v372_v10 = vrot.slane %v340_v48, 1  ;;  %v516_v62 = vrot.slane %v11906_v24, 1  ;;  %v587_v14 = vsel %vm11995_vm3, -500.0, %v523_v25 }
 0x28c   : > { %v1188_v24 = vsub.f32 %v996_v34, %v17035_v49  ;;  %v1003_v48 = vperm.slane %v459_v43, 0  ;;  %v476_v25 = vsel %vm12015_vm7, -500.0, %v11938_v50  ;;  %v1538_v55 = vmul.f32 %v9998_v37, %v1435_v26  ;;  %v17044_v34 = vld [vmem:[#allocation16_spill] sm:$0xff] }
 0x28d   : > { %v1211_v6 = vsub.f32 %v1019_v19, %v17034_v52  ;;  %vm404_vm6 = vcmp.ne.s32.totalorder %v372_v10, 0  ;;  %v580_v59 = vsel %vm11968_vm15, -500.0, %v516_v62  ;;  %v1227_v52 = vperm.slane %v587_v14, 0  ;;  %v17045_v49 = vld [vmem:[#allocation32_spill] sm:$0xff] }
 0x28e   : > { %v540_v62 = vrot.slane %v11938_v50, 1  ;;  %vm12032_vm9 = vmor %vm308_vm8, %vm404_vm6  ;;  %v1220_v29 = vperm.slane %v580_v59, 0  ;;  %v1195_v40 = vsub.f32 %v1003_v48, %v17043_v13  ;;  %v532_v19 = vrot.slane %v11951_v12, 1 }
 0x28f   : > { %v1474_v58 = vmul.f32 %v9998_v37, %v1211_v6  ;;  %v1451_v6 = vmul.f32 %v9998_v37, %v1188_v24  ;;  %v12044_v35 = vadd.f32 2.0, %v1450_v38  ;;  %v1419_v43 = vsub.f32 %v1227_v52, %v17044_v34 }
 0x290   : > { %v468_v50 = vsel %vm12032_vm9, -500.0, %v11951_v12  ;;  %v1020_v45 = vperm.slane %v476_v25, 0  ;;  %v604_v26 = vsel %vm12015_vm7, -500.0, %v540_v62  ;;  %v1412_v24 = vsub.f32 %v1220_v29, %v17045_v49  ;;  %v1403_v29 = vpop.permute.xlu2 %1402 }
 0x291   : > { %v1506_v14 = vadd.f32 2.0, %v1474_v58  ;;  %v1514_v48 = vmul.f32 %v9998_v37, %v1411_v63  ;;  %v12057_v59 = vadd.f32 2.0, %v1538_v55  ;;  %v12059_v38 = vadd.f32 2.0, %v1451_v6 }
 0x292   : > { %v1458_v30 = vmul.f32 %v9998_v37, %v1195_v40  ;;  %v596_v52 = vsel %vm12032_vm9, -500.0, %v532_v19  ;;  %v1004_v58 = vperm.slane %v460_v57, 0  ;;  %v1012_v13 = vperm.slane %v468_v50, 0  ;;  %v17047_v40 = vld [vmem:[#allocation13_spill] sm:$0xff]  ;;  %v17048_v50 = vld [vmem:[#allocation6_spill] sm:$0xff] }
 0x293   : > { %v1522_v12 = vmul.f32 %v9998_v37, %v1419_v43  ;;  %v1244_v25 = vperm.slane %v604_v26, 0  ;;  %vm1578_vm13 = vcmp.ge.f32.partialorder %v12044_v35, 0.0  ;;  %vm1602_vm2 = vcmp.ge.f32.partialorder %v1506_v14, 0.0 }
 0x294   : > { %vm1634_vm1 = vcmp.lt.f32.partialorder %v1506_v14, 4.0  ;;  %v1212_v62 = vsub.f32 %v1020_v45, %v17046_v11  ;;  %v1515_v63 = vmul.f32 %v9998_v37, %v1412_v24  ;;  %v1546_v55 = vadd.f32 2.0, %v1514_v48  ;;  %v17049_v24 = vld [vmem:[#allocation30_spill] sm:$0xff] }
 0x295   : > { %v1236_v6 = vperm.slane %v596_v52, 0  ;;  %vm1698_vm10 = vcmp.ge.f32.partialorder %v12057_v59, 0.0  ;;  %vm1610_vm11 = vcmp.lt.f32.partialorder %v12044_v35, 4.0  ;;  %vm1579_vm15 = vcmp.ge.f32.partialorder %v12059_v38, 0.0  ;;  %vm1666_vm14 = vmand %vm1602_vm2, %vm1634_vm1 }
 0x296   : > { %vm1611_vm8 = vcmp.lt.f32.partialorder %v12059_v38, 4.0  ;;  %v1490_v10 = vadd.f32 2.0, %v1458_v30  ;;  %v1204_v19 = vsub.f32 %v1012_v13, %v17047_v40  ;;  %v1554_v57 = vadd.f32 2.0, %v1522_v12  ;;  %vm1730_vm3 = vmand %vm1666_vm14, %vm1698_vm10 }
 0x297   : > { %v524_v34 = vrot.slane %v11941_v44, 1  ;;  %v1436_v43 = vsub.f32 %v1244_v25, %v1403_v29  ;;  %v1196_v45 = vsub.f32 %v1004_v58, %v17048_v50  ;;  %vm1762_vm0 = vcmp.lt.f32.partialorder %v12057_v59, 4.0  ;;  %vm1642_vm4 = vmand %vm1578_vm13, %vm1610_vm11 }
 0x298   : > { %v12078_v26 = vadd.f32 2.0, %v1515_v63  ;;  %v1475_v49 = vmul.f32 %v9998_v37, %v1212_v62  ;;  %vm1674_vm6 = vcmp.ge.f32.partialorder %v1546_v55, 0.0  ;;  %v1428_v48 = vsub.f32 %v1236_v6, %v17049_v24  ;;  %vm12086_vm7 = vmand %vm1579_vm15, %vm1611_vm8 }
 0x299   : > { %vm1586_vm9 = vcmp.ge.f32.partialorder %v1490_v10, 0.0  ;;  %vm1618_vm2 = vcmp.lt.f32.partialorder %v1490_v10, 4.0  ;;  %v1467_v30 = vmul.f32 %v9998_v37, %v1204_v19  ;;  %vm1682_vm13 = vcmp.ge.f32.partialorder %v1554_v57, 0.0  ;;  %vm12094_vm1 = vmand %vm1730_vm3, %vm1762_vm0 }
 0x29a   : > { %v588_v52 = vsel %vm12023_vm5, -500.0, %v524_v34  ;;  %v1539_v58 = vmul.f32 %v9998_v37, %v1436_v43  ;;  %v1459_v12 = vmul.f32 %v9998_v37, %v1196_v45  ;;  %vm1706_vm10 = vmand %vm1642_vm4, %vm1674_vm6  ;;  %vm1738_vm11 = vcmp.lt.f32.partialorder %v1546_v55, 4.0  ;;  %v17058_v45 = vld [vmem:[#allocation40_spill] sm:$0xff] }
 0x29b   : > { %vm1650_vm15 = vmand %vm1586_vm9, %vm1618_vm2  ;;  %vm1675_vm8 = vcmp.ge.f32.partialorder %v12078_v26, 0.0  ;;  %v12100_v25 = vadd.f32 2.0, %v1475_v49  ;;  %v1531_v11 = vmul.f32 %v9998_v37, %v1428_v48  ;;  %vm1746_vm12 = vcmp.lt.f32.partialorder %v1554_v57, 4.0 }
 0x29c   : > { %vm1714_vm14 = vmand %vm1650_vm15, %vm1682_vm13  ;;  %v1228_v47 = vperm.slane %v588_v52, 0  ;;  %v1826_v62 = vsel %vm12094_vm1, %v1506_v14, 0.0  ;;  %v12105_v29 = vadd.f32 2.0, %v1467_v30  ;;  %v12111_v6 = vadd.f32 2.0, %v1539_v58 }
 0x29d   : > { %vm12107_vm5 = vmand %vm1706_vm10, %vm1738_vm11  ;;  %v12113_v40 = vadd.f32 2.0, %v1459_v12  ;;  %vm1739_vm0 = vcmp.lt.f32.partialorder %v12078_v26, 4.0  ;;  %vm1603_vm4 = vcmp.ge.f32.partialorder %v12100_v25, 0.0  ;;  %v12123_v14 = vadd.f32 2.0, %v1531_v11 }
 0x29e   : > { %vm1707_vm3 = vmand %vm12086_vm7, %vm1675_vm8  ;;  %v8466_v34 = vceil.f32 %v1826_v62  ;;  %v8467_v43 = vfloor.f32 %v1826_v62  ;;  %vm1635_vm9 = vcmp.lt.f32.partialorder %v12100_v25, 4.0  ;;  %v1802_v50 = vsel %vm12107_vm5, %v12044_v35, 0.0 }
 0x29f   : > { %vm12119_vm6 = vmand %vm1714_vm14, %vm1746_vm12  ;;  %v1420_v49 = vsub.f32 %v1228_v47, %v17058_v45  ;;  %vm8465_vm7 = vcmp.lt.s32.totalorder %v1826_v62, 0  ;;  %vm1595_vm2 = vcmp.ge.f32.partialorder %v12105_v29, 0.0  ;;  %vm1699_vm12 = vcmp.ge.f32.partialorder %v12111_v6, 0.0 }
 0x2a0   : > { %vm1627_vm13 = vcmp.lt.f32.partialorder %v12105_v29, 4.0  ;;  %vm12133_vm10 = vmand %vm1707_vm3, %vm1739_vm0  ;;  %v1866_v48 = vsel %vm12107_vm5, %v1546_v55, 0.0  ;;  %v1810_v44 = vsel %vm12119_vm6, %v1490_v10, 0.0  ;;  %v1890_v35 = vsel %vm12094_vm1, %v12057_v59, 0.0 }
 0x2a1   : > { %vm1667_vm15 = vmand %vm1603_vm4, %vm1635_vm9  ;;  %vm8345_vm8 = vcmp.lt.s32.totalorder %v1802_v50, 0  ;;  %v8346_v30 = vceil.f32 %v1802_v50  ;;  %vm1691_vm14 = vcmp.ge.f32.partialorder %v12123_v14, 0.0  ;;  %v8468_v52 = vsel %vm8465_vm7, %v8466_v34, %v8467_v43 }
 0x2a2   : > { %v8347_v58 = vfloor.f32 %v1802_v50  ;;  %v1874_v55 = vsel %vm12119_vm6, %v1554_v57, 0.0  ;;  %v1523_v10 = vmul.f32 %v9998_v37, %v1420_v49  ;;  %vm12153_vm3 = vmand %vm1667_vm15, %vm1699_vm12  ;;  %vm1763_vm0 = vcmp.lt.f32.partialorder %v12111_v6, 4.0 }
 0x2a3   : > { %vm1659_vm4 = vmand %vm1595_vm2, %vm1627_vm13  ;;  %v8386_v12 = vceil.f32 %v1810_v44  ;;  %v8387_v11 = vfloor.f32 %v1810_v44  ;;  %v8626_v47 = vceil.f32 %v1890_v35  ;;  %v8627_v62 = vfloor.f32 %v1890_v35 }
 0x2a4   : > { %vm8385_vm9 = vcmp.lt.s32.totalorder %v1810_v44, 0  ;;  %vm12162_vm7 = vmand %vm1659_vm4, %vm1691_vm14  ;;  %vm1755_vm12 = vcmp.lt.f32.partialorder %v12123_v14, 4.0  ;;  %v8469_v57 = vcvt.f32.s32 %v8468_v52  ;;  %vm8625_vm15 = vcmp.lt.s32.totalorder %v1890_v35, 0 }
 0x2a5   : > { %vm1619_vm11 = vcmp.lt.f32.partialorder %v12113_v40, 4.0  ;;  %v1803_v34 = vsel %vm12133_vm10, %v12059_v38, 0.0  ;;  %v8506_v43 = vceil.f32 %v1866_v48  ;;  %v8507_v45 = vfloor.f32 %v1866_v48  ;;  %vm12175_vm2 = vmand %vm12153_vm3, %vm1763_vm0 }
 0x2a6   : > { %v12182_v44 = vsel %vm12133_vm10, %v12078_v26, 0.0  ;;  %v8348_v35 = vsel %vm8345_vm8, %v8346_v30, %v8347_v58  ;;  %vm8505_vm13 = vcmp.lt.s32.totalorder %v1866_v48, 0  ;;  %v12185_v52 = vadd.f32 2.0, %v1523_v10  ;;  %vm12191_vm14 = vmand %vm12162_vm7, %vm1755_vm12 }
 0x2a7   : > { %v8388_v38 = vsel %vm8385_vm9, %v8386_v12, %v8387_v11  ;;  %v8546_v2 = vceil.f32 %v1874_v55  ;;  %v8547_v51 = vfloor.f32 %v1874_v55  ;;  %v8628_v27 = vsel %vm8625_vm15, %v8626_v47, %v8627_v62 }
 0x2a8   : > { %vm8350_vm3 = vcmp.lt.s32.totalorder %v1803_v34, 0  ;;  %vm8545_vm0 = vcmp.lt.s32.totalorder %v1874_v55, 0  ;;  %v1827_v26 = vsel %vm12175_vm2, %v12100_v25, 0.0  ;;  %v1959_v50 = vmul.u32 4, %v8469_v57 }
 0x2a9   : > { %v8351_v48 = vceil.f32 %v1803_v34  ;;  %v8352_v30 = vfloor.f32 %v1803_v34  ;;  %v8349_v58 = vcvt.f32.s32 %v8348_v35  ;;  %v8508_v10 = vsel %vm8505_vm13, %v8506_v43, %v8507_v45 }
 0x2aa   : > { %v8389_v12 = vcvt.f32.s32 %v8388_v38  ;;  %vm1683_vm8 = vcmp.ge.f32.partialorder %v12185_v52, 0.0  ;;  %v1819_v11 = vsel %vm12191_vm14, %v12105_v29, 0.0  ;;  %v8629_v37 = vcvt.f32.s32 %v8628_v27 }
 0x2ab   : > { %v8548_v47 = vsel %vm8545_vm0, %v8546_v2, %v8547_v51  ;;  %v8471_v62 = vceil.f32 %v1827_v26  ;;  %v8472_v55 = vfloor.f32 %v1827_v26  ;;  %vm17069_vm4 = vcmp.ge.f32.partialorder %v12113_v40, 0.0 }
 0x2ac   : > { %vm1651_vm9 = vmand %vm17069_vm4, %vm1619_vm11  ;;  %vm8470_vm7 = vcmp.lt.s32.totalorder %v1827_v26, 0  ;;  %v1891_v57 = vsel %vm12175_vm2, %v12111_v6, 0.0  ;;  %v1991_v43 = vadd.s32 %v8629_v37, %v1959_v50  ;;  %v1935_v29 = vmul.u32 4, %v8349_v58  ;;  %v17074_v37 = vld [vmem:[#allocation11_spill] sm:$0xff] }
 0x2ad   : > { %vm1715_vm12 = vmand %vm1651_vm9, %vm1683_vm8  ;;  %vm1747_vm15 = vcmp.lt.f32.partialorder %v12185_v52, 4.0  ;;  %v8431_v2 = vceil.f32 %v1819_v11  ;;  %v8432_v27 = vfloor.f32 %v1819_v11  ;;  %v8509_v42 = vcvt.f32.s32 %v8508_v10 }
 0x2ae   : > { %v8549_v51 = vcvt.f32.s32 %v8548_v47  ;;  %v1943_v45 = vmul.u32 4, %v8389_v12  ;;  %vm8430_vm13 = vcmp.lt.s32.totalorder %v1819_v11, 0  ;;  %v8473_v35 = vsel %vm8470_vm7, %v8471_v62, %v8472_v55  ;;  %vm12214_vm11 = vmand %vm1715_vm12, %vm1747_vm15 }
 0x2af   : > { %v8631_v38 = vceil.f32 %v1891_v57  ;;  %v8632_v5 = vfloor.f32 %v1891_v57  ;;  %v7128_v26 = vcvt.s32.f32 %v7126_v54  ;;  %vm8630_vm0 = vcmp.lt.s32.totalorder %v1891_v57, 0 }
 0x2b0   : > { %v1883_v6 = vsel %vm12191_vm14, %v12123_v14, 0.0  ;;  %vm17072_vm8 = vnez %v16743_v31  ;;  %v1967_v58 = vadd.s32 %v8509_v42, %v1935_v29  ;;  %v8433_v10 = vsel %vm8430_vm13, %v8431_v2, %v8432_v27  ;;  %v17075_v42 = vld [vmem:[#allocation23_spill] sm:$0xff] }
 0x2b1   : > { %v12223_v50 = vsel %vm17072_vm8, %v1991_v43, 4294967295  ;;  %v6698_v54 = vsel %vm12094_vm1, 1, %v16629_v3  ;;  %v8353_v11 = vsel %vm8350_vm3, %v8351_v48, %v8352_v30  ;;  %v6766_v47 = vand.u32 65535, %v17074_v37  ;;  %v12236_v43 = vpop.xlane.xlu0 %6770 }
 0x2b2   : > { %17073 = vst [vmem:[#allocation5_spill] sm:$0xff] %v12223_v50  ;;  %v1975_v62 = vadd.s32 %v8549_v51, %v1943_v45  ;;  %v8474_v14 = vcvt.f32.s32 %v8473_v35  ;;  %vm8510_vm9 = vcmp.lt.s32.totalorder %v12182_v44, 0  ;;  %v8633_v55 = vsel %vm8630_vm0, %v8631_v38, %v8632_v5 }
 0x2b3   : > { %v8591_v57 = vceil.f32 %v1883_v6  ;;  %vm6664_vm7 = vcmp.eq.s32.totalorder %v12223_v50, 0  ;;  %v8434_v13 = vcvt.f32.s32 %v8433_v10  ;;  %v8592_v34 = vfloor.f32 %v1883_v6 }
 0x2b4   : > { %v6886_v48 = vand.u32 65535, %v11654_v53  ;;  %v6730_v30 = vadd.s32 %v6698_v54, %v10725_v9  ;;  %v8354_v29 = vcvt.f32.s32 %v8353_v11  ;;  %v8512_v2 = vfloor.f32 %v12182_v44 }
 0x2b5   : > { %v12244_v27 = vsel %vm17072_vm8, %v1967_v58, 4294967295  ;;  %vm8590_vm1 = vcmp.lt.s32.totalorder %v1883_v6, 0  ;;  %v12248_v5 = vsel %vm17072_vm8, %v1975_v62, 4294967295  ;;  %vm6772_vm3 = vcmp.eq.f32.partialorder %v17075_v42, %v12236_v43 }
 0x2b6   : > { %v6762_v51 = vsel %vm6664_vm7, %v6730_v30, 0  ;;  %v12255_v53 = vsel %vm12214_vm11, %v12185_v52, 0.0  ;;  %v8634_v45 = vcvt.f32.s32 %v8633_v55  ;;  %v6768_v35 = vcvt.s32.f32 %v6766_v47  ;;  %v12274_v55 = vpop.xlane.xlu1 %7025 }
 0x2b7   : > { %v8593_v38 = vsel %vm8590_vm1, %v8591_v57, %v8592_v34  ;;  %v6888_v58 = vcvt.s32.f32 %v6886_v48  ;;  %v6682_v10 = vsel %vm12119_vm6, 1, %v16629_v3  ;;  %vm17076_vm13 = vcmask 64512  }
 0x2b8   : > { %v12265_v54 = vsel %vm17076_vm13, %v6762_v51, 2147483648  ;;  %v6674_v52 = vsel %vm12107_vm5, 1, %v16629_v3  ;;  %v7021_v19 = vand.u32 65535, %v11441_v8  ;;  %vm6648_vm6 = vcmp.eq.s32.totalorder %v12248_v5, 0 }
 0x2b9   : > { %17077 = vst [vmem:[#allocation14_spill] sm:$0xff] %v12265_v54  ;;  %vm6640_vm0 = vcmp.eq.s32.totalorder %v12244_v27, 0  ;;  %v7217_v63 = vshra.s32 %v12265_v54, 16  ;;  %v6714_v57 = vadd.s32 %v6682_v10, %v10725_v9  ;;  %v17078_v48 = vceil.f32 %v12182_v44  ;;  %v17134_v54 = vld [vmem:[#allocation54_spill] sm:$0xff] }
 0x2ba   : > { %v1936_v30 = vmul.u32 4, %v8354_v29  ;;  %vm7027_vm5 = vcmp.eq.f32.partialorder %v11489_v22, %v12274_v55  ;;  %vm8550_vm1 = vcmp.lt.s32.totalorder %v12255_v53, 0  ;;  %v7156_v31 = vand.u32 65535, %v11646_v20 }
 0x2bb   : > { %v8513_v8 = vsel %vm8510_vm9, %v17078_v48, %v8512_v2  ;;  %v7023_v2 = vcvt.s32.f32 %v7021_v19  ;;  %v12294_v29 = vcvt.s32.f32 %v7217_v63  ;;  %vm17082_vm9 = vmmov %vm17076_vm13 }
 0x2bc   : > { %vm17084_vm7 = vmmov %vm17082_vm9 }
 0x2bd   : > { %17080 = vst [vmem:[#allocation20_spill] sm:$0xff] %v12294_v29  ;;  %v7028_v10 = vsel %vm7027_vm5, %v7023_v2, -inf  ;;  %v6901_v2 = vand.u32 65535, %v11513_v23 }
 0x2bf   : > { %v6903_v23 = vcvt.s32.f32 %v6901_v2 }
 0x2c3   : > { %v12212_v25 = vpop.xlane.xlu2 %7130 }
 0x2c4   : > { %vm7132_vm4 = vcmp.eq.f32.partialorder %v11612_v56, %v12212_v25  ;;  %v1811_v56 = vsel %vm12214_vm11, %v12113_v40, 0.0  ;;  %v1960_v40 = vmul.u32 4, %v8474_v14  ;;  %v8594_v14 = vcvt.f32.s32 %v8593_v38 }
 0x2c5   : > { %v7133_v12 = vsel %vm7132_vm4, %v7128_v26, -inf  ;;  %vm8390_vm12 = vcmp.lt.s32.totalorder %v1811_v56, 0  ;;  %v1952_v26 = vmul.u32 4, %v8434_v13  ;;  %v8391_v11 = vceil.f32 %v1811_v56 }
 0x2c6   : > { %7134 = vmax.xlane.f32.xlu2 %v7133_v12  ;;  %v6773_v12 = vsel %vm6772_vm3, %v6768_v35, -inf  ;;  %v8392_v37 = vfloor.f32 %v1811_v56  ;;  %v1992_v47 = vadd.s32 %v8634_v45, %v1960_v40  ;;  %v6706_v13 = vadd.s32 %v6674_v52, %v10725_v9 }
 0x2c7   : > { %v1984_v34 = vadd.s32 %v8594_v14, %v1952_v26  ;;  %v6746_v40 = vsel %vm6648_vm6, %v6714_v57, 0  ;;  %v8552_v45 = vfloor.f32 %v12255_v53  ;;  %v6699_v52 = vsel %vm12175_vm2, 1, %v16629_v3  ;;  %vm17097_vm6 = vmmov %vm17084_vm7 }
 0x2c8   : > { %v6738_v42 = vsel %vm6640_vm0, %v6706_v13, 0  ;;  %v8393_v51 = vsel %vm8390_vm12, %v8391_v11, %v8392_v37  ;;  %v12290_v35 = vsel %vm17072_vm8, %v1992_v47, 4294967295  ;;  %v12303_v26 = vsel %vm17082_vm9, %v6746_v40, 2147483648  ;;  %vm17090_vm12 = vmmov %vm17084_vm7 }
 0x2c9   : > { %17079 = vst [vmem:[#allocation7_spill] sm:$0xff] %v12290_v35  ;;  %v12298_v56 = vsel %vm17072_vm8, %v1984_v34, 4294967295  ;;  %v12306_v22 = vsel %vm17084_vm7, %v6738_v42, 2147483648  ;;  %v8514_v11 = vcvt.f32.s32 %v8513_v8  ;;  %v8394_v47 = vcvt.f32.s32 %v8393_v51  ;;  %vm17100_vm5 = vmmov %vm17097_vm6 }
 0x2ca   : > { %17081 = vst [vmem:[#allocation8_spill] sm:$0xff] %v12298_v56  ;;  %v6857_v14 = vshra.s32 %v12306_v22, 16  ;;  %vm6657_vm3 = vcmp.eq.s32.totalorder %v12298_v56, 0  ;;  %v6977_v49 = vshra.s32 %v12303_v26, 16 }
 0x2cb   : > { %17083 = vst [vmem:[#allocation16_spill] sm:$0xff] %v12303_v26  ;;  %v1968_v59 = vadd.s32 %v8514_v11, %v1936_v30  ;;  %v1944_v34 = vmul.u32 4, %v8394_v47 }
 0x2cc   : > { %v12257_v6 = vpop.xlane.xlu2 %6890  ;;  %17085 = vst [vmem:[#allocation32_spill] sm:$0xff] %v12306_v22  ;;  %v12327_v8 = vcvt.s32.f32 %v6857_v14  ;;  %v12333_v42 = vcvt.s32.f32 %v6977_v49  ;;  %v6683_v49 = vsel %vm12214_vm11, 1, %v16629_v3 }
 0x2cd   : > { %vm6892_vm15 = vcmp.eq.f32.partialorder %v11674_v41, %v12257_v6  ;;  %v7141_v41 = vand.u32 65535, %v11705_v0  ;;  %v8551_v0 = vceil.f32 %v12255_v53  ;;  %v17087_v53 = vld [vmem:[#allocation24_spill] sm:$0xff]  ;;  %v12331_v40 = vsel %vm17072_vm8, %v1968_v59, 4294967295 }
 0x2ce   : > { %v6893_v62 = vsel %vm6892_vm15, %v6888_v58, -inf  ;;  %6774 = vmax.xlane.f32.xlu2 %v6773_v12  ;;  %v6691_v12 = vsel %vm12191_vm14, 1, %v16629_v3  ;;  %vm6665_vm14 = vcmp.eq.s32.totalorder %v12290_v35, 0  ;;  %17088 = vst [vmem:[#allocation34_spill] sm:$0xff] %v12327_v8  ;;  %vm17092_vm15 = vmmov %vm17084_vm7  ;;  %vm6641_vm13 = vcmp.eq.s32.totalorder %v12331_v40, 0  ;;  %v17144_v35 = vld [vmem:[#allocation44_spill] sm:$0xff] }
 0x2cf   : > { %6894 = vmax.xlane.f32.xlu0 %v6893_v62  ;;  %v7143_v44 = vcvt.s32.f32 %v7141_v41  ;;  %v12317_v62 = vpop.xlane.xlu0 %6785  ;;  %v6723_v19 = vadd.s32 %v6691_v12, %v10725_v9  ;;  %v6731_v41 = vadd.s32 %v6699_v52, %v10725_v9  ;;  %v8553_v63 = vsel %vm8550_vm1, %v8551_v0, %v8552_v45  ;;  %17089 = vst [vmem:[#allocation13_spill] sm:$0xff] %v12333_v42 }
 0x2d0   : > { %vm6787_vm2 = vcmp.eq.f32.partialorder %v17087_v53, %v12317_v62  ;;  %v8554_v30 = vcvt.f32.s32 %v8553_v63  ;;  %v6715_v63 = vadd.s32 %v6683_v49, %v10725_v9 }
 0x2d1   : > { %v6755_v57 = vsel %vm6657_vm3, %v6723_v19, 0  ;;  %v6763_v13 = vsel %vm6665_vm14, %v6731_v41, 0 }
 0x2d2   : > { %v12337_v0 = vsel %vm17090_vm12, %v6755_v57, 2147483648  ;;  %v12340_v45 = vsel %vm17092_vm15, %v6763_v13, 2147483648 }
 0x2d3   : > { %17091 = vst [vmem:[#allocation6_spill] sm:$0xff] %v12337_v0  ;;  %v7112_v52 = vshra.s32 %v12337_v0, 16  ;;  %v7232_v11 = vshra.s32 %v12340_v45, 16  ;;  %v6777_v0 = vcvt.f32.s32 %v12236_v43  ;;  %v17132_v43 = vld [vmem:[#allocation12_spill] sm:$0xff] }
 0x2d4   : > { %17093 = vst [vmem:[#allocation30_spill] sm:$0xff] %v12340_v45 }
 0x2d5   : > { %v12292_v38 = vpop.xlane.xlu2 %7145  ;;  %v12361_v47 = vcvt.s32.f32 %v7112_v52  ;;  %v12363_v14 = vcvt.s32.f32 %v7232_v11 }
 0x2d6   : > { %vm7147_vm4 = vcmp.eq.f32.partialorder %v11727_v4, %v12292_v38  ;;  %7220 = vmax.xlane.f32.xlu2 %v12294_v29  ;;  %v17086_v4 = vld [vmem:[#allocation15_spill] sm:$0xff]  ;;  %v7032_v29 = vcvt.f32.s32 %v12274_v55 }
 0x2d7   : > { %v7148_v58 = vsel %vm7147_vm4, %v7143_v44, -inf  ;;  %v6781_v37 = vand.u32 65535, %v17086_v4  ;;  %7029 = vmax.xlane.f32.xlu0 %v7028_v10  ;;  %v6675_v44 = vsel %vm12133_vm10, 1, %v16629_v3  ;;  %v1976_v10 = vadd.s32 %v8554_v30, %v1944_v34  ;;  %17095 = vst [vmem:[#allocation11_spill] sm:$0xff] %v12361_v47  ;;  %v12372_v41 = vpop.xlane.xlu0 %7160 }
 0x2d8   : > { %7149 = vmax.xlane.f32.xlu1 %v7148_v58  ;;  %v12346_v58 = vpop.xlane.xlu1 %6905  ;;  %v6707_v4 = vadd.s32 %v6675_v44, %v10725_v9  ;;  %17096 = vst [vmem:[#allocation23_spill] sm:$0xff] %v12363_v14  ;;  %vm7162_vm0 = vcmp.eq.f32.partialorder %v11666_v1, %v12372_v41  ;;  %v7158_v34 = vcvt.s32.f32 %v7156_v31 }
 0x2d9   : > { %v6783_v48 = vcvt.s32.f32 %v6781_v37  ;;  %vm6907_vm10 = vcmp.eq.f32.partialorder %v11533_v7, %v12346_v58  ;;  %v12359_v37 = vsel %vm17072_vm8, %v1976_v10, 4294967295  ;;  %v7036_v7 = vand.u32 65535, %v11734_v16 }
 0x2da   : > { %v6739_v24 = vsel %vm6641_vm13, %v6707_v4, 0  ;;  %17094 = vst [vmem:[#allocation40_spill] sm:$0xff] %v12359_v37  ;;  %v6908_v59 = vsel %vm6907_vm10, %v6903_v23, -inf  ;;  %vm6649_vm8 = vcmp.eq.s32.totalorder %v12359_v37, 0  ;;  %v7163_v30 = vsel %vm7162_vm0, %v7158_v34, -inf }
 0x2db   : > { %v6788_v51 = vsel %vm6787_vm2, %v6783_v48, -inf  ;;  %v12369_v19 = vsel %vm17097_vm6, %v6739_v24, 2147483648  ;;  %v6747_v16 = vsel %vm6649_vm8, %v6715_v63, 0  ;;  %v7038_v57 = vcvt.s32.f32 %v7036_v7 }
 0x2dc   : > { %17098 = vst [vmem:[#allocation15_spill] sm:$0xff] %v12369_v19  ;;  %v6872_v60 = vshra.s32 %v12369_v19, 16  ;;  %v12391_v9 = vsel %vm17100_vm5, %v6747_v16, 2147483648  ;;  %v7051_v23 = vand.u32 65535, %v11680_v46  ;;  %v17104_v16 = vld [vmem:[#allocation47_spill] sm:$0xff]  ;;  %v6912_v55 = vcvt.f32.s32 %v12346_v58 }
 0x2dd   : > { %17101 = vst [vmem:[#allocation68_spill] sm:$0xff] %v12391_v9  ;;  %v6992_v1 = vshra.s32 %v12391_v9, 16  ;;  %v7152_v58 = vcvt.f32.s32 %v12292_v38  ;;  %vm4329_vm5 = vcmask 130048  }
 0x2de   : > { %6860 = vmax.xlane.f32.xlu2 %v12327_v8  ;;  %v12349_v12 = vpop.xlane.xlu2 %7040  ;;  %v12388_v48 = vcvt.s32.f32 %v6872_v60 }
 0x2df   : > { %6980 = vmax.xlane.f32.xlu0 %v12333_v42  ;;  %vm7042_vm11 = vcmp.eq.f32.partialorder %v11777_v33, %v12349_v12  ;;  %v6796_v33 = vand.u32 65535, %v11560_v32  ;;  %v12397_v44 = vpop.xlane.xlu0 %7055  ;;  %v12407_v4 = vcvt.s32.f32 %v6992_v1 }
 0x2e0   : > { %6789 = vmax.xlane.f32.xlu1 %v6788_v51  ;;  %v12386_v13 = vpop.xlane.xlu1 %6800  ;;  %17099 = vst [vmem:[#allocation24_spill] sm:$0xff] %v12388_v48  ;;  %v7043_v20 = vsel %vm7042_vm11, %v7038_v57, -inf  ;;  %v6916_v51 = vand.u32 65535, %v11787_v15  ;;  %vm7057_vm7 = vcmp.eq.f32.partialorder %v11719_v28, %v12397_v44  ;;  %v17103_v28 = vld [vmem:[#allocation48_spill] sm:$0xff]  ;;  %v17105_v57 = vld [vmem:[#allocation42_spill] sm:$0xff] }
 0x2e1   : > { %vm6802_vm9 = vcmp.eq.f32.partialorder %v11583_v17, %v12386_v13  ;;  %v6798_v11 = vcvt.s32.f32 %v6796_v33  ;;  %17102 = vst [vmem:[#allocation69_spill] sm:$0xff] %v12407_v4  ;;  %v6811_v17 = vand.u32 65535, %v11832_v39  ;;  %v6931_v60 = vand.u32 65535, %v17103_v28  ;;  %v17113_v28 = vld [vmem:[#allocation52_spill] sm:$0xff] }
 0x2e2   : > { %v6918_v52 = vcvt.s32.f32 %v6916_v51  ;;  %v7186_v34 = vand.u32 65535, %v17105_v57 }
 0x2e3   : > { %v6803_v15 = vsel %vm6802_vm9, %v6798_v11, -inf  ;;  %v6813_v49 = vcvt.s32.f32 %v6811_v17  ;;  %v6933_v33 = vcvt.s32.f32 %v6931_v60  ;;  %v17114_v60 = vld [vmem:[#allocation67_spill] sm:$0xff] }
 0x2e4   : > { %v7188_v51 = vcvt.s32.f32 %v7186_v34 }
 0x2e6   : > { %6909 = vmax.xlane.f32.xlu2 %v6908_v59  ;;  %v12380_v53 = vpop.xlane.xlu2 %6920  ;;  %v7053_v59 = vcvt.s32.f32 %v7051_v23  ;;  %v17109_v23 = vld [vmem:[#allocation51_spill] sm:$0xff] }
 0x2e7   : > { %7115 = vmax.xlane.f32.xlu0 %v12361_v47  ;;  %vm6922_vm4 = vcmp.eq.f32.partialorder %v11825_v36, %v12380_v53  ;;  %v7171_v36 = vand.u32 65535, %v11669_v18  ;;  %v12415_v24 = vpop.xlane.xlu0 %6935 }
 0x2e8   : > { %7235 = vmax.xlane.f32.xlu1 %v12363_v14  ;;  %v12403_v2 = vpop.xlane.xlu1 %7175  ;;  %v6923_v32 = vsel %vm6922_vm4, %v6918_v52, -inf  ;;  %v7058_v7 = vsel %vm7057_vm7, %v7053_v59, -inf  ;;  %v17130_v14 = vld [vmem:[#allocation18_spill] sm:$0xff] }
 0x2e9   : > { %vm7177_vm3 = vcmp.eq.f32.partialorder %v11693_v61, %v12403_v2  ;;  %v7173_v46 = vcvt.s32.f32 %v7171_v36  ;;  %v17106_v61 = vld [vmem:[#allocation50_spill] sm:$0xff]  ;;  %v6826_v36 = vand.u32 65535, %v17109_v23  ;;  %v7017_v45 = vcvt.f32.s32 %v17130_v14 }
 0x2ea   : > { %vm6937_vm14 = vcmp.eq.f32.partialorder %v17106_v61, %v12415_v24 }
 0x2eb   : > { %v7178_v63 = vsel %vm7177_vm3, %v7173_v46, -inf  ;;  %v6938_v11 = vsel %vm6937_vm14, %v6933_v33, -inf }
 0x2ee   : > { %7044 = vmax.xlane.f32.xlu2 %v7043_v20  ;;  %v12405_v10 = vpop.xlane.xlu2 %6815  ;;  %v17107_v20 = vld [vmem:[#allocation63_spill] sm:$0xff] }
 0x2ef   : > { %7164 = vmax.xlane.f32.xlu0 %v7163_v30  ;;  %vm6817_vm1 = vcmp.eq.f32.partialorder %v11867_v21, %v12405_v10  ;;  %v7066_v21 = vand.u32 65535, %v17104_v16  ;;  %v17108_v30 = vld [vmem:[#allocation17_spill] sm:$0xff]  ;;  %v12434_v52 = vpop.xlane.xlu0 %6830  ;;  %v6828_v16 = vcvt.s32.f32 %v6826_v36 }
 0x2f0   : > { %6875 = vmax.xlane.f32.xlu1 %v12388_v48  ;;  %v12421_v31 = vpop.xlane.xlu1 %7070  ;;  %v6818_v39 = vsel %vm6817_vm1, %v6813_v49, -inf  ;;  %v17110_v49 = vld [vmem:[#allocation19_spill] sm:$0xff] }
 0x2f1   : > { %vm7072_vm12 = vcmp.eq.f32.partialorder %v17108_v30, %v12421_v31  ;;  %v7068_v1 = vcvt.s32.f32 %v7066_v21  ;;  %v6946_v46 = vand.u32 65535, %v17110_v49  ;;  %v17115_v30 = vld [vmem:[#allocation57_spill] sm:$0xff] }
 0x2f2   : > { %v7201_v33 = vand.u32 65535, %v17115_v30 }
 0x2f3   : > { %v6948_v21 = vcvt.s32.f32 %v6946_v46 }
 0x2f6   : > { %6995 = vmax.xlane.f32.xlu2 %v12407_v4  ;;  %v12423_v18 = vpop.xlane.xlu2 %7190 }
 0x2f7   : > { %6804 = vmax.xlane.f32.xlu0 %v6803_v15  ;;  %vm7192_vm2 = vcmp.eq.f32.partialorder %v17107_v20, %v12423_v18  ;;  %v7073_v15 = vsel %vm7072_vm12, %v7068_v1, -inf  ;;  %v17116_v1 = vld [vmem:[#allocation59_spill] sm:$0xff] }
 0x2f8   : > { %6924 = vmax.xlane.f32.xlu1 %v6923_v32  ;;  %v7193_v32 = vsel %vm7192_vm2, %v7188_v51, -inf  ;;  %v12437_v17 = vpop.xlane.xlu1 %6950  ;;  %v12450_v51 = vpop.xlane.xlu0 %7205 }
 0x2f9   : > { %vm6952_vm13 = vcmp.eq.f32.partialorder %v17113_v28, %v12437_v17  ;;  %vm7207_vm6 = vcmp.eq.f32.partialorder %v17116_v1, %v12450_v51 }
 0x2fa   : > { %v6953_v61 = vsel %vm6952_vm13, %v6948_v21, -inf  ;;  %vm16476_vm13 = vcmask 1041409  }
 0x2fe   : > { %7059 = vmax.xlane.f32.xlu2 %v7058_v7  ;;  %v12439_v59 = vpop.xlane.xlu2 %7085  ;;  %v17111_v7 = vld [vmem:[#allocation65_spill] sm:$0xff] }
 0x2ff   : > { %7179 = vmax.xlane.f32.xlu0 %v7178_v63  ;;  %v17112_v63 = vld [vmem:[#allocation55_spill] sm:$0xff]  ;;  %vm7087_vm10 = vcmp.eq.f32.partialorder %v17114_v60, %v12439_v59 }
 0x300   : > { %6819 = vmax.xlane.f32.xlu1 %v6818_v39  ;;  %v7081_v39 = vand.u32 65535, %v17111_v7  ;;  %vm6832_vm15 = vcmp.eq.f32.partialorder %v17112_v63, %v12434_v52  ;;  %v17118_v63 = vld [vmem:[#allocation26_spill] sm:$0xff] }
 0x301   : > { %v6833_v34 = vsel %vm6832_vm15, %v6828_v16, -inf  ;;  %v2081_v28 = vperm.slane %v17118_v63, 0  ;;  %v2088_v30 = vperm.slane %v17118_v63, 1  ;;  %v2123_v1 = vperm.slane %v17118_v63, 6 }
 0x302   : > { %v7083_v57 = vcvt.s32.f32 %v7081_v39  ;;  %v12459_v39 = vpop.xlane.xlu1 %7014 }
 0x304   : > { %v7088_v20 = vsel %vm7087_vm10, %v7083_v57, -inf  ;;  %v2102_v57 = vperm.slane %v17118_v63, 3 }
 0x306   : > { %6939 = vmax.xlane.f32.xlu2 %v6938_v11  ;;  %v7203_v11 = vcvt.s32.f32 %v7201_v33 }
 0x307   : > { %7074 = vmax.xlane.f32.xlu0 %v7073_v15  ;;  %v17117_v15 = vld [vmem:[#allocation9_spill] sm:$0xff] }
 0x308   : > { %7194 = vmax.xlane.f32.xlu1 %v7193_v32  ;;  %v7208_v32 = vsel %vm7207_vm6, %v7203_v11, -inf  ;;  %v2025_v23 = vperm.slane %v17117_v15, 0  ;;  %v2032_v36 = vperm.slane %v17117_v15, 1  ;;  %v2060_v49 = vperm.slane %v17117_v15, 5 }
 0x309   : > { %v2039_v46 = vperm.slane %v17117_v15, 2  ;;  %v2046_v7 = vperm.slane %v17117_v15, 3  ;;  %v2053_v60 = vperm.slane %v17117_v15, 4  ;;  %v2067_v16 = vperm.slane %v17117_v15, 6 }
 0x30a   : > { %vm7600_vm6 = vcmask 1042434  }
 0x30e   : > { %6834 = vmax.xlane.f32.xlu2 %v6833_v34  ;;  %v12467_v34 = vpop.xlane.xlu0 %6845 }
 0x30f   : > { %7089 = vmax.xlane.f32.xlu0 %v7088_v20  ;;  %17119 = vst [vmem:[#allocation48_spill] sm:$0xff] %v12467_v34  ;;  %v2074_v20 = vperm.slane %v17117_v15, 7 }
 0x310   : > { %6954 = vmax.xlane.f32.xlu1 %v6953_v61  ;;  %v12469_v61 = vpop.xlane.xlu1 %6965 }
 0x311   : > { %17120 = vst [vmem:[#allocation47_spill] sm:$0xff] %v12469_v61 }
 0x316   : > { %7209 = vmax.xlane.f32.xlu2 %v7208_v32 }
 0x318   : > { %v12478_v32 = vpop.xlane.xlu1 %7100 }
 0x319   : > { %17121 = vst [vmem:[#allocation42_spill] sm:$0xff] %v12478_v32 }
 0x323   : > { %2030 = vperm.xlu0 %8684, %v2025_v23   ;;  %v2095_v23 = vperm.slane %v17118_v63, 2 }
 0x329   : > { %2037 = vperm.xlu1 %8683, %v2032_v36   ;;  %v2109_v36 = vperm.slane %v17118_v63, 4 }
 0x32b   : > { %2065 = vperm.xlu0 %8684, %v2060_v49   ;;  %v17123_v49 = vld [vmem:[#allocation37_spill] sm:$0xff] }
 0x32e   : > { %2044 = vperm.xlu2 %8685, %v2039_v46   ;;  %v2144_v46 = vperm.slane %v17123_v49, 1 }
 0x331   : > { %2051 = vperm.xlu1 %8683, %v2046_v7  }
 0x333   : > { %2086 = vperm.xlu0 %8684, %v2081_v28  }
 0x336   : > { %2058 = vperm.xlu2 %8685, %v2053_v60   ;;  %v2116_v60 = vperm.slane %v17118_v63, 5 }
 0x339   : > { %2072 = vperm.xlu1 %8683, %v2067_v16   ;;  %v12464_v21 = vpop.xlane.xlu2 %7134  ;;  %v2130_v16 = vperm.slane %v17118_v63, 7  ;;  %v2186_v63 = vperm.slane %v17123_v49, 7 }
 0x33b   : > { %2107 = vperm.xlu0 %8684, %v2102_v57  }
 0x33e   : > { %2079 = vperm.xlu2 %8685, %v2074_v20   ;;  %v2165_v20 = vperm.slane %v17123_v49, 4 }
 0x341   : > { %2093 = vperm.xlu1 %8683, %v2088_v30   ;;  %v12473_v33 = vpop.xlane.xlu2 %6774 }
 0x342   : > { %v12476_v11 = vpop.xlane.xlu0 %6894 }
 0x343   : > { %2128 = vperm.xlu0 %8684, %v2123_v1   ;;  %v2137_v1 = vperm.slane %v17123_v49, 0 }
 0x346   : > { %2100 = vperm.xlu2 %8685, %v2095_v23  }
 0x349   : > { %2114 = vperm.xlu1 %8683, %v2109_v36   ;;  %v12482_v15 = vpop.xlane.xlu2 %7220  ;;  %v2151_v36 = vperm.slane %v17123_v49, 2 }
 0x34a   : > { %17122 = vst [vmem:[#allocation50_spill] sm:$0xff] %v12482_v15  ;;  %v12485_v7 = vpop.xlane.xlu0 %7029 }
 0x34b   : > { %2149 = vperm.xlu0 %8684, %v2144_v46   ;;  %v12487_v28 = vpop.xlane.xlu1 %7149 }
 0x34e   : > { %2121 = vperm.xlu2 %8685, %v2116_v60  }
 0x351   : > { %2135 = vperm.xlu1 %8683, %v2130_v16   ;;  %v12491_v57 = vpop.xlane.xlu2 %6860  ;;  %v2158_v16 = vperm.slane %v17123_v49, 3 }
 0x352   : > { %17124 = vst [vmem:[#allocation63_spill] sm:$0xff] %v12491_v57  ;;  %v12494_v30 = vpop.xlane.xlu0 %6980 }
 0x353   : > { %17125 = vst [vmem:[#allocation17_spill] sm:$0xff] %v12494_v30  ;;  %2170 = vperm.xlu0 %8684, %v2165_v20   ;;  %v12497_v23 = vpop.xlane.xlu1 %6789  ;;  %v2172_v20 = vperm.slane %v17123_v49, 5 }
 0x356   : > { %2142 = vperm.xlu2 %8685, %v2137_v1   ;;  %v17128_v1 = vld [vmem:[#allocation39_spill] sm:$0xff] }
 0x357   : > { %v2207_v48 = vperm.slane %v17128_v1, 2  ;;  %v2221_v14 = vperm.slane %v17128_v1, 4  ;;  %v2235_v8 = vperm.slane %v17128_v1, 6 }
 0x359   : > { %2156 = vperm.xlu1 %8683, %v2151_v36   ;;  %v12500_v46 = vpop.xlane.xlu2 %6909  ;;  %v2179_v36 = vperm.slane %v17123_v49, 6  ;;  %v12525_v49 = vshll.u32 %v6777_v0, 16  ;;  %v7167_v0 = vcvt.f32.s32 %v12372_v41  ;;  %v17152_v41 = vperm.slane %v17132_v43, 4 }
 0x35a   : > { %v12503_v60 = vpop.xlane.xlu0 %7115 }
 0x35b   : > { %17126 = vst [vmem:[#allocation51_spill] sm:$0xff] %v12503_v60  ;;  %2191 = vperm.xlu0 %8684, %v2186_v63   ;;  %v12507_v4 = vpop.xlane.xlu1 %7235  ;;  %v2193_v63 = vperm.slane %v17128_v1, 0 }
 0x35c   : > { %17127 = vst [vmem:[#allocation19_spill] sm:$0xff] %v12507_v4 }
 0x35e   : > { %2163 = vperm.xlu2 %8685, %v2158_v16   ;;  %v2228_v16 = vperm.slane %v17128_v1, 5 }
 0x361   : > { %2177 = vperm.xlu1 %8683, %v2172_v20   ;;  %v12509_v9 = vpop.xlane.xlu2 %7044  ;;  %v6792_v20 = vcvt.f32.s32 %v12317_v62  ;;  %v2249_v62 = vperm.slane %v17132_v43, 0 }
 0x362   : > { %v12513_v19 = vpop.xlane.xlu0 %7164 }
 0x363   : > { %2212 = vperm.xlu0 %8684, %v2207_v48   ;;  %v12522_v42 = vpop.xlane.xlu1 %6875  ;;  %v2200_v48 = vperm.slane %v17128_v1, 1 }
 0x364   : > { %17131 = vst [vmem:[#allocation55_spill] sm:$0xff] %v12522_v42 }
 0x366   : > { %2184 = vperm.xlu2 %8685, %v2179_v36   ;;  %v12527_v36 = vshll.u32 %v6792_v20, 16 }
 0x369   : > { %2198 = vperm.xlu1 %8683, %v2193_v63   ;;  %v12516_v47 = vpop.xlane.xlu2 %6995  ;;  %v12529_v63 = vshll.u32 %v7017_v45, 16 }
 0x36a   : > { %17129 = vst [vmem:[#allocation65_spill] sm:$0xff] %v12516_v47  ;;  %v2214_v47 = vperm.slane %v17128_v1, 3  ;;  %v12532_v26 = vpop.xlane.xlu0 %6804 }
 0x36b   : > { %2233 = vperm.xlu0 %8684, %v2228_v16   ;;  %v2270_v16 = vperm.slane %v17132_v43, 3  ;;  %v12556_v50 = vpop.xlane.xlu1 %6924 }
 0x36c   : > { %17135 = vst [vmem:[#allocation67_spill] sm:$0xff] %v12556_v50  ;;  %v17143_v50 = vperm.slane %v17128_v1, 7  ;;  %v17150_v1 = vperm.slane %v17132_v43, 2 }
 0x36e   : > { %2205 = vperm.xlu2 %8685, %v2200_v48   ;;  %v17140_v48 = vld [vmem:[#allocation10_spill] sm:$0xff] }
 0x371   : > { %2219 = vperm.xlu1 %8683, %v2214_v47   ;;  %v12542_v22 = vpop.xlane.xlu2 %7059 }
 0x372   : > { %17133 = vst [vmem:[#allocation52_spill] sm:$0xff] %v12542_v22  ;;  %v12578_v56 = vpop.xlane.xlu0 %7179  ;;  %v17149_v22 = vperm.slane %v17132_v43, 6 }
 0x373   : > { %2254 = vperm.xlu0 %8684, %v2249_v62   ;;  %17137 = vst [vmem:[#allocation57_spill] sm:$0xff] %v12578_v56  ;;  %v17139_v62 = vld [vmem:[#allocation41_spill] sm:$0xff]  ;;  %v12602_v20 = vpop.xlane.xlu1 %6819 }
 0x374   : > { %17142 = vst [vmem:[#allocation9_spill] sm:$0xff] %v12602_v20  ;;  %v17145_v20 = vperm.slane %v17132_v43, 1 }
 0x376   : > { %2226 = vperm.xlu2 %8685, %v2221_v14  }
 0x379   : > { %2240 = vperm.xlu1 %8683, %v2235_v8   ;;  %v12580_v47 = vpop.xlane.xlu2 %6939  ;;  %v12652_v8 = vshll.u32 %v7032_v29, 16 }
 0x37a   : > { %17138 = vst [vmem:[#allocation59_spill] sm:$0xff] %v12580_v47  ;;  %v12631_v45 = vpop.xlane.xlu0 %7074  ;;  %v6897_v47 = vcvt.f32.s32 %v12257_v6 }
 0x37b   : > { %2275 = vperm.xlu0 %8684, %v2270_v16   ;;  %17148 = vst [vmem:[#allocation37_spill] sm:$0xff] %v12631_v45  ;;  %v6807_v45 = vcvt.f32.s32 %v12386_v13  ;;  %v7077_v13 = vcvt.f32.s32 %v12421_v31  ;;  %v12657_v16 = vpop.xlane.xlu1 %7194 }
 0x37c   : > { %17151 = vst [vmem:[#allocation39_spill] sm:$0xff] %v12657_v16  ;;  %v12672_v16 = vshll.u32 %v7167_v0, 16  ;;  %v6837_v0 = vcvt.f32.s32 %v12434_v52  ;;  %v7136_v52 = vcvt.f32.s32 %v12464_v21 }
 0x37d   : > { %v12667_v38 = vshll.u32 %v6807_v45, 16  ;;  %v7047_v45 = vcvt.f32.s32 %v12349_v12  ;;  %v6972_v12 = vcvt.f32.s32 %v12469_v61 }
 0x37e   : > { %2247 = vperm.xlu2 %8685, %v17143_v50   ;;  %v7062_v50 = vcvt.f32.s32 %v12397_v44  ;;  %v7153_v44 = vshll.u32 %v7152_v58, 16  ;;  %v6852_v58 = vcvt.f32.s32 %v12467_v34 }
 0x37f   : > { %v12704_v29 = vshll.u32 %v7047_v45, 16  ;;  %v17166_v45 = vld [vmem:[#allocation35_spill] sm:$0xff] }
 0x380   : > { %v12676_v6 = vshll.u32 %v7062_v50, 16  ;;  %v6822_v50 = vcvt.f32.s32 %v12405_v10 }
 0x381   : > { %2261 = vperm.xlu1 %8683, %v17145_v20   ;;  %v12620_v14 = vpop.xlane.xlu2 %6834  ;;  %v7182_v20 = vcvt.f32.s32 %v12403_v2  ;;  %v12678_v2 = vshll.u32 %v7077_v13, 16 }
 0x382   : > { %17146 = vst [vmem:[#allocation26_spill] sm:$0xff] %v12620_v14 }
 0x383   : > { %2296 = vperm.xlu0 %8684, %v17149_v22   ;;  %v7137_v22 = vcvt.f32.s32 %v12212_v25  ;;  %v7016_v25 = vcvt.f32.s32 %v12459_v39  ;;  %v12674_v14 = vshll.u32 %v7182_v20, 16  ;;  %v6957_v39 = vcvt.f32.s32 %v12437_v17 }
 0x384   : > { %v7212_v20 = vcvt.f32.s32 %v12450_v51  ;;  %v7107_v17 = vcvt.f32.s32 %v12478_v32  ;;  %v17155_v51 = vperm.slane %v17132_v43, 5 }
 0x385   : > { %v7138_v31 = vshll.u32 %v7137_v22, 16  ;;  %v17153_v22 = vperm.slane %v17134_v54, 1  ;;  %v12691_v13 = vadd.s32 %v12529_v63, %v7016_v25  ;;  %v7092_v63 = vcvt.f32.s32 %v12439_v59 }
 0x386   : > { %2268 = vperm.xlu2 %8685, %v17150_v1   ;;  %v12665_v1 = vshll.u32 %v6912_v55, 16  ;;  %v6942_v55 = vcvt.f32.s32 %v12415_v24  ;;  %v12694_v24 = vpop.xlane.xlu0 %7089  ;;  %v6896_v25 = vcvt.f32.s32 %v12476_v11  ;;  %v12708_v61 = vshll.u32 %v6957_v39, 16 }
 0x387   : > { %17154 = vst [vmem:[#allocation18_spill] sm:$0xff] %v12691_v13  ;;  %v12714_v21 = vshll.u32 %v7212_v20, 16  ;;  %v12723_v59 = vshll.u32 %v6972_v12, 16  ;;  %v17162_v12 = vperm.slane %v17134_v54, 4 }
 0x388   : > { %v12702_v10 = vshll.u32 %v6942_v55, 16  ;;  %v12720_v55 = vshll.u32 %v6852_v58, 16 }
 0x389   : > { %2282 = vperm.xlu1 %8683, %v17152_v41   ;;  %v12670_v56 = vpop.xlane.xlu2 %7209  ;;  %v6898_v41 = vshll.u32 %v6897_v47, 16  ;;  %v6927_v47 = vcvt.f32.s32 %v12380_v53  ;;  %v6776_v53 = vcvt.f32.s32 %v12473_v33  ;;  %v17156_v33 = vperm.slane %v17132_v43, 7  ;;  %17158 = vst [vmem:[#allocation54_spill] sm:$0xff] %v12723_v59  ;;  %v12736_v43 = vpop.xlane.xlu1 %6954 }
 0x38a   : > { %17157 = vst [vmem:[#allocation12_spill] sm:$0xff] %v12720_v55  ;;  %v17175_v59 = vperm.slane %v17134_v54, 3 }
 0x38b   : > { %2317 = vperm.xlu0 %8684, %v17153_v22   ;;  %v7197_v22 = vcvt.f32.s32 %v12423_v18  ;;  %v12710_v18 = vshll.u32 %v6837_v0, 16  ;;  %v12712_v32 = vshll.u32 %v6927_v47, 16  ;;  %v12729_v0 = vshll.u32 %v7107_v17, 16 }
 0x38c   : > { %v12731_v47 = vadd.s32 %v7138_v31, %v7136_v52  ;;  %v12734_v20 = vadd.s32 %v12525_v49, %v6776_v53  ;;  %v12740_v58 = vadd.s32 %v6898_v41, %v6896_v25  ;;  %v7151_v17 = vcvt.f32.s32 %v12487_v28 }
 0x38d   : > { %v12727_v39 = vshll.u32 %v7197_v22, 16  ;;  %17159 = vst [vmem:[#allocation41_spill] sm:$0xff] %v12729_v0  ;;  %v7031_v53 = vcvt.f32.s32 %v12485_v7  ;;  %v7227_v28 = vcvt.f32.s32 %v12482_v15  ;;  %v6791_v31 = vcvt.f32.s32 %v12497_v23 }
 0x38e   : > { %2289 = vperm.xlu2 %8685, %v17155_v51   ;;  %v12718_v51 = vshll.u32 %v6822_v50, 16  ;;  %17160 = vst [vmem:[#allocation10_spill] sm:$0xff] %v12731_v47  ;;  %v12738_v50 = vshll.u32 %v7092_v63, 16  ;;  %v17164_v49 = vperm.slane %v17134_v54, 0  ;;  %v17167_v22 = vperm.slane %v17134_v54, 2 }
 0x38f   : > { %17161 = vst [vmem:[#allocation44_spill] sm:$0xff] %v12740_v58  ;;  %v6867_v7 = vcvt.f32.s32 %v12491_v57  ;;  %v17171_v41 = vperm.slane %v17134_v54, 7  ;;  %v17179_v57 = vperm.slane %v12244_v27, 2 }
 0x391   : > { %2303 = vperm.xlu1 %8683, %v17156_v33   ;;  %v12725_v11 = vpop.permute.xlu2 %2044  ;;  %v12796_v0 = vshll.u32 %v6867_v7, 16 }
 0x392   : > { %vm3819_vm0 = vcmp.eq.s32.totalorder %v12725_v11, %v17166_v45 }
 0x393   : > { %2338 = vperm.xlu0 %8684, %v17162_v12   ;;  %v12764_v12 = vadd.s32 %v7153_v44, %v7151_v17  ;;  %v12777_v17 = vshll.u32 %v7227_v28, 16  ;;  %17173 = vst [vmem:[#allocation72_spill] sm:$0xff] %v12796_v0 }
 0x395   : > { %v2031_v63 = vpop.permute.xlu0 %2030  ;;  %17165 = vst [vmem:[#allocation70_spill] sm:$0xff] %v12764_v12 }
 0x396   : > { %2310 = vperm.xlu2 %8685, %v17164_v49   ;;  %vm3817_vm8 = vcmp.eq.s32.totalorder %v2031_v63, %v17166_v45  ;;  %v12772_v49 = vadd.s32 %v12652_v8, %v7031_v53  ;;  %17170 = vst [vmem:[#allocation71_spill] sm:$0xff] %v12777_v17  ;;  %v12780_v63 = vadd.s32 %v12527_v36, %v6791_v31  ;;  %v6911_v8 = vcvt.f32.s32 %v12500_v46 }
 0x397   : > { %v4073_v53 = vsel %vm3817_vm8, 1, %v16629_v3  ;;  %v7122_v31 = vcvt.f32.s32 %v12503_v60  ;;  %v4075_v46 = vsel %vm3819_vm0, 1, %v16629_v3 }
 0x398   : > { %17168 = vst [vmem:[#allocation35_spill] sm:$0xff] %v12772_v49  ;;  %v4330_v17 = vsel %vm4329_vm5, %v4073_v53, 0  ;;  %v12808_v7 = vadd.s32 %v12665_v1, %v6911_v8  ;;  %v4344_v55 = vsel %vm4329_vm5, %v4075_v46, 0  ;;  %v17183_v49 = vperm.slane %v12244_v27, 5 }
 0x399   : > { %2324 = vperm.xlu1 %8683, %v17167_v22   ;;  %v2059_v52 = vpop.permute.xlu2 %2058  ;;  %v6987_v22 = vcvt.f32.s32 %v12494_v30  ;;  %v12824_v30 = vshll.u32 %v7122_v31, 16  ;;  %v4345_v53 = vrot.slane %v4344_v55, 4 }
 0x39a   : > { %vm3821_vm4 = vcmp.eq.s32.totalorder %v2059_v52, %v17166_v45  ;;  %17176 = vst [vmem:[#allocation74_spill] sm:$0xff] %v12808_v7 }
 0x39b   : > { %v2038_v23 = vpop.permute.xlu1 %2037  ;;  %2359 = vperm.xlu0 %8684, %v17171_v41   ;;  %v12800_v28 = vshll.u32 %v6987_v22, 16  ;;  %v4077_v52 = vsel %vm3821_vm4, 1, %v16629_v3  ;;  %v17177_v22 = vperm.slane %v17134_v54, 5  ;;  %v4331_v41 = vrot.slane %v4330_v17, 4  ;;  %17178 = vst [vmem:[#allocation75_spill] sm:$0xff] %v12824_v30 }
 0x39c   : > { %vm3818_vm11 = vcmp.eq.s32.totalorder %v2038_v23, %v17166_v45  ;;  %v4346_v8 = vadd.s32 %v4345_v53, %v4344_v55 }
 0x39d   : > { %v4074_v36 = vsel %vm3818_vm11, 1, %v16629_v3  ;;  %v2066_v23 = vpop.permute.xlu0 %2065  ;;  %17174 = vst [vmem:[#allocation73_spill] sm:$0xff] %v12800_v28  ;;  %v4332_v31 = vadd.s32 %v4331_v41, %v4330_v17  ;;  %v7046_v17 = vcvt.f32.s32 %v12509_v9  ;;  %vm7602_vm11 = vcmask 1043459  }
 0x39e   : > { %v4337_v11 = vsel %vm4329_vm5, %v4074_v36, 0  ;;  %2331 = vperm.xlu2 %8685, %v17175_v59   ;;  %vm3822_vm9 = vcmp.eq.s32.totalorder %v2066_v23, %v17166_v45  ;;  %v4358_v36 = vsel %vm4329_vm5, %v4077_v52, 0 }
 0x39f   : > { %v4338_v28 = vrot.slane %v4337_v11, 4  ;;  %v4078_v60 = vsel %vm3822_vm9, 1, %v16629_v3  ;;  %v4359_v52 = vrot.slane %v4358_v36, 4  ;;  %v4333_v46 = vrot.slane %v4332_v31, 2 }
 0x3a0   : > { %v4365_v59 = vsel %vm4329_vm5, %v4078_v60, 0 }
 0x3a1   : > { %2345 = vperm.xlu1 %8683, %v17177_v22   ;;  %v2080_v0 = vpop.permute.xlu2 %2079  ;;  %v4339_v30 = vadd.s32 %v4338_v28, %v4337_v11  ;;  %v4366_v60 = vrot.slane %v4365_v59, 4  ;;  %v4360_v28 = vadd.s32 %v4359_v52, %v4358_v36  ;;  %v4347_v52 = vrot.slane %v4346_v8, 2 }
 0x3a2   : > { %vm3824_vm1 = vcmp.eq.s32.totalorder %v2080_v0, %v17166_v45  ;;  %v17182_v0 = vperm.slane %v12244_v27, 0  ;;  %v4334_v55 = vadd.s32 %v4333_v46, %v4332_v31 }
 0x3a3   : > { %v2052_v22 = vpop.permute.xlu1 %2051  ;;  %2380 = vperm.xlu0 %8684, %v17179_v57   ;;  %v4367_v4 = vadd.s32 %v4366_v60, %v4365_v59  ;;  %v4361_v53 = vrot.slane %v4360_v28, 2 }
 0x3a4   : > { %vm3820_vm7 = vcmp.eq.s32.totalorder %v2052_v22, %v17166_v45  ;;  %v17181_v22 = vperm.slane %v17134_v54, 6  ;;  %v4340_v54 = vrot.slane %v4339_v30, 2 }
 0x3a5   : > { %v2087_v15 = vpop.permute.xlu0 %2086  ;;  %v4076_v57 = vsel %vm3820_vm7, 1, %v16629_v3  ;;  %v4368_v46 = vrot.slane %v4367_v4, 2 }
 0x3a6   : > { %vm3825_vm3 = vcmp.eq.s32.totalorder %v2087_v15, %v17166_v45  ;;  %2352 = vperm.xlu2 %8685, %v17181_v22   ;;  %v4351_v1 = vsel %vm4329_vm5, %v4076_v57, 0  ;;  %v4080_v22 = vsel %vm3824_vm1, 1, %v16629_v3  ;;  %v7166_v15 = vcvt.f32.s32 %v12513_v19 }
 0x3a7   : > { %v4352_v41 = vrot.slane %v4351_v1, 4  ;;  %v4081_v11 = vsel %vm3825_vm3, 1, %v16629_v3  ;;  %v4379_v9 = vsel %vm4329_vm5, %v4080_v22, 0  ;;  %v17185_v19 = vperm.slane %v12244_v27, 1 }
 0x3a8   : > { %v4386_v34 = vsel %vm4329_vm5, %v4081_v11, 0  ;;  %v4341_v11 = vadd.s32 %v4340_v54, %v4339_v30  ;;  %v4380_v59 = vrot.slane %v4379_v9, 4  ;;  %v7894_v30 = vld [vmem:[%s16214_s2 + $0x8] sm:$0xff]  ;;  %v12874_v54 = vadd.s32 %v12672_v16, %v7166_v15 }
 0x3a9   : > { %2366 = vperm.xlu1 %8683, %v17182_v0   ;;  %v2101_v57 = vpop.permute.xlu2 %2100  ;;  %v4353_v47 = vadd.s32 %v4352_v41, %v4351_v1  ;;  %v4387_v13 = vrot.slane %v4386_v34, 4  ;;  %v12864_v0 = vadd.s32 %v12704_v29, %v7046_v17  ;;  %v6806_v29 = vcvt.f32.s32 %v12532_v26  ;;  %8009 = vmatpush.msra.mxu0 %v7894_v30 }
 0x3aa   : > { %vm3827_vm14 = vcmp.eq.s32.totalorder %v2101_v57, %v17166_v45  ;;  %17186 = vst [vmem:[#allocation77_spill] sm:$0xff] %v12874_v54  ;;  %v17187_v17 = vperm.slane %v12244_v27, 3  ;;  %v4348_v22 = vadd.s32 %v4347_v52, %v4346_v8  ;;  %8309 = vmatpush.msra.mxu1 %v7894_v30  ;;  %8310 = vmatpush.msra.mxu2 %v7894_v30  ;;  %v4335_v16 = vrot.slane %v4334_v55, 1  ;;  %v7893_v8 = vld [vmem:[%s16214_s2] sm:$0xff] }
 0x3ab   : > { %v2073_v12 = vpop.permute.xlu1 %2072  ;;  %2401 = vperm.xlu0 %8684, %v17183_v49   ;;  %17184 = vst [vmem:[#allocation76_spill] sm:$0xff] %v12864_v0  ;;  %v4354_v60 = vrot.slane %v4353_v47, 2  ;;  %v4388_v49 = vadd.s32 %v4387_v13, %v4386_v34  ;;  %v4362_v15 = vadd.s32 %v4361_v53, %v4360_v28  ;;  %v4083_v26 = vsel %vm3827_vm14, 1, %v16629_v3  ;;  %8311 = vmatpush.msra.mxu3 %v7894_v30 }
 0x3ac   : > { %vm3823_vm2 = vcmp.eq.s32.totalorder %v2073_v12, %v17166_v45  ;;  %v4381_v13 = vadd.s32 %v4380_v59, %v4379_v9  ;;  %8010 = vmatpush.msra.mxu0 %v7893_v8  ;;  %v12894_v28 = vadd.s32 %v12667_v38, %v6806_v29  ;;  %v4369_v57 = vadd.s32 %v4368_v46, %v4367_v4 }
 0x3ad   : > { %v2108_v1 = vpop.permute.xlu0 %2107  ;;  %v4079_v31 = vsel %vm3823_vm2, 1, %v16629_v3  ;;  %v4355_v52 = vadd.s32 %v4354_v60, %v4353_v47  ;;  %8312 = vmatpush.msra.mxu1 %v7893_v8  ;;  %8313 = vmatpush.msra.mxu2 %v7893_v8  ;;  %v4389_v23 = vrot.slane %v4388_v49, 2  ;;  %v4400_v9 = vsel %vm4329_vm5, %v4083_v26, 0 }
 0x3ae   : > { %2373 = vperm.xlu2 %8685, %v17185_v19   ;;  %v4342_v19 = vrot.slane %v4341_v11, 1  ;;  %v4372_v12 = vsel %vm4329_vm5, %v4079_v31, 0  ;;  %v17188_v31 = vperm.slane %v12331_v40, 0  ;;  %vm3828_vm15 = vcmp.eq.s32.totalorder %v2108_v1, %v17166_v45  ;;  %8314 = vmatpush.msra.mxu3 %v7893_v8 }
 0x3af   : > { %v4373_v36 = vrot.slane %v4372_v12, 4  ;;  %v4349_v59 = vrot.slane %v4348_v22, 1  ;;  %v4336_v60 = vadd.s32 %v4335_v16, %v4334_v55  ;;  %v17190_v38 = vperm.slane %v12244_v27, 4 }
 0x3b0   : > { %v4343_v30 = vadd.s32 %v4342_v19, %v4341_v11  ;;  %v4382_v29 = vrot.slane %v4381_v13, 2  ;;  %v4356_v11 = vrot.slane %v4355_v52, 1  ;;  %v4370_v46 = vrot.slane %v4369_v57, 1 }
 0x3b1   : > { %2387 = vperm.xlu1 %8683, %v17187_v17   ;;  %v12881_v41 = vpop.permute.xlu2 %2121  ;;  %v4374_v53 = vadd.s32 %v4373_v36, %v4372_v12  ;;  %v17189_v17 = vld [vmem:[#allocation21_spill] sm:$0xff]  ;;  %v4363_v36 = vrot.slane %v4362_v15, 1  ;;  %v4401_v19 = vrot.slane %v4400_v9, 4  ;;  %v4084_v1 = vsel %vm3828_vm15, 1, %v16629_v3 }
 0x3b2   : > { %v17191_v12 = vperm.slane %v12244_v27, 6  ;;  %vm6123_vm10 = vcmp.gt.s32.totalorder %v4343_v30, 0  ;;  %v4390_v55 = vadd.s32 %v4389_v23, %v4388_v49  ;;  %v4350_v8 = vadd.s32 %v4349_v59, %v4348_v22 }
 0x3b3   : > { %v2094_v42 = vpop.permute.xlu1 %2093  ;;  %2422 = vperm.xlu0 %8684, %v17188_v31   ;;  %v4375_v31 = vrot.slane %v4374_v53, 2  ;;  %vm6122_vm8 = vcmp.gt.s32.totalorder %v4336_v60, 0  ;;  %vm3830_vm0 = vcmp.eq.s32.totalorder %v12881_v41, %v17166_v45  ;;  %v4364_v34 = vadd.s32 %v4363_v36, %v4362_v15 }
 0x3b4   : > { %vm3826_vm12 = vcmp.eq.s32.totalorder %v2094_v42, %v17166_v45  ;;  %v4383_v25 = vadd.s32 %v4382_v29, %v4381_v13  ;;  %v4357_v0 = vadd.s32 %v4356_v11, %v4355_v52  ;;  %v4407_v7 = vsel %vm4329_vm5, %v4084_v1, 0 }
 0x3b5   : > { %v2129_v47 = vpop.permute.xlu0 %2128  ;;  %v4082_v4 = vsel %vm3826_vm12, 1, %v16629_v3  ;;  %v4376_v16 = vadd.s32 %v4375_v31, %v4374_v53  ;;  %v17193_v23 = vand.u32 1, %v12734_v20  ;;  %v16458_v22 = vmov 0.0  }
 0x3b6   : > { %2394 = vperm.xlu2 %8685, %v17190_v38   ;;  %v4393_v42 = vsel %vm4329_vm5, %v4082_v4, 0  ;;  %v6379_v53 = vsel %vm6123_vm10, 1.0, %v16458_v22  ;;  %v4371_v41 = vadd.s32 %v4370_v46, %v4369_v57  ;;  %v4402_v59 = vadd.s32 %v4401_v19, %v4400_v9 }
 0x3b7   : > { %vm12915_vm4 = vcmp.eq.s32.totalorder %v17193_v23, 1  ;;  %v4394_v15 = vrot.slane %v4393_v42, 4  ;;  %v4391_v13 = vrot.slane %v4390_v55, 1  ;;  %v4377_v52 = vrot.slane %v4376_v16, 1 }
 0x3b8   : > { %v4086_v31 = vsel %vm3830_vm0, 1, %v16629_v3  ;;  %vm6124_vm7 = vcmp.gt.s32.totalorder %v4350_v8, 0  ;;  %v6378_v20 = vsel %vm6122_vm8, 1.0, %v16458_v22  ;;  %v4408_v36 = vrot.slane %v4407_v7, 4 }
 0x3b9   : > { %2408 = vperm.xlu1 %8683, %v17191_v12   ;;  %v2143_v26 = vpop.permute.xlu2 %2142  ;;  %v17192_v12 = vperm.slane %v12331_v40, 3  ;;  %vm3831_vm1 = vcmp.eq.s32.totalorder %v2129_v47, %v17166_v45  ;;  %v17196_v30 = vperm.slane %v12244_v27, 7  ;;  %vm6126_vm3 = vcmp.gt.s32.totalorder %v4364_v34, 0 }
 0x3ba   : > { %v7599_v57 = vsel %vm16476_vm13, %v6379_v53, %v6378_v20  ;;  %v4384_v9 = vrot.slane %v4383_v25, 1  ;;  %vm6125_vm14 = vcmp.gt.s32.totalorder %v4357_v0, 0  ;;  %vm6127_vm2 = vcmp.gt.s32.totalorder %v4371_v41, 0 }
 0x3bb   : > { %v2115_v38 = vpop.permute.xlu1 %2114  ;;  %2443 = vperm.xlu0 %8684, %v17192_v12   ;;  %v4421_v29 = vsel %vm4329_vm5, %v4086_v31, 0  ;;  %v4395_v11 = vadd.s32 %v4394_v15, %v4393_v42  ;;  %v17197_v60 = vperm.slane %v12331_v40, 1  ;;  %v12933_v19 = vadd.s32 %v4391_v13, %v4390_v55 }
 0x3bc   : > { %vm3829_vm9 = vcmp.eq.s32.totalorder %v2115_v38, %v17166_v45  ;;  %v4403_v47 = vrot.slane %v4402_v59, 2  ;;  %v4378_v1 = vadd.s32 %v4377_v52, %v4376_v16  ;;  %v4087_v27 = vsel %vm3831_vm1, 1, %v16629_v3 }
 0x3bd   : > { %v2150_v4 = vpop.permute.xlu0 %2149  ;;  %v4085_v46 = vsel %vm3829_vm9, 1, %v16629_v3  ;;  %v6380_v0 = vsel %vm6124_vm7, 1.0, %v16458_v22  ;;  %v6382_v38 = vsel %vm6126_vm3, 1.0, %v16458_v22  ;;  %v6381_v42 = vsel %vm6125_vm14, 1.0, %v16458_v22 }
 0x3be   : > { %2415 = vperm.xlu2 %8685, %v17196_v30   ;;  %v4409_v12 = vadd.s32 %v4408_v36, %v4407_v7  ;;  %v4422_v53 = vrot.slane %v4421_v29, 4  ;;  %vm3833_vm12 = vcmp.eq.s32.totalorder %v2143_v26, %v17166_v45  ;;  %v4414_v55 = vsel %vm4329_vm5, %v4085_v46, 0 }
 0x3bf   : > { %v4385_v15 = vadd.s32 %v4384_v9, %v4383_v25  ;;  %v17198_v16 = vperm.slane %v12331_v40, 6  ;;  %v6383_v13 = vsel %vm6127_vm2, 1.0, %v16458_v22  ;;  %v7601_v8 = vsel %vm7600_vm6, %v6380_v0, %v7599_v57 }
 0x3c0   : > { %v4396_v52 = vrot.slane %v4395_v11, 2  ;;  %v4428_v31 = vsel %vm4329_vm5, %v4087_v27, 0  ;;  %v7603_v7 = vsel %vm7602_vm11, %v6381_v42, %v7601_v8  ;;  %vm6130_vm15 = vcmp.gt.s32.totalorder %v12933_v19, 0  ;;  %v17201_v8 = vld [vmem:[#allocation22_spill] sm:$0xff] }
 0x3c1   : > { %2429 = vperm.xlu1 %8683, %v17197_v60   ;;  %v12936_v34 = vpop.permute.xlu2 %2163  ;;  %v12952_v20 = vadd.s32 %v4403_v47, %v4402_v59  ;;  %vm6128_vm10 = vcmp.gt.s32.totalorder %v4378_v1, 0  ;;  %v4410_v25 = vrot.slane %v4409_v12, 2  ;;  %v4089_v36 = vsel %vm3833_vm12, 1, %v16629_v3 }
 0x3c2   : > { %v4415_v30 = vrot.slane %v4414_v55, 4  ;;  %vm3834_vm8 = vcmp.eq.s32.totalorder %v2150_v4, %v17166_v45  ;;  %v17199_v41 = vperm.slane %v12331_v40, 2  ;;  %v4423_v57 = vadd.s32 %v4422_v53, %v4421_v29 }
 0x3c3   : > { %v2136_v23 = vpop.permute.xlu1 %2135  ;;  %2464 = vperm.xlu0 %8684, %v17198_v16   ;;  %v4429_v9 = vrot.slane %v4428_v31, 4  ;;  %vm6129_vm0 = vcmp.gt.s32.totalorder %v4385_v15, 0  ;;  %v7309_v59 = vsel %vm12915_vm4, 1.0, %v16458_v22  ;;  %v4397_v46 = vadd.s32 %v4396_v52, %v4395_v11 }
 0x3c4   : > { %v6384_v60 = vsel %vm6128_vm10, 1.0, %v16458_v22  ;;  %vm7604_vm9 = vcmask 1044484   ;;  %vm7606_vm7 = vcmask 1045509   ;;  %v17200_v47 = vperm.slane %v12331_v40, 4 }
 0x3c5   : > { %v12954_v26 = vpop.permute.xlu0 %2170  ;;  %v4442_v4 = vsel %vm4329_vm5, %v4089_v36, 0  ;;  %v4090_v1 = vsel %vm3834_vm8, 1, %v16629_v3  ;;  %v7605_v29 = vsel %vm7604_vm9, %v6382_v38, %v7603_v7  ;;  %vm7608_vm1 = vcmask 1046534  }
 0x3c6   : > { %2436 = vperm.xlu2 %8685, %v17199_v41   ;;  %v4416_v0 = vadd.s32 %v4415_v30, %v4414_v55  ;;  %vm16477_vm3 = vcmp.eq.s32.totalorder %v17166_v45, 0  ;;  %v7607_v49 = vsel %vm7606_vm7, %v6383_v13, %v7605_v29  ;;  %vm16478_vm4 = vcmask 1047559  }
 0x3c7   : > { %v4424_v42 = vrot.slane %v4423_v57, 2  ;;  %v6385_v53 = vsel %vm6129_vm0, 1.0, %v16458_v22  ;;  %v7609_v16 = vsel %vm7608_vm1, %v6384_v60, %v7607_v49  ;;  %vm3832_vm14 = vcmp.eq.s32.totalorder %v2136_v23, %v17166_v45 }
 0x3c8   : > { %v17202_v52 = vperm.slane %v17201_v8, 1  ;;  %v4411_v38 = vadd.s32 %v4410_v25, %v4409_v12  ;;  %v4430_v7 = vadd.s32 %v4429_v9, %v4428_v31  ;;  %v4449_v55 = vsel %vm4329_vm5, %v4090_v1, 0 }
 0x3c9   : > { %2450 = vperm.xlu1 %8683, %v17200_v47   ;;  %v2185_v27 = vpop.permute.xlu2 %2184  ;;  %v7611_v36 = vsel %vm16478_vm4, %v6385_v53, %v7609_v16  ;;  %v4398_v13 = vrot.slane %v4397_v46, 1  ;;  %v4443_v30 = vrot.slane %v4442_v4, 4  ;;  %v4088_v15 = vsel %vm3832_vm14, 1, %v16629_v3 }
 0x3ca   : > { %v7861_v41 = vsel %vm16477_vm3, %v7309_v59, %v7611_v36  ;;  %v4405_v23 = vrot.slane %v12952_v20, 1  ;;  %v4417_v29 = vrot.slane %v4416_v0, 2  ;;  %v4435_v12 = vsel %vm4329_vm5, %v4088_v15, 0 }
 0x3cb   : > { %v2157_v11 = vpop.permute.xlu1 %2156  ;;  %2485 = vperm.xlu0 %8684, %v17202_v52   ;;  %8271 = vmatmul.msk.f32.vlgmr.msra.gmra.mxu0 %vm4329_vm5, %v7861_v41  ;;  %v17203_v31 = vperm.slane %v12331_v40, 5  ;;  %v4425_v25 = vadd.s32 %v4424_v42, %v4423_v57  ;;  %v4450_v9 = vrot.slane %v4449_v55, 4  ;;  %vm3836_vm2 = vcmp.eq.s32.totalorder %v12936_v34, %v17166_v45 }
 0x3cc   : > { %v4436_v59 = vrot.slane %v4435_v12, 4  ;;  %v12993_v1 = vsel %vm6130_vm15, 1.0, %v16458_v22  ;;  %v4412_v49 = vrot.slane %v4411_v38, 1  ;;  %v4431_v53 = vrot.slane %v4430_v7, 2 }
 0x3cd   : > { %v2192_v47 = vpop.permute.xlu0 %2191  ;;  %vm3835_vm12 = vcmp.eq.s32.totalorder %v2157_v11, %v17166_v45  ;;  %v17204_v16 = vperm.slane %v12331_v40, 7  ;;  %v4399_v52 = vadd.s32 %v4398_v13, %v4397_v46  ;;  %v4444_v36 = vadd.s32 %v4443_v30, %v4442_v4 }
 0x3ce   : > { %2457 = vperm.xlu2 %8685, %v17203_v31   ;;  %v4437_v57 = vadd.s32 %v4436_v59, %v4435_v12  ;;  %vm3837_vm10 = vcmp.eq.s32.totalorder %v12954_v26, %v17166_v45  ;;  %v4418_v42 = vadd.s32 %v4417_v29, %v4416_v0  ;;  %v4092_v19 = vsel %vm3836_vm2, 1, %v16629_v3 }
 0x3cf   : > { %vm3839_vm15 = vcmp.eq.s32.totalorder %v2185_v27, %v17166_v45  ;;  %v4091_v41 = vsel %vm3835_vm12, 1, %v16629_v3  ;;  %v4406_v11 = vadd.s32 %v4405_v23, %v12952_v20  ;;  %v4426_v40 = vrot.slane %v4425_v25, 1 }
 0x3d0   : > { %v4451_v31 = vadd.s32 %v4450_v9, %v4449_v55  ;;  %v4438_v46 = vrot.slane %v4437_v57, 2  ;;  %v17205_v4 = vperm.slane %v17201_v8, 4  ;;  %v4432_v13 = vadd.s32 %v4431_v53, %v4430_v7 }
 0x3d1   : > { %2471 = vperm.xlu1 %8683, %v17204_v16   ;;  %v13000_v34 = vpop.permute.xlu2 %2205  ;;  %v4093_v26 = vsel %vm3837_vm10, 1, %v16629_v3  ;;  %v4456_v0 = vsel %vm4329_vm5, %v4091_v41, 0  ;;  %vm3840_vm8 = vcmp.eq.s32.totalorder %v2192_v47, %v17166_v45  ;;  %v4445_v30 = vrot.slane %v4444_v36, 2 }
 0x3d2   : > { %v4463_v27 = vsel %vm4329_vm5, %v4092_v19, 0  ;;  %v4095_v29 = vsel %vm3839_vm15, 1, %v16629_v3  ;;  %v4457_v12 = vrot.slane %v4456_v0, 4  ;;  %v4413_v55 = vadd.s32 %v4412_v49, %v4411_v38 }
 0x3d3   : > { %v2178_v15 = vpop.permute.xlu1 %2177  ;;  %2506 = vperm.xlu0 %8684, %v17205_v4   ;;  %vm6131_vm0 = vcmp.gt.s32.totalorder %v4399_v52, 0  ;;  %v4419_v23 = vrot.slane %v4418_v42, 1  ;;  %v17206_v7 = vperm.slane %v17201_v8, 0  ;;  %v4452_v9 = vrot.slane %v4451_v31, 2 }
 0x3d4   : > { %vm3838_vm14 = vcmp.eq.s32.totalorder %v2178_v15, %v17166_v45  ;;  %v4439_v59 = vadd.s32 %v4438_v46, %v4437_v57  ;;  %v4470_v47 = vsel %vm4329_vm5, %v4093_v26, 0  ;;  %v4096_v53 = vsel %vm3840_vm8, 1, %v16629_v3 }
 0x3d5   : > { %v13013_v20 = vpop.permute.xlu0 %2212  ;;  %v4464_v16 = vrot.slane %v4463_v27, 4  ;;  %v4484_v19 = vsel %vm4329_vm5, %v4095_v29, 0  ;;  %v4458_v41 = vadd.s32 %v4457_v12, %v4456_v0  ;;  %v4094_v4 = vsel %vm3838_vm14, 1, %v16629_v3 }
 0x3d6   : > { %2478 = vperm.xlu2 %8685, %v17206_v7   ;;  %v17207_v38 = vperm.slane %v17201_v8, 2  ;;  %v4427_v49 = vadd.s32 %v4426_v40, %v4425_v25  ;;  %v6387_v52 = vsel %vm6131_vm0, 1.0, %v16458_v22  ;;  %v4433_v15 = vrot.slane %v4432_v13, 1 }
 0x3d7   : > { %v4446_v7 = vadd.s32 %v4445_v30, %v4444_v36  ;;  %v4420_v57 = vadd.s32 %v4419_v23, %v4418_v42  ;;  %v4471_v46 = vrot.slane %v4470_v47, 4  ;;  %v4491_v26 = vsel %vm4329_vm5, %v4096_v53, 0 }
 0x3d8   : > { %v4477_v44 = vsel %vm4329_vm5, %v4094_v4, 0  ;;  %vm6132_vm2 = vcmp.gt.s32.totalorder %v4406_v11, 0  ;;  %v4453_v0 = vadd.s32 %v4452_v9, %v4451_v31  ;;  %v4440_v12 = vrot.slane %v4439_v59, 1 }
 0x3d9   : > { %2492 = vperm.xlu1 %8683, %v17207_v38   ;;  %v13025_v60 = vpop.permute.xlu2 %2226  ;;  %v4485_v58 = vrot.slane %v4484_v19, 4  ;;  %v17208_v25 = vperm.slane %v17201_v8, 7  ;;  %v17209_v40 = vand.u32 1, %v12780_v63  ;;  %vm6133_vm10 = vcmp.gt.s32.totalorder %v4413_v55, 0 }
 0x3da   : > { %v4465_v42 = vadd.s32 %v4464_v16, %v4463_v27  ;;  %v4459_v30 = vrot.slane %v4458_v41, 2  ;;  %v4478_v23 = vrot.slane %v4477_v44, 4  ;;  %vm6135_vm15 = vcmp.gt.s32.totalorder %v4427_v49, 0 }
 0x3db   : > { %v13029_v29 = vpop.permute.xlu1 %2198  ;;  %2527 = vperm.xlu0 %8684, %v17208_v25   ;;  %vm13035_vm12 = vcmp.eq.s32.totalorder %v17209_v40, 1  ;;  %v7612_v53 = vsel %vm16476_vm13, %v6387_v52, %v12993_v1  ;;  %v4434_v31 = vadd.s32 %v4433_v15, %v4432_v13  ;;  %v4492_v9 = vrot.slane %v4491_v26, 4 }
 0x3dc   : > { %v4447_v38 = vrot.slane %v4446_v7, 1  ;;  %vm6134_vm8 = vcmp.gt.s32.totalorder %v4420_v57, 0  ;;  %v4472_v25 = vadd.s32 %v4471_v46, %v4470_v47  ;;  %v4479_v63 = vadd.s32 %v4478_v23, %v4477_v44 }
 0x3dd   : > { %v13041_v4 = vpop.permute.xlu0 %2233  ;;  %v17212_v40 = vperm.slane %v17201_v8, 3  ;;  %v6388_v27 = vsel %vm6132_vm2, 1.0, %v16458_v22  ;;  %v4454_v16 = vrot.slane %v4453_v0, 1  ;;  %v4486_v33 = vadd.s32 %v4485_v58, %v4484_v19 }
 0x3de   : > { %v4441_v37 = vadd.s32 %v4440_v12, %v4439_v59  ;;  %v6389_v1 = vsel %vm6133_vm10, 1.0, %v16458_v22  ;;  %v7613_v13 = vsel %vm7600_vm6, %v6388_v27, %v7612_v53  ;;  %v4466_v52 = vrot.slane %v4465_v42, 2 }
 0x3df   : > { %2499 = vperm.xlu2 %8685, %v17212_v40   ;;  %v4460_v15 = vadd.s32 %v4459_v30, %v4458_v41  ;;  %v17213_v57 = vperm.slane %v17201_v8, 5  ;;  %v6391_v44 = vsel %vm6135_vm15, 1.0, %v16458_v22  ;;  %v6390_v47 = vsel %vm6134_vm8, 1.0, %v16458_v22 }
 0x3e0   : > { %v4493_v11 = vadd.s32 %v4492_v9, %v4491_v26  ;;  %vm6137_vm0 = vcmp.gt.s32.totalorder %v4441_v37, 0  ;;  %vm6136_vm14 = vcmp.gt.s32.totalorder %v4434_v31, 0  ;;  %v13057_v58 = vadd.s32 %v4447_v38, %v4446_v7 }
 0x3e1   : > { %2513 = vperm.xlu1 %8683, %v17213_v57   ;;  %v13055_v46 = vpop.permute.xlu2 %2247  ;;  %v4473_v55 = vrot.slane %v4472_v25, 2  ;;  %v4480_v59 = vrot.slane %v4479_v63, 2  ;;  %v4455_v12 = vadd.s32 %v4454_v16, %v4453_v0  ;;  %v4487_v41 = vrot.slane %v4486_v33, 2 }
 0x3e2   : > { %vm3842_vm2 = vcmp.eq.s32.totalorder %v13000_v34, %v17166_v45  ;;  %v7614_v49 = vsel %vm7602_vm11, %v6389_v1, %v7613_v13  ;;  %v17214_v30 = vperm.slane %v17139_v62, 2  ;;  %v4467_v26 = vadd.s32 %v4466_v52, %v4465_v42 }
 0x3e3   : > { %v2220_v19 = vpop.permute.xlu1 %2219  ;;  %v4461_v37 = vrot.slane %v4460_v15, 1  ;;  %v6393_v23 = vsel %vm6137_vm0, 1.0, %v16458_v22  ;;  %v7615_v7 = vsel %vm7604_vm9, %v6390_v47, %v7614_v49  ;;  %v4494_v53 = vrot.slane %v4493_v11, 2 }
 0x3e4   : > { %2548 = vperm.xlu0 %8684, %v17214_v30   ;;  %v6392_v31 = vsel %vm6136_vm14, 1.0, %v16458_v22  ;;  %v7616_v0 = vsel %vm7606_vm7, %v6391_v44, %v7615_v7  ;;  %vm3841_vm10 = vcmp.eq.s32.totalorder %v13029_v29, %v17166_v45  ;;  %v4474_v38 = vadd.s32 %v4473_v55, %v4472_v25 }
 0x3e5   : > { %v13070_v9 = vpop.permute.xlu0 %2254  ;;  %v4481_v40 = vadd.s32 %v4480_v59, %v4479_v63  ;;  %vm3843_vm15 = vcmp.eq.s32.totalorder %v13013_v20, %v17166_v45  ;;  %v7617_v42 = vsel %vm7608_vm1, %v6392_v31, %v7616_v0  ;;  %v17215_v27 = vperm.slane %v17201_v8, 6 }
 0x3e6   : > { %v4488_v16 = vadd.s32 %v4487_v41, %v4486_v33  ;;  %v7310_v1 = vsel %vm13035_vm12, 1.0, %v16458_v22  ;;  %v7618_v13 = vsel %vm16478_vm4, %v6393_v23, %v7617_v42  ;;  %v4097_v29 = vsel %vm3841_vm10, 1, %v16629_v3 }
 0x3e7   : > { %2520 = vperm.xlu2 %8685, %v17215_v27   ;;  %v4468_v52 = vrot.slane %v4467_v26, 1  ;;  %v4462_v25 = vadd.s32 %v4461_v37, %v4460_v15  ;;  %v4098_v20 = vsel %vm3842_vm2, 1, %v16629_v3  ;;  %v7862_v8 = vsel %vm16477_vm3, %v7310_v1, %v7618_v13 }
 0x3e8   : > { %v17216_v33 = vperm.slane %v17139_v62, 0  ;;  %vm6138_vm8 = vcmp.gt.s32.totalorder %v13057_v58, 0  ;;  %vm6139_vm12 = vcmp.gt.s32.totalorder %v4455_v12, 0  ;;  %v4495_v36 = vadd.s32 %v4494_v53, %v4493_v11  ;;  %8272 = vmatmul.msk.f32.gmra.mxu0 %vm4329_vm5, %v7862_v8 }
 0x3e9   : > { %v4099_v63 = vsel %vm3843_vm15, 1, %v16629_v3  ;;  %v13093_v15 = vpop.permute.xlu2 %2268  ;;  %v4482_v57 = vrot.slane %v4481_v40, 1  ;;  %vm3845_vm0 = vcmp.eq.s32.totalorder %v13025_v60, %v17166_v45  ;;  %v4498_v34 = vsel %vm4329_vm5, %v4097_v29, 0 }
 0x3ea   : > { %2534 = vperm.xlu1 %8683, %v17216_v33   ;;  %vm3846_vm14 = vcmp.eq.s32.totalorder %v13041_v4, %v17166_v45  ;;  %v4475_v47 = vrot.slane %v4474_v38, 1  ;;  %v4489_v55 = vrot.slane %v4488_v16, 1  ;;  %v4505_v11 = vsel %vm4329_vm5, %v4098_v20, 0 }
 0x3eb   : > { %v13100_v44 = vpop.permute.xlu1 %2240  ;;  %vm3844_vm2 = vcmp.eq.s32.totalorder %v2220_v19, %v17166_v45  ;;  %v17217_v59 = vperm.slane %v17139_v62, 5  ;;  %v6395_v12 = vsel %vm6139_vm12, 1.0, %v16458_v22  ;;  %v4469_v41 = vadd.s32 %v4468_v52, %v4467_v26 }
 0x3ec   : > { %vm6140_vm10 = vcmp.gt.s32.totalorder %v4462_v25, 0  ;;  %v4512_v60 = vsel %vm4329_vm5, %v4099_v63, 0  ;;  %v4101_v49 = vsel %vm3845_vm0, 1, %v16629_v3  ;;  %v4499_v4 = vrot.slane %v4498_v34, 4 }
 0x3ed   : > { %2569 = vperm.xlu0 %8684, %v17217_v59   ;;  %v4102_v30 = vsel %vm3846_vm14, 1, %v16629_v3  ;;  %v4100_v37 = vsel %vm3844_vm2, 1, %v16629_v3  ;;  %v13111_v23 = vpop.permute.xlu0 %2275  ;;  %v4496_v7 = vrot.slane %v4495_v36, 1  ;;  %v4506_v19 = vrot.slane %v4505_v11, 4 }
 0x3ee   : > { %v4483_v53 = vadd.s32 %v4482_v57, %v4481_v40  ;;  %v4519_v31 = vsel %vm4329_vm5, %v4100_v37, 0  ;;  %v17218_v0 = vperm.slane %v17139_v62, 1  ;;  %v6394_v26 = vsel %vm6138_vm8, 1.0, %v16458_v22 }
 0x3ef   : > { %v4476_v42 = vadd.s32 %v4475_v47, %v4474_v38  ;;  %v4490_v27 = vadd.s32 %v4489_v55, %v4488_v16  ;;  %vm3848_vm15 = vcmp.eq.s32.totalorder %v13055_v46, %v17166_v45  ;;  %v6396_v1 = vsel %vm6140_vm10, 1.0, %v16458_v22 }
 0x3f0   : > { %2541 = vperm.xlu2 %8685, %v17218_v0   ;;  %v4513_v13 = vrot.slane %v4512_v60, 4  ;;  %v4526_v40 = vsel %vm4329_vm5, %v4101_v49, 0  ;;  %v4533_v29 = vsel %vm4329_vm5, %v4102_v30, 0  ;;  %v17219_v52 = vperm.slane %v17139_v62, 3 }
 0x3f1   : > { %v7619_v20 = vsel %vm16476_vm13, %v6395_v12, %v6394_v26  ;;  %vm6141_vm12 = vcmp.gt.s32.totalorder %v4469_v41, 0  ;;  %v4500_v58 = vadd.s32 %v4499_v4, %v4498_v34  ;;  %v4520_v38 = vrot.slane %v4519_v31, 4  ;;  %v13128_v16 = vpop.permute.xlu2 %2289 }
 0x3f2   : > { %2555 = vperm.xlu1 %8683, %v17219_v52   ;;  %v4507_v8 = vadd.s32 %v4506_v19, %v4505_v11  ;;  %vm6143_vm8 = vcmp.gt.s32.totalorder %v4483_v53, 0  ;;  %v4104_v46 = vsel %vm3848_vm15, 1, %v16629_v3  ;;  %v4497_v25 = vadd.s32 %v4496_v7, %v4495_v36  ;;  %v17225_v53 = vld [vmem:[#allocation9_spill] sm:$0xff] }
 0x3f3   : > { %v13131_v33 = vpop.permute.xlu1 %2261  ;;  %vm6142_vm0 = vcmp.gt.s32.totalorder %v4476_v42, 0  ;;  %v7620_v63 = vsel %vm7600_vm6, %v6396_v1, %v7619_v20  ;;  %v4527_v57 = vrot.slane %v4526_v40, 4  ;;  %v4534_v47 = vrot.slane %v4533_v29, 4 }
 0x3f4   : > { %v17220_v55 = vperm.slane %v17140_v48, 0  ;;  %v17221_v34 = vand.u32 1, %v12894_v28  ;;  %v6397_v11 = vsel %vm6141_vm12, 1.0, %v16458_v22  ;;  %vm6144_vm2 = vcmp.gt.s32.totalorder %v4490_v27, 0 }
 0x3f5   : > { %v4514_v36 = vadd.s32 %v4513_v13, %v4512_v60  ;;  %v6399_v12 = vsel %vm6143_vm8, 1.0, %v16458_v22  ;;  %v4501_v41 = vrot.slane %v4500_v58, 2  ;;  %v4547_v49 = vsel %vm4329_vm5, %v4104_v46, 0  ;;  %v13145_v30 = vpop.permute.xlu0 %2296 }
 0x3f6   : > { %2590 = vperm.xlu0 %8684, %v17220_v55   ;;  %vm13138_vm14 = vcmp.eq.s32.totalorder %v17221_v34, 1  ;;  %v4521_v4 = vadd.s32 %v4520_v38, %v4519_v31  ;;  %v6398_v37 = vsel %vm6142_vm0, 1.0, %v16458_v22  ;;  %v4508_v7 = vrot.slane %v4507_v8, 2 }
 0x3f7   : > { %vm6145_vm10 = vcmp.gt.s32.totalorder %v4497_v25, 0  ;;  %v7621_v28 = vsel %vm7602_vm11, %v6397_v11, %v7620_v63  ;;  %v17224_v19 = vperm.slane %v17139_v62, 4  ;;  %v6821_v0 = vcvt.f32.s32 %v17225_v53 }
 0x3f8   : > { %v4528_v60 = vadd.s32 %v4527_v57, %v4526_v40  ;;  %v4535_v26 = vadd.s32 %v4534_v47, %v4533_v29  ;;  %v7622_v42 = vsel %vm7604_vm9, %v6398_v37, %v7621_v28  ;;  %v4515_v1 = vrot.slane %v4514_v36, 2 }
 0x3f9   : > { %2562 = vperm.xlu2 %8685, %v17224_v19   ;;  %v4548_v13 = vrot.slane %v4547_v49, 4  ;;  %v6400_v31 = vsel %vm6144_vm2, 1.0, %v16458_v22  ;;  %v7623_v52 = vsel %vm7606_vm7, %v6399_v12, %v7622_v42  ;;  %v17226_v20 = vperm.slane %v17139_v62, 6  ;;  %v13160_v40 = vpop.permute.xlu2 %2310 }
 0x3fa   : > { %v4502_v38 = vadd.s32 %v4501_v41, %v4500_v58  ;;  %v4522_v46 = vrot.slane %v4521_v4, 2  ;;  %v6401_v25 = vsel %vm6145_vm10, 1.0, %v16458_v22  ;;  %v7624_v63 = vsel %vm7608_vm1, %v6400_v31, %v7623_v52 }
 0x3fb   : > { %2576 = vperm.xlu1 %8683, %v17226_v20   ;;  %v4509_v29 = vadd.s32 %v4508_v7, %v4507_v8  ;;  %v7311_v57 = vsel %vm13138_vm14, 1.0, %v16458_v22  ;;  %v7625_v27 = vsel %vm16478_vm4, %v6401_v25, %v7624_v63  ;;  %vm3847_vm15 = vcmp.eq.s32.totalorder %v13100_v44, %v17166_v45  ;;  %v13168_v47 = vpop.permute.xlu1 %2282 }
 0x3fc   : > { %v4529_v58 = vrot.slane %v4528_v60, 2  ;;  %v4536_v55 = vrot.slane %v4535_v26, 2  ;;  %v7863_v34 = vsel %vm16477_vm3, %v7311_v57, %v7625_v27  ;;  %v4103_v11 = vsel %vm3847_vm15, 1, %v16629_v3 }
 0x3fd   : > { %v17227_v8 = vperm.slane %v17140_v48, 3  ;;  %v4516_v12 = vadd.s32 %v4515_v1, %v4514_v36  ;;  %v4549_v59 = vadd.s32 %v4548_v13, %v4547_v49  ;;  %vm3849_vm12 = vcmp.eq.s32.totalorder %v13070_v9, %v17166_v45  ;;  %8273 = vmatmul.msk.f32.gmra.mxu0 %vm4329_vm5, %v7863_v34  ;;  %v13179_v28 = vpop.permute.xlu0 %2317 }
 0x3fe   : > { %v4540_v44 = vsel %vm4329_vm5, %v4103_v11, 0  ;;  %v4503_v41 = vrot.slane %v4502_v38, 1  ;;  %v4523_v37 = vadd.s32 %v4522_v46, %v4521_v4  ;;  %v4510_v42 = vrot.slane %v4509_v29, 1 }
 0x3ff   : > { %2611 = vperm.xlu0 %8684, %v17227_v8   ;;  %v4541_v7 = vrot.slane %v4540_v44, 4  ;;  %vm3850_vm8 = vcmp.eq.s32.totalorder %v13131_v33, %v17166_v45  ;;  %v17228_v36 = vperm.slane %v17139_v62, 7  ;;  %v4530_v49 = vadd.s32 %v4529_v58, %v4528_v60 }
 0x400   : > { %v4537_v1 = vadd.s32 %v4536_v55, %v4535_v26  ;;  %v4105_v4 = vsel %vm3849_vm12, 1, %v16629_v3  ;;  %v13190_v31 = vadd.s32 %v12718_v51, %v6821_v0  ;;  %v4517_v52 = vrot.slane %v4516_v12, 1  ;;  %v17230_v26 = vld [vmem:[#allocation67_spill] sm:$0xff] }
 0x401   : > { %2583 = vperm.xlu2 %8685, %v17228_v36   ;;  %v4542_v13 = vadd.s32 %v4541_v7, %v4540_v44  ;;  %v4550_v20 = vrot.slane %v4549_v59, 2  ;;  %v17229_v46 = vperm.slane %v17140_v48, 1  ;;  %v4504_v25 = vadd.s32 %v4503_v41, %v4502_v38  ;;  %v13196_v60 = vpop.permute.xlu2 %2331  ;;  %v17232_v44 = vld [vmem:[#allocation52_spill] sm:$0xff] }
 0x402   : > { %v4524_v62 = vrot.slane %v4523_v37, 1  ;;  %v4106_v57 = vsel %vm3850_vm8, 1, %v16629_v3  ;;  %v6926_v27 = vcvt.f32.s32 %v17230_v26  ;;  %v4511_v58 = vadd.s32 %v4510_v42, %v4509_v29 }
 0x403   : > { %2597 = vperm.xlu1 %8683, %v17229_v46   ;;  %v4543_v63 = vrot.slane %v4542_v13, 2  ;;  %v4554_v51 = vsel %vm4329_vm5, %v4105_v4, 0  ;;  %v4531_v55 = vrot.slane %v4530_v49, 1  ;;  %v4538_v34 = vrot.slane %v4537_v1, 1  ;;  %v13208_v42 = vpop.permute.xlu1 %2303 }
 0x404   : > { %vm3851_vm0 = vcmp.eq.s32.totalorder %v13093_v15, %v17166_v45  ;;  %v17231_v38 = vperm.slane %v17140_v48, 6  ;;  %v7248_v8 = vand.u32 1, %v13190_v31  ;;  %v7061_v41 = vcvt.f32.s32 %v17232_v44 }
 0x405   : > { %v4544_v11 = vadd.s32 %v4543_v63, %v4542_v13  ;;  %v4551_v7 = vadd.s32 %v4550_v20, %v4549_v59  ;;  %v4561_v29 = vsel %vm4329_vm5, %v4106_v57, 0  ;;  %v4518_v36 = vadd.s32 %v4517_v52, %v4516_v12  ;;  %v13212_v15 = vpop.permute.xlu0 %2338 }
 0x406   : > { %vm6146_vm14 = vcmp.gt.s32.totalorder %v4504_v25, 0  ;;  %v4525_v4 = vadd.s32 %v4524_v62, %v4523_v37  ;;  %vm3853_vm2 = vcmp.eq.s32.totalorder %v13168_v47, %v17166_v45  ;;  %v4555_v13 = vrot.slane %v4554_v51, 4 }
 0x407   : > { %2632 = vperm.xlu0 %8684, %v17231_v38   ;;  %v4107_v46 = vsel %vm3851_vm0, 1, %v16629_v3  ;;  %v4545_v63 = vrot.slane %v4544_v11, 1  ;;  %vm3852_vm10 = vcmp.eq.s32.totalorder %v13111_v23, %v17166_v45  ;;  %v17233_v59 = vperm.slane %v17140_v48, 2 }
 0x408   : > { %vm6147_vm15 = vcmp.gt.s32.totalorder %v4511_v58, 0  ;;  %v4532_v31 = vadd.s32 %v4531_v55, %v4530_v49  ;;  %v4539_v12 = vadd.s32 %v4538_v34, %v4537_v1  ;;  %v4562_v52 = vrot.slane %v4561_v29, 4 }
 0x409   : > { %2604 = vperm.xlu2 %8685, %v17233_v59   ;;  %v6402_v37 = vsel %vm6146_vm14, 1.0, %v16458_v22  ;;  %v4552_v20 = vrot.slane %v4551_v7, 1  ;;  %vm3854_vm12 = vcmp.eq.s32.totalorder %v13128_v16, %v17166_v45  ;;  %v4109_v47 = vsel %vm3853_vm2, 1, %v16629_v3  ;;  %v13229_v49 = vpop.permute.xlu2 %2352 }
 0x40a   : > { %v17234_v25 = vperm.slane %v17140_v48, 4  ;;  %vm6149_vm8 = vcmp.gt.s32.totalorder %v4525_v4, 0  ;;  %v4568_v23 = vsel %vm4329_vm5, %v4107_v46, 0  ;;  %v4108_v62 = vsel %vm3852_vm10, 1, %v16629_v3 }
 0x40b   : > { %vm3855_vm0 = vcmp.eq.s32.totalorder %v13145_v30, %v17166_v45  ;;  %v6403_v1 = vsel %vm6147_vm15, 1.0, %v16458_v22  ;;  %vm6148_vm14 = vcmp.gt.s32.totalorder %v4518_v36, 0  ;;  %v4556_v57 = vadd.s32 %v4555_v13, %v4554_v51  ;;  %v13240_v36 = vpop.permute.xlu1 %2324 }
 0x40c   : > { %2618 = vperm.xlu1 %8683, %v17234_v25   ;;  %v4546_v16 = vadd.s32 %v4545_v63, %v4544_v11  ;;  %v7626_v58 = vsel %vm16476_vm13, %v6403_v1, %v6402_v37  ;;  %v4110_v55 = vsel %vm3854_vm12, 1, %v16629_v3  ;;  %v4563_v34 = vadd.s32 %v4562_v52, %v4561_v29 }
 0x40d   : > { %v4582_v38 = vsel %vm4329_vm5, %v4109_v47, 0  ;;  %v17235_v4 = vperm.slane %v17144_v35, 1  ;;  %v6405_v46 = vsel %vm6149_vm8, 1.0, %v16458_v22  ;;  %v4569_v30 = vrot.slane %v4568_v23, 4  ;;  %v13243_v29 = vpop.permute.xlu0 %2359 }
 0x40e   : > { %v4575_v59 = vsel %vm4329_vm5, %v4108_v62, 0  ;;  %v4111_v25 = vsel %vm3855_vm0, 1, %v16629_v3  ;;  %v6404_v51 = vsel %vm6148_vm14, 1.0, %v16458_v22  ;;  %vm6150_vm2 = vcmp.gt.s32.totalorder %v4532_v31, 0 }
 0x40f   : > { %2653 = vperm.xlu0 %8684, %v17235_v4   ;;  %vm6151_vm10 = vcmp.gt.s32.totalorder %v4539_v12, 0  ;;  %v4553_v11 = vadd.s32 %v4552_v20, %v4551_v7  ;;  %v7627_v13 = vsel %vm7600_vm6, %v6404_v51, %v7626_v58  ;;  %vm6152_vm15 = vcmp.gt.s32.totalorder %v4546_v16, 0  ;;  %v17239_v7 = vld [vmem:[#allocation57_spill] sm:$0xff] }
 0x410   : > { %v4589_v63 = vsel %vm4329_vm5, %v4110_v55, 0  ;;  %v4583_v52 = vrot.slane %v4582_v38, 4  ;;  %v17236_v37 = vperm.slane %v17140_v48, 5  ;;  %v7628_v47 = vsel %vm7602_vm11, %v6405_v46, %v7627_v13 }
 0x411   : > { %v4576_v62 = vrot.slane %v4575_v59, 4  ;;  %v4564_v1 = vrot.slane %v4563_v34, 2  ;;  %v4596_v4 = vsel %vm4329_vm5, %v4111_v25, 0  ;;  %vm13251_vm12 = vcmp.eq.s32.totalorder %v7248_v8, 1  ;;  %v13262_v25 = vpop.permute.xlu2 %2373 }
 0x412   : > { %2625 = vperm.xlu2 %8685, %v17236_v37   ;;  %v7181_v20 = vcvt.f32.s32 %v17239_v7  ;;  %v4557_v58 = vrot.slane %v4556_v57, 2  ;;  %v4570_v51 = vadd.s32 %v4569_v30, %v4568_v23  ;;  %v17240_v55 = vperm.slane %v17140_v48, 7 }
 0x413   : > { %v6406_v37 = vsel %vm6150_vm2, 1.0, %v16458_v22  ;;  %v4590_v0 = vrot.slane %v4589_v63, 4  ;;  %vm6153_vm8 = vcmp.gt.s32.totalorder %v4553_v11, 0  ;;  %v6408_v46 = vsel %vm6152_vm15, 1.0, %v16458_v22  ;;  %v13274_v9 = vpop.permute.xlu1 %2345 }
 0x414   : > { %2639 = vperm.xlu1 %8683, %v17240_v55   ;;  %v6407_v8 = vsel %vm6151_vm10, 1.0, %v16458_v22  ;;  %v4597_v13 = vrot.slane %v4596_v4, 4  ;;  %v4584_v7 = vadd.s32 %v4583_v52, %v4582_v38  ;;  %v7629_v23 = vsel %vm7604_vm9, %v6406_v37, %v7628_v47 }
 0x415   : > { %v4577_v30 = vadd.s32 %v4576_v62, %v4575_v59  ;;  %v4565_v48 = vadd.s32 %v4564_v1, %v4563_v34  ;;  %v7630_v55 = vsel %vm7606_vm7, %v6407_v8, %v7629_v23  ;;  %vm3856_vm0 = vcmp.eq.s32.totalorder %v13208_v42, %v17166_v45  ;;  %v13288_v1 = vpop.permute.xlu0 %2380 }
 0x416   : > { %v17241_v31 = vperm.slane %v17144_v35, 4  ;;  %v4558_v16 = vadd.s32 %v4557_v58, %v4556_v57  ;;  %v4571_v11 = vrot.slane %v4570_v51, 2  ;;  %v6409_v33 = vsel %vm6153_vm8, 1.0, %v16458_v22 }
 0x417   : > { %v7631_v12 = vsel %vm7608_vm1, %v6408_v46, %v7630_v55  ;;  %v4591_v38 = vadd.s32 %v4590_v0, %v4589_v63  ;;  %v7312_v34 = vsel %vm13251_vm12, 1.0, %v16458_v22  ;;  %v4112_v42 = vsel %vm3856_vm0, 1, %v16629_v3 }
 0x418   : > { %2674 = vperm.xlu0 %8684, %v17241_v31   ;;  %v7632_v59 = vsel %vm16478_vm4, %v6409_v33, %v7631_v12  ;;  %v13284_v57 = vadd.s32 %v12712_v32, %v6926_v27  ;;  %v4598_v52 = vadd.s32 %v4597_v13, %v4596_v4  ;;  %v4585_v47 = vrot.slane %v4584_v7, 2 }
 0x419   : > { %v7864_v62 = vsel %vm16477_vm3, %v7312_v34, %v7632_v59  ;;  %v17242_v0 = vperm.slane %v17144_v35, 0  ;;  %v13295_v53 = vadd.s32 %v12676_v6, %v7061_v41  ;;  %v4578_v33 = vrot.slane %v4577_v30, 2  ;;  %v13306_v46 = vpop.permute.xlu2 %2394 }
 0x41a   : > { %v4566_v26 = vrot.slane %v4565_v48, 1  ;;  %8274 = vmatmul.msk.f32.gmra.mxu0 %vm4329_vm5, %v7864_v62  ;;  %v4603_v32 = vsel %vm4329_vm5, %v4112_v42, 0  ;;  %v4572_v27 = vadd.s32 %v4571_v11, %v4570_v51  ;;  %v17243_v4 = vperm.slane %v17144_v35, 2 }
 0x41b   : > { %2646 = vperm.xlu2 %8685, %v17242_v0   ;;  %v4604_v63 = vrot.slane %v4603_v32, 4  ;;  %v13304_v44 = vadd.s32 %v12674_v14, %v7181_v20  ;;  %v4559_v6 = vrot.slane %v4558_v16, 1  ;;  %v4592_v41 = vrot.slane %v4591_v38, 2  ;;  %v17246_v14 = vld [vmem:[#allocation46_spill] sm:$0xff]  ;;  %v13314_v62 = vpop.permute.xlu1 %2366 }
 0x41c   : > { %2660 = vperm.xlu1 %8683, %v17243_v4   ;;  %v4599_v51 = vrot.slane %v4598_v52, 2  ;;  %v4586_v23 = vadd.s32 %v4585_v47, %v4584_v7  ;;  %v4579_v11 = vadd.s32 %v4578_v33, %v4577_v30  ;;  %v4567_v12 = vadd.s32 %v4566_v26, %v4565_v48  ;;  %v17248_v7 = vld [vmem:[#allocation59_spill] sm:$0xff] }
 0x41d   : > { %17244 = vst [vmem:[#allocation21_spill] sm:$0xff] %v13304_v44  ;;  %v4605_v55 = vadd.s32 %v4604_v63, %v4603_v32  ;;  %v17245_v34 = vperm.slane %v17144_v35, 7  ;;  %v4573_v59 = vrot.slane %v4572_v27, 1  ;;  %v4560_v47 = vadd.s32 %v4559_v6, %v4558_v16 }
 0x41e   : > { %v4593_v32 = vadd.s32 %v4592_v41, %v4591_v38  ;;  %v4600_v48 = vadd.s32 %v4599_v51, %v4598_v52  ;;  %vm3857_vm14 = vcmp.eq.s32.totalorder %v13160_v40, %v17166_v45  ;;  %v4587_v33 = vrot.slane %v4586_v23, 1  ;;  %v17249_v38 = vld [vmem:[#allocation26_spill] sm:$0xff]  ;;  %v13328_v52 = vpop.permute.xlu0 %2401 }
 0x41f   : > { %v4606_v42 = vrot.slane %v4605_v55, 2  ;;  %v17247_v26 = vperm.slane %v17144_v35, 3  ;;  %vm6155_vm2 = vcmp.gt.s32.totalorder %v4567_v12, 0  ;;  %v6941_v16 = vcvt.f32.s32 %v17248_v7  ;;  %v17252_v7 = vld [vmem:[#allocation37_spill] sm:$0xff] }
 0x420   : > { %2695 = vperm.xlu0 %8684, %v17245_v34   ;;  %v4580_v34 = vrot.slane %v4579_v11, 1  ;;  %v6836_v6 = vcvt.f32.s32 %v17249_v38  ;;  %v4574_v41 = vadd.s32 %v4573_v59, %v4572_v27  ;;  %v17250_v51 = vperm.slane %v17144_v35, 5 }
 0x421   : > { %v4607_v31 = vadd.s32 %v4606_v42, %v4605_v55  ;;  %vm6154_vm10 = vcmp.gt.s32.totalorder %v4560_v47, 0  ;;  %v4594_v19 = vrot.slane %v4593_v32, 1  ;;  %v4113_v55 = vsel %vm3857_vm14, 1, %v16629_v3  ;;  %v13338_v12 = vpop.permute.xlu2 %2415  ;;  %v17253_v47 = vld [vmem:[#allocation31_spill] sm:$0xff] }
 0x422   : > { %v6411_v27 = vsel %vm6155_vm2, 1.0, %v16458_v22  ;;  %v4601_v59 = vrot.slane %v4600_v48, 1  ;;  %v4588_v42 = vadd.s32 %v4587_v33, %v4586_v23  ;;  %vm3858_vm15 = vcmp.eq.s32.totalorder %v13179_v28, %v17166_v45 }
 0x423   : > { %2667 = vperm.xlu2 %8685, %v17247_v26   ;;  %v17251_v26 = vld [vmem:[#allocation39_spill] sm:$0xff]  ;;  %v7076_v38 = vcvt.f32.s32 %v17252_v7  ;;  %v17254_v37 = vperm.slane %v17253_v47, 2  ;;  %v6839_v40 = vadd.s32 %v12710_v18, %v6836_v6  ;;  %v6410_v63 = vsel %vm6154_vm10, 1.0, %v16458_v22  ;;  %v13350_v23 = vpop.permute.xlu1 %2387 }
 0x424   : > { %2681 = vperm.xlu1 %8683, %v17250_v51   ;;  %v7196_v58 = vcvt.f32.s32 %v17251_v26  ;;  %v4581_v51 = vadd.s32 %v4580_v34, %v4579_v11  ;;  %v4608_v26 = vrot.slane %v4607_v31, 1  ;;  %vm6156_vm12 = vcmp.gt.s32.totalorder %v4574_v41, 0 }
 0x425   : > { %v4610_v30 = vsel %vm4329_vm5, %v4113_v55, 0  ;;  %v4595_v33 = vadd.s32 %v4594_v19, %v4593_v32  ;;  %v7633_v28 = vsel %vm16476_vm13, %v6411_v27, %v6410_v63  ;;  %v4114_v11 = vsel %vm3858_vm15, 1, %v16629_v3 }
 0x426   : > { %vm3860_vm8 = vcmp.eq.s32.totalorder %v13196_v60, %v17166_v45  ;;  %v13360_v18 = vadd.s32 %v12702_v10, %v6941_v16  ;;  %v4602_v34 = vadd.s32 %v4601_v59, %v4600_v48  ;;  %vm6158_vm0 = vcmp.gt.s32.totalorder %v4588_v42, 0 }
 0x427   : > { %v17256_v6 = vperm.slane %v17144_v35, 6  ;;  %v6412_v19 = vsel %vm6156_vm12, 1.0, %v16458_v22  ;;  %vm6157_vm14 = vcmp.gt.s32.totalorder %v4581_v51, 0  ;;  %v4611_v32 = vrot.slane %v4610_v30, 4 }
 0x428   : > { %2716 = vperm.xlu0 %8684, %v17254_v37   ;;  %v13357_v37 = vadd.s32 %v12727_v39, %v7196_v58  ;;  %v4609_v63 = vadd.s32 %v4608_v26, %v4607_v31  ;;  %v7249_v41 = vand.u32 1, %v6839_v40  ;;  %v7634_v55 = vsel %vm7600_vm6, %v6412_v19, %v7633_v28  ;;  %v13368_v58 = vpop.permute.xlu0 %2422 }
 0x429   : > { %v4617_v60 = vsel %vm4329_vm5, %v4114_v11, 0  ;;  %v4116_v39 = vsel %vm3860_vm8, 1, %v16629_v3  ;;  %v17257_v10 = vperm.slane %v17253_v47, 0  ;;  %v13373_v35 = vadd.s32 %v12678_v2, %v7076_v38  ;;  %v13376_v31 = vpop.permute.xlu2 %2436 }
 0x42a   : > { %17255 = vst [vmem:[#allocation22_spill] sm:$0xff] %v13357_v37  ;;  %vm6159_vm2 = vcmp.gt.s32.totalorder %v4595_v33, 0  ;;  %v6414_v48 = vsel %vm6158_vm0, 1.0, %v16458_v22  ;;  %vm6161_vm10 = vcmp.gt.s32.totalorder %v4609_v63, 0  ;;  %v6413_v27 = vsel %vm6157_vm14, 1.0, %v16458_v22 }
 0x42b   : > { %2688 = vperm.xlu2 %8685, %v17256_v6   ;;  %17258 = vst [vmem:[#allocation9_spill] sm:$0xff] %v13373_v35  ;;  %vm6160_vm15 = vcmp.gt.s32.totalorder %v4602_v34, 0  ;;  %vm3861_vm12 = vcmp.eq.s32.totalorder %v13212_v15, %v17166_v45  ;;  %v4612_v59 = vadd.s32 %v4611_v32, %v4610_v30  ;;  %v4618_v42 = vrot.slane %v4617_v60, 4  ;;  %v13393_v15 = vpop.permute.xlu1 %2408  ;;  %v17263_v32 = vld [vmem:[#allocation58_spill] sm:$0xff] }
 0x42c   : > { %2702 = vperm.xlu1 %8683, %v17257_v10   ;;  %v4631_v7 = vsel %vm4329_vm5, %v4116_v39, 0  ;;  %v7635_v2 = vsel %vm7602_vm11, %v6413_v27, %v7634_v55  ;;  %v17259_v38 = vperm.slane %v17253_v47, 5  ;;  %vm13386_vm8 = vcmp.eq.s32.totalorder %v7249_v41, 1 }
 0x42d   : > { %v6415_v26 = vsel %vm6159_vm2, 1.0, %v16458_v22  ;;  %v6417_v40 = vsel %vm6161_vm10, 1.0, %v16458_v22  ;;  %v7636_v33 = vsel %vm7604_vm9, %v6414_v48, %v7635_v2  ;;  %v4117_v30 = vsel %vm3861_vm12, 1, %v16629_v3 }
 0x42e   : > { %vm3859_vm0 = vcmp.eq.s32.totalorder %v13240_v36, %v17166_v45  ;;  %v6416_v28 = vsel %vm6160_vm15, 1.0, %v16458_v22  ;;  %v7637_v11 = vsel %vm7606_vm7, %v6415_v26, %v7636_v33  ;;  %v4632_v34 = vrot.slane %v4631_v7, 4 }
 0x42f   : > { %v7638_v6 = vsel %vm7608_vm1, %v6416_v28, %v7637_v11  ;;  %v17262_v19 = vperm.slane %v17253_v47, 1  ;;  %v4613_v55 = vrot.slane %v4612_v59, 2  ;;  %v4619_v39 = vadd.s32 %v4618_v42, %v4617_v60 }
 0x430   : > { %2737 = vperm.xlu0 %8684, %v17259_v38   ;;  %v7313_v36 = vsel %vm13386_vm8, 1.0, %v16458_v22  ;;  %v7639_v10 = vsel %vm16478_vm4, %v6417_v40, %v7638_v6  ;;  %v4638_v48 = vsel %vm4329_vm5, %v4117_v30, 0  ;;  %vm3863_vm14 = vcmp.eq.s32.totalorder %v13229_v49, %v17166_v45  ;;  %v13415_v38 = vpop.permute.xlu0 %2443 }
 0x431   : > { %v4115_v27 = vsel %vm3859_vm0, 1, %v16629_v3  ;;  %v7865_v2 = vsel %vm16477_vm3, %v7313_v36, %v7639_v10  ;;  %v17264_v60 = vperm.slane %v17253_v47, 3  ;;  %v13422_v26 = vpop.permute.xlu2 %2457  ;;  %v4633_v30 = vadd.s32 %v4632_v34, %v4631_v7 }
 0x432   : > { %8275 = vmatmul.msk.f32.gmra.mxu0 %vm4329_vm5, %v7865_v2  ;;  %v4119_v36 = vsel %vm3863_vm14, 1, %v16629_v3  ;;  %v4624_v10 = vsel %vm4329_vm5, %v4115_v27, 0  ;;  %vm3866_vm2 = vcmp.eq.s32.totalorder %v13262_v25, %v17166_v45  ;;  %v17265_v2 = vld [vmem:[#allocation53_spill] sm:$0xff]  ;;  %v4614_v7 = vadd.s32 %v4613_v55, %v4612_v59  ;;  %v17267_v25 = vld [vmem:[#allocation8_spill] sm:$0xff] }
 0x433   : > { %2709 = vperm.xlu2 %8685, %v17262_v19   ;;  %v4639_v19 = vrot.slane %v4638_v48, 4  ;;  %v4620_v34 = vrot.slane %v4619_v39, 2  ;;  %vm3862_vm10 = vcmp.eq.s32.totalorder %v13274_v9, %v17166_v45  ;;  %vm3867_vm15 = vcmp.eq.s32.totalorder %v13288_v1, %v17166_v45  ;;  %v13442_v42 = vpop.permute.xlu1 %2429 }
 0x434   : > { %2723 = vperm.xlu1 %8683, %v17264_v60   ;;  %v17266_v60 = vperm.slane %v17265_v2, 0  ;;  %v6956_v49 = vcvt.f32.s32 %v12736_v43  ;;  %v7091_v27 = vcvt.f32.s32 %v12694_v24  ;;  %v4634_v11 = vrot.slane %v4633_v30, 2 }
 0x435   : > { %v4652_v59 = vsel %vm4329_vm5, %v4119_v36, 0  ;;  %v4625_v55 = vrot.slane %v4624_v10, 4  ;;  %v17268_v9 = vperm.slane %v17253_v47, 4  ;;  %v4640_v1 = vadd.s32 %v4639_v19, %v4638_v48 }
 0x436   : > { %v4118_v28 = vsel %vm3862_vm10, 1, %v16629_v3  ;;  %v4123_v43 = vsel %vm3867_vm15, 1, %v16629_v3  ;;  %vm3865_vm12 = vcmp.eq.s32.totalorder %v13314_v62, %v17166_v45  ;;  %v7211_v24 = vcvt.f32.s32 %v12670_v56 }
 0x437   : > { %v4615_v6 = vrot.slane %v4614_v7, 1  ;;  %v4621_v51 = vadd.s32 %v4620_v34, %v4619_v39  ;;  %v17269_v36 = vperm.slane %v17253_v47, 6  ;;  %vm3864_vm8 = vcmp.eq.s32.totalorder %v13243_v29, %v17166_v45 }
 0x438   : > { %2758 = vperm.xlu0 %8684, %v17266_v60   ;;  %v4122_v60 = vsel %vm3866_vm2, 1, %v16629_v3  ;;  %v13457_v33 = vpop.permute.xlu0 %2464  ;;  %vm3869_vm0 = vcmp.eq.s32.totalorder %v13306_v46, %v17166_v45  ;;  %v4626_v56 = vadd.s32 %v4625_v55, %v4624_v10  ;;  %v4645_v39 = vsel %vm4329_vm5, %v4118_v28, 0 }
 0x439   : > { %v4673_v48 = vsel %vm4329_vm5, %v4122_v60, 0  ;;  %v13467_v62 = vpop.permute.xlu2 %2478  ;;  %v4680_v19 = vsel %vm4329_vm5, %v4123_v43, 0  ;;  %v4121_v34 = vsel %vm3865_vm12, 1, %v16629_v3  ;;  %v13476_v40 = vadd.s32 %v12738_v50, %v7091_v27 }
 0x43a   : > { %v4635_v29 = vadd.s32 %v4634_v11, %v4633_v30  ;;  %v4641_v60 = vrot.slane %v4640_v1, 2  ;;  %v17271_v41 = vperm.slane %v17265_v2, 3  ;;  %v4622_v46 = vrot.slane %v4621_v51, 1 }
 0x43b   : > { %2730 = vperm.xlu2 %8685, %v17268_v9   ;;  %v4653_v9 = vrot.slane %v4652_v59, 4  ;;  %17270 = vst [vmem:[#allocation67_spill] sm:$0xff] %v13476_v40  ;;  %v4120_v10 = vsel %vm3864_vm8, 1, %v16629_v3  ;;  %v4674_v55 = vrot.slane %v4673_v48, 4  ;;  %v4125_v28 = vsel %vm3869_vm0, 1, %v16629_v3 }
 0x43c   : > { %2744 = vperm.xlu1 %8683, %v17269_v36   ;;  %v13473_v36 = vadd.s32 %v12708_v61, %v6956_v49  ;;  %v4646_v8 = vrot.slane %v4645_v39, 4  ;;  %v4681_v63 = vrot.slane %v4680_v19, 4  ;;  %v4666_v61 = vsel %vm4329_vm5, %v4121_v34, 0  ;;  %v13483_v49 = vpop.permute.xlu1 %2450 }
 0x43d   : > { %v4654_v43 = vadd.s32 %v4653_v9, %v4652_v59  ;;  %v13486_v50 = vadd.s32 %v12714_v21, %v7211_v24  ;;  %v4616_v30 = vadd.s32 %v4615_v6, %v4614_v7  ;;  %v4627_v11 = vrot.slane %v4626_v56, 2 }
 0x43e   : > { %vm3870_vm14 = vcmp.eq.s32.totalorder %v13328_v52, %v17166_v45  ;;  %v4636_v27 = vrot.slane %v4635_v29, 1  ;;  %v4642_v4 = vadd.s32 %v4641_v60, %v4640_v1  ;;  %v4659_v59 = vsel %vm4329_vm5, %v4120_v10, 0 }
 0x43f   : > { %17272 = vst [vmem:[#allocation52_spill] sm:$0xff] %v13486_v50  ;;  %v4694_v9 = vsel %vm4329_vm5, %v4125_v28, 0  ;;  %v4623_v0 = vadd.s32 %v4622_v46, %v4621_v51  ;;  %v4675_v20 = vadd.s32 %v4674_v55, %v4673_v48  ;;  %v4667_v21 = vrot.slane %v4666_v61, 4 }
 0x440   : > { %2779 = vperm.xlu0 %8684, %v17271_v41   ;;  %v17273_v41 = vperm.slane %v17253_v47, 7  ;;  %v13495_v24 = vpop.permute.xlu0 %2485  ;;  %v17274_v6 = vperm.slane %v17265_v2, 1  ;;  %v4655_v52 = vrot.slane %v4654_v43, 2  ;;  %v4647_v7 = vadd.s32 %v4646_v8, %v4645_v39 }
 0x441   : > { %v4682_v47 = vadd.s32 %v4681_v63, %v4680_v19  ;;  %v4628_v60 = vadd.s32 %v4627_v11, %v4626_v56  ;;  %v4660_v10 = vrot.slane %v4659_v59, 4  ;;  %v4695_v28 = vrot.slane %v4694_v9, 4  ;;  %v13501_v16 = vpop.permute.xlu2 %2499 }
 0x442   : > { %vm6162_vm2 = vcmp.gt.s32.totalorder %v4616_v30, 0  ;;  %v4637_v48 = vadd.s32 %v4636_v27, %v4635_v29  ;;  %v4643_v46 = vrot.slane %v4642_v4, 1  ;;  %v17275_v55 = vperm.slane %v17265_v2, 6 }
 0x443   : > { %2751 = vperm.xlu2 %8685, %v17273_v41   ;;  %v4126_v41 = vsel %vm3870_vm14, 1, %v16629_v3  ;;  %v4668_v8 = vadd.s32 %v4667_v21, %v4666_v61  ;;  %vm3872_vm10 = vcmp.eq.s32.totalorder %v13338_v12, %v17166_v45  ;;  %vm6163_vm15 = vcmp.gt.s32.totalorder %v4623_v0, 0 }
 0x444   : > { %2765 = vperm.xlu1 %8683, %v17274_v6   ;;  %v4676_v6 = vrot.slane %v4675_v20, 2  ;;  %v4701_v63 = vsel %vm4329_vm5, %v4126_v41, 0  ;;  %v4656_v56 = vadd.s32 %v4655_v52, %v4654_v43  ;;  %v4648_v39 = vrot.slane %v4647_v7, 2  ;;  %v13509_v11 = vpop.permute.xlu1 %2471 }
 0x445   : > { %v4683_v19 = vrot.slane %v4682_v47, 2  ;;  %v4629_v51 = vrot.slane %v4628_v60, 1  ;;  %v4661_v1 = vadd.s32 %v4660_v10, %v4659_v59  ;;  %v4696_v29 = vadd.s32 %v4695_v28, %v4694_v9 }
 0x446   : > { %vm3868_vm12 = vcmp.eq.s32.totalorder %v13350_v23, %v17166_v45  ;;  %v17276_v27 = vperm.slane %v17265_v2, 2  ;;  %v6418_v61 = vsel %vm6162_vm2, 1.0, %v16458_v22  ;;  %v13517_v12 = vadd.s32 %v4643_v46, %v4642_v4 }
 0x447   : > { %v4702_v0 = vrot.slane %v4701_v63, 4  ;;  %v4128_v43 = vsel %vm3872_vm10, 1, %v16629_v3  ;;  %v6419_v21 = vsel %vm6163_vm15, 1.0, %v16458_v22  ;;  %vm6165_vm8 = vcmp.gt.s32.totalorder %v4637_v48, 0 }
 0x448   : > { %2800 = vperm.xlu0 %8684, %v17275_v55   ;;  %v4677_v59 = vadd.s32 %v4676_v6, %v4675_v20  ;;  %v4669_v9 = vrot.slane %v4668_v8, 2  ;;  %v13521_v52 = vpop.permute.xlu0 %2506  ;;  %v17277_v23 = vperm.slane %v17265_v2, 4  ;;  %v4657_v41 = vrot.slane %v4656_v56, 1  ;;  %v13531_v20 = vld [vmem:[%s16215_s3] ss:$0 sm:$0xff] }
 0x449   : > { %v4649_v10 = vadd.s32 %v4648_v39, %v4647_v7  ;;  %v4684_v28 = vadd.s32 %v4683_v19, %v4682_v47  ;;  %v4124_v30 = vsel %vm3868_vm12, 1, %v16629_v3  ;;  %v4630_v4 = vadd.s32 %v4629_v51, %v4628_v60  ;;  %v8012_v60 = vpop.f32.mrf.mxu0  ;;  %v13539_v51 = vpop.permute.xlu2 %2520 }
 0x44a   : > { %v4662_v46 = vrot.slane %v4661_v1, 2  ;;  %v4697_v55 = vrot.slane %v4696_v29, 2  ;;  %v7640_v6 = vsel %vm16476_vm13, %v6419_v21, %v6418_v61  ;;  %v13536_v7 = vsel %vm6165_vm8, 1.0, %v16458_v22 }
 0x44b   : > { %2772 = vperm.xlu2 %8685, %v17276_v27   ;;  %v4715_v27 = vsel %vm4329_vm5, %v4128_v43, 0  ;;  %17278 = vst [vmem:[#allocation57_spill] sm:$0xff] %v13536_v7  ;;  %vm6166_vm0 = vcmp.gt.s32.totalorder %v13517_v12, 0  ;;  %v4703_v47 = vadd.s32 %v4702_v0, %v4701_v63  ;;  %v17279_v39 = vperm.slane %v12248_v5, 1 }
 0x44c   : > { %2786 = vperm.xlu1 %8683, %v17277_v23   ;;  %v4678_v19 = vrot.slane %v4677_v59, 1  ;;  %v4670_v43 = vadd.s32 %v4669_v9, %v4668_v8  ;;  %v4687_v23 = vsel %vm4329_vm5, %v4124_v30, 0  ;;  %vm3873_vm14 = vcmp.eq.s32.totalorder %v13368_v58, %v17166_v45  ;;  %v13550_v0 = vpop.permute.xlu1 %2492 }
 0x44d   : > { %v13548_v48 = vadd.s32 %v4657_v41, %v4656_v56  ;;  %v4650_v61 = vrot.slane %v4649_v10, 1  ;;  %v4685_v21 = vrot.slane %v4684_v28, 1  ;;  %v4716_v63 = vrot.slane %v4715_v27, 4 }
 0x44e   : > { %vm6164_vm2 = vcmp.gt.s32.totalorder %v4630_v4, 0  ;;  %v13552_v34 = vadd.s32 %v4662_v46, %v4661_v1  ;;  %v8013_v8 = vadd.f32 %v13531_v20, %v8012_v60  ;;  %v17282_v9 = vperm.slane %v17265_v2, 5 }
 0x44f   : > { %17280 = vst [vmem:[#allocation46_spill] sm:$0xff] %v13548_v48  ;;  %v4704_v30 = vrot.slane %v4703_v47, 2  ;;  %v4688_v58 = vrot.slane %v4687_v23, 4  ;;  %v4129_v13 = vsel %vm3873_vm14, 1, %v16629_v3  ;;  %vm3881_vm10 = vcmp.eq.s32.totalorder %v13467_v62, %v17166_v45 }
 0x450   : > { %2821 = vperm.xlu0 %8684, %v17279_v39   ;;  %17281 = vst [vmem:[#allocation59_spill] sm:$0xff] %v13552_v34  ;;  %v4698_v39 = vadd.s32 %v4697_v55, %v4696_v29  ;;  %v4679_v56 = vadd.s32 %v4678_v19, %v4677_v59  ;;  %v4671_v41 = vrot.slane %v4670_v43, 1  ;;  %v8108_v22 = vmax.f32 %v8013_v8, 0.0 }
 0x451   : > { %vm3882_vm15 = vcmp.eq.s32.totalorder %v13495_v24, %v17166_v45  ;;  %v17283_v1 = vperm.slane %v17265_v2, 7  ;;  %v17284_v29 = vmov 0.0   ;;  %v4651_v46 = vadd.s32 %v4650_v61, %v4649_v10 }
 0x452   : > { %v6420_v4 = vsel %vm6164_vm2, 1.0, %v17284_v29  ;;  %v4686_v55 = vadd.s32 %v4685_v21, %v4684_v28  ;;  %v4717_v60 = vadd.s32 %v4716_v63, %v4715_v27  ;;  %v4699_v7 = vrot.slane %v4698_v39, 1  ;;  %8140 = vst [vmem:[%s13569_s28] sm:$0xff] %v8108_v22  ;;  %v13576_v28 = vpop.permute.xlu2 %2541 }
 0x453   : > { %2793 = vperm.xlu2 %8685, %v17282_v9   ;;  %v13565_v9 = vpop.permute.xlu0 %2527  ;;  %v4722_v48 = vsel %vm4329_vm5, %v4129_v13, 0  ;;  %v4137_v62 = vsel %vm3881_vm10, 1, %v16629_v3  ;;  %v4138_v24 = vsel %vm3882_vm15, 1, %v16629_v3  ;;  %v4705_v2 = vadd.s32 %v4704_v30, %v4703_v47 }
 0x454   : > { %2807 = vperm.xlu1 %8683, %v17283_v1   ;;  %v4689_v59 = vadd.s32 %v4688_v58, %v4687_v23  ;;  %vm3875_vm12 = vcmp.eq.s32.totalorder %v13376_v31, %v17166_v45  ;;  %v4785_v10 = vsel %vm4329_vm5, %v4138_v24, 0  ;;  %v17285_v27 = vperm.slane %v12248_v5, 4  ;;  %v13587_v61 = vpop.permute.xlu1 %2513 }
 0x455   : > { %v13583_v13 = vsel %vm6166_vm0, 1.0, %v17284_v29  ;;  %vm6171_vm8 = vcmp.gt.s32.totalorder %v4679_v56, 0  ;;  %v4672_v47 = vadd.s32 %v4671_v41, %v4670_v43  ;;  %vm6167_vm14 = vcmp.gt.s32.totalorder %v4651_v46, 0 }
 0x456   : > { %17286 = vst [vmem:[#allocation26_spill] sm:$0xff] %v13583_v13  ;;  %v4718_v19 = vrot.slane %v4717_v60, 2  ;;  %v4723_v23 = vrot.slane %v4722_v48, 4  ;;  %v4778_v31 = vsel %vm4329_vm5, %v4137_v62, 0  ;;  %v13590_v21 = vsel %vm7600_vm6, %v6420_v4, %v7640_v6 }
 0x457   : > { %17287 = vst [vmem:[#allocation39_spill] sm:$0xff] %v13590_v21  ;;  %v4700_v63 = vadd.s32 %v4699_v7, %v4698_v39  ;;  %v4131_v8 = vsel %vm3875_vm12, 1, %v16629_v3  ;;  %v4786_v12 = vrot.slane %v4785_v10, 4  ;;  %v17288_v30 = vperm.slane %v12248_v5, 0 }
 0x458   : > { %2842 = vperm.xlu0 %8684, %v17285_v27   ;;  %v6427_v58 = vsel %vm6171_vm8, 1.0, %v17284_v29  ;;  %vm6172_vm0 = vcmp.gt.s32.totalorder %v4686_v55, 0  ;;  %v4706_v43 = vrot.slane %v4705_v2, 1  ;;  %v4690_v56 = vrot.slane %v4689_v59, 2 }
 0x459   : > { %v13597_v41 = vsel %vm6167_vm14, 1.0, %v17284_v29  ;;  %vm6170_vm2 = vcmp.gt.s32.totalorder %v4672_v47, 0  ;;  %v4779_v1 = vrot.slane %v4778_v31, 4  ;;  %vm3884_vm10 = vcmp.eq.s32.totalorder %v13501_v16, %v17166_v45 }
 0x45a   : > { %17289 = vst [vmem:[#allocation37_spill] sm:$0xff] %v13597_v41  ;;  %v17290_v6 = vperm.slane %v12248_v5, 2  ;;  %v13603_v7 = vadd.s32 %v4718_v19, %v4717_v60  ;;  %v4724_v39 = vadd.s32 %v4723_v23, %v4722_v48  ;;  %v4736_v4 = vsel %vm4329_vm5, %v4131_v8, 0  ;;  %v13615_v27 = vpop.permute.xlu2 %2562 }
 0x45b   : > { %2814 = vperm.xlu2 %8685, %v17288_v30   ;;  %vm3885_vm15 = vcmp.eq.s32.totalorder %v13521_v52, %v17166_v45  ;;  %v13608_v46 = vpop.permute.xlu0 %2548  ;;  %v6428_v55 = vsel %vm6172_vm0, 1.0, %v17284_v29  ;;  %vm6174_vm12 = vcmp.gt.s32.totalorder %v4700_v63, 0  ;;  %vm3871_vm8 = vcmp.eq.s32.totalorder %v13393_v15, %v17166_v45 }
 0x45c   : > { %2828 = vperm.xlu1 %8683, %v17290_v6   ;;  %17291 = vst [vmem:[#allocation31_spill] sm:$0xff] %v13603_v7  ;;  %v4787_v16 = vadd.s32 %v4786_v12, %v4785_v10  ;;  %v6426_v62 = vsel %vm6170_vm2, 1.0, %v17284_v29  ;;  %v4707_v24 = vadd.s32 %v4706_v43, %v4705_v2  ;;  %v4691_v60 = vadd.s32 %v4690_v56, %v4689_v59  ;;  %v13635_v56 = vpop.permute.xlu1 %2534 }
 0x45d   : > { %v4140_v48 = vsel %vm3884_vm10, 1, %v16629_v3  ;;  %v17292_v47 = vperm.slane %v12248_v5, 7  ;;  %v4737_v52 = vrot.slane %v4736_v4, 4  ;;  %v4780_v19 = vadd.s32 %v4779_v1, %v4778_v31 }
 0x45e   : > { %v4141_v23 = vsel %vm3885_vm15, 1, %v16629_v3  ;;  %vm3883_vm14 = vcmp.eq.s32.totalorder %v13550_v0, %v17166_v45  ;;  %v13623_v15 = vsel %vm6174_vm12, 1.0, %v17284_v29  ;;  %v4725_v59 = vrot.slane %v4724_v39, 2 }
 0x45f   : > { %17293 = vst [vmem:[#allocation58_spill] sm:$0xff] %v13623_v15  ;;  %v4127_v10 = vsel %vm3871_vm8, 1, %v16629_v3  ;;  %v7647_v63 = vsel %vm16476_vm13, %v6427_v58, %v6426_v62  ;;  %v4788_v8 = vrot.slane %v4787_v16, 2  ;;  %v4799_v12 = vsel %vm4329_vm5, %v4140_v48, 0  ;;  %v17297_v15 = vld [vmem:[#allocation40_spill] sm:$0xff] }
 0x460   : > { %2863 = vperm.xlu0 %8684, %v17292_v47   ;;  %vm3887_vm0 = vcmp.eq.s32.totalorder %v13539_v51, %v17166_v45  ;;  %v17294_v31 = vperm.slane %v12248_v5, 3  ;;  %vm6175_vm2 = vcmp.gt.s32.totalorder %v4707_v24, 0  ;;  %v4692_v0 = vrot.slane %v4691_v60, 1 }
 0x461   : > { %v4806_v30 = vsel %vm4329_vm5, %v4141_v23, 0  ;;  %v4139_v43 = vsel %vm3883_vm14, 1, %v16629_v3  ;;  %v4738_v1 = vadd.s32 %v4737_v52, %v4736_v4  ;;  %v4708_v58 = vsel %vm4329_vm5, %v4127_v10, 0 }
 0x462   : > { %vm3876_vm10 = vcmp.eq.s32.totalorder %v13415_v38, %v17166_v45  ;;  %v4781_v6 = vrot.slane %v4780_v19, 2  ;;  %v17295_v51 = vperm.slane %v12248_v5, 5  ;;  %v4800_v62 = vrot.slane %v4799_v12, 4 }
 0x463   : > { %2835 = vperm.xlu2 %8685, %v17294_v31   ;;  %v4143_v24 = vsel %vm3887_vm0, 1, %v16629_v3  ;;  %v4792_v48 = vsel %vm4329_vm5, %v4139_v43, 0  ;;  %vm3888_vm15 = vcmp.eq.s32.totalorder %v13565_v9, %v17166_v45  ;;  %v13646_v47 = vpop.permute.xlu0 %2569  ;;  %v13649_v4 = vsel %vm6175_vm2, 1.0, %v17284_v29  ;;  %v13658_v43 = vpop.permute.xlu2 %2583 }
 0x464   : > { %2849 = vperm.xlu1 %8683, %v17295_v51   ;;  %17296 = vst [vmem:[#allocation53_spill] sm:$0xff] %v13649_v4  ;;  %v13652_v52 = vsel %vm7600_vm6, %v6428_v55, %v7647_v63  ;;  %v4789_v23 = vadd.s32 %v4788_v8, %v4787_v16  ;;  %v4807_v10 = vrot.slane %v4806_v30, 4  ;;  %v13654_v31 = vadd.s32 %v4692_v0, %v4691_v60 }
 0x465   : > { %v13656_v51 = vadd.s32 %v4725_v59, %v4724_v39  ;;  %v4709_v2 = vrot.slane %v4708_v58, 4  ;;  %v4793_v22 = vrot.slane %v4792_v48, 4  ;;  %v17298_v9 = vperm.slane %v17297_v15, 2  ;;  %v8015_v4 = vpop.f32.mrf.mxu0 }
 0x466   : > { %v4739_v7 = vrot.slane %v4738_v1, 2  ;;  %v4132_v55 = vsel %vm3876_vm10, 1, %v16629_v3  ;;  %v4820_v16 = vsel %vm4329_vm5, %v4143_v24, 0  ;;  %v4144_v60 = vsel %vm3888_vm15, 1, %v16629_v3 }
 0x467   : > { %v4782_v63 = vadd.s32 %v4781_v6, %v4780_v19  ;;  %v4801_v39 = vadd.s32 %v4800_v62, %v4799_v12  ;;  %v4794_v59 = vadd.s32 %v4793_v22, %v4792_v48  ;;  %vm3886_vm12 = vcmp.eq.s32.totalorder %v13587_v61, %v17166_v45 }
 0x468   : > { %2884 = vperm.xlu0 %8684, %v17298_v9   ;;  %vm3878_vm8 = vcmp.eq.s32.totalorder %v13422_v26, %v17166_v45  ;;  %v4790_v8 = vrot.slane %v4789_v23, 1  ;;  %v4808_v0 = vadd.s32 %v4807_v10, %v4806_v30  ;;  %v4142_v9 = vsel %vm3886_vm12, 1, %v16629_v3 }
 0x469   : > { %v17299_v38 = vperm.slane %v12248_v5, 6  ;;  %v4821_v24 = vrot.slane %v4820_v16, 4  ;;  %v4795_v41 = vrot.slane %v4794_v59, 2  ;;  %v4827_v19 = vsel %vm4329_vm5, %v4144_v60, 0 }
 0x46a   : > { %v4813_v22 = vsel %vm4329_vm5, %v4142_v9, 0  ;;  %v4727_v12 = vrot.slane %v13656_v51, 1  ;;  %v13678_v61 = vadd.s32 %v4709_v2, %v4708_v58  ;;  %v8016_v62 = vadd.f32 %v13531_v20, %v8015_v4  ;;  %v13690_v9 = vpop.permute.xlu1 %2555 }
 0x46b   : > { %2856 = vperm.xlu2 %8685, %v17299_v38   ;;  %v4814_v6 = vrot.slane %v4813_v22, 4  ;;  %v17300_v30 = vperm.slane %v17297_v15, 0  ;;  %v13684_v48 = vsel %vm4329_vm5, %v4132_v55, 0  ;;  %v4134_v5 = vsel %vm3878_vm8, 1, %v16629_v3  ;;  %v13692_v13 = vpop.permute.xlu0 %2590 }
 0x46c   : > { %v4783_v10 = vrot.slane %v4782_v63, 1  ;;  %v4802_v60 = vrot.slane %v4801_v39, 2  ;;  %v4809_v2 = vrot.slane %v4808_v0, 2  ;;  %v4828_v58 = vrot.slane %v4827_v19, 4 }
 0x46d   : > { %2870 = vperm.xlu1 %8683, %v17300_v30   ;;  %v4815_v38 = vadd.s32 %v4814_v6, %v4813_v22  ;;  %v8109_v4 = vmax.f32 %v8016_v62, 0.0  ;;  %v4791_v30 = vadd.s32 %v4790_v8, %v4789_v23  ;;  %v4822_v34 = vadd.s32 %v4821_v24, %v4820_v16 }
 0x46e   : > { %v4796_v55 = vadd.s32 %v4795_v41, %v4794_v59  ;;  %vm3890_vm14 = vcmp.eq.s32.totalorder %v13576_v28, %v17166_v45  ;;  %v17301_v26 = vperm.slane %v17297_v15, 5  ;;  %vm6173_vm0 = vcmp.gt.s32.totalorder %v13654_v31, 0  ;;  %v13708_v28 = vpop.permute.xlu2 %2604 }
 0x46f   : > { %v13699_v21 = vadd.s32 %v4739_v7, %v4738_v1  ;;  %8141 = vst [vmem:[%s13569_s28 + $0x8] sm:$0xff] %v8109_v4  ;;  %vm3891_vm2 = vcmp.eq.s32.totalorder %v13608_v46, %v17166_v45  ;;  %v13706_v23 = vsel %vm4329_vm5, %v4134_v5, 0  ;;  %v4784_v41 = vadd.s32 %v4783_v10, %v4782_v63 }
 0x470   : > { %2905 = vperm.xlu0 %8684, %v17301_v26   ;;  %v4803_v16 = vadd.s32 %v4802_v60, %v4801_v39  ;;  %v4816_v59 = vrot.slane %v4815_v38, 2  ;;  %v4810_v8 = vadd.s32 %v4809_v2, %v4808_v0  ;;  %v4829_v24 = vadd.s32 %v4828_v58, %v4827_v19  ;;  %v17304_v26 = vld [vmem:[#allocation28_spill] sm:$0xff] }
 0x471   : > { %v4146_v22 = vsel %vm3890_vm14, 1, %v16629_v3  ;;  %vm3889_vm10 = vcmp.eq.s32.totalorder %v13635_v56, %v17166_v45  ;;  %v17302_v7 = vperm.slane %v17297_v15, 1  ;;  %vm6187_vm15 = vcmp.gt.s32.totalorder %v4791_v30, 0 }
 0x472   : > { %v4823_v46 = vrot.slane %v4822_v34, 2  ;;  %v4797_v1 = vrot.slane %v4796_v55, 1  ;;  %v4147_v6 = vsel %vm3891_vm2, 1, %v16629_v3  ;;  %v13719_v63 = vsel %vm6173_vm0, 1.0, %v17284_v29  ;;  %v13734_v30 = vpop.permute.xlu1 %2576 }
 0x473   : > { %2877 = vperm.xlu2 %8685, %v17302_v7   ;;  %v13722_v39 = vadd.s32 %v4727_v12, %v13656_v51  ;;  %v4145_v56 = vsel %vm3889_vm10, 1, %v16629_v3  ;;  %v17303_v19 = vperm.slane %v17297_v15, 3  ;;  %vm6186_vm12 = vcmp.gt.s32.totalorder %v4784_v41, 0 }
 0x474   : > { %v4804_v62 = vrot.slane %v4803_v16, 1  ;;  %v4841_v5 = vsel %vm4329_vm5, %v4146_v22, 0  ;;  %v4817_v10 = vadd.s32 %v4816_v59, %v4815_v38  ;;  %v6443_v60 = vsel %vm6187_vm15, 1.0, %v17284_v29 }
 0x475   : > { %2891 = vperm.xlu1 %8683, %v17303_v19   ;;  %v4811_v31 = vrot.slane %v4810_v8, 1  ;;  %v4830_v2 = vrot.slane %v4829_v24, 2  ;;  %v4848_v58 = vsel %vm4329_vm5, %v4147_v6, 0  ;;  %v4824_v51 = vadd.s32 %v4823_v46, %v4822_v34  ;;  %v13742_v34 = vpop.permute.xlu0 %2611 }
 0x476   : > { %v4798_v12 = vadd.s32 %v4797_v1, %v4796_v55  ;;  %vm3893_vm8 = vcmp.eq.s32.totalorder %v13615_v27, %v17166_v45  ;;  %v4834_v4 = vsel %vm4329_vm5, %v4145_v56, 0  ;;  %v17305_v41 = vperm.slane %v17304_v26, 0 }
 0x477   : > { %v6442_v59 = vsel %vm6186_vm12, 1.0, %v17284_v29  ;;  %v4842_v22 = vrot.slane %v4841_v5, 4  ;;  %vm3892_vm14 = vcmp.eq.s32.totalorder %v13690_v9, %v17166_v45  ;;  %v4805_v55 = vadd.s32 %v4804_v62, %v4803_v16  ;;  %v13751_v16 = vpop.permute.xlu2 %2625 }
 0x478   : > { %2926 = vperm.xlu0 %8684, %v17305_v41   ;;  %v4818_v7 = vrot.slane %v4817_v10, 1  ;;  %v4849_v27 = vrot.slane %v4848_v58, 4  ;;  %vm3894_vm0 = vcmp.eq.s32.totalorder %v13646_v47, %v17166_v45  ;;  %v7661_v46 = vsel %vm16476_vm13, %v6443_v60, %v6442_v59 }
 0x479   : > { %v4831_v1 = vadd.s32 %v4830_v2, %v4829_v24  ;;  %v4149_v6 = vsel %vm3893_vm8, 1, %v16629_v3  ;;  %v4835_v56 = vrot.slane %v4834_v4, 4  ;;  %v17306_v19 = vperm.slane %v17297_v15, 4 }
 0x47a   : > { %v4812_v41 = vadd.s32 %v4811_v31, %v4810_v8  ;;  %v4825_v38 = vrot.slane %v4824_v51, 1  ;;  %vm6188_vm2 = vcmp.gt.s32.totalorder %v4798_v12, 0  ;;  %v4148_v9 = vsel %vm3892_vm14, 1, %v16629_v3  ;;  %v8018_v2 = vpop.f32.mrf.mxu0  ;;  %v17308_v12 = vld [vmem:[#allocation44_spill] sm:$0xff] }
 0x47b   : > { %2898 = vperm.xlu2 %8685, %v17306_v19   ;;  %v4843_v62 = vadd.s32 %v4842_v22, %v4841_v5  ;;  %v4150_v0 = vsel %vm3894_vm0, 1, %v16629_v3  ;;  %vm3896_vm10 = vcmp.eq.s32.totalorder %v13658_v43, %v17166_v45  ;;  %v4855_v47 = vsel %vm4329_vm5, %v4148_v9, 0 }
 0x47c   : > { %v17307_v24 = vperm.slane %v17297_v15, 6  ;;  %vm6189_vm15 = vcmp.gt.s32.totalorder %v4805_v55, 0  ;;  %v4819_v60 = vadd.s32 %v4818_v7, %v4817_v10  ;;  %v4850_v8 = vadd.s32 %v4849_v27, %v4848_v58  ;;  %v13770_v7 = vpop.permute.xlu1 %2597 }
 0x47d   : > { %v4862_v31 = vsel %vm4329_vm5, %v4149_v6, 0  ;;  %v17309_v59 = vand.u32 1, %v17308_v12  ;;  %v6444_v22 = vsel %vm6188_vm2, 1.0, %v17284_v29  ;;  %v4832_v43 = vrot.slane %v4831_v1, 1 }
 0x47e   : > { %2912 = vperm.xlu1 %8683, %v17307_v24   ;;  %v4836_v19 = vadd.s32 %v4835_v56, %v4834_v4  ;;  %v8019_v9 = vadd.f32 %v13531_v20, %v8018_v2  ;;  %vm6190_vm8 = vcmp.gt.s32.totalorder %v4812_v41, 0  ;;  %v4869_v24 = vsel %vm4329_vm5, %v4150_v0, 0 }
 0x47f   : > { %vm13762_vm12 = vcmp.eq.s32.totalorder %v17309_v59, 1  ;;  %v4152_v10 = vsel %vm3896_vm10, 1, %v16629_v3  ;;  %v4856_v58 = vrot.slane %v4855_v47, 4  ;;  %v17312_v27 = vperm.slane %v17304_v26, 3 }
 0x480   : > { %v4826_v6 = vadd.s32 %v4825_v38, %v4824_v51  ;;  %v4844_v12 = vrot.slane %v4843_v62, 2  ;;  %v4863_v59 = vrot.slane %v4862_v31, 4  ;;  %v8110_v50 = vmax.f32 %v8019_v9, 0.0 }
 0x481   : > { %2947 = vperm.xlu0 %8684, %v17312_v27   ;;  %v13777_v4 = vsel %vm7602_vm11, %v13719_v63, %v13652_v52  ;;  %v7662_v0 = vsel %vm7600_vm6, %v6444_v22, %v7661_v46  ;;  %vm6191_vm14 = vcmp.gt.s32.totalorder %v4819_v60, 0  ;;  %v4851_v56 = vrot.slane %v4850_v8, 2  ;;  %v13782_v27 = vpop.permute.xlu0 %2632  ;;  %v13792_v46 = vpop.permute.xlu2 %2646 }
 0x482   : > { %17313 = vst [vmem:[#allocation8_spill] sm:$0xff] %v13777_v4  ;;  %v4837_v2 = vrot.slane %v4836_v19, 2  ;;  %v4870_v37 = vrot.slane %v4869_v24, 4  ;;  %v4883_v44 = vsel %vm4329_vm5, %v4152_v10, 0  ;;  %v4833_v54 = vadd.s32 %v4832_v43, %v4831_v1 }
 0x483   : > { %8142 = vst [vmem:[%s13569_s28 + $0x10] sm:$0xff] %v8110_v50  ;;  %v17314_v51 = vperm.slane %v17297_v15, 7  ;;  %v6445_v38 = vsel %vm6189_vm15, 1.0, %v17284_v29  ;;  %v6446_v52 = vsel %vm6190_vm8, 1.0, %v17284_v29  ;;  %v4857_v63 = vadd.s32 %v4856_v58, %v4855_v47 }
 0x484   : > { %vm3897_vm0 = vcmp.eq.s32.totalorder %v13692_v13, %v17166_v45  ;;  %vm6192_vm2 = vcmp.gt.s32.totalorder %v4826_v6, 0  ;;  %v4845_v50 = vadd.s32 %v4844_v12, %v4843_v62  ;;  %v6447_v1 = vsel %vm6191_vm14, 1.0, %v17284_v29 }
 0x485   : > { %2919 = vperm.xlu2 %8685, %v17314_v51   ;;  %v4864_v22 = vadd.s32 %v4863_v59, %v4862_v31  ;;  %v17315_v15 = vperm.slane %v17304_v26, 1  ;;  %v4852_v55 = vadd.s32 %v4851_v56, %v4850_v8  ;;  %v4884_v43 = vrot.slane %v4883_v44, 4 }
 0x486   : > { %vm6193_vm10 = vcmp.gt.s32.totalorder %v4833_v54, 0  ;;  %v7663_v41 = vsel %vm7602_vm11, %v6445_v38, %v7662_v0  ;;  %v4838_v47 = vadd.s32 %v4837_v2, %v4836_v19  ;;  %v4871_v9 = vadd.s32 %v4870_v37, %v4869_v24  ;;  %v13812_v19 = vpop.permute.xlu1 %2618 }
 0x487   : > { %2933 = vperm.xlu1 %8683, %v17315_v15   ;;  %v4153_v13 = vsel %vm3897_vm0, 1, %v16629_v3  ;;  %v7664_v10 = vsel %vm7604_vm9, %v6446_v52, %v7663_v41  ;;  %v4858_v58 = vrot.slane %v4857_v63, 2  ;;  %v6448_v62 = vsel %vm6192_vm2, 1.0, %v17284_v29 }
 0x488   : > { %v7665_v60 = vsel %vm7606_vm7, %v6447_v1, %v7664_v10  ;;  %vm3899_vm15 = vcmp.eq.s32.totalorder %v13708_v28, %v17166_v45  ;;  %v17316_v8 = vperm.slane %v17304_v26, 6  ;;  %v6449_v54 = vsel %vm6193_vm10, 1.0, %v17284_v29 }
 0x489   : > { %v7666_v31 = vsel %vm7608_vm1, %v6448_v62, %v7665_v60  ;;  %v4155_v37 = vsel %vm3899_vm15, 1, %v16629_v3  ;;  %vm3895_vm8 = vcmp.eq.s32.totalorder %v13734_v30, %v17166_v45  ;;  %v4846_v24 = vrot.slane %v4845_v50, 1  ;;  %v13822_v51 = vpop.permute.xlu0 %2653 }
 0x48a   : > { %2968 = vperm.xlu0 %8684, %v17316_v8   ;;  %v7317_v6 = vsel %vm13762_vm12, 1.0, %v17284_v29  ;;  %v7667_v28 = vsel %vm16478_vm4, %v6449_v54, %v7666_v31  ;;  %v4151_v12 = vsel %vm3895_vm8, 1, %v16629_v3  ;;  %v4853_v59 = vrot.slane %v4852_v55, 1 }
 0x48b   : > { %v4865_v0 = vrot.slane %v4864_v22, 2  ;;  %v4890_v56 = vsel %vm4329_vm5, %v4153_v13, 0  ;;  %v7869_v2 = vsel %vm16477_vm3, %v7317_v6, %v7667_v28  ;;  %v17317_v30 = vperm.slane %v17304_v26, 2 }
 0x48c   : > { %v4885_v38 = vadd.s32 %v4884_v43, %v4883_v44  ;;  %8279 = vmatmul.msk.f32.vlgmr.msra.gmra.mxu1 %vm4329_vm5, %v7869_v2  ;;  %v4904_v5 = vsel %vm4329_vm5, %v4155_v37, 0  ;;  %v4876_v52 = vsel %vm4329_vm5, %v4151_v12, 0  ;;  %vm3900_vm12 = vcmp.eq.s32.totalorder %v13742_v34, %v17166_v45  ;;  %v13836_v43 = vpop.permute.xlu2 %2667 }
 0x48d   : > { %2940 = vperm.xlu2 %8685, %v17317_v30   ;;  %v4839_v1 = vrot.slane %v4838_v47, 1  ;;  %v4872_v15 = vrot.slane %v4871_v9, 2  ;;  %v4859_v41 = vadd.s32 %v4858_v58, %v4857_v63  ;;  %v4877_v13 = vrot.slane %v4876_v52, 4 }
 0x48e   : > { %v17318_v10 = vperm.slane %v17304_v26, 4  ;;  %v4847_v60 = vadd.s32 %v4846_v24, %v4845_v50  ;;  %v4891_v44 = vrot.slane %v4890_v56, 4  ;;  %vm3898_vm14 = vcmp.eq.s32.totalorder %v13770_v7, %v17166_v45  ;;  %v17320_v24 = vld [vmem:[#allocation27_spill] sm:$0xff] }
 0x48f   : > { %v4866_v8 = vadd.s32 %v4865_v0, %v4864_v22  ;;  %v4905_v54 = vrot.slane %v4904_v5, 4  ;;  %v4878_v31 = vadd.s32 %v4877_v13, %v4876_v52  ;;  %v4156_v34 = vsel %vm3900_vm12, 1, %v16629_v3  ;;  %v13851_v13 = vpop.permute.xlu1 %2639 }
 0x490   : > { %2954 = vperm.xlu1 %8683, %v17318_v10   ;;  %v17319_v63 = vrot.slane %v13684_v48, 4  ;;  %v4854_v37 = vadd.s32 %v4853_v59, %v4852_v55  ;;  %v4886_v6 = vrot.slane %v4885_v38, 2  ;;  %v4154_v50 = vsel %vm3898_vm14, 1, %v16629_v3 }
 0x491   : > { %v17321_v28 = vperm.slane %v17320_v24, 1  ;;  %v4840_v7 = vadd.s32 %v4839_v1, %v4838_v47  ;;  %v4873_v12 = vadd.s32 %v4872_v15, %v4871_v9  ;;  %v4860_v2 = vrot.slane %v4859_v41, 1  ;;  %v13853_v10 = vpop.permute.xlu0 %2674 }
 0x492   : > { %v13842_v58 = vadd.s32 %v17319_v63, %v13684_v48  ;;  %v4879_v22 = vrot.slane %v4878_v31, 2  ;;  %v4892_v0 = vadd.s32 %v4891_v44, %v4890_v56  ;;  %v4911_v30 = vsel %vm4329_vm5, %v4156_v34, 0 }
 0x493   : > { %2989 = vperm.xlu0 %8684, %v17321_v28   ;;  %vm3902_vm0 = vcmp.eq.s32.totalorder %v13751_v16, %v17166_v45  ;;  %v4897_v48 = vsel %vm4329_vm5, %v4154_v50, 0  ;;  %vm6195_vm2 = vcmp.gt.s32.totalorder %v4847_v60, 0  ;;  %v4867_v55 = vrot.slane %v4866_v8, 1 }
 0x494   : > { %v4906_v59 = vadd.s32 %v4905_v54, %v4904_v5  ;;  %v4880_v52 = vadd.s32 %v4879_v22, %v4878_v31  ;;  %v17322_v47 = vperm.slane %v17304_v26, 5  ;;  %vm6196_vm10 = vcmp.gt.s32.totalorder %v4854_v37, 0 }
 0x495   : > { %v4887_v9 = vadd.s32 %v4886_v6, %v4885_v38  ;;  %v4898_v56 = vrot.slane %v4897_v48, 4  ;;  %vm3901_vm15 = vcmp.eq.s32.totalorder %v13812_v19, %v17166_v45  ;;  %vm6194_vm8 = vcmp.gt.s32.totalorder %v4840_v7, 0  ;;  %v13870_v6 = vpop.permute.xlu2 %2688 }
 0x496   : > { %2961 = vperm.xlu2 %8685, %v17322_v47   ;;  %v4861_v1 = vadd.s32 %v4860_v2, %v4859_v41  ;;  %v4912_v15 = vrot.slane %v4911_v30, 4  ;;  %v4158_v5 = vsel %vm3902_vm0, 1, %v16629_v3  ;;  %v17323_v44 = vperm.slane %v17304_v26, 7 }
 0x497   : > { %v6451_v54 = vsel %vm6195_vm2, 1.0, %v17284_v29  ;;  %v4874_v31 = vrot.slane %v4873_v12, 1  ;;  %v4893_v38 = vrot.slane %v4892_v0, 2  ;;  %vm3903_vm12 = vcmp.eq.s32.totalorder %v13782_v27, %v17166_v45  ;;  %v8021_v2 = vpop.f32.mrf.mxu0 }
 0x498   : > { %2975 = vperm.xlu1 %8683, %v17323_v44   ;;  %v4868_v19 = vadd.s32 %v4867_v55, %v4866_v8  ;;  %v4907_v34 = vrot.slane %v4906_v59, 2  ;;  %v4881_v41 = vrot.slane %v4880_v52, 1  ;;  %v4157_v63 = vsel %vm3901_vm15, 1, %v16629_v3  ;;  %v17325_v44 = vld [vmem:[#allocation74_spill] sm:$0xff] }
 0x499   : > { %v6452_v16 = vsel %vm6196_vm10, 1.0, %v17284_v29  ;;  %v6450_v26 = vsel %vm6194_vm8, 1.0, %v17284_v29  ;;  %v4925_v60 = vsel %vm4329_vm5, %v4158_v5, 0  ;;  %v4899_v50 = vadd.s32 %v4898_v56, %v4897_v48 }
 0x49a   : > { %v17324_v28 = vperm.slane %v17320_v24, 4  ;;  %v4888_v7 = vrot.slane %v4887_v9, 1  ;;  %vm6197_vm14 = vcmp.gt.s32.totalorder %v4861_v1, 0  ;;  %v4913_v27 = vadd.s32 %v4912_v15, %v4911_v30  ;;  %v13888_v15 = vpop.permute.xlu1 %2660 }
 0x49b   : > { %v4159_v8 = vsel %vm3903_vm12, 1, %v16629_v3  ;;  %v4875_v22 = vadd.s32 %v4874_v31, %v4873_v12  ;;  %v4894_v55 = vadd.s32 %v4893_v38, %v4892_v0  ;;  %v4918_v47 = vsel %vm4329_vm5, %v4157_v63, 0 }
 0x49c   : > { %3010 = vperm.xlu0 %8684, %v17324_v28   ;;  %v8022_v37 = vadd.f32 %v13531_v20, %v8021_v2  ;;  %v17326_v62 = vand.u32 1, %v17325_v44  ;;  %v7668_v48 = vsel %vm16476_vm13, %v6451_v54, %v6450_v26  ;;  %v4908_v56 = vadd.s32 %v4907_v34, %v4906_v59  ;;  %v13897_v59 = vpop.permute.xlu0 %2695 }
 0x49d   : > { %v4882_v28 = vadd.s32 %v4881_v41, %v4880_v52  ;;  %v4926_v30 = vrot.slane %v4925_v60, 4  ;;  %v17329_v12 = vperm.slane %v17320_v24, 0  ;;  %vm6198_vm2 = vcmp.gt.s32.totalorder %v4868_v19, 0 }
 0x49e   : > { %vm13883_vm0 = vcmp.eq.s32.totalorder %v17326_v62, 1  ;;  %v6453_v0 = vsel %vm6197_vm14, 1.0, %v17284_v29  ;;  %v4900_v31 = vrot.slane %v4899_v50, 2  ;;  %v4932_v62 = vsel %vm4329_vm5, %v4159_v8, 0  ;;  %v13905_v8 = vpop.permute.xlu2 %2709 }
 0x49f   : > { %2982 = vperm.xlu2 %8685, %v17329_v12   ;;  %v4914_v38 = vrot.slane %v4913_v27, 2  ;;  %v4919_v63 = vrot.slane %v4918_v47, 4  ;;  %v8111_v2 = vmax.f32 %v8022_v37, 0.0  ;;  %vm3906_vm10 = vcmp.eq.s32.totalorder %v13822_v51, %v17166_v45 }
 0x4a0   : > { %v17330_v52 = vperm.slane %v17320_v24, 2  ;;  %vm6199_vm15 = vcmp.gt.s32.totalorder %v4875_v22, 0  ;;  %v7669_v54 = vsel %vm7600_vm6, %v6452_v16, %v7668_v48  ;;  %v4895_v1 = vrot.slane %v4894_v55, 1 }
 0x4a1   : > { %vm3905_vm8 = vcmp.eq.s32.totalorder %v13792_v46, %v17166_v45  ;;  %v4909_v34 = vrot.slane %v4908_v56, 1  ;;  %vm6200_vm12 = vcmp.gt.s32.totalorder %v4882_v28, 0  ;;  %v4927_v41 = vadd.s32 %v4926_v30, %v4925_v60  ;;  %8143 = vst [vmem:[%s13569_s28 + $0x18] sm:$0xff] %v8111_v2 }
 0x4a2   : > { %2996 = vperm.xlu1 %8683, %v17330_v52   ;;  %v4889_v26 = vadd.s32 %v4888_v7, %v4887_v9  ;;  %v7670_v37 = vsel %vm7602_vm11, %v6453_v0, %v7669_v54  ;;  %v4901_v44 = vadd.s32 %v4900_v31, %v4899_v50  ;;  %v4933_v12 = vrot.slane %v4932_v62, 4 }
 0x4a3   : > { %v4162_v16 = vsel %vm3906_vm10, 1, %v16629_v3  ;;  %v17331_v48 = vperm.slane %v17320_v24, 7  ;;  %v6454_v46 = vsel %vm6198_vm2, 1.0, %v17284_v29  ;;  %v4915_v60 = vadd.s32 %v4914_v38, %v4913_v27 }
 0x4a4   : > { %v4161_v9 = vsel %vm3905_vm8, 1, %v16629_v3  ;;  %v4920_v7 = vadd.s32 %v4919_v63, %v4918_v47  ;;  %v6455_v30 = vsel %vm6199_vm15, 1.0, %v17284_v29  ;;  %v13919_v50 = vadd.s32 %v4895_v1, %v4894_v55  ;;  %v13931_v63 = vpop.permute.xlu1 %2681 }
 0x4a5   : > { %3031 = vperm.xlu0 %8684, %v17331_v48   ;;  %vm6201_vm14 = vcmp.gt.s32.totalorder %v4889_v26, 0  ;;  %v6456_v51 = vsel %vm6200_vm12, 1.0, %v17284_v29  ;;  %v13923_v0 = vadd.s32 %v4909_v34, %v4908_v56  ;;  %v4928_v31 = vrot.slane %v4927_v41, 2 }
 0x4a6   : > { %v4953_v2 = vsel %vm4329_vm5, %v4162_v16, 0  ;;  %v7671_v19 = vsel %vm7604_vm9, %v6454_v46, %v7670_v37  ;;  %v17332_v27 = vperm.slane %v17320_v24, 3  ;;  %v4902_v47 = vrot.slane %v4901_v44, 1  ;;  %v13949_v16 = vpop.permute.xlu0 %2716 }
 0x4a7   : > { %v4934_v38 = vadd.s32 %v4933_v12, %v4932_v62  ;;  %v4946_v22 = vsel %vm4329_vm5, %v4161_v9, 0  ;;  %v7672_v55 = vsel %vm7606_vm7, %v6455_v30, %v7671_v19  ;;  %v4916_v28 = vrot.slane %v4915_v60, 1 }
 0x4a8   : > { %3003 = vperm.xlu2 %8685, %v17332_v27   ;;  %v4921_v52 = vrot.slane %v4920_v7, 2  ;;  %v6457_v56 = vsel %vm6201_vm14, 1.0, %v17284_v29  ;;  %v7673_v54 = vsel %vm7608_vm1, %v6456_v51, %v7672_v55  ;;  %v17333_v1 = vperm.slane %v17320_v24, 5 }
 0x4a9   : > { %v4954_v34 = vrot.slane %v4953_v2, 4  ;;  %v7318_v62 = vsel %vm13883_vm0, 1.0, %v17284_v29  ;;  %v7674_v26 = vsel %vm16478_vm4, %v6457_v56, %v7673_v54  ;;  %vm3908_vm2 = vcmp.eq.s32.totalorder %v13836_v43, %v17166_v45  ;;  %v17334_v43 = vld [vmem:[#allocation33_spill] sm:$0xff] }
 0x4aa   : > { %3017 = vperm.xlu1 %8683, %v17333_v1   ;;  %v4929_v37 = vadd.s32 %v4928_v31, %v4927_v41  ;;  %v7870_v12 = vsel %vm16477_vm3, %v7318_v62, %v7674_v26  ;;  %vm3904_vm10 = vcmp.eq.s32.totalorder %v13851_v13, %v17166_v45  ;;  %vm3909_vm15 = vcmp.eq.s32.totalorder %v13853_v10, %v17166_v45  ;;  %v13960_v10 = vpop.permute.xlu2 %2730 }
 0x4ab   : > { %v4903_v48 = vadd.s32 %v4902_v47, %v4901_v44  ;;  %v4935_v5 = vrot.slane %v4934_v38, 2  ;;  %v4947_v46 = vrot.slane %v4946_v22, 4  ;;  %8280 = vmatmul.msk.f32.gmra.mxu1 %vm4329_vm5, %v7870_v12  ;;  %v4160_v9 = vsel %vm3904_vm10, 1, %v16629_v3 }
 0x4ac   : > { %v17335_v41 = vperm.slane %v17334_v43, 2  ;;  %v4164_v30 = vsel %vm3908_vm2, 1, %v16629_v3  ;;  %v4939_v51 = vsel %vm4329_vm5, %v4160_v9, 0  ;;  %v4165_v13 = vsel %vm3909_vm15, 1, %v16629_v3  ;;  %v13978_v62 = vpop.permute.xlu1 %2702 }
 0x4ad   : > { %vm3907_vm0 = vcmp.eq.s32.totalorder %v13888_v15, %v17166_v45  ;;  %vm6202_vm8 = vcmp.gt.s32.totalorder %v13919_v50, 0  ;;  %v4922_v44 = vadd.s32 %v4921_v52, %v4920_v7  ;;  %v4955_v31 = vadd.s32 %v4954_v34, %v4953_v2 }
 0x4ae   : > { %3052 = vperm.xlu0 %8684, %v17335_v41   ;;  %v4940_v19 = vrot.slane %v4939_v51, 4  ;;  %vm6204_vm12 = vcmp.gt.s32.totalorder %v13923_v0, 0  ;;  %v13964_v27 = vadd.s32 %v4916_v28, %v4915_v60  ;;  %v4930_v47 = vrot.slane %v4929_v37, 1 }
 0x4af   : > { %v4163_v55 = vsel %vm3907_vm0, 1, %v16629_v3  ;;  %v17336_v56 = vperm.slane %v17320_v24, 6  ;;  %v4967_v54 = vsel %vm4329_vm5, %v4164_v30, 0  ;;  %v4974_v1 = vsel %vm4329_vm5, %v4165_v13, 0 }
 0x4b0   : > { %v4941_v15 = vadd.s32 %v4940_v19, %v4939_v51  ;;  %vm3911_vm14 = vcmp.eq.s32.totalorder %v13870_v6, %v17166_v45  ;;  %vm6203_vm2 = vcmp.gt.s32.totalorder %v4903_v48, 0  ;;  %v4936_v7 = vadd.s32 %v4935_v5, %v4934_v38  ;;  %v13993_v51 = vpop.permute.xlu0 %2737 }
 0x4b1   : > { %3024 = vperm.xlu2 %8685, %v17336_v56   ;;  %v4948_v2 = vadd.s32 %v4947_v46, %v4946_v22  ;;  %v4960_v60 = vsel %vm4329_vm5, %v4163_v55, 0  ;;  %v17337_v28 = vperm.slane %v17334_v43, 0  ;;  %v4923_v52 = vrot.slane %v4922_v44, 1 }
 0x4b2   : > { %v4956_v34 = vrot.slane %v4955_v31, 2  ;;  %v4942_v24 = vrot.slane %v4941_v15, 2  ;;  %vm3912_vm10 = vcmp.eq.s32.totalorder %v13897_v59, %v17166_v45  ;;  %v4968_v26 = vrot.slane %v4967_v54, 4 }
 0x4b3   : > { %3038 = vperm.xlu1 %8683, %v17337_v28   ;;  %v4975_v12 = vrot.slane %v4974_v1, 4  ;;  %v4167_v6 = vsel %vm3911_vm14, 1, %v16629_v3  ;;  %v4961_v9 = vrot.slane %v4960_v60, 4  ;;  %v6458_v38 = vsel %vm6202_vm8, 1.0, %v17284_v29 }
 0x4b4   : > { %v6460_v22 = vsel %vm6204_vm12, 1.0, %v17284_v29  ;;  %vm6205_vm15 = vcmp.gt.s32.totalorder %v13964_v27, 0  ;;  %v4943_v5 = vadd.s32 %v4942_v24, %v4941_v15  ;;  %v17338_v59 = vperm.slane %v17334_v43, 5  ;;  %v14016_v40 = vpop.permute.xlu1 %2723 }
 0x4b5   : > { %v4931_v46 = vadd.s32 %v4930_v47, %v4929_v37  ;;  %v4962_v41 = vadd.s32 %v4961_v9, %v4960_v60  ;;  %v4168_v30 = vsel %vm3912_vm10, 1, %v16629_v3  ;;  %vm3910_vm0 = vcmp.eq.s32.totalorder %v13931_v63, %v17166_v45  ;;  %v8024_v37 = vpop.f32.mrf.mxu0  ;;  %v13998_v47 = vpop.permute.xlu2 %2751 }
 0x4b6   : > { %3073 = vperm.xlu0 %8684, %v17338_v59   ;;  %v6459_v50 = vsel %vm6203_vm2, 1.0, %v17284_v29  ;;  %v4937_v0 = vrot.slane %v4936_v7, 1  ;;  %v4949_v13 = vrot.slane %v4948_v2, 2  ;;  %v4988_v19 = vsel %vm4329_vm5, %v4167_v6, 0 }
 0x4b7   : > { %v4924_v55 = vadd.s32 %v4923_v52, %v4922_v44  ;;  %v4957_v56 = vadd.s32 %v4956_v34, %v4955_v31  ;;  %v4969_v15 = vadd.s32 %v4968_v26, %v4967_v54  ;;  %v4976_v28 = vadd.s32 %v4975_v12, %v4974_v1 }
 0x4b8   : > { %v17339_v60 = vperm.slane %v17334_v43, 1  ;;  %v4944_v63 = vrot.slane %v4943_v5, 1  ;;  %v4995_v24 = vsel %vm4329_vm5, %v4168_v30, 0  ;;  %v4166_v48 = vsel %vm3910_vm0, 1, %v16629_v3 }
 0x4b9   : > { %v8025_v9 = vadd.f32 %v13531_v20, %v8024_v37  ;;  %v17340_v59 = vand.u32 1, %v13284_v57  ;;  %vm6207_vm12 = vcmp.gt.s32.totalorder %v4931_v46, 0  ;;  %v4989_v31 = vrot.slane %v4988_v19, 4 }
 0x4ba   : > { %3045 = vperm.xlu2 %8685, %v17339_v60   ;;  %v4963_v54 = vrot.slane %v4962_v41, 2  ;;  %v4981_v1 = vsel %vm4329_vm5, %v4166_v48, 0  ;;  %v17343_v52 = vperm.slane %v17334_v43, 3  ;;  %v7675_v34 = vsel %vm16476_vm13, %v6459_v50, %v6458_v38  ;;  %v17344_v48 = vld [vmem:[#allocation43_spill] sm:$0xff]  ;;  %v14023_v50 = vpop.permute.xlu0 %2758 }
 0x4bb   : > { %vm14007_vm8 = vcmp.eq.s32.totalorder %v17340_v59, 1  ;;  %v4938_v26 = vadd.s32 %v4937_v0, %v4936_v7  ;;  %v4982_v12 = vrot.slane %v4981_v1, 4  ;;  %v8112_v20 = vmax.f32 %v8025_v9, 0.0 }
 0x4bc   : > { %3059 = vperm.xlu1 %8683, %v17343_v52   ;;  %v4950_v6 = vadd.s32 %v4949_v13, %v4948_v2  ;;  %vm6206_vm14 = vcmp.gt.s32.totalorder %v4924_v55, 0  ;;  %v4958_v57 = vrot.slane %v4957_v56, 1  ;;  %v4996_v30 = vrot.slane %v4995_v24, 4  ;;  %v14064_v44 = vpop.permute.xlu1 %2744 }
 0x4bd   : > { %v4970_v37 = vrot.slane %v4969_v15, 2  ;;  %v4977_v60 = vrot.slane %v4976_v28, 2  ;;  %v4983_v59 = vadd.s32 %v4982_v12, %v4981_v1  ;;  %8144 = vst [vmem:[%s13569_s28 + $0x20] sm:$0xff] %v8112_v20  ;;  %v4945_v4 = vadd.s32 %v4944_v63, %v4943_v5 }
 0x4be   : > { %v17345_v35 = vperm.slane %v17344_v48, 0  ;;  %vm3874_vm2 = vcmp.eq.s32.totalorder %v13442_v42, %v17166_v45  ;;  %v7676_v7 = vsel %vm7600_vm6, %v6460_v22, %v7675_v34  ;;  %v4990_v38 = vadd.s32 %v4989_v31, %v4988_v19 }
 0x4bf   : > { %v4964_v2 = vadd.s32 %v4963_v54, %v4962_v41  ;;  %v6461_v0 = vsel %vm6205_vm15, 1.0, %v17284_v29  ;;  %v6462_v5 = vsel %vm6206_vm14, 1.0, %v17284_v29  ;;  %v4984_v13 = vrot.slane %v4983_v59, 2  ;;  %v14035_v54 = vpop.permute.xlu2 %2772 }
 0x4c0   : > { %3094 = vperm.xlu0 %8684, %v17345_v35   ;;  %vm6209_vm10 = vcmp.gt.s32.totalorder %v4945_v4, 0  ;;  %v6463_v35 = vsel %vm6207_vm12, 1.0, %v17284_v29  ;;  %vm6208_vm0 = vcmp.gt.s32.totalorder %v4938_v26, 0  ;;  %v4951_v63 = vrot.slane %v4950_v6, 1 }
 0x4c1   : > { %v4997_v9 = vadd.s32 %v4996_v30, %v4995_v24  ;;  %v17346_v22 = vperm.slane %v17334_v43, 4  ;;  %v4959_v41 = vadd.s32 %v4958_v57, %v4957_v56  ;;  %v4971_v19 = vadd.s32 %v4970_v37, %v4969_v15 }
 0x4c2   : > { %v4978_v31 = vadd.s32 %v4977_v60, %v4976_v28  ;;  %v7677_v27 = vsel %vm7602_vm11, %v6461_v0, %v7676_v7  ;;  %v4991_v55 = vrot.slane %v4990_v38, 2  ;;  %v4965_v1 = vrot.slane %v4964_v2, 1 }
 0x4c3   : > { %3066 = vperm.xlu2 %8685, %v17346_v22   ;;  %v6465_v4 = vsel %vm6209_vm10, 1.0, %v17284_v29  ;;  %v7678_v46 = vsel %vm7604_vm9, %v6462_v5, %v7677_v27  ;;  %v17347_v52 = vperm.slane %v17334_v43, 6  ;;  %v4985_v24 = vadd.s32 %v4984_v13, %v4983_v59  ;;  %v14072_v13 = vpop.permute.xlu0 %2779 }
 0x4c4   : > { %v6464_v34 = vsel %vm6208_vm0, 1.0, %v17284_v29  ;;  %v7679_v56 = vsel %vm7606_vm7, %v6463_v35, %v7678_v46  ;;  %vm3913_vm15 = vcmp.eq.s32.totalorder %v13978_v62, %v17166_v45  ;;  %v4952_v15 = vadd.s32 %v4951_v63, %v4950_v6 }
 0x4c5   : > { %3080 = vperm.xlu1 %8683, %v17347_v52   ;;  %v4998_v28 = vrot.slane %v4997_v9, 2  ;;  %vm3914_vm12 = vcmp.eq.s32.totalorder %v13905_v8, %v17166_v45  ;;  %v7680_v26 = vsel %vm7608_vm1, %v6464_v34, %v7679_v56  ;;  %v17348_v12 = vrot.slane %v13678_v61, 2 }
 0x4c6   : > { %v4972_v57 = vrot.slane %v4971_v19, 1  ;;  %v7319_v30 = vsel %vm14007_vm8, 1.0, %v17284_v29  ;;  %v7681_v37 = vsel %vm16478_vm4, %v6465_v4, %v7680_v26  ;;  %v17349_v62 = vperm.slane %v17344_v48, 3 }
 0x4c7   : > { %v14051_v20 = vadd.s32 %v17348_v12, %v13678_v61  ;;  %v4979_v6 = vrot.slane %v4978_v31, 1  ;;  %v4992_v60 = vadd.s32 %v4991_v55, %v4990_v38  ;;  %v7871_v8 = vsel %vm16477_vm3, %v7319_v30, %v7681_v37  ;;  %v14088_v55 = vpop.permute.xlu2 %2793 }
 0x4c8   : > { %3115 = vperm.xlu0 %8684, %v17349_v62   ;;  %v4169_v59 = vsel %vm3913_vm15, 1, %v16629_v3  ;;  %vm6211_vm14 = vcmp.gt.s32.totalorder %v4959_v41, 0  ;;  %v4966_v61 = vadd.s32 %v4965_v1, %v4964_v2  ;;  %v4170_v7 = vsel %vm3914_vm12, 1, %v16629_v3  ;;  %8281 = vmatmul.msk.f32.gmra.mxu1 %vm4329_vm5, %v7871_v8 }
 0x4c9   : > { %v4986_v0 = vrot.slane %v4985_v24, 1  ;;  %v4130_v5 = vsel %vm3874_vm2, 1, %v16629_v3  ;;  %vm6210_vm8 = vcmp.gt.s32.totalorder %v4952_v15, 0  ;;  %v4999_v38 = vadd.s32 %v4998_v28, %v4997_v9 }
 0x4ca   : > { %vm3915_vm10 = vcmp.eq.s32.totalorder %v13949_v16, %v17166_v45  ;;  %v17350_v2 = vperm.slane %v17334_v43, 7  ;;  %v4973_v35 = vadd.s32 %v4972_v57, %v4971_v19  ;;  %vm3917_vm0 = vcmp.eq.s32.totalorder %v13960_v10, %v17166_v45 }
 0x4cb   : > { %v5002_v63 = vsel %vm4329_vm5, %v4169_v59, 0  ;;  %vm3916_vm15 = vcmp.eq.s32.totalorder %v14016_v40, %v17166_v45  ;;  %v6467_v42 = vsel %vm6211_vm14, 1.0, %v17284_v29  ;;  %v4980_v9 = vadd.s32 %v4979_v6, %v4978_v31 }
 0x4cc   : > { %3087 = vperm.xlu2 %8685, %v17350_v2   ;;  %v4993_v22 = vrot.slane %v4992_v60, 1  ;;  %v5009_v16 = vsel %vm4329_vm5, %v4170_v7, 0  ;;  %v17351_v27 = vperm.slane %v17344_v48, 1  ;;  %vm6212_vm2 = vcmp.gt.s32.totalorder %v4966_v61, 0  ;;  %v14122_v2 = vpop.permute.xlu0 %2800 }
 0x4cd   : > { %v4987_v43 = vadd.s32 %v4986_v0, %v4985_v24  ;;  %v4171_v19 = vsel %vm3915_vm10, 1, %v16629_v3  ;;  %v4172_v10 = vsel %vm3916_vm15, 1, %v16629_v3  ;;  %v6466_v40 = vsel %vm6210_vm8, 1.0, %v17284_v29 }
 0x4ce   : > { %3101 = vperm.xlu1 %8683, %v17351_v27   ;;  %v5000_v41 = vrot.slane %v4999_v38, 1  ;;  %v4173_v31 = vsel %vm3917_vm0, 1, %v16629_v3  ;;  %v5003_v1 = vrot.slane %v5002_v63, 4  ;;  %v17352_v4 = vand.u32 1, %v13360_v18 }
 0x4cf   : > { %v7682_v52 = vsel %vm16476_vm13, %v6467_v42, %v6466_v40  ;;  %vm6213_vm14 = vcmp.gt.s32.totalorder %v4973_v35, 0  ;;  %vm3918_vm10 = vcmp.eq.s32.totalorder %v13993_v51, %v17166_v45  ;;  %v5023_v24 = vsel %vm4329_vm5, %v4172_v10, 0  ;;  %v14111_v51 = vpop.permute.xlu1 %2765 }
 0x4d0   : > { %vm14095_vm12 = vcmp.eq.s32.totalorder %v17352_v4, 1  ;;  %v17355_v34 = vperm.slane %v17344_v48, 6  ;;  %v4994_v56 = vadd.s32 %v4993_v22, %v4992_v60  ;;  %v6468_v15 = vsel %vm6212_vm2, 1.0, %v17284_v29 }
 0x4d1   : > { %v5010_v18 = vrot.slane %v5009_v16, 4  ;;  %v5016_v28 = vsel %vm4329_vm5, %v4171_v19, 0  ;;  %vm6214_vm8 = vcmp.gt.s32.totalorder %v4980_v9, 0  ;;  %vm6215_vm0 = vcmp.gt.s32.totalorder %v4987_v43, 0  ;;  %v14133_v9 = vpop.permute.xlu2 %2814 }
 0x4d2   : > { %3136 = vperm.xlu0 %8684, %v17355_v34   ;;  %v5030_v26 = vsel %vm4329_vm5, %v4173_v31, 0  ;;  %vm3920_vm15 = vcmp.eq.s32.totalorder %v13998_v47, %v17166_v45  ;;  %v5004_v12 = vadd.s32 %v5003_v1, %v5002_v63  ;;  %v4174_v57 = vsel %vm3918_vm10, 1, %v16629_v3 }
 0x4d3   : > { %v5024_v30 = vrot.slane %v5023_v24, 4  ;;  %v5001_v37 = vadd.s32 %v5000_v41, %v4999_v38  ;;  %v17356_v62 = vperm.slane %v17344_v48, 2  ;;  %v4746_v6 = vrot.slane %v13842_v58, 2 }
 0x4d4   : > { %v4729_v60 = vsel %vm4329_vm5, %v4130_v5, 0  ;;  %v7683_v8 = vsel %vm7600_vm6, %v6468_v15, %v7682_v52  ;;  %v5017_v59 = vrot.slane %v5016_v28, 4  ;;  %v6469_v61 = vsel %vm6213_vm14, 1.0, %v17284_v29 }
 0x4d5   : > { %3108 = vperm.xlu2 %8685, %v17356_v62   ;;  %v6470_v7 = vsel %vm6214_vm8, 1.0, %v17284_v29  ;;  %vm6216_vm2 = vcmp.gt.s32.totalorder %v4994_v56, 0  ;;  %v5011_v0 = vadd.s32 %v5010_v18, %v5009_v16  ;;  %v17357_v38 = vperm.slane %v17344_v48, 4 }
 0x4d6   : > { %v6471_v63 = vsel %vm6215_vm0, 1.0, %v17284_v29  ;;  %v5031_v42 = vrot.slane %v5030_v26, 4  ;;  %v5037_v5 = vsel %vm4329_vm5, %v4174_v57, 0  ;;  %v4176_v35 = vsel %vm3920_vm15, 1, %v16629_v3 }
 0x4d7   : > { %3122 = vperm.xlu1 %8683, %v17357_v38   ;;  %v5005_v22 = vrot.slane %v5004_v12, 2  ;;  %v5025_v16 = vadd.s32 %v5024_v30, %v5023_v24  ;;  %vm6217_vm14 = vcmp.gt.s32.totalorder %v5001_v37, 0  ;;  %v7684_v27 = vsel %vm7602_vm11, %v6469_v61, %v7683_v8  ;;  %v14152_v30 = vpop.permute.xlu1 %2786  ;;  %v14168_v38 = vpop.permute.xlu0 %2821 }
 0x4d8   : > { %v4730_v19 = vrot.slane %v4729_v60, 4  ;;  %vm3879_vm10 = vcmp.eq.s32.totalorder %v13457_v33, %v17166_v45  ;;  %v5018_v43 = vadd.s32 %v5017_v59, %v5016_v28  ;;  %v7685_v10 = vsel %vm7604_vm9, %v6470_v7, %v7684_v27 }
 0x4d9   : > { %v17358_v40 = vperm.slane %v17246_v14, 1  ;;  %vm6178_vm8 = vcmp.gt.s32.totalorder %v13722_v39, 0  ;;  %v5012_v47 = vrot.slane %v5011_v0, 2  ;;  %v5051_v41 = vsel %vm4329_vm5, %v4176_v35, 0 }
 0x4da   : > { %v6472_v31 = vsel %vm6216_vm2, 1.0, %v17284_v29  ;;  %v7686_v1 = vsel %vm7606_vm7, %v6471_v63, %v7685_v10  ;;  %v5032_v4 = vadd.s32 %v5031_v42, %v5030_v26  ;;  %v5038_v52 = vrot.slane %v5037_v5, 4  ;;  %v14177_v10 = vpop.permute.xlu2 %2835 }
 0x4db   : > { %3157 = vperm.xlu0 %8684, %v17358_v40   ;;  %v6473_v24 = vsel %vm6217_vm14, 1.0, %v17284_v29  ;;  %v7687_v34 = vsel %vm7608_vm1, %v6472_v31, %v7686_v1  ;;  %v5006_v15 = vadd.s32 %v5005_v22, %v5004_v12  ;;  %v5026_v18 = vrot.slane %v5025_v16, 2 }
 0x4dc   : > { %v7320_v28 = vsel %vm14095_vm12, 1.0, %v17284_v29  ;;  %v7688_v57 = vsel %vm16478_vm4, %v6473_v24, %v7687_v34  ;;  %v17359_v56 = vperm.slane %v17344_v48, 5  ;;  %v5019_v37 = vrot.slane %v5018_v43, 2 }
 0x4dd   : > { %v5052_v26 = vrot.slane %v5051_v41, 4  ;;  %v7872_v62 = vsel %vm16477_vm3, %v7320_v28, %v7688_v57  ;;  %vm3919_vm0 = vcmp.eq.s32.totalorder %v14064_v44, %v17166_v45  ;;  %v17360_v12 = vrot.slane %v13699_v21, 1 }
 0x4de   : > { %3129 = vperm.xlu2 %8685, %v17359_v56   ;;  %v17361_v8 = vrot.slane %v13706_v23, 4  ;;  %v5013_v61 = vadd.s32 %v5012_v47, %v5011_v0  ;;  %8282 = vmatmul.msk.f32.gmra.mxu1 %vm4329_vm5, %v7872_v62  ;;  %v4175_v7 = vsel %vm3919_vm0, 1, %v16629_v3  ;;  %v17362_v63 = vperm.slane %v17344_v48, 7 }
 0x4df   : > { %v4742_v46 = vadd.s32 %v17360_v12, %v13699_v21  ;;  %v4731_v42 = vadd.s32 %v4730_v19, %v4729_v60  ;;  %v4135_v21 = vsel %vm3879_vm10, 1, %v16629_v3  ;;  %v5039_v44 = vadd.s32 %v5038_v52, %v5037_v5  ;;  %v14199_v62 = vpop.permute.xlu0 %2842 }
 0x4e0   : > { %v4759_v59 = vadd.s32 %v17361_v8, %v13706_v23  ;;  %3143 = vperm.xlu1 %8683, %v17362_v63   ;;  %v5044_v35 = vsel %vm4329_vm5, %v4175_v7, 0  ;;  %v5033_v23 = vrot.slane %v5032_v4, 2  ;;  %v5007_v0 = vrot.slane %v5006_v15, 1 }
 0x4e1   : > { %v5027_v22 = vadd.s32 %v5026_v18, %v5025_v16  ;;  %v5045_v27 = vrot.slane %v5044_v35, 4  ;;  %v4713_v40 = vrot.slane %v14051_v20, 1  ;;  %v4747_v48 = vadd.s32 %v4746_v6, %v13842_v58 }
 0x4e2   : > { %v5020_v47 = vadd.s32 %v5019_v37, %v5018_v43  ;;  %v5053_v60 = vadd.s32 %v5052_v26, %v5051_v41  ;;  %v17363_v19 = vperm.slane %v17246_v14, 4  ;;  %vm6180_vm12 = vcmp.gt.s32.totalorder %v4742_v46, 0  ;;  %v14197_v26 = vpop.permute.xlu1 %2807 }
 0x4e3   : > { %v4760_v33 = vrot.slane %v4759_v59, 2  ;;  %v5014_v5 = vrot.slane %v5013_v61, 1  ;;  %v5046_v31 = vadd.s32 %v5045_v27, %v5044_v35  ;;  %v4732_v1 = vrot.slane %v4731_v42, 2 }
 0x4e4   : > { %3178 = vperm.xlu0 %8684, %v17363_v19   ;;  %v4764_v52 = vsel %vm4329_vm5, %v4135_v21, 0  ;;  %vm3877_vm15 = vcmp.eq.s32.totalorder %v13483_v49, %v17166_v45  ;;  %v5040_v16 = vrot.slane %v5039_v44, 2  ;;  %v5034_v24 = vadd.s32 %v5033_v23, %v5032_v4 }
 0x4e5   : > { %v5008_v34 = vadd.s32 %v5007_v0, %v5006_v15  ;;  %v5028_v18 = vrot.slane %v5027_v22, 1  ;;  %v5047_v58 = vrot.slane %v5046_v31, 2  ;;  %v17364_v6 = vperm.slane %v17246_v14, 0 }
 0x4e6   : > { %v14191_v43 = vsel %vm6178_vm8, 1.0, %v17284_v29  ;;  %v4748_v41 = vrot.slane %v4747_v48, 1  ;;  %v5021_v28 = vrot.slane %v5020_v47, 1  ;;  %v5054_v57 = vrot.slane %v5053_v60, 2 }
 0x4e7   : > { %3150 = vperm.xlu2 %8685, %v17364_v6   ;;  %v14195_v56 = vsel %vm6180_vm12, 1.0, %v17284_v29  ;;  %v4765_v37 = vrot.slane %v4764_v52, 4  ;;  %v5015_v4 = vadd.s32 %v5014_v5, %v5013_v61  ;;  %v5048_v15 = vadd.s32 %v5047_v58, %v5046_v31 }
 0x4e8   : > { %17365 = vst [vmem:[#allocation40_spill] sm:$0xff] %v14195_v56  ;;  %v17366_v12 = vperm.slane %v17246_v14, 2  ;;  %v14204_v39 = vadd.s32 %v4713_v40, %v14051_v20  ;;  %v14206_v8 = vadd.s32 %v4760_v33, %v4759_v59  ;;  %v4133_v46 = vsel %vm3877_vm15, 1, %v16629_v3  ;;  %v14218_v20 = vpop.permute.xlu2 %2856 }
 0x4e9   : > { %v5041_v7 = vadd.s32 %v5040_v16, %v5039_v44  ;;  %v14212_v61 = vadd.s32 %v4732_v1, %v4731_v42  ;;  %v5035_v63 = vrot.slane %v5034_v24, 1  ;;  %vm6218_vm2 = vcmp.gt.s32.totalorder %v5008_v34, 0  ;;  %v14250_v16 = vpop.permute.xlu0 %2863 }
 0x4ea   : > { %3164 = vperm.xlu1 %8683, %v17366_v12   ;;  %v5029_v21 = vadd.s32 %v5028_v18, %v5027_v22  ;;  %v14214_v35 = vadd.s32 %v4748_v41, %v4747_v48  ;;  %v5022_v23 = vadd.s32 %v5021_v28, %v5020_v47  ;;  %v5055_v0 = vadd.s32 %v5054_v57, %v5053_v60 }
 0x4eb   : > { %vm3921_vm14 = vcmp.eq.s32.totalorder %v14023_v50, %v17166_v45  ;;  %v17367_v59 = vperm.slane %v17246_v14, 7  ;;  %v14222_v49 = vadd.s32 %v4765_v37, %v4764_v52  ;;  %vm6219_vm10 = vcmp.gt.s32.totalorder %v5015_v4, 0  ;;  %v14248_v52 = vpop.permute.xlu1 %2828 }
 0x4ec   : > { %vm3923_vm8 = vcmp.eq.s32.totalorder %v14035_v54, %v17166_v45  ;;  %v5049_v42 = vrot.slane %v5048_v15, 1  ;;  %v14227_v44 = vsel %vm4329_vm5, %v4133_v46, 0  ;;  %v6474_v22 = vsel %vm6218_vm2, 1.0, %v17284_v29 }
 0x4ed   : > { %3199 = vperm.xlu0 %8684, %v17367_v59   ;;  %v5042_v27 = vrot.slane %v5041_v7, 1  ;;  %vm3924_vm0 = vcmp.eq.s32.totalorder %v14072_v13, %v17166_v45  ;;  %v4734_v50 = vrot.slane %v14212_v61, 1  ;;  %v5036_v40 = vadd.s32 %v5035_v63, %v5034_v24 }
 0x4ee   : > { %vm6221_vm12 = vcmp.gt.s32.totalorder %v5029_v21, 0  ;;  %v4177_v48 = vsel %vm3921_vm14, 1, %v16629_v3  ;;  %v17368_v47 = vperm.slane %v17246_v14, 3  ;;  %v6475_v54 = vsel %vm6219_vm10, 1.0, %v17284_v29 }
 0x4ef   : > { %vm6220_vm15 = vcmp.gt.s32.totalorder %v5022_v23, 0  ;;  %v5056_v60 = vrot.slane %v5055_v0, 1  ;;  %v4179_v19 = vsel %vm3923_vm8, 1, %v16629_v3  ;;  %v17369_v33 = vand.u32 1, %v13473_v36 }
 0x4f0   : > { %3171 = vperm.xlu2 %8685, %v17368_v47   ;;  %v7689_v13 = vsel %vm16476_vm13, %v6475_v54, %v6474_v22  ;;  %v5050_v31 = vadd.s32 %v5049_v42, %v5048_v15  ;;  %v4180_v1 = vsel %vm3924_vm0, 1, %v16629_v3  ;;  %vm3926_vm14 = vcmp.eq.s32.totalorder %v14088_v55, %v17166_v45  ;;  %v14267_v37 = vpop.permute.xlu2 %2877 }
 0x4f1   : > { %vm14240_vm2 = vcmp.eq.s32.totalorder %v17369_v33, 1  ;;  %v17372_v24 = vperm.slane %v17246_v14, 5  ;;  %v5043_v36 = vadd.s32 %v5042_v27, %v5041_v7  ;;  %v6477_v34 = vsel %vm6221_vm12, 1.0, %v17284_v29 }
 0x4f2   : > { %v5058_v18 = vsel %vm4329_vm5, %v4177_v48, 0  ;;  %vm3922_vm10 = vcmp.eq.s32.totalorder %v14111_v51, %v17166_v45  ;;  %vm3880_vm8 = vcmp.eq.s32.totalorder %v13509_v11, %v17166_v45  ;;  %v6476_v55 = vsel %vm6220_vm15, 1.0, %v17284_v29 }
 0x4f3   : > { %3185 = vperm.xlu1 %8683, %v17372_v24   ;;  %vm6222_vm0 = vcmp.gt.s32.totalorder %v5036_v40, 0  ;;  %v5072_v58 = vsel %vm4329_vm5, %v4179_v19, 0  ;;  %v7690_v6 = vsel %vm7600_vm6, %v6476_v55, %v7689_v13  ;;  %v5079_v41 = vsel %vm4329_vm5, %v4180_v1, 0  ;;  %v14289_v47 = vpop.permute.xlu1 %2849 }
 0x4f4   : > { %v4182_v28 = vsel %vm3926_vm14, 1, %v16629_v3  ;;  %v5057_v57 = vadd.s32 %v5056_v60, %v5055_v0  ;;  %v17373_v51 = vperm.slane %v17263_v32, 2  ;;  %v7691_v11 = vsel %vm7602_vm11, %v6477_v34, %v7690_v6 }
 0x4f5   : > { %v5059_v4 = vrot.slane %v5058_v18, 4  ;;  %vm6224_vm12 = vcmp.gt.s32.totalorder %v5050_v31, 0  ;;  %v4178_v15 = vsel %vm3922_vm10, 1, %v16629_v3  ;;  %v4751_v12 = vrot.slane %v14227_v44, 4 }
 0x4f6   : > { %3220 = vperm.xlu0 %8684, %v17373_v51   ;;  %v4136_v46 = vsel %vm3880_vm8, 1, %v16629_v3  ;;  %vm6223_vm15 = vcmp.gt.s32.totalorder %v5043_v36, 0  ;;  %v5073_v7 = vrot.slane %v5072_v58, 4  ;;  %v6478_v63 = vsel %vm6222_vm0, 1.0, %v17284_v29 }
 0x4f7   : > { %v5080_v21 = vrot.slane %v5079_v41, 4  ;;  %v5093_v23 = vsel %vm4329_vm5, %v4182_v28, 0  ;;  %vm3929_vm14 = vcmp.eq.s32.totalorder %v14133_v9, %v17166_v45  ;;  %v17374_v0 = vperm.slane %v17246_v14, 6  ;;  %v14291_v9 = vpop.permute.xlu0 %2884 }
 0x4f8   : > { %v5065_v59 = vsel %vm4329_vm5, %v4178_v15, 0  ;;  %vm6225_vm10 = vcmp.gt.s32.totalorder %v5057_v57, 0  ;;  %v6480_v42 = vsel %vm6224_vm12, 1.0, %v17284_v29  ;;  %v7692_v22 = vsel %vm7604_vm9, %v6478_v63, %v7691_v11  ;;  %v14311_v57 = vpop.permute.xlu2 %2898 }
 0x4f9   : > { %3192 = vperm.xlu2 %8685, %v17374_v0   ;;  %v4771_v27 = vsel %vm4329_vm5, %v4136_v46, 0  ;;  %v6479_v40 = vsel %vm6223_vm15, 1.0, %v17284_v29  ;;  %v5060_v48 = vadd.s32 %v5059_v4, %v5058_v18  ;;  %vm3927_vm8 = vcmp.eq.s32.totalorder %v14122_v2, %v17166_v45 }
 0x4fa   : > { %v17375_v14 = vperm.slane %v17263_v32, 0  ;;  %v5074_v54 = vadd.s32 %v5073_v7, %v5072_v58  ;;  %v5094_v60 = vrot.slane %v5093_v23, 4  ;;  %v4185_v19 = vsel %vm3929_vm14, 1, %v16629_v3 }
 0x4fb   : > { %v7693_v33 = vsel %vm7606_vm7, %v6479_v40, %v7692_v22  ;;  %v4752_v13 = vadd.s32 %v4751_v12, %v14227_v44  ;;  %v5066_v31 = vrot.slane %v5065_v59, 4  ;;  %v6481_v1 = vsel %vm6225_vm10, 1.0, %v17284_v29 }
 0x4fc   : > { %3206 = vperm.xlu1 %8683, %v17375_v14   ;;  %v7694_v2 = vsel %vm7608_vm1, %v6480_v42, %v7693_v33  ;;  %v5081_v24 = vadd.s32 %v5080_v21, %v5079_v41  ;;  %v4183_v36 = vsel %vm3927_vm8, 1, %v16629_v3  ;;  %v7321_v34 = vsel %vm14240_vm2, 1.0, %v17284_v29 }
 0x4fd   : > { %v7695_v18 = vsel %vm16478_vm4, %v6481_v1, %v7694_v2  ;;  %v17376_v55 = vperm.slane %v17263_v32, 5  ;;  %v4772_v58 = vrot.slane %v4771_v27, 4  ;;  %v5061_v44 = vrot.slane %v5060_v48, 2 }
 0x4fe   : > { %v5114_v6 = vsel %vm4329_vm5, %v4185_v19, 0  ;;  %v7873_v28 = vsel %vm16477_vm3, %v7321_v34, %v7695_v18  ;;  %v4767_v41 = vrot.slane %v14222_v49, 2  ;;  %v5075_v51 = vrot.slane %v5074_v54, 2 }
 0x4ff   : > { %3241 = vperm.xlu0 %8684, %v17376_v55   ;;  %v5095_v11 = vadd.s32 %v5094_v60, %v5093_v23  ;;  %vm3925_vm2 = vcmp.eq.s32.totalorder %v14152_v30, %v17166_v45  ;;  %8283 = vmatmul.msk.f32.gmra.mxu1 %vm4329_vm5, %v7873_v28  ;;  %v4762_v5 = vrot.slane %v14206_v8, 1  ;;  %v4753_v4 = vrot.slane %v4752_v13, 2  ;;  %v14330_v42 = vpop.permute.xlu0 %2905 }
 0x500   : > { %v5067_v15 = vadd.s32 %v5066_v31, %v5065_v59  ;;  %v5100_v12 = vsel %vm4329_vm5, %v4183_v36, 0  ;;  %v17377_v46 = vperm.slane %v17263_v32, 1  ;;  %vm6181_vm0 = vcmp.gt.s32.totalorder %v14214_v35, 0  ;;  %v14328_v59 = vpop.permute.xlu1 %2870 }
 0x501   : > { %v4735_v7 = vadd.s32 %v4734_v50, %v14212_v61  ;;  %v5082_v63 = vrot.slane %v5081_v24, 2  ;;  %v5115_v21 = vrot.slane %v5114_v6, 4  ;;  %v4773_v30 = vadd.s32 %v4772_v58, %v4771_v27  ;;  %v14352_v58 = vpop.permute.xlu2 %2919 }
 0x502   : > { %3213 = vperm.xlu2 %8685, %v17377_v46   ;;  %v5062_v23 = vadd.s32 %v5061_v44, %v5060_v48  ;;  %v4181_v0 = vsel %vm3925_vm2, 1, %v16629_v3  ;;  %vm3930_vm12 = vcmp.eq.s32.totalorder %v14168_v38, %v17166_v45  ;;  %v17378_v22 = vperm.slane %v17263_v32, 3 }
 0x503   : > { %v14335_v35 = vadd.s32 %v4767_v41, %v14222_v49  ;;  %v5076_v61 = vadd.s32 %v5075_v51, %v5074_v54  ;;  %v5096_v50 = vrot.slane %v5095_v11, 2  ;;  %v5101_v40 = vrot.slane %v5100_v12, 4 }
 0x504   : > { %3227 = vperm.xlu1 %8683, %v17378_v22   ;;  %v14338_v27 = vsel %vm6181_vm0, 1.0, %v17284_v29  ;;  %v14341_v48 = vadd.s32 %v4762_v5, %v14206_v8  ;;  %v4754_v38 = vadd.s32 %v4753_v4, %v4752_v13  ;;  %v5068_v14 = vrot.slane %v5067_v15, 2 }
 0x505   : > { %17379 = vst [vmem:[#allocation28_spill] sm:$0xff] %v14335_v35  ;;  %v5083_v60 = vadd.s32 %v5082_v63, %v5081_v24  ;;  %v5116_v19 = vadd.s32 %v5115_v21, %v5114_v6  ;;  %v5086_v33 = vsel %vm4329_vm5, %v4181_v0, 0  ;;  %v4186_v31 = vsel %vm3930_vm12, 1, %v16629_v3 }
 0x506   : > { %17380 = vst [vmem:[#allocation44_spill] sm:$0xff] %v14338_v27  ;;  %v17382_v49 = vperm.slane %v17189_v17, 0  ;;  %vm6179_vm15 = vcmp.gt.s32.totalorder %v4735_v7, 0  ;;  %v4774_v54 = vrot.slane %v4773_v30, 2  ;;  %v5063_v1 = vrot.slane %v5062_v23, 1 }
 0x507   : > { %17381 = vst [vmem:[#allocation27_spill] sm:$0xff] %v14341_v48  ;;  %vm3938_vm14 = vcmp.eq.s32.totalorder %v14267_v37, %v17166_v45  ;;  %v5077_v2 = vrot.slane %v5076_v61, 1  ;;  %v5097_v13 = vadd.s32 %v5096_v50, %v5095_v11  ;;  %v5102_v36 = vadd.s32 %v5101_v40, %v5100_v12  ;;  %v14363_v12 = vpop.permute.xlu0 %2926 }
 0x508   : > { %3262 = vperm.xlu0 %8684, %v17382_v49   ;;  %v5069_v24 = vadd.s32 %v5068_v14, %v5067_v15  ;;  %v5087_v34 = vrot.slane %v5086_v33, 4  ;;  %v5121_v18 = vsel %vm4329_vm5, %v4186_v31, 0  ;;  %v4194_v55 = vsel %vm3938_vm14, 1, %v16629_v3  ;;  %v14361_v15 = vpop.permute.xlu1 %2891 }
 0x509   : > { %v17383_v44 = vperm.slane %v17263_v32, 4  ;;  %v4755_v6 = vrot.slane %v4754_v38, 1  ;;  %v5084_v28 = vrot.slane %v5083_v60, 1  ;;  %v5117_v41 = vrot.slane %v5116_v19, 2 }
 0x50a   : > { %v5177_v37 = vsel %vm4329_vm5, %v4194_v55, 0  ;;  %v6435_v51 = vsel %vm6179_vm15, 1.0, %v17284_v29  ;;  %v14359_v11 = vadd.s32 %v4774_v54, %v4773_v30  ;;  %v5064_v5 = vadd.s32 %v5063_v1, %v5062_v23 }
 0x50b   : > { %3234 = vperm.xlu2 %8685, %v17383_v44   ;;  %v5178_v4 = vrot.slane %v5177_v37, 4  ;;  %v17385_v46 = vperm.slane %v17263_v32, 6  ;;  %v5078_v63 = vadd.s32 %v5077_v2, %v5076_v61  ;;  %v5103_v21 = vrot.slane %v5102_v36, 2 }
 0x50c   : > { %17384 = vst [vmem:[#allocation74_spill] sm:$0xff] %v14359_v11  ;;  %v5122_v0 = vrot.slane %v5121_v18, 4  ;;  %vm3939_vm10 = vcmp.eq.s32.totalorder %v14291_v9, %v17166_v45  ;;  %v5098_v22 = vrot.slane %v5097_v13, 1  ;;  %v5070_v7 = vrot.slane %v5069_v24, 1 }
 0x50d   : > { %3248 = vperm.xlu1 %8683, %v17385_v46   ;;  %v5088_v50 = vadd.s32 %v5087_v34, %v5086_v33  ;;  %v5179_v30 = vadd.s32 %v5178_v4, %v5177_v37  ;;  %v14371_v23 = vsel %vm16476_vm13, %v6435_v51, %v14191_v43  ;;  %v14373_v40 = vadd.s32 %v4755_v6, %v4754_v38 }
 0x50e   : > { %17386 = vst [vmem:[#allocation33_spill] sm:$0xff] %v14371_v23  ;;  %v5085_v14 = vadd.s32 %v5084_v28, %v5083_v60  ;;  %v5118_v31 = vadd.s32 %v5117_v41, %v5116_v19  ;;  %v17388_v49 = vperm.slane %v17189_v17, 3  ;;  %vm6226_vm8 = vcmp.gt.s32.totalorder %v5064_v5, 0 }
 0x50f   : > { %17387 = vst [vmem:[#allocation43_spill] sm:$0xff] %v14373_v40  ;;  %v5180_v54 = vrot.slane %v5179_v30, 2  ;;  %v4195_v9 = vsel %vm3939_vm10, 1, %v16629_v3  ;;  %vm6228_vm2 = vcmp.gt.s32.totalorder %v5078_v63, 0  ;;  %v5104_v33 = vadd.s32 %v5103_v21, %v5102_v36  ;;  %v14397_v51 = vpop.permute.xlu0 %2947 }
 0x510   : > { %3283 = vperm.xlu0 %8684, %v17388_v49   ;;  %v5123_v1 = vadd.s32 %v5122_v0, %v5121_v18  ;;  %v5184_v2 = vsel %vm4329_vm5, %v4195_v9, 0  ;;  %v5099_v43 = vadd.s32 %v5098_v22, %v5097_v13  ;;  %v5071_v34 = vadd.s32 %v5070_v7, %v5069_v24  ;;  %v14388_v24 = vpop.permute.xlu2 %2940  ;;  %v14390_v6 = vpop.permute.xlu1 %2912 }
 0x511   : > { %v5089_v38 = vrot.slane %v5088_v50, 2  ;;  %v5185_v55 = vrot.slane %v5184_v2, 4  ;;  %v17389_v60 = vperm.slane %v17263_v32, 7  ;;  %v6482_v19 = vsel %vm6226_vm8, 1.0, %v17284_v29 }
 0x512   : > { %vm6229_vm0 = vcmp.gt.s32.totalorder %v5085_v14, 0  ;;  %v5119_v44 = vrot.slane %v5118_v31, 1  ;;  %vm3937_vm12 = vcmp.eq.s32.totalorder %v14328_v59, %v17166_v45  ;;  %vm3932_vm15 = vcmp.eq.s32.totalorder %v14177_v10, %v17166_v45 }
 0x513   : > { %3255 = vperm.xlu2 %8685, %v17389_v60   ;;  %v5181_v36 = vadd.s32 %v5180_v54, %v5179_v30  ;;  %v5186_v18 = vadd.s32 %v5185_v55, %v5184_v2  ;;  %v4193_v13 = vsel %vm3937_vm12, 1, %v16629_v3  ;;  %v17390_v32 = vperm.slane %v17189_v17, 1  ;;  %v8036_v30 = vpop.f32.mrf.mxu1 }
 0x514   : > { %v6484_v28 = vsel %vm6228_vm2, 1.0, %v17284_v29  ;;  %v5105_v41 = vrot.slane %v5104_v33, 1  ;;  %v5124_v37 = vrot.slane %v5123_v1, 2  ;;  %v5170_v59 = vsel %vm4329_vm5, %v4193_v13, 0 }
 0x515   : > { %3269 = vperm.xlu1 %8683, %v17390_v32   ;;  %vm6231_vm14 = vcmp.gt.s32.totalorder %v5099_v43, 0  ;;  %vm6227_vm10 = vcmp.gt.s32.totalorder %v5071_v34, 0  ;;  %v5090_v5 = vadd.s32 %v5089_v38, %v5088_v50  ;;  %v5171_v4 = vrot.slane %v5170_v59, 4 }
 0x516   : > { %v14401_v46 = vsel %vm6229_vm0, 1.0, %v17284_v29  ;;  %v5120_v21 = vadd.s32 %v5119_v44, %v5118_v31  ;;  %v4188_v63 = vsel %vm3932_vm15, 1, %v16629_v3  ;;  %v5187_v0 = vrot.slane %v5186_v18, 2 }
 0x517   : > { %v17391_v22 = vperm.slane %v17189_v17, 6  ;;  %vm3928_vm8 = vcmp.eq.s32.totalorder %v14197_v26, %v17166_v45  ;;  %v5182_v7 = vrot.slane %v5181_v36, 1  ;;  %v5172_v50 = vadd.s32 %v5171_v4, %v5170_v59 }
 0x518   : > { %vm3940_vm2 = vcmp.eq.s32.totalorder %v14361_v15, %v17166_v45  ;;  %v14414_v14 = vsel %vm6231_vm14, 1.0, %v17284_v29  ;;  %v6483_v31 = vsel %vm6227_vm10, 1.0, %v17284_v29  ;;  %v14417_v10 = vadd.s32 %v5105_v41, %v5104_v33  ;;  %v14429_v33 = vld [vmem:[%s16215_s3] ss:$0 sm:$0xff]  ;;  %v14433_v44 = vpop.permute.xlu1 %2933 }
 0x519   : > { %3304 = vperm.xlu0 %8684, %v17391_v22   ;;  %v5125_v49 = vadd.s32 %v5124_v37, %v5123_v1  ;;  %v5091_v54 = vrot.slane %v5090_v5, 1  ;;  %v5135_v9 = vsel %vm4329_vm5, %v4188_v63, 0  ;;  %vm3933_vm0 = vcmp.eq.s32.totalorder %v14199_v62, %v17166_v45 }
 0x51a   : > { %v5173_v26 = vrot.slane %v5172_v50, 2  ;;  %v17392_v2 = vperm.slane %v17189_v17, 2  ;;  %v4184_v15 = vsel %vm3928_vm8, 1, %v16629_v3  ;;  %v5188_v43 = vadd.s32 %v5187_v0, %v5186_v18 }
 0x51b   : > { %v4196_v34 = vsel %vm3940_vm2, 1, %v16629_v3  ;;  %v8037_v1 = vadd.f32 %v14429_v33, %v8036_v30  ;;  %v7696_v38 = vsel %vm16476_vm13, %v6483_v31, %v6482_v19  ;;  %vm6234_vm12 = vcmp.gt.s32.totalorder %v5120_v21, 0  ;;  %v14443_v21 = vpop.permute.xlu2 %2961 }
 0x51c   : > { %3276 = vperm.xlu2 %8685, %v17392_v2   ;;  %v5183_v55 = vadd.s32 %v5182_v7, %v5181_v36  ;;  %v5174_v60 = vadd.s32 %v5173_v26, %v5172_v50  ;;  %v17393_v13 = vperm.slane %v17189_v17, 4  ;;  %v5126_v18 = vrot.slane %v5125_v49, 1  ;;  %v14454_v7 = vpop.permute.xlu0 %2968 }
 0x51d   : > { %v5136_v32 = vrot.slane %v5135_v9, 4  ;;  %v5191_v41 = vsel %vm4329_vm5, %v4196_v34, 0  ;;  %v8116_v37 = vmax.f32 %v8037_v1, 0.0  ;;  %v5107_v59 = vsel %vm4329_vm5, %v4184_v15, 0 }
 0x51e   : > { %3290 = vperm.xlu1 %8683, %v17393_v13   ;;  %v4189_v19 = vsel %vm3933_vm0, 1, %v16629_v3  ;;  %v5175_v36 = vrot.slane %v5174_v60, 1  ;;  %v5192_v4 = vrot.slane %v5191_v41, 4  ;;  %v14446_v63 = vsel %vm7600_vm6, %v6484_v28, %v7696_v38 }
 0x51f   : > { %v14449_v0 = vsel %vm6234_vm12, 1.0, %v17284_v29  ;;  %vm3935_vm15 = vcmp.eq.s32.totalorder %v14218_v20, %v17166_v45  ;;  %v5189_v22 = vrot.slane %v5188_v43, 1  ;;  %8148 = vst [vmem:[%s13569_s28 + $0x40] sm:$0xff] %v8116_v37  ;;  %v17394_v62 = vperm.slane %v17267_v25, 1 }
 0x520   : > { %v5092_v50 = vadd.s32 %v5091_v54, %v5090_v5  ;;  %vm6243_vm14 = vcmp.gt.s32.totalorder %v5183_v55, 0  ;;  %v5176_v30 = vadd.s32 %v5175_v36, %v5174_v60  ;;  %v5193_v31 = vadd.s32 %v5192_v4, %v5191_v41  ;;  %v14471_v60 = vpop.permute.xlu1 %2954 }
 0x521   : > { %3325 = vperm.xlu0 %8684, %v17394_v62   ;;  %v5127_v26 = vadd.s32 %v5126_v18, %v5125_v49  ;;  %v5137_v28 = vadd.s32 %v5136_v32, %v5135_v9  ;;  %v5108_v2 = vrot.slane %v5107_v59, 4  ;;  %v5142_v15 = vsel %vm4329_vm5, %v4189_v19, 0 }
 0x522   : > { %v4191_v34 = vsel %vm3935_vm15, 1, %v16629_v3  ;;  %vm3931_vm10 = vcmp.eq.s32.totalorder %v14248_v52, %v17166_v45  ;;  %vm6242_vm8 = vcmp.gt.s32.totalorder %v5176_v30, 0  ;;  %v5194_v20 = vrot.slane %v5193_v31, 2 }
 0x523   : > { %v17395_v1 = vperm.slane %v17189_v17, 5  ;;  %v6499_v5 = vsel %vm6243_vm14, 1.0, %v17284_v29  ;;  %v5190_v54 = vadd.s32 %v5189_v22, %v5188_v43  ;;  %v6498_v38 = vsel %vm6242_vm8, 1.0, %v17284_v29  ;;  %v2983_v62 = vpop.permute.xlu2 %2982 }
 0x524   : > { %vm3945_vm2 = vcmp.eq.s32.totalorder %v14363_v12, %v17166_v45  ;;  %v5143_v49 = vrot.slane %v5142_v15, 4  ;;  %v7710_v9 = vsel %vm16476_vm13, %v6499_v5, %v6498_v38  ;;  %v5195_v55 = vadd.s32 %v5194_v20, %v5193_v31  ;;  %v14495_v30 = vpop.permute.xlu0 %2989 }
 0x525   : > { %3297 = vperm.xlu2 %8685, %v17395_v1   ;;  %vm3947_vm0 = vcmp.eq.s32.totalorder %v14388_v24, %v17166_v45  ;;  %v17396_v13 = vperm.slane %v17189_v17, 7  ;;  %vm6230_vm12 = vcmp.gt.s32.totalorder %v5092_v50, 0  ;;  %v5138_v18 = vrot.slane %v5137_v28, 2 }
 0x526   : > { %v5156_v43 = vsel %vm4329_vm5, %v4191_v34, 0  ;;  %v4187_v12 = vsel %vm3931_vm10, 1, %v16629_v3  ;;  %vm6235_vm15 = vcmp.gt.s32.totalorder %v5127_v26, 0  ;;  %v5196_v32 = vrot.slane %v5195_v55, 1 }
 0x527   : > { %3311 = vperm.xlu1 %8683, %v17396_v13   ;;  %v4201_v41 = vsel %vm3945_vm2, 1, %v16629_v3  ;;  %vm3948_vm14 = vcmp.eq.s32.totalorder %v14397_v51, %v17166_v45  ;;  %v5109_v24 = vadd.s32 %v5108_v2, %v5107_v59  ;;  %vm6244_vm8 = vcmp.gt.s32.totalorder %v5190_v54, 0 }
 0x528   : > { %v4203_v17 = vsel %vm3947_vm0, 1, %v16629_v3  ;;  %v4204_v37 = vsel %vm3948_vm14, 1, %v16629_v3  ;;  %v17397_v19 = vperm.slane %v17267_v25, 4  ;;  %v14488_v36 = vsel %vm6230_vm12, 1.0, %v17284_v29 }
 0x529   : > { %v5144_v52 = vadd.s32 %v5143_v49, %v5142_v15  ;;  %v5157_v4 = vrot.slane %v5156_v43, 4  ;;  %v5197_v22 = vadd.s32 %v5196_v32, %v5195_v55  ;;  %v6491_v50 = vsel %vm6235_vm15, 1.0, %v17284_v29 }
 0x52a   : > { %3346 = vperm.xlu0 %8684, %v17397_v19   ;;  %v5128_v51 = vsel %vm4329_vm5, %v4187_v12, 0  ;;  %v5226_v59 = vsel %vm4329_vm5, %v4201_v41, 0  ;;  %vm3950_vm10 = vcmp.eq.s32.totalorder %v14443_v21, %v17166_v45  ;;  %v6500_v31 = vsel %vm6244_vm8, 1.0, %v17284_v29 }
 0x52b   : > { %vm6245_vm2 = vcmp.gt.s32.totalorder %v5197_v22, 0  ;;  %v5240_v26 = vsel %vm4329_vm5, %v4203_v17, 0  ;;  %v5247_v2 = vsel %vm4329_vm5, %v4204_v37, 0  ;;  %v5139_v15 = vadd.s32 %v5138_v18, %v5137_v28  ;;  %v14510_v28 = vpop.permute.xlu1 %2975 }
 0x52c   : > { %v5110_v34 = vrot.slane %v5109_v24, 2  ;;  %v6501_v20 = vsel %vm6245_vm2, 1.0, %v17284_v29  ;;  %v7711_v1 = vsel %vm7600_vm6, %v6500_v31, %v7710_v9  ;;  %v5129_v5 = vrot.slane %v5128_v51, 4 }
 0x52d   : > { %v14503_v54 = vsel %vm7602_vm11, %v6501_v20, %v7711_v1  ;;  %v5227_v21 = vrot.slane %v5226_v59, 4  ;;  %v4206_v38 = vsel %vm3950_vm10, 1, %v16629_v3  ;;  %vm3936_vm0 = vcmp.eq.s32.totalorder %v14250_v16, %v17166_v45  ;;  %v3004_v20 = vpop.permute.xlu2 %3003 }
 0x52e   : > { %17398 = vst [vmem:[#allocation78_spill] sm:$0xff] %v14503_v54  ;;  %v5241_v49 = vrot.slane %v5240_v26, 4  ;;  %v5248_v55 = vrot.slane %v5247_v2, 4  ;;  %vm3946_vm12 = vcmp.eq.s32.totalorder %v14433_v44, %v17166_v45  ;;  %v5145_v13 = vrot.slane %v5144_v52, 2 }
 0x52f   : > { %v5158_v18 = vadd.s32 %v5157_v4, %v5156_v43  ;;  %v4202_v9 = vsel %vm3946_vm12, 1, %v16629_v3  ;;  %vm3951_vm15 = vcmp.eq.s32.totalorder %v14454_v7, %v17166_v45  ;;  %v14517_v12 = vsel %vm16476_vm13, %v6491_v50, %v14449_v0 }
 0x530   : > { %v5140_v32 = vrot.slane %v5139_v15, 1  ;;  %v5261_v16 = vsel %vm4329_vm5, %v4206_v38, 0  ;;  %v5233_v41 = vsel %vm4329_vm5, %v4202_v9, 0  ;;  %v14521_v17 = vadd.s32 %v5110_v34, %v5109_v24 }
 0x531   : > { %v4192_v44 = vsel %vm3936_vm0, 1, %v16629_v3  ;;  %v5228_v37 = vadd.s32 %v5227_v21, %v5226_v59  ;;  %v5234_v43 = vrot.slane %v5233_v41, 4  ;;  %v5242_v19 = vadd.s32 %v5241_v49, %v5240_v26  ;;  %v14534_v59 = vpop.permute.xlu0 %3010  ;;  %v8039_v49 = vpop.f32.mrf.mxu1 }
 0x532   : > { %v5249_v4 = vadd.s32 %v5248_v55, %v5247_v2  ;;  %v4207_v22 = vsel %vm3951_vm15, 1, %v16629_v3  ;;  %vm3953_vm14 = vcmp.eq.s32.totalorder %v2983_v62, %v17166_v45  ;;  %v14526_v7 = vadd.s32 %v5145_v13, %v5144_v52 }
 0x533   : > { %v5159_v0 = vrot.slane %v5158_v18, 2  ;;  %v5130_v50 = vadd.s32 %v5129_v5, %v5128_v51  ;;  %v5262_v31 = vrot.slane %v5261_v16, 4  ;;  %v14529_v1 = vsel %vm4329_vm5, %v4192_v44, 0 }
 0x534   : > { %v5235_v24 = vadd.s32 %v5234_v43, %v5233_v41  ;;  %v4209_v34 = vsel %vm3953_vm14, 1, %v16629_v3  ;;  %vm3949_vm8 = vcmp.eq.s32.totalorder %v14471_v60, %v17166_v45  ;;  %v5141_v26 = vadd.s32 %v5140_v32, %v5139_v15  ;;  %v14543_v43 = vpop.permute.xlu1 %2996 }
 0x535   : > { %v5268_v52 = vsel %vm4329_vm5, %v4207_v22, 0  ;;  %v5282_v51 = vsel %vm4329_vm5, %v4209_v34, 0  ;;  %v5229_v2 = vrot.slane %v5228_v37, 2  ;;  %v5243_v5 = vrot.slane %v5242_v19, 2 }
 0x536   : > { %v5250_v21 = vrot.slane %v5249_v4, 2  ;;  %v4205_v38 = vsel %vm3949_vm8, 1, %v16629_v3  ;;  %v5131_v55 = vrot.slane %v5130_v50, 2  ;;  %v5164_v13 = vrot.slane %v14529_v1, 4 }
 0x537   : > { %v5263_v9 = vadd.s32 %v5262_v31, %v5261_v16  ;;  %v5254_v60 = vsel %vm4329_vm5, %v4205_v38, 0  ;;  %v5236_v32 = vrot.slane %v5235_v24, 2  ;;  %v5269_v41 = vrot.slane %v5268_v52, 4 }
 0x538   : > { %v5283_v44 = vrot.slane %v5282_v51, 4  ;;  %v14545_v22 = vadd.s32 %v5159_v0, %v5158_v18  ;;  %v5255_v34 = vrot.slane %v5254_v60, 4  ;;  %v8040_v8 = vadd.f32 %v14429_v33, %v8039_v49 }
 0x539   : > { %vm3954_vm10 = vcmp.eq.s32.totalorder %v14495_v30, %v17166_v45  ;;  %vm3934_vm2 = vcmp.eq.s32.totalorder %v14289_v47, %v17166_v45  ;;  %v5230_v16 = vadd.s32 %v5229_v2, %v5228_v37  ;;  %v5244_v31 = vadd.s32 %v5243_v5, %v5242_v19  ;;  %v3025_v37 = vpop.permute.xlu2 %3024 }
 0x53a   : > { %v5251_v38 = vadd.s32 %v5250_v21, %v5249_v4  ;;  %v5264_v61 = vrot.slane %v5263_v9, 2  ;;  %v8117_v62 = vmax.f32 %v8040_v8, 0.0  ;;  %v4210_v15 = vsel %vm3954_vm10, 1, %v16629_v3 }
 0x53b   : > { %vm3956_vm0 = vcmp.eq.s32.totalorder %v3004_v20, %v17166_v45  ;;  %v5237_v18 = vadd.s32 %v5236_v32, %v5235_v24  ;;  %v5270_v0 = vadd.s32 %v5269_v41, %v5268_v52  ;;  %v5284_v27 = vadd.s32 %v5283_v44, %v5282_v51  ;;  %v14561_v20 = vpop.permute.xlu0 %3031 }
 0x53c   : > { %v5289_v49 = vsel %vm4329_vm5, %v4210_v15, 0  ;;  %v5256_v35 = vadd.s32 %v5255_v34, %v5254_v60  ;;  %8149 = vst [vmem:[%s13569_s28 + $0x48] sm:$0xff] %v8117_v62  ;;  %v4212_v11 = vsel %vm3956_vm0, 1, %v16629_v3  ;;  %vm3952_vm12 = vcmp.eq.s32.totalorder %v14510_v28, %v17166_v45 }
 0x53d   : > { %v5290_v30 = vrot.slane %v5289_v49, 4  ;;  %vm6237_vm15 = vcmp.gt.s32.totalorder %v5141_v26, 0  ;;  %v14559_v8 = vadd.s32 %v5131_v55, %v5130_v50  ;;  %v5231_v19 = vrot.slane %v5230_v16, 1 }
 0x53e   : > { %v5245_v4 = vrot.slane %v5244_v31, 1  ;;  %v5252_v24 = vrot.slane %v5251_v38, 1  ;;  %v5265_v52 = vadd.s32 %v5264_v61, %v5263_v9  ;;  %v4208_v2 = vsel %vm3952_vm12, 1, %v16629_v3  ;;  %v3018_v9 = vpop.permute.xlu1 %3017 }
 0x53f   : > { %v5291_v51 = vadd.s32 %v5290_v30, %v5289_v49  ;;  %v5238_v62 = vrot.slane %v5237_v18, 1  ;;  %v5271_v5 = vrot.slane %v5270_v0, 2  ;;  %v5285_v21 = vrot.slane %v5284_v27, 2 }
 0x540   : > { %v5303_v60 = vsel %vm4329_vm5, %v4212_v11, 0  ;;  %v5257_v15 = vrot.slane %v5256_v35, 2  ;;  %v5275_v32 = vsel %vm4329_vm5, %v4208_v2, 0  ;;  %vm3957_vm14 = vcmp.eq.s32.totalorder %v14534_v59, %v17166_v45 }
 0x541   : > { %v5292_v28 = vrot.slane %v5291_v51, 2  ;;  %v14570_v50 = vsel %vm6237_vm15, 1.0, %v17284_v29  ;;  %v14573_v61 = vadd.s32 %v5164_v13, %v14529_v1  ;;  %v14579_v55 = vsel %vm3934_vm2, 1, %v16629_v3 }
 0x542   : > { %v5276_v11 = vrot.slane %v5275_v32, 4  ;;  %v5232_v41 = vadd.s32 %v5231_v19, %v5230_v16  ;;  %v5246_v44 = vadd.s32 %v5245_v4, %v5244_v31  ;;  %v5304_v34 = vrot.slane %v5303_v60, 4 }
 0x543   : > { %v4213_v59 = vsel %vm3957_vm14, 1, %v16629_v3  ;;  %v5253_v49 = vadd.s32 %v5252_v24, %v5251_v38  ;;  %v5266_v26 = vrot.slane %v5265_v52, 1  ;;  %v5286_v30 = vadd.s32 %v5285_v21, %v5284_v27  ;;  %v3046_v38 = vpop.permute.xlu2 %3045 }
 0x544   : > { %v5277_v2 = vadd.s32 %v5276_v11, %v5275_v32  ;;  %v5239_v56 = vadd.s32 %v5238_v62, %v5237_v18  ;;  %v5272_v1 = vadd.s32 %v5271_v5, %v5270_v0  ;;  %v5258_v13 = vadd.s32 %v5257_v15, %v5256_v35  ;;  %v14588_v0 = vpop.permute.xlu0 %3052 }
 0x545   : > { %v5293_v23 = vadd.s32 %v5292_v28, %v5291_v51  ;;  %v5310_v47 = vsel %vm4329_vm5, %v4213_v59, 0  ;;  %vm3959_vm8 = vcmp.eq.s32.totalorder %v3025_v37, %v17166_v45  ;;  %vm3955_vm10 = vcmp.eq.s32.totalorder %v14543_v43, %v17166_v45 }
 0x546   : > { %v5278_v48 = vrot.slane %v5277_v2, 2  ;;  %vm6250_vm2 = vcmp.gt.s32.totalorder %v5232_v41, 0  ;;  %vm6252_vm0 = vcmp.gt.s32.totalorder %v5246_v44, 0  ;;  %v5305_v16 = vadd.s32 %v5304_v34, %v5303_v60  ;;  %v14599_v32 = vpop.permute.xlu1 %3038 }
 0x547   : > { %v4211_v31 = vsel %vm3955_vm10, 1, %v16629_v3  ;;  %vm6253_vm12 = vcmp.gt.s32.totalorder %v5253_v49, 0  ;;  %v5267_v27 = vadd.s32 %v5266_v26, %v5265_v52  ;;  %v5287_v18 = vrot.slane %v5286_v30, 1 }
 0x548   : > { %v5296_v35 = vsel %vm4329_vm5, %v4211_v31, 0  ;;  %v5259_v19 = vrot.slane %v5258_v13, 1  ;;  %v5294_v4 = vrot.slane %v5293_v23, 1  ;;  %v5311_v24 = vrot.slane %v5310_v47, 4 }
 0x549   : > { %v4215_v37 = vsel %vm3959_vm8, 1, %v16629_v3  ;;  %v6506_v43 = vsel %vm6250_vm2, 1.0, %v17284_v29  ;;  %vm6251_vm15 = vcmp.gt.s32.totalorder %v5239_v56, 0  ;;  %v5273_v51 = vrot.slane %v5272_v1, 1 }
 0x54a   : > { %v5279_v62 = vadd.s32 %v5278_v48, %v5277_v2  ;;  %v6508_v5 = vsel %vm6252_vm0, 1.0, %v17284_v29  ;;  %v5306_v21 = vrot.slane %v5305_v16, 2  ;;  %v5297_v52 = vrot.slane %v5296_v35, 4 }
 0x54b   : > { %vm3960_vm14 = vcmp.eq.s32.totalorder %v14561_v20, %v17166_v45  ;;  %v6509_v60 = vsel %vm6253_vm12, 1.0, %v17284_v29  ;;  %vm6255_vm10 = vcmp.gt.s32.totalorder %v5267_v27, 0  ;;  %v5288_v15 = vadd.s32 %v5287_v18, %v5286_v30  ;;  %v8042_v30 = vpop.f32.mrf.mxu1 }
 0x54c   : > { %v5324_v28 = vsel %vm4329_vm5, %v4215_v37, 0  ;;  %v6507_v56 = vsel %vm6251_vm15, 1.0, %v17284_v29  ;;  %v5260_v48 = vadd.s32 %v5259_v19, %v5258_v13  ;;  %v5295_v11 = vadd.s32 %v5294_v4, %v5293_v23  ;;  %v17399_v13 = vld [vmem:[#allocation18_spill] sm:$0xff] }
 0x54d   : > { %v5312_v41 = vadd.s32 %v5311_v24, %v5310_v47  ;;  %v5274_v44 = vadd.s32 %v5273_v51, %v5272_v1  ;;  %v5280_v34 = vrot.slane %v5279_v62, 1  ;;  %v4216_v59 = vsel %vm3960_vm14, 1, %v16629_v3  ;;  %v14617_v24 = vpop.permute.xlu0 %3073 }
 0x54e   : > { %vm3958_vm8 = vcmp.eq.s32.totalorder %v3018_v9, %v17166_v45  ;;  %v5307_v20 = vadd.s32 %v5306_v21, %v5305_v16  ;;  %v5325_v49 = vrot.slane %v5324_v28, 4  ;;  %v5298_v26 = vadd.s32 %v5297_v52, %v5296_v35 }
 0x54f   : > { %vm3962_vm2 = vcmp.eq.s32.totalorder %v3046_v38, %v17166_v45  ;;  %v7717_v2 = vsel %vm16476_vm13, %v6507_v56, %v6506_v43  ;;  %vm6258_vm0 = vcmp.gt.s32.totalorder %v5288_v15, 0  ;;  %v4214_v31 = vsel %vm3958_vm8, 1, %v16629_v3  ;;  %v3067_v38 = vpop.permute.xlu2 %3066 }
 0x550   : > { %v8043_v23 = vadd.f32 %v14429_v33, %v8042_v30  ;;  %v17400_v1 = vand.u32 1, %v17399_v13  ;;  %vm6254_vm15 = vcmp.gt.s32.totalorder %v5260_v48, 0  ;;  %vm6259_vm14 = vcmp.gt.s32.totalorder %v5295_v11, 0 }
 0x551   : > { %v5313_v9 = vrot.slane %v5312_v41, 2  ;;  %v5331_v16 = vsel %vm4329_vm5, %v4216_v59, 0  ;;  %v5281_v18 = vadd.s32 %v5280_v34, %v5279_v62  ;;  %v4218_v35 = vsel %vm3962_vm2, 1, %v16629_v3 }
 0x552   : > { %vm14610_vm12 = vcmp.eq.s32.totalorder %v17400_v1, 1  ;;  %v5317_v19 = vsel %vm4329_vm5, %v4214_v31, 0  ;;  %v8118_v4 = vmax.f32 %v8043_v23, 0.0  ;;  %v5308_v37 = vrot.slane %v5307_v20, 1 }
 0x553   : > { %v5326_v43 = vadd.s32 %v5325_v49, %v5324_v28  ;;  %v5299_v51 = vrot.slane %v5298_v26, 2  ;;  %v5318_v21 = vrot.slane %v5317_v19, 4  ;;  %v6511_v52 = vsel %vm6255_vm10, 1.0, %v17284_v29  ;;  %v14636_v49 = vpop.permute.xlu1 %3059 }
 0x554   : > { %v7718_v56 = vsel %vm7600_vm6, %v6508_v5, %v7717_v2  ;;  %v5332_v30 = vrot.slane %v5331_v16, 4  ;;  %8150 = vst [vmem:[%s13569_s28 + $0x50] sm:$0xff] %v8118_v4  ;;  %vm3963_vm8 = vcmp.eq.s32.totalorder %v14588_v0, %v17166_v45  ;;  %vm6256_vm2 = vcmp.gt.s32.totalorder %v5274_v44, 0 }
 0x555   : > { %v14627_v62 = vsel %vm6258_vm0, 1.0, %v17284_v29  ;;  %v6510_v28 = vsel %vm6254_vm15, 1.0, %v17284_v29  ;;  %v5345_v34 = vsel %vm4329_vm5, %v4218_v35, 0  ;;  %v14634_v27 = vsel %vm6259_vm14, 1.0, %v17284_v29 }
 0x556   : > { %v5314_v5 = vadd.s32 %v5313_v9, %v5312_v41  ;;  %v5319_v59 = vadd.s32 %v5318_v21, %v5317_v19  ;;  %vm6257_vm10 = vcmp.gt.s32.totalorder %v5281_v18, 0  ;;  %v14638_v0 = vadd.s32 %v5308_v37, %v5307_v20  ;;  %v14659_v21 = vpop.permute.xlu0 %3094 }
 0x557   : > { %v5327_v2 = vrot.slane %v5326_v43, 2  ;;  %v5300_v15 = vadd.s32 %v5299_v51, %v5298_v26  ;;  %v4219_v31 = vsel %vm3963_vm8, 1, %v16629_v3  ;;  %v5333_v23 = vadd.s32 %v5332_v30, %v5331_v16  ;;  %v3088_v4 = vpop.permute.xlu2 %3087 }
 0x558   : > { %v5346_v48 = vrot.slane %v5345_v34, 4  ;;  %v7719_v13 = vsel %vm7602_vm11, %v6509_v60, %v7718_v56  ;;  %v3313_v1 = vperm.slane %v17267_v25, 0  ;;  %v6513_v11 = vsel %vm6257_vm10, 1.0, %v17284_v29 }
 0x559   : > { %v7720_v41 = vsel %vm7604_vm9, %v6510_v28, %v7719_v13  ;;  %v3327_v9 = vperm.slane %v17267_v25, 2  ;;  %vm3965_vm0 = vcmp.eq.s32.totalorder %v3067_v38, %v17166_v45  ;;  %v5320_v20 = vrot.slane %v5319_v59, 2 }
 0x55a   : > { %v5352_v18 = vsel %vm4329_vm5, %v4219_v31, 0  ;;  %v6512_v26 = vsel %vm6256_vm2, 1.0, %v17284_v29  ;;  %v7721_v16 = vsel %vm7606_vm7, %v6511_v52, %v7720_v41  ;;  %3318 = vperm.xlu2 %8685, %v3313_v1   ;;  %v5315_v60 = vrot.slane %v5314_v5, 1 }
 0x55b   : > { %v5301_v35 = vrot.slane %v5300_v15, 1  ;;  %v7722_v19 = vsel %vm7608_vm1, %v6512_v26, %v7721_v16  ;;  %3332 = vperm.xlu1 %8683, %v3327_v9   ;;  %vm3961_vm15 = vcmp.eq.s32.totalorder %v14599_v32, %v17166_v45  ;;  %v5334_v37 = vrot.slane %v5333_v23, 2 }
 0x55c   : > { %v7325_v38 = vsel %vm14610_vm12, 1.0, %v17284_v29  ;;  %v7723_v44 = vsel %vm16478_vm4, %v6513_v11, %v7722_v19  ;;  %v4221_v51 = vsel %vm3965_vm0, 1, %v16629_v3  ;;  %v5347_v52 = vadd.s32 %v5346_v48, %v5345_v34 }
 0x55d   : > { %v5353_v56 = vrot.slane %v5352_v18, 4  ;;  %v7877_v30 = vsel %vm16477_vm3, %v7325_v38, %v7723_v44  ;;  %v4217_v28 = vsel %vm3961_vm15, 1, %v16629_v3  ;;  %v5328_v32 = vadd.s32 %v5327_v2, %v5326_v43  ;;  %v14674_v2 = vpop.permute.xlu1 %3080 }
 0x55e   : > { %v5321_v31 = vadd.s32 %v5320_v20, %v5319_v59  ;;  %8287 = vmatmul.msk.f32.vlgmr.msra.gmra.mxu2 %vm4329_vm5, %v7877_v30  ;;  %v5338_v47 = vsel %vm4329_vm5, %v4217_v28, 0  ;;  %v3362_v13 = vperm.slane %v17267_v25, 7  ;;  %v14667_v1 = vadd.s32 %v5315_v60, %v5314_v5 }
 0x55f   : > { %v5366_v11 = vsel %vm4329_vm5, %v4221_v51, 0  ;;  %v5339_v41 = vrot.slane %v5338_v47, 4  ;;  %vm3966_vm12 = vcmp.eq.s32.totalorder %v14617_v24, %v17166_v45  ;;  %v5302_v34 = vadd.s32 %v5301_v35, %v5300_v15  ;;  %v8045_v15 = vpop.f32.mrf.mxu1  ;;  %v3109_v51 = vpop.permute.xlu2 %3108 }
 0x560   : > { %v5335_v48 = vadd.s32 %v5334_v37, %v5333_v23  ;;  %3367 = vperm.xlu0 %8684, %v3362_v13   ;;  %v4222_v43 = vsel %vm3966_vm12, 1, %v16629_v3  ;;  %v3334_v59 = vperm.slane %v17267_v25, 3  ;;  %v5348_v9 = vrot.slane %v5347_v52, 2 }
 0x561   : > { %v5354_v20 = vadd.s32 %v5353_v56, %v5352_v18  ;;  %v3348_v5 = vperm.slane %v17267_v25, 5  ;;  %vm3968_vm14 = vcmp.eq.s32.totalorder %v3088_v4, %v17166_v45  ;;  %vm6261_vm8 = vcmp.gt.s32.totalorder %v14638_v0, 0 }
 0x562   : > { %v5329_v26 = vrot.slane %v5328_v32, 1  ;;  %v5322_v16 = vrot.slane %v5321_v31, 1  ;;  %v5367_v24 = vrot.slane %v5366_v11, 4  ;;  %3339 = vperm.xlu2 %8685, %v3334_v59   ;;  %vm6262_vm2 = vcmp.gt.s32.totalorder %v14667_v1, 0 }
 0x563   : > { %v5340_v23 = vadd.s32 %v5339_v41, %v5338_v47  ;;  %v5373_v60 = vsel %vm4329_vm5, %v4222_v43, 0  ;;  %3353 = vperm.xlu1 %8683, %v3348_v5   ;;  %vm3964_vm10 = vcmp.eq.s32.totalorder %v14636_v49, %v17166_v45  ;;  %vm6260_vm0 = vcmp.gt.s32.totalorder %v5302_v34, 0  ;;  %v17403_v47 = vld [vmem:[#allocation25_spill] sm:$0xff]  ;;  %v14688_v49 = vpop.permute.xlu0 %3115 }
 0x564   : > { %v5336_v18 = vrot.slane %v5335_v48, 1  ;;  %v4224_v35 = vsel %vm3968_vm14, 1, %v16629_v3  ;;  %v4220_v19 = vsel %vm3964_vm10, 1, %v16629_v3  ;;  %v5349_v4 = vadd.s32 %v5348_v9, %v5347_v52  ;;  %v17404_v52 = vld [vmem:[#allocation35_spill] sm:$0xff] }
 0x565   : > { %v5355_v37 = vrot.slane %v5354_v20, 2  ;;  %v5359_v38 = vsel %vm4329_vm5, %v4220_v19, 0  ;;  %v8046_v44 = vadd.f32 %v14429_v33, %v8045_v15  ;;  %v5323_v56 = vadd.s32 %v5322_v16, %v5321_v31 }
 0x566   : > { %v5368_v30 = vadd.s32 %v5367_v24, %v5366_v11  ;;  %v5374_v28 = vrot.slane %v5373_v60, 4  ;;  %v3383_v13 = vperm.slane %v17403_v47, 2  ;;  %v5341_v41 = vrot.slane %v5340_v23, 2 }
 0x567   : > { %v5387_v43 = vsel %vm4329_vm5, %v4224_v35, 0  ;;  %v8119_v59 = vmax.f32 %v8046_v44, 0.0  ;;  %vm3969_vm15 = vcmp.eq.s32.totalorder %v14659_v21, %v17166_v45  ;;  %v17405_v9 = vand.u32 1, %v17404_v52  ;;  %v3130_v1 = vpop.permute.xlu2 %3129 }
 0x568   : > { %v5330_v31 = vadd.s32 %v5329_v26, %v5328_v32  ;;  %v6516_v11 = vsel %vm6260_vm0, 1.0, %v17284_v29  ;;  %v5360_v16 = vrot.slane %v5359_v38, 4  ;;  %3388 = vperm.xlu0 %8684, %v3383_v13   ;;  %v3355_v24 = vperm.slane %v17267_v25, 6  ;;  %v14707_v32 = vpop.permute.xlu1 %3101 }
 0x569   : > { %vm14695_vm12 = vcmp.eq.s32.totalorder %v17405_v9, 1  ;;  %v5350_v15 = vrot.slane %v5349_v4, 1  ;;  %v14702_v35 = vadd.s32 %v5355_v37, %v5354_v20  ;;  %8151 = vst [vmem:[%s13569_s28 + $0x58] sm:$0xff] %v8119_v59  ;;  %v4225_v21 = vsel %vm3969_vm15, 1, %v16629_v3 }
 0x56a   : > { %v3369_v19 = vperm.slane %v17403_v47, 0  ;;  %vm6263_vm14 = vcmp.gt.s32.totalorder %v5323_v56, 0  ;;  %v5369_v44 = vrot.slane %v5368_v30, 2  ;;  %v5375_v52 = vadd.s32 %v5374_v28, %v5373_v60  ;;  %3360 = vperm.xlu2 %8685, %v3355_v24  }
 0x56b   : > { %v5388_v9 = vrot.slane %v5387_v43, 4  ;;  %v7724_v34 = vsel %vm16476_vm13, %v14634_v27, %v14627_v62  ;;  %v5337_v25 = vadd.s32 %v5336_v18, %v5335_v48  ;;  %v5342_v26 = vadd.s32 %v5341_v41, %v5340_v23  ;;  %v14729_v56 = vpop.permute.xlu0 %3136 }
 0x56c   : > { %v5394_v20 = vsel %vm4329_vm5, %v4225_v21, 0  ;;  %3374 = vperm.xlu1 %8683, %v3369_v19   ;;  %v6517_v37 = vsel %vm6261_vm8, 1.0, %v17284_v29  ;;  %v6518_v60 = vsel %vm6262_vm2, 1.0, %v17284_v29  ;;  %v7725_v28 = vsel %vm7600_vm6, %v6516_v11, %v7724_v34 }
 0x56d   : > { %v5361_v13 = vadd.s32 %v5360_v16, %v5359_v38  ;;  %vm6264_vm10 = vcmp.gt.s32.totalorder %v5330_v31, 0  ;;  %v5351_v59 = vadd.s32 %v5350_v15, %v5349_v4  ;;  %v6519_v62 = vsel %vm6263_vm14, 1.0, %v17284_v29 }
 0x56e   : > { %v5357_v27 = vrot.slane %v14702_v35, 1  ;;  %v5370_v48 = vadd.s32 %v5369_v44, %v5368_v30  ;;  %v5376_v23 = vrot.slane %v5375_v52, 2  ;;  %v5389_v18 = vadd.s32 %v5388_v9, %v5387_v43 }
 0x56f   : > { %v5395_v41 = vrot.slane %v5394_v20, 4  ;;  %v5343_v0 = vrot.slane %v5342_v26, 1  ;;  %vm6265_vm8 = vcmp.gt.s32.totalorder %v5337_v25, 0  ;;  %v7726_v24 = vsel %vm7602_vm11, %v6517_v37, %v7725_v28 }
 0x570   : > { %vm3971_vm2 = vcmp.eq.s32.totalorder %v3109_v51, %v17166_v45  ;;  %v5362_v11 = vrot.slane %v5361_v13, 2  ;;  %v7727_v38 = vsel %vm7604_vm9, %v6518_v60, %v7726_v24  ;;  %vm3967_vm0 = vcmp.eq.s32.totalorder %v14674_v2, %v17166_v45  ;;  %v14750_v28 = vpop.permute.xlu1 %3122 }
 0x571   : > { %v4227_v4 = vsel %vm3971_vm2, 1, %v16629_v3  ;;  %v6520_v30 = vsel %vm6264_vm10, 1.0, %v17284_v29  ;;  %v7728_v43 = vsel %vm7606_vm7, %v6519_v62, %v7727_v38  ;;  %v4223_v51 = vsel %vm3967_vm0, 1, %v16629_v3 }
 0x572   : > { %v5408_v16 = vsel %vm4329_vm5, %v4227_v4, 0  ;;  %v5396_v15 = vadd.s32 %v5395_v41, %v5394_v20  ;;  %v6521_v21 = vsel %vm6265_vm8, 1.0, %v17284_v29  ;;  %v7729_v19 = vsel %vm7608_vm1, %v6520_v30, %v7728_v43 }
 0x573   : > { %v5380_v44 = vsel %vm4329_vm5, %v4223_v51, 0  ;;  %v7326_v2 = vsel %vm14695_vm12, 1.0, %v17284_v29  ;;  %v7730_v31 = vsel %vm16478_vm4, %v6521_v21, %v7729_v19  ;;  %v5409_v9 = vrot.slane %v5408_v16, 4 }
 0x574   : > { %v5381_v34 = vrot.slane %v5380_v44, 4  ;;  %v14745_v25 = vsel %vm4329_vm5, %v14579_v55, 0  ;;  %v5377_v37 = vadd.s32 %v5376_v23, %v5375_v52  ;;  %v7878_v20 = vsel %vm16477_vm3, %v7326_v2, %v7730_v31 }
 0x575   : > { %v3404_v60 = vperm.slane %v17403_v47, 5  ;;  %v5344_v62 = vadd.s32 %v5343_v0, %v5342_v26  ;;  %v5390_v41 = vrot.slane %v5389_v18, 2  ;;  %8288 = vmatmul.msk.f32.gmra.mxu2 %vm4329_vm5, %v7878_v20  ;;  %v3376_v24 = vperm.slane %v17403_v47, 1 }
 0x576   : > { %v5382_v5 = vadd.s32 %v5381_v34, %v5380_v44  ;;  %v17408_v38 = vrot.slane %v14526_v7, 1  ;;  %v5371_v52 = vrot.slane %v5370_v48, 1  ;;  %v5363_v23 = vadd.s32 %v5362_v11, %v5361_v13  ;;  %v3151_v13 = vpop.permute.xlu2 %3150 }
 0x577   : > { %3409 = vperm.xlu0 %8684, %v3404_v60   ;;  %v3390_v4 = vperm.slane %v17403_v47, 3  ;;  %vm6267_vm15 = vcmp.gt.s32.totalorder %v5351_v59, 0  ;;  %v5358_v30 = vadd.s32 %v5357_v27, %v14702_v35  ;;  %v5397_v26 = vrot.slane %v5396_v15, 2  ;;  %3381 = vperm.xlu2 %8685, %v3376_v24  }
 0x578   : > { %v14757_v55 = vadd.s32 %v17408_v38, %v14526_v7  ;;  %v5410_v0 = vadd.s32 %v5409_v9, %v5408_v16  ;;  %v5150_v43 = vrot.slane %v14745_v25, 4  ;;  %v5378_v51 = vrot.slane %v5377_v37, 1  ;;  %v14769_v16 = vpop.permute.xlu0 %3157 }
 0x579   : > { %v5383_v21 = vrot.slane %v5382_v5, 2  ;;  %vm3972_vm12 = vcmp.eq.s32.totalorder %v14688_v49, %v17166_v45  ;;  %3395 = vperm.xlu1 %8683, %v3390_v4   ;;  %vm6266_vm14 = vcmp.gt.s32.totalorder %v5344_v62, 0  ;;  %v5391_v7 = vadd.s32 %v5390_v41, %v5389_v18  ;;  %v14779_v41 = vpop.permute.xlu1 %3143 }
 0x57a   : > { %vm3974_vm10 = vcmp.eq.s32.totalorder %v3130_v1, %v17166_v45  ;;  %vm3970_vm8 = vcmp.eq.s32.totalorder %v14707_v32, %v17166_v45  ;;  %v6523_v35 = vsel %vm6267_vm15, 1.0, %v17284_v29  ;;  %v5372_v59 = vadd.s32 %v5371_v52, %v5370_v48  ;;  %v17409_v32 = vld [vmem:[#allocation36_spill] sm:$0xff] }
 0x57b   : > { %v5364_v27 = vrot.slane %v5363_v23, 1  ;;  %v4226_v11 = vsel %vm3970_vm8, 1, %v16629_v3  ;;  %vm6268_vm2 = vcmp.gt.s32.totalorder %v5358_v30, 0  ;;  %v5398_v19 = vadd.s32 %v5397_v26, %v5396_v15 }
 0x57c   : > { %v5411_v49 = vrot.slane %v5410_v0, 2  ;;  %v4228_v44 = vsel %vm3972_vm12, 1, %v16629_v3  ;;  %v6522_v18 = vsel %vm6266_vm14, 1.0, %v17284_v29  ;;  %v5384_v1 = vadd.s32 %v5383_v21, %v5382_v5 }
 0x57d   : > { %v4230_v2 = vsel %vm3974_vm10, 1, %v16629_v3  ;;  %v3425_v31 = vperm.slane %v17409_v32, 0  ;;  %v5379_v9 = vadd.s32 %v5378_v51, %v5377_v37  ;;  %v5392_v34 = vrot.slane %v5391_v7, 1 }
 0x57e   : > { %v5401_v48 = vsel %vm4329_vm5, %v4226_v11, 0  ;;  %v3397_v20 = vperm.slane %v17403_v47, 4  ;;  %vm6270_vm0 = vcmp.gt.s32.totalorder %v5372_v59, 0  ;;  %v5365_v60 = vadd.s32 %v5364_v27, %v5363_v23  ;;  %v17410_v59 = vld [vmem:[#allocation76_spill] sm:$0xff] }
 0x57f   : > { %v5415_v15 = vsel %vm4329_vm5, %v4228_v44, 0  ;;  %3430 = vperm.xlu0 %8684, %v3425_v31   ;;  %v3411_v62 = vperm.slane %v17403_v47, 6  ;;  %v7731_v5 = vsel %vm16476_vm13, %v6523_v35, %v6522_v18  ;;  %v5399_v24 = vrot.slane %v5398_v19, 1  ;;  %v8048_v35 = vpop.f32.mrf.mxu1 }
 0x580   : > { %v5412_v38 = vadd.s32 %v5411_v49, %v5410_v0  ;;  %v5429_v37 = vsel %vm4329_vm5, %v4230_v2, 0  ;;  %3402 = vperm.xlu2 %8685, %v3397_v20   ;;  %v6524_v52 = vsel %vm6268_vm2, 1.0, %v17284_v29  ;;  %v5385_v4 = vrot.slane %v5384_v1, 1  ;;  %v3172_v49 = vpop.permute.xlu2 %3171 }
 0x581   : > { %v5402_v26 = vrot.slane %v5401_v48, 4  ;;  %3416 = vperm.xlu1 %8683, %v3411_v62   ;;  %vm3973_vm15 = vcmp.eq.s32.totalorder %v14750_v28, %v17166_v45  ;;  %v6526_v23 = vsel %vm6270_vm0, 1.0, %v17284_v29  ;;  %vm6271_vm12 = vcmp.gt.s32.totalorder %v5379_v9, 0 }
 0x582   : > { %v5393_v51 = vadd.s32 %v5392_v34, %v5391_v7  ;;  %v5416_v21 = vrot.slane %v5415_v15, 4  ;;  %vm6269_vm14 = vcmp.gt.s32.totalorder %v5365_v60, 0  ;;  %v7732_v0 = vsel %vm7600_vm6, %v6524_v52, %v7731_v5  ;;  %v14817_v52 = vpop.permute.xlu1 %3164 }
 0x583   : > { %v5430_v27 = vrot.slane %v5429_v37, 4  ;;  %vm3975_vm10 = vcmp.eq.s32.totalorder %v14729_v56, %v17166_v45  ;;  %v5400_v30 = vadd.s32 %v5399_v24, %v5398_v19  ;;  %v5413_v11 = vrot.slane %v5412_v38, 1  ;;  %v14802_v56 = vpop.permute.xlu0 %3178 }
 0x584   : > { %vm3977_vm8 = vcmp.eq.s32.totalorder %v3151_v13, %v17166_v45  ;;  %v4229_v28 = vsel %vm3973_vm15, 1, %v16629_v3  ;;  %v17411_v44 = vand.u32 1, %v17410_v59  ;;  %v5386_v18 = vadd.s32 %v5385_v4, %v5384_v1 }
 0x585   : > { %v5403_v2 = vadd.s32 %v5402_v26, %v5401_v48  ;;  %v3446_v31 = vperm.slane %v17409_v32, 3  ;;  %v8049_v34 = vadd.f32 %v14429_v33, %v8048_v35  ;;  %v6527_v13 = vsel %vm6271_vm12, 1.0, %v17284_v29 }
 0x586   : > { %vm14796_vm2 = vcmp.eq.s32.totalorder %v17411_v44, 1  ;;  %v6525_v19 = vsel %vm6269_vm14, 1.0, %v17284_v29  ;;  %v5417_v20 = vadd.s32 %v5416_v21, %v5415_v15  ;;  %v4231_v62 = vsel %vm3975_vm10, 1, %v16629_v3 }
 0x587   : > { %v5431_v5 = vadd.s32 %v5430_v27, %v5429_v37  ;;  %v4233_v1 = vsel %vm3977_vm8, 1, %v16629_v3  ;;  %v5422_v48 = vsel %vm4329_vm5, %v4229_v28, 0  ;;  %3451 = vperm.xlu0 %8684, %v3446_v31   ;;  %v8120_v24 = vmax.f32 %v8049_v34, 0.0 }
 0x588   : > { %vm6274_vm0 = vcmp.gt.s32.totalorder %v5400_v30, 0  ;;  %v5414_v33 = vadd.s32 %v5413_v11, %v5412_v38  ;;  %vm3978_vm15 = vcmp.eq.s32.totalorder %v14769_v16, %v17166_v45  ;;  %v3418_v9 = vperm.slane %v17403_v47, 7 }
 0x589   : > { %vm6272_vm12 = vcmp.gt.s32.totalorder %v5386_v18, 0  ;;  %v5404_v60 = vrot.slane %v5403_v2, 2  ;;  %v5436_v15 = vsel %vm4329_vm5, %v4231_v62, 0  ;;  %8152 = vst [vmem:[%s13569_s28 + $0x60] sm:$0xff] %v8120_v24  ;;  %v4234_v37 = vsel %vm3978_vm15, 1, %v16629_v3 }
 0x58a   : > { %v7733_v4 = vsel %vm7602_vm11, %v6525_v19, %v7732_v0  ;;  %v5450_v26 = vsel %vm4329_vm5, %v4233_v1, 0  ;;  %v5423_v21 = vrot.slane %v5422_v48, 4  ;;  %v5457_v38 = vsel %vm4329_vm5, %v4234_v37, 0  ;;  %3423 = vperm.xlu2 %8685, %v3418_v9   ;;  %v3193_v19 = vpop.permute.xlu2 %3192 }
 0x58b   : > { %v14823_v16 = vsel %vm6274_vm0, 1.0, %v17284_v29  ;;  %v5418_v47 = vrot.slane %v5417_v20, 2  ;;  %v5432_v35 = vrot.slane %v5431_v5, 2  ;;  %v5458_v27 = vrot.slane %v5457_v38, 4  ;;  %v14835_v1 = vpop.permute.xlu0 %3199 }
 0x58c   : > { %vm6276_vm14 = vcmp.gt.s32.totalorder %v5414_v33, 0  ;;  %v5437_v30 = vrot.slane %v5436_v15, 4  ;;  %vm6273_vm10 = vcmp.gt.s32.totalorder %v5393_v51, 0  ;;  %v6528_v11 = vsel %vm6272_vm12, 1.0, %v17284_v29 }
 0x58d   : > { %v5405_v28 = vadd.s32 %v5404_v60, %v5403_v2  ;;  %v5451_v0 = vrot.slane %v5450_v26, 4  ;;  %v7734_v59 = vsel %vm7604_vm9, %v6526_v23, %v7733_v4  ;;  %v3432_v44 = vperm.slane %v17409_v32, 1 }
 0x58e   : > { %v5424_v31 = vadd.s32 %v5423_v21, %v5422_v48  ;;  %v7735_v34 = vsel %vm7606_vm7, %v6527_v13, %v7734_v59  ;;  %vm3980_vm8 = vcmp.eq.s32.totalorder %v3172_v49, %v17166_v45  ;;  %vm3976_vm0 = vcmp.eq.s32.totalorder %v14779_v41, %v17166_v45 }
 0x58f   : > { %v5419_v62 = vadd.s32 %v5418_v47, %v5417_v20  ;;  %v5459_v51 = vadd.s32 %v5458_v27, %v5457_v38  ;;  %v6529_v18 = vsel %vm6273_vm10, 1.0, %v17284_v29  ;;  %v7736_v2 = vsel %vm7608_vm1, %v6528_v11, %v7735_v34  ;;  %3437 = vperm.xlu1 %8683, %v3432_v44   ;;  %v14857_v38 = vpop.permute.xlu1 %3185 }
 0x590   : > { %v5438_v23 = vadd.s32 %v5437_v30, %v5436_v15  ;;  %v7327_v13 = vsel %vm14796_vm2, 1.0, %v17284_v29  ;;  %v7737_v48 = vsel %vm16478_vm4, %v6529_v18, %v7736_v2  ;;  %v4232_v24 = vsel %vm3976_vm0, 1, %v16629_v3 }
 0x591   : > { %v14844_v41 = vsel %vm6276_vm14, 1.0, %v17284_v29  ;;  %v5452_v20 = vadd.s32 %v5451_v0, %v5450_v26  ;;  %v7879_v9 = vsel %vm16477_vm3, %v7327_v13, %v7737_v48  ;;  %v4236_v60 = vsel %vm3980_vm8, 1, %v16629_v3 }
 0x592   : > { %v5406_v15 = vrot.slane %v5405_v28, 1  ;;  %v5425_v37 = vrot.slane %v5424_v31, 2  ;;  %8289 = vmatmul.msk.f32.gmra.mxu2 %vm4329_vm5, %v7879_v9  ;;  %v5443_v7 = vsel %vm4329_vm5, %v4232_v24, 0  ;;  %v3467_v4 = vperm.slane %v17409_v32, 6 }
 0x593   : > { %v5460_v21 = vrot.slane %v5459_v51, 2  ;;  %v5444_v33 = vrot.slane %v5443_v7, 4  ;;  %vm3981_vm2 = vcmp.eq.s32.totalorder %v14802_v56, %v17166_v45  ;;  %v3439_v26 = vperm.slane %v17409_v32, 2 }
 0x594   : > { %v5420_v47 = vrot.slane %v5419_v62, 1  ;;  %v5433_v49 = vadd.s32 %v5432_v35, %v5431_v5  ;;  %v5439_v27 = vrot.slane %v5438_v23, 2  ;;  %v5471_v30 = vsel %vm4329_vm5, %v4236_v60, 0  ;;  %3472 = vperm.xlu0 %8684, %v3467_v4  }
 0x595   : > { %v5453_v11 = vrot.slane %v5452_v20, 2  ;;  %v5445_v0 = vadd.s32 %v5444_v33, %v5443_v7  ;;  %3444 = vperm.xlu2 %8685, %v3439_v26   ;;  %v3453_v59 = vperm.slane %v17409_v32, 4  ;;  %vm3983_vm15 = vcmp.eq.s32.totalorder %v3193_v19, %v17166_v45  ;;  %v14868_v19 = vpop.permute.xlu2 %3213 }
 0x596   : > { %v5407_v44 = vadd.s32 %v5406_v15, %v5405_v28  ;;  %v5426_v34 = vadd.s32 %v5425_v37, %v5424_v31  ;;  %v4237_v56 = vsel %vm3981_vm2, 1, %v16629_v3  ;;  %vm3979_vm12 = vcmp.eq.s32.totalorder %v14817_v52, %v17166_v45  ;;  %v14871_v52 = vpop.permute.xlu0 %3220  ;;  %v17414_v37 = vld [vmem:[#allocation29_spill] sm:$0xff] }
 0x597   : > { %v5461_v18 = vadd.s32 %v5460_v21, %v5459_v51  ;;  %v5472_v5 = vrot.slane %v5471_v30, 4  ;;  %v5446_v35 = vrot.slane %v5445_v0, 2  ;;  %3458 = vperm.xlu1 %8683, %v3453_v59   ;;  %v4235_v2 = vsel %vm3979_vm12, 1, %v16629_v3  ;;  %v14879_v59 = vpop.permute.xlu1 %3206 }
 0x598   : > { %v5421_v13 = vadd.s32 %v5420_v47, %v5419_v62  ;;  %v5440_v48 = vadd.s32 %v5439_v27, %v5438_v23  ;;  %v4239_v24 = vsel %vm3983_vm15, 1, %v16629_v3  ;;  %v5464_v9 = vsel %vm4329_vm5, %v4235_v2, 0 }
 0x599   : > { %v5434_v28 = vrot.slane %v5433_v49, 1  ;;  %v5454_v31 = vadd.s32 %v5453_v11, %v5452_v20  ;;  %v5447_v60 = vadd.s32 %v5446_v35, %v5445_v0  ;;  %v5478_v15 = vsel %vm4329_vm5, %v4237_v56, 0 }
 0x59a   : > { %vm6275_vm14 = vcmp.gt.s32.totalorder %v5407_v44, 0  ;;  %v5427_v51 = vrot.slane %v5426_v34, 1  ;;  %v3488_v7 = vperm.slane %v17414_v37, 1  ;;  %vm3984_vm10 = vcmp.eq.s32.totalorder %v14835_v1, %v17166_v45 }
 0x59b   : > { %v5462_v62 = vrot.slane %v5461_v18, 1  ;;  %v5473_v23 = vadd.s32 %v5472_v5, %v5471_v30  ;;  %v5492_v4 = vsel %vm4329_vm5, %v4239_v24, 0  ;;  %v5465_v21 = vrot.slane %v5464_v9, 4 }
 0x59c   : > { %vm6277_vm8 = vcmp.gt.s32.totalorder %v5421_v13, 0  ;;  %v5441_v33 = vrot.slane %v5440_v48, 1  ;;  %v5479_v20 = vrot.slane %v5478_v15, 4  ;;  %3493 = vperm.xlu0 %8684, %v3488_v7   ;;  %v3460_v26 = vperm.slane %v17409_v32, 5 }
 0x59d   : > { %v5435_v47 = vadd.s32 %v5434_v28, %v5433_v49  ;;  %v5455_v27 = vrot.slane %v5454_v31, 1  ;;  %v5448_v11 = vrot.slane %v5447_v60, 1  ;;  %v4240_v0 = vsel %vm3984_vm10, 1, %v16629_v3 }
 0x59e   : > { %v6531_v1 = vsel %vm6275_vm14, 1.0, %v17284_v29  ;;  %v5428_v30 = vadd.s32 %v5427_v51, %v5426_v34  ;;  %v5493_v56 = vrot.slane %v5492_v4, 4  ;;  %3465 = vperm.xlu2 %8685, %v3460_v26   ;;  %v3474_v5 = vperm.slane %v17409_v32, 7 }
 0x59f   : > { %v6533_v35 = vsel %vm6277_vm8, 1.0, %v17284_v29  ;;  %v5463_v2 = vadd.s32 %v5462_v62, %v5461_v18  ;;  %v5474_v13 = vrot.slane %v5473_v23, 2  ;;  %v5466_v24 = vadd.s32 %v5465_v21, %v5464_v9 }
 0x5a0   : > { %v5442_v49 = vadd.s32 %v5441_v33, %v5440_v48  ;;  %v5480_v28 = vadd.s32 %v5479_v20, %v5478_v15  ;;  %v5499_v7 = vsel %vm4329_vm5, %v4240_v0, 0  ;;  %3479 = vperm.xlu1 %8683, %v3474_v5   ;;  %vm3982_vm0 = vcmp.eq.s32.totalorder %v14857_v38, %v17166_v45  ;;  %v3235_v38 = vpop.permute.xlu2 %3234  ;;  %v14900_v33 = vpop.permute.xlu0 %3241 }
 0x5a1   : > { %v17415_v44 = vand.u32 1, %v13295_v53  ;;  %vm6279_vm15 = vcmp.gt.s32.totalorder %v5435_v47, 0  ;;  %v7738_v32 = vsel %vm16476_vm13, %v6531_v1, %v14823_v16  ;;  %v14896_v18 = vadd.s32 %v5455_v27, %v5454_v31 }
 0x5a2   : > { %v5449_v48 = vadd.s32 %v5448_v11, %v5447_v60  ;;  %vm6278_vm12 = vcmp.gt.s32.totalorder %v5428_v30, 0  ;;  %v5494_v9 = vadd.s32 %v5493_v56, %v5492_v4  ;;  %v4238_v15 = vsel %vm3982_vm0, 1, %v16629_v3  ;;  %v14913_v56 = vpop.permute.xlu1 %3227 }
 0x5a3   : > { %vm14890_vm2 = vcmp.eq.s32.totalorder %v17415_v44, 1  ;;  %v3509_v51 = vperm.slane %v17414_v37, 4  ;;  %vm6283_vm14 = vcmp.gt.s32.totalorder %v5463_v2, 0  ;;  %v5475_v53 = vadd.s32 %v5474_v13, %v5473_v23 }
 0x5a4   : > { %v5467_v62 = vrot.slane %v5466_v24, 2  ;;  %v5500_v21 = vrot.slane %v5499_v7, 4  ;;  %v6535_v20 = vsel %vm6279_vm15, 1.0, %v17284_v29  ;;  %vm6280_vm10 = vcmp.gt.s32.totalorder %v5442_v49, 0 }
 0x5a5   : > { %v5481_v16 = vrot.slane %v5480_v28, 2  ;;  %v5485_v31 = vsel %vm4329_vm5, %v4238_v15, 0  ;;  %3514 = vperm.xlu0 %8684, %v3509_v51   ;;  %v7739_v60 = vsel %vm7600_vm6, %v14844_v41, %v7738_v32  ;;  %vm3986_vm8 = vcmp.eq.s32.totalorder %v14868_v19, %v17166_v45 }
 0x5a6   : > { %v5486_v4 = vrot.slane %v5485_v31, 4  ;;  %vm6281_vm0 = vcmp.gt.s32.totalorder %v5449_v48, 0  ;;  %vm6282_vm13 = vcmp.gt.s32.totalorder %v14896_v18, 0  ;;  %v6534_v23 = vsel %vm6278_vm12, 1.0, %v17284_v29 }
 0x5a7   : > { %v6539_v26 = vsel %vm6283_vm14, 1.0, %v17284_v29  ;;  %v5495_v47 = vrot.slane %v5494_v9, 2  ;;  %v5476_v27 = vrot.slane %v5475_v53, 1  ;;  %v5468_v11 = vadd.s32 %v5467_v62, %v5466_v24 }
 0x5a8   : > { %v5501_v0 = vadd.s32 %v5500_v21, %v5499_v7  ;;  %v5487_v1 = vadd.s32 %v5486_v4, %v5485_v31  ;;  %v5482_v41 = vadd.s32 %v5481_v16, %v5480_v28  ;;  %v4242_v19 = vsel %vm3986_vm8, 1, %v16629_v3 }
 0x5a9   : > { %v6537_v5 = vsel %vm6281_vm0, 1.0, %v17284_v29  ;;  %v7740_v13 = vsel %vm7602_vm11, %v6533_v35, %v7739_v60  ;;  %v3481_v2 = vperm.slane %v17414_v37, 0  ;;  %v3495_v32 = vperm.slane %v17414_v37, 2 }
 0x5aa   : > { %v5488_v44 = vrot.slane %v5487_v1, 2  ;;  %v7741_v30 = vsel %vm7604_vm9, %v6534_v23, %v7740_v13  ;;  %v5496_v48 = vadd.s32 %v5495_v47, %v5494_v9  ;;  %vm3987_vm15 = vcmp.eq.s32.totalorder %v14871_v52, %v17166_v45  ;;  %v3256_v9 = vpop.permute.xlu2 %3255 }
 0x5ab   : > { %v6536_v24 = vsel %vm6280_vm10, 1.0, %v17284_v29  ;;  %v7742_v28 = vsel %vm7606_vm7, %v6535_v20, %v7741_v30  ;;  %v5469_v7 = vrot.slane %v5468_v11, 1  ;;  %v5502_v15 = vrot.slane %v5501_v0, 2  ;;  %3486 = vperm.xlu2 %8685, %v3481_v2   ;;  %3500 = vperm.xlu1 %8683, %v3495_v32   ;;  %v14953_v2 = vpop.permute.xlu1 %3248 }
 0x5ac   : > { %v7743_v35 = vsel %vm7608_vm1, %v6536_v24, %v7742_v28  ;;  %vm3985_vm12 = vcmp.eq.s32.totalorder %v14879_v59, %v17166_v45  ;;  %v5513_v51 = vsel %vm4329_vm5, %v4242_v19, 0  ;;  %v7328_v52 = vsel %vm14890_vm2, 1.0, %v17284_v29  ;;  %v3263_v59 = vpop.permute.xlu0 %3262 }
 0x5ad   : > { %v7744_v49 = vsel %vm16478_vm4, %v6537_v5, %v7743_v35  ;;  %vm3989_vm14 = vcmp.eq.s32.totalorder %v3235_v38, %v17166_v45  ;;  %v5489_v62 = vadd.s32 %v5488_v44, %v5487_v1  ;;  %v4243_v21 = vsel %vm3987_vm15, 1, %v16629_v3  ;;  %v17419_v35 = vld [vmem:[#allocation45_spill] sm:$0xff] }
 0x5ae   : > { %v7880_v20 = vsel %vm16477_vm3, %v7328_v52, %v7744_v49  ;;  %v4241_v16 = vsel %vm3985_vm12, 1, %v16629_v3  ;;  %v14939_v31 = vadd.s32 %v5476_v27, %v5475_v53  ;;  %v5483_v60 = vrot.slane %v5482_v41, 1 }
 0x5af   : > { %8290 = vmatmul.msk.f32.gmra.mxu2 %vm4329_vm5, %v7880_v20  ;;  %v5506_v34 = vsel %vm4329_vm5, %v4241_v16, 0  ;;  %v3530_v4 = vperm.slane %v17414_v37, 7  ;;  %v5497_v38 = vrot.slane %v5496_v48, 1  ;;  %v5514_v23 = vrot.slane %v5513_v51, 4 }
 0x5b0   : > { %v4245_v47 = vsel %vm3989_vm14, 1, %v16629_v3  ;;  %v5507_v1 = vrot.slane %v5506_v34, 4  ;;  %v6538_v19 = vsel %vm6282_vm13, 1.0, %v17284_v29  ;;  %v5470_v5 = vadd.s32 %v5469_v7, %v5468_v11 }
 0x5b1   : > { %v5503_v13 = vadd.s32 %v5502_v15, %v5501_v0  ;;  %v5520_v53 = vsel %vm4329_vm5, %v4243_v21, 0  ;;  %3535 = vperm.xlu0 %8684, %v3530_v4   ;;  %v5490_v27 = vrot.slane %v5489_v62, 1  ;;  %vm3990_vm2 = vcmp.eq.s32.totalorder %v14900_v33, %v17166_v45  ;;  %v17420_v21 = vld [vmem:[#allocation9_spill] sm:$0xff] }
 0x5b2   : > { %v3502_v44 = vperm.slane %v17414_v37, 3  ;;  %v3516_v30 = vperm.slane %v17414_v37, 5  ;;  %vm3941_vm10 = vcmp.eq.s32.totalorder %v14311_v57, %v17166_v45  ;;  %vm17418_vm8 = vcmask 1041409   ;;  %v3277_v49 = vpop.permute.xlu2 %3276 }
 0x5b3   : > { %v7745_v18 = vsel %vm17418_vm8, %v6539_v26, %v6538_v19  ;;  %v5484_v11 = vadd.s32 %v5483_v60, %v5482_v41  ;;  %v5534_v0 = vsel %vm4329_vm5, %v4245_v47, 0  ;;  %vm6285_vm13 = vcmp.gt.s32.totalorder %v14939_v31, 0 }
 0x5b4   : > { %v14960_v32 = vadd.s32 %v5497_v38, %v5496_v48  ;;  %v5515_v24 = vadd.s32 %v5514_v23, %v5513_v51  ;;  %v5508_v33 = vadd.s32 %v5507_v1, %v5506_v34  ;;  %3507 = vperm.xlu2 %8685, %v3502_v44   ;;  %3521 = vperm.xlu1 %8683, %v3516_v30   ;;  %v5521_v28 = vrot.slane %v5520_v53, 4  ;;  %v14978_v60 = vpop.permute.xlu0 %3283 }
 0x5b5   : > { %v4246_v7 = vsel %vm3990_vm2, 1, %v16629_v3  ;;  %vm3988_vm0 = vcmp.eq.s32.totalorder %v14913_v56, %v17166_v45  ;;  %vm3993_vm15 = vcmp.eq.s32.totalorder %v3263_v59, %v17166_v45  ;;  %vm6284_vm12 = vcmp.gt.s32.totalorder %v5470_v5, 0 }
 0x5b6   : > { %v5504_v26 = vrot.slane %v5503_v13, 1  ;;  %v5491_v41 = vadd.s32 %v5490_v27, %v5489_v62  ;;  %v5535_v15 = vrot.slane %v5534_v0, 4  ;;  %vm3992_vm14 = vcmp.eq.s32.totalorder %v3256_v9, %v17166_v45 }
 0x5b7   : > { %v4244_v48 = vsel %vm3988_vm0, 1, %v16629_v3  ;;  %v3551_v51 = vperm.slane %v17419_v35, 2  ;;  %v4249_v52 = vsel %vm3993_vm15, 1, %v16629_v3  ;;  %v17421_v20 = vand.u32 1, %v17420_v21 }
 0x5b8   : > { %vm6286_vm8 = vcmp.gt.s32.totalorder %v5484_v11, 0  ;;  %v5509_v56 = vrot.slane %v5508_v33, 2  ;;  %v5541_v62 = vsel %vm4329_vm5, %v4246_v7, 0  ;;  %v5527_v59 = vsel %vm4329_vm5, %v4244_v48, 0 }
 0x5b9   : > { %vm14972_vm2 = vcmp.eq.s32.totalorder %v17421_v20, 1  ;;  %v6540_v34 = vsel %vm6284_vm12, 1.0, %v17284_v29  ;;  %v5516_v4 = vrot.slane %v5515_v24, 2  ;;  %v5522_v38 = vadd.s32 %v5521_v28, %v5520_v53  ;;  %3556 = vperm.xlu0 %8684, %v3551_v51  }
 0x5ba   : > { %v5528_v23 = vrot.slane %v5527_v59, 4  ;;  %v4248_v47 = vsel %vm3992_vm14, 1, %v16629_v3  ;;  %v5562_v1 = vsel %vm4329_vm5, %v4249_v52, 0  ;;  %v3523_v19 = vperm.slane %v17414_v37, 6  ;;  %v14995_v37 = vpop.permute.xlu1 %3269 }
 0x5bb   : > { %v3537_v5 = vperm.slane %v17419_v35, 0  ;;  %v5505_v27 = vadd.s32 %v5504_v26, %v5503_v13  ;;  %vm6287_vm0 = vcmp.gt.s32.totalorder %v5491_v41, 0  ;;  %v5536_v44 = vadd.s32 %v5535_v15, %v5534_v0  ;;  %v15008_v41 = vpop.permute.xlu2 %3297 }
 0x5bc   : > { %v5542_v30 = vrot.slane %v5541_v62, 4  ;;  %v4197_v53 = vsel %vm3941_vm10, 1, %v16629_v3  ;;  %v6541_v9 = vsel %vm6285_vm13, 1.0, %v17284_v29  ;;  %v7746_v28 = vsel %vm7600_vm6, %v6540_v34, %v7745_v18  ;;  %3528 = vperm.xlu2 %8685, %v3523_v19  }
 0x5bd   : > { %v5510_v7 = vadd.s32 %v5509_v56, %v5508_v33  ;;  %3542 = vperm.xlu1 %8683, %v3537_v5   ;;  %v6542_v13 = vsel %vm6286_vm8, 1.0, %v17284_v29  ;;  %v5555_v0 = vsel %vm4329_vm5, %v4248_v47, 0  ;;  %v5529_v26 = vadd.s32 %v5528_v23, %v5527_v59 }
 0x5be   : > { %v5563_v15 = vrot.slane %v5562_v1, 4  ;;  %vm6288_vm10 = vcmp.gt.s32.totalorder %v14960_v32, 0  ;;  %v5517_v57 = vadd.s32 %v5516_v4, %v5515_v24  ;;  %v6543_v31 = vsel %vm6287_vm0, 1.0, %v17284_v29  ;;  %v15015_v4 = vpop.permute.xlu0 %3304 }
 0x5bf   : > { %v5523_v48 = vrot.slane %v5522_v38, 2  ;;  %v5537_v18 = vrot.slane %v5536_v44, 2  ;;  %v5543_v33 = vadd.s32 %v5542_v30, %v5541_v62  ;;  %vm6289_vm13 = vcmp.gt.s32.totalorder %v5505_v27, 0 }
 0x5c0   : > { %v7747_v51 = vsel %vm7602_vm11, %v6541_v9, %v7746_v28  ;;  %v5511_v52 = vrot.slane %v5510_v7, 1  ;;  %v5556_v21 = vrot.slane %v5555_v0, 4  ;;  %vm3995_vm15 = vcmp.eq.s32.totalorder %v3277_v49, %v17166_v45 }
 0x5c1   : > { %v7748_v11 = vsel %vm7604_vm9, %v6542_v13, %v7747_v51  ;;  %v5530_v20 = vrot.slane %v5529_v26, 2  ;;  %v5564_v56 = vadd.s32 %v5563_v15, %v5562_v1  ;;  %v6544_v32 = vsel %vm6288_vm10, 1.0, %v17284_v29 }
 0x5c2   : > { %v7749_v24 = vsel %vm7606_vm7, %v6543_v31, %v7748_v11  ;;  %v6545_v59 = vsel %vm6289_vm13, 1.0, %v17284_v29  ;;  %v4251_v34 = vsel %vm3995_vm15, 1, %v16629_v3  ;;  %vm3991_vm12 = vcmp.eq.s32.totalorder %v14953_v2, %v17166_v45  ;;  %v15028_v11 = vpop.permute.xlu1 %3290 }
 0x5c3   : > { %v7750_v62 = vsel %vm7608_vm1, %v6544_v32, %v7749_v24  ;;  %v7329_v49 = vsel %vm14972_vm2, 1.0, %v17284_v29  ;;  %v5576_v47 = vsel %vm4329_vm5, %v4251_v34, 0  ;;  %v4247_v1 = vsel %vm3991_vm12, 1, %v16629_v3 }
 0x5c4   : > { %v7751_v23 = vsel %vm16478_vm4, %v6545_v59, %v7750_v62  ;;  %v5518_v19 = vrot.slane %v5517_v57, 1  ;;  %v5577_v27 = vrot.slane %v5576_v47, 4  ;;  %v5548_v30 = vsel %vm4329_vm5, %v4247_v1, 0 }
 0x5c5   : > { %v7881_v5 = vsel %vm16477_vm3, %v7329_v49, %v7751_v23  ;;  %v5524_v2 = vadd.s32 %v5523_v48, %v5522_v38  ;;  %v5544_v9 = vrot.slane %v5543_v33, 2  ;;  %v5549_v28 = vrot.slane %v5548_v30, 4 }
 0x5c6   : > { %8291 = vmatmul.msk.f32.gmra.mxu2 %vm4329_vm5, %v7881_v5  ;;  %v3572_v16 = vperm.slane %v17419_v35, 5  ;;  %v5538_v13 = vadd.s32 %v5537_v18, %v5536_v44  ;;  %v5557_v15 = vadd.s32 %v5556_v21, %v5555_v0  ;;  %v5565_v31 = vrot.slane %v5564_v56, 2 }
 0x5c7   : > { %v5578_v51 = vadd.s32 %v5577_v27, %v5576_v47  ;;  %v15031_v32 = vsel %vm4329_vm5, %v4197_v53, 0  ;;  %v5512_v24 = vadd.s32 %v5511_v52, %v5510_v7  ;;  %v5531_v59 = vadd.s32 %v5530_v20, %v5529_v26  ;;  %v3319_v20 = vpop.permute.xlu2 %3318  ;;  %v17424_v27 = vld [vmem:[#allocation56_spill] sm:$0xff] }
 0x5c8   : > { %v5550_v62 = vadd.s32 %v5549_v28, %v5548_v30  ;;  %3577 = vperm.xlu0 %8684, %v3572_v16   ;;  %v5519_v38 = vadd.s32 %v5518_v19, %v5517_v57  ;;  %v3544_v34 = vperm.slane %v17419_v35, 1  ;;  %v3558_v49 = vperm.slane %v17419_v35, 3 }
 0x5c9   : > { %v5579_v48 = vrot.slane %v5578_v51, 2  ;;  %v5525_v23 = vrot.slane %v5524_v2, 1  ;;  %v5545_v44 = vadd.s32 %v5544_v9, %v5543_v33  ;;  %vm3994_vm14 = vcmp.eq.s32.totalorder %v14995_v37, %v17166_v45 }
 0x5ca   : > { %v5551_v0 = vrot.slane %v5550_v62, 2  ;;  %v5539_v18 = vrot.slane %v5538_v13, 1  ;;  %v5558_v21 = vrot.slane %v5557_v15, 2  ;;  %v5566_v53 = vadd.s32 %v5565_v31, %v5564_v56  ;;  %3549 = vperm.xlu2 %8685, %v3544_v34   ;;  %3563 = vperm.xlu1 %8683, %v3558_v49   ;;  %v3326_v56 = vpop.permute.xlu0 %3325 }
 0x5cb   : > { %v4250_v7 = vsel %vm3994_vm14, 1, %v16629_v3  ;;  %vm6290_vm2 = vcmp.gt.s32.totalorder %v5512_v24, 0  ;;  %v5532_v26 = vrot.slane %v5531_v59, 1  ;;  %v5580_v57 = vadd.s32 %v5579_v48, %v5578_v51  ;;  %v15054_v48 = vpop.permute.xlu1 %3311 }
 0x5cc   : > { %v5569_v52 = vsel %vm4329_vm5, %v4250_v7, 0  ;;  %v15042_v33 = vadd.s32 %v5150_v43, %v14745_v25  ;;  %v5199_v37 = vrot.slane %v15031_v32, 4  ;;  %v5552_v47 = vadd.s32 %v5551_v0, %v5550_v62 }
 0x5cd   : > { %v5570_v1 = vrot.slane %v5569_v52, 4  ;;  %vm6291_vm8 = vcmp.gt.s32.totalorder %v5519_v38, 0  ;;  %v5526_v19 = vadd.s32 %v5525_v23, %v5524_v2  ;;  %v5546_v5 = vrot.slane %v5545_v44, 1 }
 0x5ce   : > { %v3593_v30 = vperm.slane %v17424_v27, 0  ;;  %v15046_v9 = vadd.s32 %v5539_v18, %v5538_v13  ;;  %v6546_v28 = vsel %vm6290_vm2, 1.0, %v17284_v29  ;;  %v5567_v16 = vrot.slane %v5566_v53, 1 }
 0x5cf   : > { %v5571_v31 = vadd.s32 %v5570_v1, %v5569_v52  ;;  %vm3942_vm0 = vcmp.eq.s32.totalorder %v14330_v42, %v17166_v45  ;;  %v5559_v25 = vadd.s32 %v5558_v21, %v5557_v15  ;;  %v5533_v43 = vadd.s32 %v5532_v26, %v5531_v59  ;;  %v17426_v52 = vld [vmem:[#allocation67_spill] sm:$0xff] }
 0x5d0   : > { %v5581_v51 = vrot.slane %v5580_v57, 1  ;;  %3598 = vperm.xlu0 %8684, %v3593_v30   ;;  %vm4001_vm10 = vcmp.eq.s32.totalorder %v3319_v20, %v17166_v45  ;;  %v5553_v24 = vrot.slane %v5552_v47, 1  ;;  %v3565_v62 = vperm.slane %v17419_v35, 4 }
 0x5d1   : > { %v5572_v2 = vrot.slane %v5571_v31, 2  ;;  %v3579_v13 = vperm.slane %v17419_v35, 6  ;;  %v6547_v34 = vsel %vm6291_vm8, 1.0, %v17284_v29  ;;  %vm6292_vm13 = vcmp.gt.s32.totalorder %v5526_v19, 0 }
 0x5d2   : > { %v5547_v49 = vadd.s32 %v5546_v5, %v5545_v44  ;;  %v4257_v15 = vsel %vm4001_vm10, 1, %v16629_v3  ;;  %vm17425_vm15 = vcmask 1041409   ;;  %v5568_v23 = vadd.s32 %v5567_v16, %v5566_v53  ;;  %3570 = vperm.xlu2 %8685, %v3565_v62  }
 0x5d3   : > { %v7752_v59 = vsel %vm17425_vm15, %v6547_v34, %v6546_v28  ;;  %v5573_v0 = vadd.s32 %v5572_v2, %v5571_v31  ;;  %3584 = vperm.xlu1 %8683, %v3579_v13   ;;  %v5618_v18 = vsel %vm4329_vm5, %v4257_v15, 0  ;;  %v5560_v21 = vrot.slane %v5559_v25, 1  ;;  %v15075_v31 = vpop.permute.xlu0 %3346 }
 0x5d4   : > { %vm6293_vm12 = vcmp.gt.s32.totalorder %v5533_v43, 0  ;;  %v5582_v7 = vadd.s32 %v5581_v51, %v5580_v57  ;;  %v5619_v26 = vrot.slane %v5618_v18, 4  ;;  %v17427_v20 = vand.u32 1, %v17426_v52  ;;  %v15071_v57 = vpop.permute.xlu2 %3339 }
 0x5d5   : > { %v6548_v44 = vsel %vm6292_vm13, 1.0, %v17284_v29  ;;  %vm6294_vm2 = vcmp.gt.s32.totalorder %v15046_v9, 0  ;;  %v5554_v53 = vadd.s32 %v5553_v24, %v5552_v47  ;;  %v5574_v1 = vrot.slane %v5573_v0, 1 }
 0x5d6   : > { %vm15063_vm14 = vcmp.eq.s32.totalorder %v17427_v20, 1  ;;  %vm6295_vm8 = vcmp.gt.s32.totalorder %v5547_v49, 0  ;;  %v7753_v19 = vsel %vm7600_vm6, %v6548_v44, %v7752_v59  ;;  %v5620_v5 = vadd.s32 %v5619_v26, %v5618_v18 }
 0x5d7   : > { %v3614_v30 = vperm.slane %v17424_v27, 3  ;;  %v6549_v28 = vsel %vm6293_vm12, 1.0, %v17284_v29  ;;  %vm6298_vm10 = vcmp.gt.s32.totalorder %v5568_v23, 0  ;;  %v5575_v16 = vadd.s32 %v5574_v1, %v5573_v0  ;;  %v3333_v0 = vpop.permute.xlu1 %3332 }
 0x5d8   : > { %vm4002_vm15 = vcmp.eq.s32.totalorder %v3326_v56, %v17166_v45  ;;  %v5561_v43 = vadd.s32 %v5560_v21, %v5559_v25  ;;  %vm6300_vm13 = vcmp.gt.s32.totalorder %v5582_v7, 0  ;;  %v5621_v47 = vrot.slane %v5620_v5, 2 }
 0x5d9   : > { %3619 = vperm.xlu0 %8684, %v3614_v30   ;;  %v4258_v51 = vsel %vm4002_vm15, 1, %v16629_v3  ;;  %vm6296_vm3 = vcmp.gt.s32.totalorder %v5554_v53, 0  ;;  %vm6299_vm4 = vcmp.gt.s32.totalorder %v5575_v16, 0  ;;  %v3586_v2 = vperm.slane %v17419_v35, 7 }
 0x5da   : > { %v5625_v24 = vsel %vm4329_vm5, %v4258_v51, 0  ;;  %v7754_v62 = vsel %vm7602_vm11, %v6549_v28, %v7753_v19  ;;  %v6554_v13 = vsel %vm6298_vm10, 1.0, %v17284_v29  ;;  %v6555_v56 = vsel %vm6299_vm4, 1.0, %v17284_v29 }
 0x5db   : > { %v5622_v34 = vadd.s32 %v5621_v47, %v5620_v5  ;;  %v4198_v25 = vsel %vm3942_vm0, 1, %v16629_v3  ;;  %v6556_v15 = vsel %vm6300_vm13, 1.0, %v17284_v29  ;;  %vm17430_vm12 = vcmask 1041409   ;;  %3591 = vperm.xlu2 %8685, %v3586_v2  }
 0x5dc   : > { %v7759_v59 = vsel %vm17430_vm12, %v6555_v56, %v6554_v13  ;;  %v5626_v23 = vrot.slane %v5625_v24, 4  ;;  %v6550_v35 = vsel %vm6294_vm2, 1.0, %v17284_v29  ;;  %vm6297_vm4 = vcmp.gt.s32.totalorder %v5561_v43, 0  ;;  %v15123_v43 = vpop.permute.xlu0 %3367 }
 0x5dd   : > { %v15093_v18 = vsel %vm7600_vm6, %v6556_v15, %v7759_v59  ;;  %v6552_v21 = vsel %vm6296_vm3, 1.0, %v17284_v29  ;;  %v6551_v42 = vsel %vm6295_vm8, 1.0, %v17284_v29  ;;  %v5623_v7 = vrot.slane %v5622_v34, 1 }
 0x5de   : > { %v5627_v26 = vadd.s32 %v5626_v23, %v5625_v24  ;;  %v7755_v52 = vsel %vm7604_vm9, %v6550_v35, %v7754_v62  ;;  %v5200_v20 = vadd.s32 %v5199_v37, %v15031_v32  ;;  %vm3996_vm0 = vcmp.eq.s32.totalorder %v14978_v60, %v17166_v45  ;;  %v15118_v37 = vpop.permute.xlu2 %3360 }
 0x5df   : > { %v7756_v9 = vsel %vm7606_vm7, %v6551_v42, %v7755_v52  ;;  %v3600_v44 = vperm.slane %v17424_v27, 1  ;;  %vm3998_vm3 = vcmp.eq.s32.totalorder %v15008_v41, %v17166_v45  ;;  %v6553_v53 = vsel %vm6297_vm4, 1.0, %v17284_v29  ;;  %v15144_v35 = vpop.permute.xlu1 %3353 }
 0x5e0   : > { %v5628_v49 = vrot.slane %v5627_v26, 2  ;;  %v7757_v1 = vsel %vm7608_vm1, %v6552_v21, %v7756_v9  ;;  %v5205_v19 = vsel %vm4329_vm5, %v4198_v25, 0  ;;  %vm3944_vm2 = vcmp.eq.s32.totalorder %v14352_v58, %v17166_v45 }
 0x5e1   : > { %v7330_v60 = vsel %vm15063_vm14, 1.0, %v17284_v29  ;;  %vm17431_vm8 = vcmask 1047559   ;;  %3605 = vperm.xlu1 %8683, %v3600_v44   ;;  %v4252_v5 = vsel %vm3996_vm0, 1, %v16629_v3  ;;  %v5624_v30 = vadd.s32 %v5623_v7, %v5622_v34 }
 0x5e2   : > { %v7758_v32 = vsel %vm17431_vm8, %v6553_v53, %v7757_v1  ;;  %v5629_v28 = vadd.s32 %v5628_v49, %v5627_v26  ;;  %vm17432_vm10 = vcmp.eq.s32.totalorder %v17166_v45, 0  ;;  %v5161_v47 = vrot.slane %v14545_v22, 1 }
 0x5e3   : > { %v7882_v16 = vsel %vm17432_vm10, %v7330_v60, %v7758_v32  ;;  %v5152_v51 = vrot.slane %v15042_v33, 2  ;;  %v4254_v38 = vsel %vm3998_vm3, 1, %v16629_v3  ;;  %v3635_v24 = vperm.slane %v17424_v27, 6  ;;  %v17434_v32 = vld [vmem:[#allocation49_spill] sm:$0xff] }
 0x5e4   : > { %8292 = vmatmul.msk.f32.gmra.mxu2 %vm4329_vm5, %v7882_v16  ;;  %v5133_v2 = vrot.slane %v14559_v8, 1  ;;  %v5201_v62 = vrot.slane %v5200_v20, 2  ;;  %v4200_v13 = vsel %vm3944_vm2, 1, %v16629_v3  ;;  %v5630_v56 = vrot.slane %v5629_v28, 1 }
 0x5e5   : > { %v5166_v34 = vrot.slane %v14573_v61, 2  ;;  %v5206_v25 = vrot.slane %v5205_v19, 4  ;;  %v5583_v15 = vsel %vm4329_vm5, %v4252_v5, 0  ;;  %3640 = vperm.xlu0 %8684, %v3635_v24   ;;  %v3607_v41 = vperm.slane %v17424_v27, 2 }
 0x5e6   : > { %vm3943_vm14 = vcmp.eq.s32.totalorder %v14390_v6, %v17166_v45  ;;  %v5597_v59 = vsel %vm4329_vm5, %v4254_v38, 0  ;;  %vm6306_vm15 = vcmp.gt.s32.totalorder %v5624_v30, 0  ;;  %v5631_v23 = vadd.s32 %v5630_v56, %v5629_v28  ;;  %v3382_v30 = vpop.permute.xlu2 %3381 }
 0x5e7   : > { %v5153_v58 = vadd.s32 %v5152_v51, %v15042_v33  ;;  %v5219_v21 = vsel %vm4329_vm5, %v4200_v13, 0  ;;  %3612 = vperm.xlu2 %8685, %v3607_v41   ;;  %v3621_v42 = vperm.slane %v17424_v27, 4  ;;  %vm4003_vm13 = vcmp.eq.s32.totalorder %v3333_v0, %v17166_v45  ;;  %v3389_v51 = vpop.permute.xlu0 %3388 }
 0x5e8   : > { %v5202_v7 = vadd.s32 %v5201_v62, %v5200_v20  ;;  %v5584_v26 = vrot.slane %v5583_v15, 4  ;;  %vm6307_vm12 = vcmp.gt.s32.totalorder %v5631_v23, 0  ;;  %v4259_v6 = vsel %vm4003_vm13, 1, %v16629_v3 }
 0x5e9   : > { %v4199_v52 = vsel %vm3943_vm14, 1, %v16629_v3  ;;  %v5598_v9 = vrot.slane %v5597_v59, 4  ;;  %v6562_v44 = vsel %vm6306_vm15, 1.0, %v17284_v29  ;;  %v6563_v49 = vsel %vm6307_vm12, 1.0, %v17284_v29  ;;  %3626 = vperm.xlu1 %8683, %v3621_v42   ;;  %v3375_v42 = vpop.permute.xlu1 %3374 }
 0x5ea   : > { %v5207_v33 = vadd.s32 %v5206_v25, %v5205_v19  ;;  %v5220_v53 = vrot.slane %v5219_v21, 4  ;;  %vm17433_vm4 = vcmask 1041409   ;;  %v5632_v0 = vsel %vm4329_vm5, %v4259_v6, 0 }
 0x5eb   : > { %v15155_v1 = vsel %vm17433_vm4, %v6563_v49, %v6562_v44  ;;  %v5134_v20 = vadd.s32 %v5133_v2, %v14559_v8  ;;  %vm3999_vm0 = vcmp.eq.s32.totalorder %v15015_v4, %v17166_v45  ;;  %v5633_v60 = vrot.slane %v5632_v0, 4 }
 0x5ec   : > { %v3656_v5 = vperm.slane %v17434_v32, 1  ;;  %vm6238_vm3 = vcmp.gt.s32.totalorder %v14757_v55, 0  ;;  %v5154_v28 = vrot.slane %v5153_v58, 1  ;;  %v5212_v19 = vsel %vm4329_vm5, %v4199_v52, 0 }
 0x5ed   : > { %v5585_v16 = vadd.s32 %v5584_v26, %v5583_v15  ;;  %v15165_v38 = vadd.s32 %v5166_v34, %v14573_v61  ;;  %v5599_v24 = vadd.s32 %v5598_v9, %v5597_v59  ;;  %v5634_v62 = vadd.s32 %v5633_v60, %v5632_v0 }
 0x5ee   : > { %3661 = vperm.xlu0 %8684, %v3656_v5   ;;  %v3628_v8 = vperm.slane %v17424_v27, 5  ;;  %v5203_v2 = vrot.slane %v5202_v7, 1  ;;  %v5208_v13 = vrot.slane %v5207_v33, 2  ;;  %v5221_v56 = vadd.s32 %v5220_v53, %v5219_v21  ;;  %v3403_v60 = vpop.permute.xlu2 %3402 }
 0x5ef   : > { %17435 = vst [vmem:[#allocation18_spill] sm:$0xff] %v15165_v38  ;;  %v4255_v25 = vsel %vm3999_vm0, 1, %v16629_v3  ;;  %vm6236_vm2 = vcmp.gt.s32.totalorder %v5134_v20, 0  ;;  %v5213_v41 = vrot.slane %v5212_v19, 4  ;;  %v5635_v15 = vrot.slane %v5634_v62, 2 }
 0x5f0   : > { %3633 = vperm.xlu2 %8685, %v3628_v8   ;;  %v3642_v61 = vperm.slane %v17424_v27, 7  ;;  %v15176_v34 = vsel %vm6238_vm3, 1.0, %v17284_v29  ;;  %v15179_v59 = vadd.s32 %v5161_v47, %v14545_v22  ;;  %v15181_v23 = vadd.s32 %v5154_v28, %v5153_v58 }
 0x5f1   : > { %v5586_v21 = vrot.slane %v5585_v16, 2  ;;  %v5600_v4 = vrot.slane %v5599_v24, 2  ;;  %v5604_v26 = vsel %vm4329_vm5, %v4255_v25, 0  ;;  %v5636_v6 = vadd.s32 %v5635_v15, %v5634_v62 }
 0x5f2   : > { %3647 = vperm.xlu1 %8683, %v3642_v61   ;;  %vm4010_vm8 = vcmp.eq.s32.totalorder %v3382_v30, %v17166_v45  ;;  %v6492_v27 = vsel %vm6236_vm2, 1.0, %v17284_v29  ;;  %v15186_v52 = vadd.s32 %v5203_v2, %v5202_v7  ;;  %v5209_v55 = vadd.s32 %v5208_v13, %v5207_v33 }
 0x5f3   : > { %v5222_v9 = vrot.slane %v5221_v56, 2  ;;  %v5214_v47 = vadd.s32 %v5213_v41, %v5212_v19  ;;  %v5637_v58 = vrot.slane %v5636_v6, 1  ;;  %v3677_v44 = vperm.slane %v17434_v32, 4  ;;  %v8060_v19 = vpop.f32.mrf.mxu2 }
 0x5f4   : > { %v5587_v49 = vadd.s32 %v5586_v21, %v5585_v16  ;;  %v5605_v53 = vrot.slane %v5604_v26, 4  ;;  %vm3997_vm10 = vcmp.eq.s32.totalorder %v15028_v11, %v17166_v45  ;;  %v4266_v0 = vsel %vm4010_vm8, 1, %v16629_v3  ;;  %v3410_v16 = vpop.permute.xlu0 %3409  ;;  %v15216_v11 = vld [vmem:[%s16215_s3] ss:$0 sm:$0xff] }
 0x5f5   : > { %v15195_v20 = vsel %vm7600_vm6, %v6492_v27, %v14517_v12  ;;  %vm6239_vm14 = vcmp.gt.s32.totalorder %v15181_v23, 0  ;;  %v5601_v7 = vadd.s32 %v5600_v4, %v5599_v24  ;;  %v5638_v33 = vadd.s32 %v5637_v58, %v5636_v6 }
 0x5f6   : > { %3682 = vperm.xlu0 %8684, %v3677_v44   ;;  %vm6246_vm15 = vcmp.gt.s32.totalorder %v15186_v52, 0  ;;  %v5210_v5 = vrot.slane %v5209_v55, 1  ;;  %v5223_v30 = vadd.s32 %v5222_v9, %v5221_v56  ;;  %vm4011_vm13 = vcmp.eq.s32.totalorder %v3389_v51, %v17166_v45 }
 0x5f7   : > { %v3649_v28 = vperm.slane %v17434_v32, 0  ;;  %v5215_v62 = vrot.slane %v5214_v47, 2  ;;  %v4253_v12 = vsel %vm3997_vm10, 1, %v16629_v3  ;;  %vm6308_vm12 = vcmp.gt.s32.totalorder %v5638_v33, 0 }
 0x5f8   : > { %v5681_v24 = vsel %vm4329_vm5, %v4266_v0, 0  ;;  %v5588_v8 = vrot.slane %v5587_v49, 1  ;;  %v5606_v2 = vadd.s32 %v5605_v53, %v5604_v26  ;;  %v6564_v13 = vsel %vm6308_vm12, 1.0, %v17284_v29 }
 0x5f9   : > { %3654 = vperm.xlu2 %8685, %v3649_v28   ;;  %v3663_v51 = vperm.slane %v17434_v32, 2  ;;  %v5602_v56 = vrot.slane %v5601_v7, 1  ;;  %v15210_v25 = vsel %vm7600_vm6, %v6564_v13, %v15155_v1  ;;  %v4267_v41 = vsel %vm4011_vm13, 1, %v16629_v3  ;;  %v3396_v1 = vpop.permute.xlu1 %3395 }
 0x5fa   : > { %17436 = vst [vmem:[#allocation25_spill] sm:$0xff] %v15210_v25  ;;  %v8061_v15 = vadd.f32 %v15216_v11, %v8060_v19  ;;  %v5590_v61 = vsel %vm4329_vm5, %v4253_v12, 0  ;;  %v5682_v21 = vrot.slane %v5681_v24, 4  ;;  %vm4013_vm4 = vcmp.eq.s32.totalorder %v3403_v60, %v17166_v45  ;;  %v3424_v12 = vpop.permute.xlu2 %3423 }
 0x5fb   : > { %3668 = vperm.xlu1 %8683, %v3663_v51   ;;  %vm4009_vm0 = vcmp.eq.s32.totalorder %v3375_v42, %v17166_v45  ;;  %v5211_v4 = vadd.s32 %v5210_v5, %v5209_v55  ;;  %v5216_v26 = vadd.s32 %v5215_v62, %v5214_v47  ;;  %v5589_v9 = vadd.s32 %v5588_v8, %v5587_v49 }
 0x5fc   : > { %v8124_v6 = vmax.f32 %v8061_v15, 0.0  ;;  %v4265_v27 = vsel %vm4009_vm0, 1, %v16629_v3  ;;  %v5607_v58 = vrot.slane %v5606_v2, 2  ;;  %v5688_v44 = vsel %vm4329_vm5, %v4267_v41, 0 }
 0x5fd   : > { %v5674_v53 = vsel %vm4329_vm5, %v4265_v27, 0  ;;  %v5591_v0 = vrot.slane %v5590_v61, 4  ;;  %v4269_v33 = vsel %vm4013_vm4, 1, %v16629_v3  ;;  %v3698_v60 = vperm.slane %v17434_v32, 7 }
 0x5fe   : > { %8156 = vst [vmem:[%s13569_s28 + $0x80] sm:$0xff] %v8124_v6  ;;  %v5675_v28 = vrot.slane %v5674_v53, 4  ;;  %v5224_v42 = vrot.slane %v5223_v30, 1  ;;  %v5603_v19 = vadd.s32 %v5602_v56, %v5601_v7  ;;  %v5683_v55 = vadd.s32 %v5682_v21, %v5681_v24  ;;  %v3431_v24 = vpop.permute.xlu0 %3430 }
 0x5ff   : > { %v3670_v47 = vperm.slane %v17434_v32, 3  ;;  %v15232_v49 = vsel %vm6239_vm14, 1.0, %v17284_v29  ;;  %vm6247_vm3 = vcmp.gt.s32.totalorder %v5211_v4, 0  ;;  %v5217_v5 = vrot.slane %v5216_v26, 1  ;;  %3703 = vperm.xlu0 %8684, %v3698_v60  }
 0x600   : > { %17437 = vst [vmem:[#allocation35_spill] sm:$0xff] %v15232_v49  ;;  %v5689_v62 = vrot.slane %v5688_v44, 4  ;;  %v5702_v8 = vsel %vm4329_vm5, %v4269_v33, 0  ;;  %v5676_v13 = vadd.s32 %v5675_v28, %v5674_v53  ;;  %vm4014_vm2 = vcmp.eq.s32.totalorder %v3410_v16, %v17166_v45 }
 0x601   : > { %3675 = vperm.xlu2 %8685, %v3670_v47   ;;  %v3684_v7 = vperm.slane %v17434_v32, 5  ;;  %v15240_v23 = vsel %vm6246_vm15, 1.0, %v17284_v29  ;;  %vm6301_vm8 = vcmp.gt.s32.totalorder %v5589_v9, 0  ;;  %v5608_v51 = vadd.s32 %v5607_v58, %v5606_v2  ;;  %v3417_v9 = vpop.permute.xlu1 %3416 }
 0x602   : > { %17438 = vst [vmem:[#allocation36_spill] sm:$0xff] %v15240_v23  ;;  %v5592_v56 = vadd.s32 %v5591_v0, %v5590_v61  ;;  %v15243_v41 = vsel %vm6247_vm3, 1.0, %v17284_v29  ;;  %v15245_v15 = vadd.s32 %v5224_v42, %v5223_v30  ;;  %vm6303_vm10 = vcmp.gt.s32.totalorder %v5603_v19, 0 }
 0x603   : > { %17439 = vst [vmem:[#allocation76_spill] sm:$0xff] %v15243_v41  ;;  %v5684_v21 = vrot.slane %v5683_v55, 2  ;;  %3689 = vperm.xlu1 %8683, %v3684_v7   ;;  %v5690_v16 = vadd.s32 %v5689_v62, %v5688_v44  ;;  %v5703_v4 = vrot.slane %v5702_v8, 4  ;;  %v4270_v6 = vsel %vm4014_vm2, 1, %v16629_v3 }
 0x604   : > { %17440 = vst [vmem:[#allocation29_spill] sm:$0xff] %v15245_v15  ;;  %vm4012_vm14 = vcmp.eq.s32.totalorder %v3396_v1, %v17166_v45  ;;  %v15249_v52 = vadd.s32 %v5217_v5, %v5216_v26  ;;  %v15252_v27 = vsel %vm6301_vm8, 1.0, %v17284_v29  ;;  %v5677_v2 = vrot.slane %v5676_v13, 2  ;;  %v17441_v26 = vld [vmem:[#allocation5_spill] sm:$0xff] }
 0x605   : > { %v4268_v61 = vsel %vm4012_vm14, 1, %v16629_v3  ;;  %v15256_v30 = vsel %vm6303_vm10, 1.0, %v17284_v29  ;;  %v5609_v58 = vrot.slane %v5608_v51, 1  ;;  %v5593_v53 = vrot.slane %v5592_v56, 2 }
 0x606   : > { %vm4016_vm15 = vcmp.eq.s32.totalorder %v3424_v12, %v17166_v45  ;;  %v5685_v44 = vadd.s32 %v5684_v21, %v5683_v55  ;;  %v5709_v0 = vsel %vm4329_vm5, %v4270_v6, 0  ;;  %v5695_v1 = vsel %vm4329_vm5, %v4268_v61, 0  ;;  %v3445_v21 = vpop.permute.xlu2 %3444 }
 0x607   : > { %v3719_v33 = vperm.slane %v17441_v26, 2  ;;  %vm4004_vm13 = vcmp.eq.s32.totalorder %v15071_v57, %v17166_v45  ;;  %v5691_v28 = vrot.slane %v5690_v16, 2  ;;  %v5704_v60 = vadd.s32 %v5703_v4, %v5702_v8 }
 0x608   : > { %v5696_v42 = vrot.slane %v5695_v1, 4  ;;  %v5678_v19 = vadd.s32 %v5677_v2, %v5676_v13  ;;  %v4272_v47 = vsel %vm4016_vm15, 1, %v16629_v3  ;;  %v3691_v5 = vperm.slane %v17434_v32, 6  ;;  %v3452_v32 = vpop.permute.xlu0 %3451 }
 0x609   : > { %3724 = vperm.xlu0 %8684, %v3719_v33   ;;  %v3705_v55 = vperm.slane %v17441_v26, 0  ;;  %v15267_v62 = vadd.s32 %v5593_v53, %v5592_v56  ;;  %v5710_v12 = vrot.slane %v5709_v0, 4  ;;  %vm4017_vm12 = vcmp.eq.s32.totalorder %v3431_v24, %v17166_v45 }
 0x60a   : > { %v5697_v7 = vadd.s32 %v5696_v42, %v5695_v1  ;;  %v15270_v6 = vadd.s32 %v5609_v58, %v5608_v51  ;;  %v4260_v57 = vsel %vm4004_vm13, 1, %v16629_v3  ;;  %vm4000_vm4 = vcmp.eq.s32.totalorder %v15054_v48, %v17166_v45  ;;  %3696 = vperm.xlu2 %8685, %v3691_v5  }
 0x60b   : > { %v5686_v8 = vrot.slane %v5685_v44, 1  ;;  %3710 = vperm.xlu1 %8683, %v3705_v55   ;;  %v5692_v13 = vadd.s32 %v5691_v28, %v5690_v16  ;;  %v5705_v4 = vrot.slane %v5704_v60, 2  ;;  %v5723_v56 = vsel %vm4329_vm5, %v4272_v47, 0  ;;  %v8063_v16 = vpop.f32.mrf.mxu2  ;;  %v3438_v47 = vpop.permute.xlu1 %3437 }
 0x60c   : > { %v5698_v2 = vrot.slane %v5697_v7, 2  ;;  %v5679_v61 = vrot.slane %v5678_v19, 1  ;;  %v4273_v24 = vsel %vm4017_vm12, 1, %v16629_v3  ;;  %vm4019_vm0 = vcmp.eq.s32.totalorder %v3445_v21, %v17166_v45 }
 0x60d   : > { %vm4015_vm3 = vcmp.eq.s32.totalorder %v3417_v9, %v17166_v45  ;;  %v15281_v48 = vsel %vm4329_vm5, %v4260_v57, 0  ;;  %v4256_v58 = vsel %vm4000_vm4, 1, %v16629_v3  ;;  %v5711_v53 = vadd.s32 %v5710_v12, %v5709_v0 }
 0x60e   : > { %v5724_v1 = vrot.slane %v5723_v56, 4  ;;  %v4275_v33 = vsel %vm4019_vm0, 1, %v16629_v3  ;;  %v4271_v28 = vsel %vm4015_vm3, 1, %v16629_v3  ;;  %v3733_v42 = vperm.slane %v17441_v26, 4 }
 0x60f   : > { %v5687_v5 = vadd.s32 %v5686_v8, %v5685_v44  ;;  %v5693_v55 = vrot.slane %v5692_v13, 1  ;;  %v5699_v9 = vadd.s32 %v5698_v2, %v5697_v7  ;;  %v5730_v21 = vsel %vm4329_vm5, %v4273_v24, 0 }
 0x610   : > { %v5706_v22 = vadd.s32 %v5705_v4, %v5704_v60  ;;  %v5680_v57 = vadd.s32 %v5679_v61, %v5678_v19  ;;  %v5716_v51 = vsel %vm4329_vm5, %v4271_v28, 0  ;;  %v8064_v0 = vadd.f32 %v15216_v11, %v8063_v16  ;;  %v3466_v61 = vpop.permute.xlu2 %3465 }
 0x611   : > { %3738 = vperm.xlu0 %8684, %v3733_v42   ;;  %v5712_v12 = vrot.slane %v5711_v53, 2  ;;  %v5744_v41 = vsel %vm4329_vm5, %v4275_v33, 0  ;;  %v5717_v23 = vrot.slane %v5716_v51, 4  ;;  %vm4020_vm2 = vcmp.eq.s32.totalorder %v3452_v32, %v17166_v45  ;;  %v3473_v32 = vpop.permute.xlu0 %3472 }
 0x612   : > { %v5725_v54 = vadd.s32 %v5724_v1, %v5723_v56  ;;  %v5731_v44 = vrot.slane %v5730_v21, 4  ;;  %v8125_v8 = vmax.f32 %v8064_v0, 0.0  ;;  %v3712_v7 = vperm.slane %v17441_v26, 1 }
 0x613   : > { %v5694_v19 = vadd.s32 %v5693_v55, %v5692_v13  ;;  %v5700_v4 = vrot.slane %v5699_v9, 1  ;;  %v5718_v2 = vadd.s32 %v5717_v23, %v5716_v51  ;;  %vm6314_vm8 = vcmp.gt.s32.totalorder %v5680_v57, 0 }
 0x614   : > { %v5745_v24 = vrot.slane %v5744_v41, 4  ;;  %8157 = vst [vmem:[%s13569_s28 + $0x88] sm:$0xff] %v8125_v8  ;;  %v4276_v16 = vsel %vm4020_vm2, 1, %v16629_v3  ;;  %3717 = vperm.xlu2 %8685, %v3712_v7   ;;  %v3740_v33 = vperm.slane %v17441_v26, 5  ;;  %vm6315_vm10 = vcmp.gt.s32.totalorder %v5687_v5, 0 }
 0x615   : > { %v5707_v56 = vrot.slane %v5706_v22, 1  ;;  %v5713_v1 = vadd.s32 %v5712_v12, %v5711_v53  ;;  %v5719_v28 = vrot.slane %v5718_v2, 2  ;;  %v5726_v42 = vrot.slane %v5725_v54, 2 }
 0x616   : > { %v5732_v0 = vadd.s32 %v5731_v44, %v5730_v21  ;;  %3745 = vperm.xlu1 %8683, %v3740_v33   ;;  %vm4018_vm14 = vcmp.eq.s32.totalorder %v3438_v47, %v17166_v45  ;;  %v3747_v23 = vperm.slane %v17441_v26, 6  ;;  %vm6316_vm15 = vcmp.gt.s32.totalorder %v5694_v19, 0  ;;  %v3459_v21 = vpop.permute.xlu1 %3458 }
 0x617   : > { %v6570_v13 = vsel %vm6314_vm8, 1.0, %v17284_v29  ;;  %v5701_v51 = vadd.s32 %v5700_v4, %v5699_v9  ;;  %v5751_v55 = vsel %vm4329_vm5, %v4276_v16, 0  ;;  %v5746_v8 = vadd.s32 %v5745_v24, %v5744_v41 }
 0x618   : > { %v5720_v7 = vadd.s32 %v5719_v28, %v5718_v2  ;;  %vm4022_vm13 = vcmp.eq.s32.totalorder %v3466_v61, %v17166_v45  ;;  %v4274_v53 = vsel %vm4018_vm14, 1, %v16629_v3  ;;  %v15305_v12 = vsel %vm4329_vm5, %v4256_v58, 0 }
 0x619   : > { %3752 = vperm.xlu0 %8684, %v3747_v23   ;;  %v5708_v47 = vadd.s32 %v5707_v56, %v5706_v22  ;;  %v5714_v44 = vrot.slane %v5713_v1, 1  ;;  %v5737_v33 = vsel %vm4329_vm5, %v4274_v53, 0  ;;  %vm4005_vm12 = vcmp.eq.s32.totalorder %v15075_v31, %v17166_v45 }
 0x61a   : > { %v6571_v41 = vsel %vm6315_vm10, 1.0, %v17284_v29  ;;  %v5727_v9 = vadd.s32 %v5726_v42, %v5725_v54  ;;  %v5733_v57 = vrot.slane %v5732_v0, 2  ;;  %v5752_v4 = vrot.slane %v5751_v55, 4  ;;  %v17443_v54 = vld [vmem:[#allocation7_spill] sm:$0xff]  ;;  %v3487_v42 = vpop.permute.xlu2 %3486 }
 0x61b   : > { %v6572_v2 = vsel %vm6316_vm15, 1.0, %v17284_v29  ;;  %vm17442_vm4 = vcmask 1041409   ;;  %v4278_v58 = vsel %vm4022_vm13, 1, %v16629_v3  ;;  %v3726_v22 = vperm.slane %v17441_v26, 3 }
 0x61c   : > { %v7773_v61 = vsel %vm17442_vm4, %v6571_v41, %v6570_v13  ;;  %vm6317_vm0 = vcmp.gt.s32.totalorder %v5701_v51, 0  ;;  %v5747_v24 = vrot.slane %v5746_v8, 2  ;;  %v5721_v16 = vrot.slane %v5720_v7, 1  ;;  %v3494_v41 = vpop.permute.xlu0 %3493 }
 0x61d   : > { %v5738_v56 = vrot.slane %v5737_v33, 4  ;;  %vm6318_vm3 = vcmp.gt.s32.totalorder %v5708_v47, 0  ;;  %v5715_v28 = vadd.s32 %v5714_v44, %v5713_v1  ;;  %vm4023_vm2 = vcmp.eq.s32.totalorder %v3473_v32, %v17166_v45  ;;  %3731 = vperm.xlu2 %8685, %v3726_v22   ;;  %v17444_v44 = vld [vmem:[#allocation10_spill] sm:$0xff] }
 0x61e   : > { %v3761_v5 = vperm.slane %v17443_v54, 0  ;;  %v5728_v19 = vrot.slane %v5727_v9, 1  ;;  %v5734_v23 = vadd.s32 %v5733_v57, %v5732_v0  ;;  %v5753_v53 = vadd.s32 %v5752_v4, %v5751_v55 }
 0x61f   : > { %v5765_v13 = vsel %vm4329_vm5, %v4278_v58, 0  ;;  %v6573_v60 = vsel %vm6317_vm0, 1.0, %v17284_v29  ;;  %v7774_v51 = vsel %vm7600_vm6, %v6572_v2, %v7773_v61  ;;  %vm4021_vm8 = vcmp.eq.s32.totalorder %v3459_v21, %v17166_v45 }
 0x620   : > { %3766 = vperm.xlu1 %8683, %v3761_v5   ;;  %v3754_v1 = vperm.slane %v17441_v26, 7  ;;  %v17445_v22 = vand.u32 1, %v17444_v44  ;;  %v5748_v0 = vadd.s32 %v5747_v24, %v5746_v8  ;;  %v5722_v55 = vadd.s32 %v5721_v16, %v5720_v7  ;;  %v3480_v44 = vpop.permute.xlu1 %3479 }
 0x621   : > { %v5739_v57 = vadd.s32 %v5738_v56, %v5737_v33  ;;  %v4279_v4 = vsel %vm4023_vm2, 1, %v16629_v3  ;;  %vm6319_vm14 = vcmp.gt.s32.totalorder %v5715_v28, 0  ;;  %v5766_v2 = vrot.slane %v5765_v13, 4 }
 0x622   : > { %vm15326_vm10 = vcmp.eq.s32.totalorder %v17445_v22, 1  ;;  %v4277_v61 = vsel %vm4021_vm8, 1, %v16629_v3  ;;  %3759 = vperm.xlu0 %8684, %v3754_v1   ;;  %vm4026_vm15 = vcmp.eq.s32.totalorder %v3494_v41, %v17166_v45  ;;  %v5729_v26 = vadd.s32 %v5728_v19, %v5727_v9 }
 0x623   : > { %v7775_v21 = vsel %vm7602_vm11, %v6573_v60, %v7774_v51  ;;  %v5735_v58 = vrot.slane %v5734_v23, 1  ;;  %v5754_v5 = vrot.slane %v5753_v53, 2  ;;  %v5772_v8 = vsel %vm4329_vm5, %v4279_v4, 0  ;;  %v3508_v4 = vpop.permute.xlu2 %3507 }
 0x624   : > { %vm4025_vm13 = vcmp.eq.s32.totalorder %v3487_v42, %v17166_v45  ;;  %v4282_v32 = vsel %vm4026_vm15, 1, %v16629_v3  ;;  %v3768_v7 = vperm.slane %v17443_v54, 1  ;;  %v5749_v33 = vrot.slane %v5748_v0, 1  ;;  %v3515_v40 = vpop.permute.xlu0 %3514 }
 0x625   : > { %vm6320_vm4 = vcmp.gt.s32.totalorder %v5722_v55, 0  ;;  %v5740_v24 = vrot.slane %v5739_v57, 2  ;;  %v5758_v16 = vsel %vm4329_vm5, %v4277_v61, 0  ;;  %v15346_v60 = vsel %vm4005_vm12, 1, %v16629_v3 }
 0x626   : > { %v6574_v56 = vsel %vm6318_vm3, 1.0, %v17284_v29  ;;  %v5767_v42 = vadd.s32 %v5766_v2, %v5765_v13  ;;  %3773 = vperm.xlu2 %8685, %v3768_v7   ;;  %v6575_v19 = vsel %vm6319_vm14, 1.0, %v17284_v29  ;;  %v5773_v41 = vrot.slane %v5772_v8, 4 }
 0x627   : > { %v4281_v51 = vsel %vm4025_vm13, 1, %v16629_v3  ;;  %v5793_v1 = vsel %vm4329_vm5, %v4282_v32, 0  ;;  %v5759_v22 = vrot.slane %v5758_v16, 4  ;;  %vm6321_vm0 = vcmp.gt.s32.totalorder %v5729_v26, 0 }
 0x628   : > { %v6576_v55 = vsel %vm6320_vm4, 1.0, %v17284_v29  ;;  %v7776_v31 = vsel %vm7604_vm9, %v6574_v56, %v7775_v21  ;;  %v5736_v61 = vadd.s32 %v5735_v58, %v5734_v23  ;;  %v5750_v47 = vadd.s32 %v5749_v33, %v5748_v0  ;;  %v8066_v21 = vpop.f32.mrf.mxu2 }
 0x629   : > { %v5755_v9 = vadd.s32 %v5754_v5, %v5753_v53  ;;  %v5741_v13 = vadd.s32 %v5740_v24, %v5739_v57  ;;  %v5768_v2 = vrot.slane %v5767_v42, 2  ;;  %v5794_v7 = vrot.slane %v5793_v1, 4  ;;  %v3501_v5 = vpop.permute.xlu1 %3500 }
 0x62a   : > { %v7777_v28 = vsel %vm7606_vm7, %v6575_v19, %v7776_v31  ;;  %v3782_v38 = vperm.slane %v17443_v54, 3  ;;  %v5774_v25 = vadd.s32 %v5773_v41, %v5772_v8  ;;  %v5786_v32 = vsel %vm4329_vm5, %v4281_v51, 0 }
 0x62b   : > { %v6577_v26 = vsel %vm6321_vm0, 1.0, %v17284_v29  ;;  %v7778_v49 = vsel %vm7608_vm1, %v6576_v55, %v7777_v28  ;;  %v5760_v56 = vadd.s32 %v5759_v22, %v5758_v16  ;;  %v7333_v23 = vsel %vm15326_vm10, 1.0, %v17284_v29  ;;  %v3529_v28 = vpop.permute.xlu2 %3528 }
 0x62c   : > { %vm17448_vm12 = vcmask 1047559   ;;  %3787 = vperm.xlu1 %8683, %v3782_v38   ;;  %vm4024_vm3 = vcmp.eq.s32.totalorder %v3480_v44, %v17166_v45  ;;  %vm6322_vm2 = vcmp.gt.s32.totalorder %v5736_v61, 0  ;;  %v5756_v0 = vrot.slane %v5755_v9, 1 }
 0x62d   : > { %v7779_v53 = vsel %vm17448_vm12, %v6577_v26, %v7778_v49  ;;  %v5742_v57 = vrot.slane %v5741_v13, 1  ;;  %vm17449_vm8 = vcmp.eq.s32.totalorder %v17166_v45, 0  ;;  %v5787_v8 = vrot.slane %v5786_v32, 4 }
 0x62e   : > { %v7885_v58 = vsel %vm17449_vm8, %v7333_v23, %v7779_v53  ;;  %v5795_v33 = vadd.s32 %v5794_v7, %v5793_v1  ;;  %v4280_v24 = vsel %vm4024_vm3, 1, %v16629_v3  ;;  %v8067_v15 = vadd.f32 %v15216_v11, %v8066_v21  ;;  %v3536_v53 = vpop.permute.xlu0 %3535 }
 0x62f   : > { %8295 = vmatmul.msk.f32.vlgmr.msra.gmra.mxu3 %vm4329_vm5, %v7885_v58  ;;  %vm6324_vm10 = vcmp.gt.s32.totalorder %v5750_v47, 0  ;;  %vm4028_vm14 = vcmp.eq.s32.totalorder %v3508_v4, %v17166_v45  ;;  %v5779_v38 = vsel %vm4329_vm5, %v4280_v24, 0  ;;  %v3775_v49 = vperm.slane %v17443_v54, 2 }
 0x630   : > { %v5769_v44 = vadd.s32 %v5768_v2, %v5767_v42  ;;  %v5775_v16 = vrot.slane %v5774_v25, 2  ;;  %v5761_v19 = vrot.slane %v5760_v56, 2  ;;  %v5780_v41 = vrot.slane %v5779_v38, 4 }
 0x631   : > { %v5743_v51 = vadd.s32 %v5742_v57, %v5741_v13  ;;  %v8126_v1 = vmax.f32 %v8067_v15, 0.0  ;;  %3780 = vperm.xlu0 %8684, %v3775_v49   ;;  %vm4029_vm15 = vcmp.eq.s32.totalorder %v3515_v40, %v17166_v45  ;;  %v3789_v22 = vperm.slane %v17443_v54, 4 }
 0x632   : > { %v5788_v55 = vadd.s32 %v5787_v8, %v5786_v32  ;;  %v5796_v31 = vrot.slane %v5795_v33, 2  ;;  %v4284_v4 = vsel %vm4028_vm14, 1, %v16629_v3  ;;  %v5781_v7 = vadd.s32 %v5780_v41, %v5779_v38 }
 0x633   : > { %v6578_v42 = vsel %vm6322_vm2, 1.0, %v17284_v29  ;;  %v15381_v2 = vsel %vm6324_vm10, 1.0, %v17284_v29  ;;  %8158 = vst [vmem:[%s13569_s28 + $0x90] sm:$0xff] %v8126_v1  ;;  %v4285_v13 = vsel %vm4029_vm15, 1, %v16629_v3  ;;  %3794 = vperm.xlu2 %8685, %v3789_v22   ;;  %v3803_v40 = vperm.slane %v17443_v54, 6 }
 0x634   : > { %v15386_v26 = vadd.s32 %v5756_v0, %v5755_v9  ;;  %v5770_v32 = vrot.slane %v5769_v44, 1  ;;  %v5762_v21 = vadd.s32 %v5761_v19, %v5760_v56  ;;  %v5782_v23 = vrot.slane %v5781_v7, 2 }
 0x635   : > { %v5776_v57 = vadd.s32 %v5775_v16, %v5774_v25  ;;  %v5807_v61 = vsel %vm4329_vm5, %v4284_v4, 0  ;;  %3808 = vperm.xlu1 %8683, %v3803_v40   ;;  %vm4031_vm13 = vcmp.eq.s32.totalorder %v3529_v28, %v17166_v45  ;;  %vm4027_vm4 = vcmp.eq.s32.totalorder %v3501_v5, %v17166_v45  ;;  %v3522_v25 = vpop.permute.xlu1 %3521 }
 0x636   : > { %vm6323_vm0 = vcmp.gt.s32.totalorder %v5743_v51, 0  ;;  %v5789_v47 = vrot.slane %v5788_v55, 2  ;;  %v5797_v58 = vadd.s32 %v5796_v31, %v5795_v33  ;;  %v5814_v8 = vsel %vm4329_vm5, %v4285_v13, 0 }
 0x637   : > { %v4287_v9 = vsel %vm4031_vm13, 1, %v16629_v3  ;;  %v4283_v0 = vsel %vm4027_vm4, 1, %v16629_v3  ;;  %v3796_v56 = vperm.slane %v17443_v54, 5  ;;  %vm4032_vm12 = vcmp.eq.s32.totalorder %v3536_v53, %v17166_v45 }
 0x638   : > { %vm6325_vm3 = vcmp.gt.s32.totalorder %v15386_v26, 0  ;;  %v5763_v24 = vrot.slane %v5762_v21, 1  ;;  %v5808_v15 = vrot.slane %v5807_v61, 4  ;;  %v5783_v38 = vadd.s32 %v5782_v23, %v5781_v7 }
 0x639   : > { %v5771_v5 = vadd.s32 %v5770_v32, %v5769_v44  ;;  %v5815_v49 = vrot.slane %v5814_v8, 4  ;;  %v5800_v33 = vsel %vm4329_vm5, %v4283_v0, 0  ;;  %3801 = vperm.xlu0 %8684, %v3796_v56   ;;  %v4288_v16 = vsel %vm4032_vm12, 1, %v16629_v3  ;;  %v3550_v32 = vpop.permute.xlu2 %3549  ;;  %v3557_v56 = vpop.permute.xlu0 %3556 }
 0x63a   : > { %v6579_v19 = vsel %vm6323_vm0, 1.0, %v17284_v29  ;;  %v5777_v41 = vrot.slane %v5776_v57, 1  ;;  %v5828_v1 = vsel %vm4329_vm5, %v4287_v9, 0  ;;  %vm4030_vm2 = vcmp.eq.s32.totalorder %v3522_v25, %v17166_v45 }
 0x63b   : > { %v5790_v22 = vadd.s32 %v5789_v47, %v5788_v55  ;;  %v5798_v31 = vrot.slane %v5797_v58, 1  ;;  %v5801_v4 = vrot.slane %v5800_v33, 4  ;;  %v3810_v7 = vperm.slane %v17443_v54, 7  ;;  %v17451_v54 = vld [vmem:[#allocation70_spill] sm:$0xff] }
 0x63c   : > { %v5764_v44 = vadd.s32 %v5763_v24, %v5762_v21  ;;  %v5809_v28 = vadd.s32 %v5808_v15, %v5807_v61  ;;  %v5784_v13 = vrot.slane %v5783_v38, 1  ;;  %v5835_v40 = vsel %vm4329_vm5, %v4288_v16, 0 }
 0x63d   : > { %v5816_v23 = vadd.s32 %v5815_v49, %v5814_v8  ;;  %v5829_v53 = vrot.slane %v5828_v1, 4  ;;  %v5802_v51 = vadd.s32 %v5801_v4, %v5800_v33  ;;  %3815 = vperm.xlu1 %8683, %v3810_v7   ;;  %v4286_v0 = vsel %vm4030_vm2, 1, %v16629_v3 }
 0x63e   : > { %vm6327_vm8 = vcmp.gt.s32.totalorder %v5771_v5, 0  ;;  %vm17450_vm10 = vcmask 1041409   ;;  %v5778_v55 = vadd.s32 %v5777_v41, %v5776_v57  ;;  %v5821_v47 = vsel %vm4329_vm5, %v4286_v0, 0 }
 0x63f   : > { %v7780_v9 = vsel %vm17450_vm10, %v6579_v19, %v6578_v42  ;;  %v17452_v21 = vand.u32 1, %v17451_v54  ;;  %v5803_v25 = vrot.slane %v5802_v51, 2  ;;  %v5836_v8 = vrot.slane %v5835_v40, 4 }
 0x640   : > { %vm4034_vm15 = vcmp.eq.s32.totalorder %v3550_v32, %v17166_v45  ;;  %v5822_v24 = vrot.slane %v5821_v47, 4  ;;  %v5791_v15 = vrot.slane %v5790_v22, 1  ;;  %v5799_v49 = vadd.s32 %v5798_v31, %v5797_v58  ;;  %v8069_v31 = vpop.f32.mrf.mxu2 }
 0x641   : > { %vm15410_vm14 = vcmp.eq.s32.totalorder %v17452_v21, 1  ;;  %v5810_v33 = vrot.slane %v5809_v28, 2  ;;  %v5785_v16 = vadd.s32 %v5784_v13, %v5783_v38  ;;  %vm6326_vm13 = vcmp.gt.s32.totalorder %v5764_v44, 0  ;;  %v3543_v44 = vpop.permute.xlu1 %3542  ;;  %v3571_v21 = vpop.permute.xlu2 %3570 }
 0x642   : > { %v5817_v42 = vrot.slane %v5816_v23, 2  ;;  %v5830_v57 = vadd.s32 %v5829_v53, %v5828_v1  ;;  %v5823_v19 = vadd.s32 %v5822_v24, %v5821_v47  ;;  %v6581_v41 = vsel %vm6325_vm3, 1.0, %v17284_v29 }
 0x643   : > { %v6583_v4 = vsel %vm6327_vm8, 1.0, %v17284_v29  ;;  %v5804_v7 = vadd.s32 %v5803_v25, %v5802_v51  ;;  %v4290_v0 = vsel %vm4034_vm15, 1, %v16629_v3  ;;  %v7781_v32 = vsel %vm7600_vm6, %v15381_v2, %v7780_v9 }
 0x644   : > { %vm6328_vm4 = vcmp.gt.s32.totalorder %v5778_v55, 0  ;;  %v5837_v58 = vadd.s32 %v5836_v8, %v5835_v40  ;;  %v5824_v38 = vrot.slane %v5823_v19, 2  ;;  %v5792_v1 = vadd.s32 %v5791_v15, %v5790_v22  ;;  %v3578_v15 = vpop.permute.xlu0 %3577 }
 0x645   : > { %v6582_v13 = vsel %vm6326_vm13, 1.0, %v17284_v29  ;;  %v5811_v53 = vadd.s32 %v5810_v33, %v5809_v28  ;;  %vm6329_vm0 = vcmp.gt.s32.totalorder %v5785_v16, 0  ;;  %vm6331_vm12 = vcmp.gt.s32.totalorder %v5799_v49, 0 }
 0x646   : > { %v5818_v26 = vadd.s32 %v5817_v42, %v5816_v23  ;;  %v5831_v5 = vrot.slane %v5830_v57, 2  ;;  %v5849_v51 = vsel %vm4329_vm5, %v4290_v0, 0  ;;  %v5805_v47 = vrot.slane %v5804_v7, 1 }
 0x647   : > { %vm4035_vm3 = vcmp.eq.s32.totalorder %v3557_v56, %v17166_v45  ;;  %v7782_v2 = vsel %vm7602_vm11, %v6581_v41, %v7781_v32  ;;  %v8070_v40 = vadd.f32 %v15216_v11, %v8069_v31  ;;  %v5838_v9 = vrot.slane %v5837_v58, 2 }
 0x648   : > { %v5825_v54 = vadd.s32 %v5824_v38, %v5823_v19  ;;  %v6585_v22 = vsel %vm6329_vm0, 1.0, %v17284_v29  ;;  %v7783_v28 = vsel %vm7604_vm9, %v6582_v13, %v7782_v2  ;;  %v5812_v25 = vrot.slane %v5811_v53, 1 }
 0x649   : > { %v6584_v23 = vsel %vm6328_vm4, 1.0, %v17284_v29  ;;  %v7784_v8 = vsel %vm7606_vm7, %v6583_v4, %v7783_v28  ;;  %v8127_v24 = vmax.f32 %v8070_v40, 0.0  ;;  %v5819_v33 = vrot.slane %v5818_v26, 1 }
 0x64a   : > { %v5832_v16 = vadd.s32 %v5831_v5, %v5830_v57  ;;  %v5850_v42 = vrot.slane %v5849_v51, 4  ;;  %v7785_v41 = vsel %vm7608_vm1, %v6584_v23, %v7784_v8  ;;  %v5806_v19 = vadd.s32 %v5805_v47, %v5804_v7 }
 0x64b   : > { %v4291_v0 = vsel %vm4035_vm3, 1, %v16629_v3  ;;  %v7334_v32 = vsel %vm15410_vm14, 1.0, %v17284_v29  ;;  %vm17455_vm2 = vcmask 1047559   ;;  %8159 = vst [vmem:[%s13569_s28 + $0x98] sm:$0xff] %v8127_v24  ;;  %v5839_v4 = vadd.s32 %v5838_v9, %v5837_v58 }
 0x64c   : > { %v7786_v55 = vsel %vm17455_vm2, %v6585_v22, %v7785_v41  ;;  %v5826_v38 = vrot.slane %v5825_v54, 1  ;;  %vm17456_vm8 = vcmp.eq.s32.totalorder %v17166_v45, 0  ;;  %vm4033_vm10 = vcmp.eq.s32.totalorder %v3543_v44, %v17166_v45  ;;  %v3564_v44 = vpop.permute.xlu1 %3563 }
 0x64d   : > { %v7886_v57 = vsel %vm17456_vm8, %v7334_v32, %v7786_v55  ;;  %v17457_v7 = vrot.slane %v15281_v48, 4  ;;  %v15452_v56 = vsel %vm4329_vm5, %v15346_v60, 0  ;;  %vm6330_vm14 = vcmp.gt.s32.totalorder %v5792_v1, 0 }
 0x64e   : > { %v6587_v61 = vsel %vm6331_vm12, 1.0, %v17284_v29  ;;  %8296 = vmatmul.msk.f32.gmra.mxu3 %vm4329_vm5, %v7886_v57  ;;  %v5813_v58 = vadd.s32 %v5812_v25, %v5811_v53  ;;  %v5820_v13 = vadd.s32 %v5819_v33, %v5818_v26  ;;  %v5851_v5 = vadd.s32 %v5850_v42, %v5849_v51  ;;  %v17460_v25 = vld [vmem:[#allocation77_spill] sm:$0xff]  ;;  %v3599_v33 = vpop.permute.xlu0 %3598 }
 0x64f   : > { %v15448_v31 = vadd.s32 %v17457_v7, %v15281_v48  ;;  %vm4037_vm15 = vcmp.eq.s32.totalorder %v3571_v21, %v17166_v45  ;;  %v5833_v47 = vrot.slane %v5832_v16, 1  ;;  %vm6332_vm13 = vcmp.gt.s32.totalorder %v5806_v19, 0 }
 0x650   : > { %v5856_v48 = vsel %vm4329_vm5, %v4291_v0, 0  ;;  %v4289_v2 = vsel %vm4033_vm10, 1, %v16629_v3  ;;  %v17458_v60 = vrot.slane %v15305_v12, 4  ;;  %v6586_v49 = vsel %vm6330_vm14, 1.0, %v17284_v29 }
 0x651   : > { %v5840_v40 = vrot.slane %v5839_v4, 1  ;;  %v5827_v53 = vadd.s32 %v5826_v38, %v5825_v54  ;;  %v5647_v26 = vrot.slane %v15452_v56, 4  ;;  %vm17459_vm4 = vcmask 1041409  }
 0x652   : > { %v15463_v1 = vadd.s32 %v17458_v60, %v15305_v12  ;;  %v7787_v51 = vsel %vm17459_vm4, %v6587_v61, %v6586_v49  ;;  %v4293_v9 = vsel %vm4037_vm15, 1, %v16629_v3  ;;  %vm4036_vm0 = vcmp.eq.s32.totalorder %v3564_v44, %v17166_v45  ;;  %v3592_v12 = vpop.permute.xlu2 %3591 }
 0x653   : > { %v6588_v22 = vsel %vm6332_vm13, 1.0, %v17284_v29  ;;  %v5857_v28 = vrot.slane %v5856_v48, 4  ;;  %v5842_v21 = vsel %vm4329_vm5, %v4289_v2, 0  ;;  %vm4038_vm12 = vcmp.eq.s32.totalorder %v3578_v15, %v17166_v45 }
 0x654   : > { %v17461_v23 = vand.u32 1, %v17460_v25  ;;  %vm6333_vm2 = vcmp.gt.s32.totalorder %v5813_v58, 0  ;;  %vm6334_vm8 = vcmp.gt.s32.totalorder %v5820_v13, 0  ;;  %v5834_v8 = vadd.s32 %v5833_v47, %v5832_v16  ;;  %v3585_v25 = vpop.permute.xlu1 %3584 }
 0x655   : > { %v5852_v24 = vrot.slane %v5851_v5, 2  ;;  %v5841_v42 = vadd.s32 %v5840_v40, %v5839_v4  ;;  %vm6335_vm10 = vcmp.gt.s32.totalorder %v5827_v53, 0  ;;  %v5870_v41 = vsel %vm4329_vm5, %v4293_v9, 0 }
 0x656   : > { %vm15475_vm3 = vcmp.eq.s32.totalorder %v17461_v23, 1  ;;  %v4292_v19 = vsel %vm4036_vm0, 1, %v16629_v3  ;;  %v7788_v15 = vsel %vm7600_vm6, %v6588_v22, %v7787_v51  ;;  %v5843_v0 = vrot.slane %v5842_v21, 4 }
 0x657   : > { %v4294_v32 = vsel %vm4038_vm12, 1, %v16629_v3  ;;  %vm4040_vm14 = vcmp.eq.s32.totalorder %v3592_v12, %v17166_v45  ;;  %v6589_v55 = vsel %vm6333_vm2, 1.0, %v17284_v29  ;;  %v6590_v38 = vsel %vm6334_vm8, 1.0, %v17284_v29 }
 0x658   : > { %v5858_v16 = vadd.s32 %v5857_v28, %v5856_v48  ;;  %vm4041_vm15 = vcmp.eq.s32.totalorder %v3599_v33, %v17166_v45  ;;  %v5853_v4 = vadd.s32 %v5852_v24, %v5851_v5  ;;  %v6591_v57 = vsel %vm6335_vm10, 1.0, %v17284_v29 }
 0x659   : > { %v5871_v7 = vrot.slane %v5870_v41, 4  ;;  %v5863_v61 = vsel %vm4329_vm5, %v4292_v19, 0  ;;  %vm6336_vm13 = vcmp.gt.s32.totalorder %v5834_v8, 0  ;;  %v5877_v58 = vsel %vm4329_vm5, %v4294_v32, 0 }
 0x65a   : > { %v4296_v13 = vsel %vm4040_vm14, 1, %v16629_v3  ;;  %v7789_v44 = vsel %vm7602_vm11, %v6589_v55, %v7788_v15  ;;  %v5844_v47 = vadd.s32 %v5843_v0, %v5842_v21  ;;  %v4297_v2 = vsel %vm4041_vm15, 1, %v16629_v3 }
 0x65b   : > { %vm6337_vm4 = vcmp.gt.s32.totalorder %v5841_v42, 0  ;;  %v7790_v48 = vsel %vm7604_vm9, %v6590_v38, %v7789_v44  ;;  %vm4007_vm0 = vcmp.eq.s32.totalorder %v15118_v37, %v17166_v45  ;;  %v5859_v5 = vrot.slane %v5858_v16, 2  ;;  %v8072_v37 = vpop.f32.mrf.mxu2  ;;  %v3613_v42 = vpop.permute.xlu2 %3612 }
 0x65c   : > { %v5864_v60 = vrot.slane %v5863_v61, 4  ;;  %v7791_v49 = vsel %vm7606_vm7, %v6591_v57, %v7790_v48  ;;  %v5872_v53 = vadd.s32 %v5871_v7, %v5870_v41  ;;  %v5891_v51 = vsel %vm4329_vm5, %v4296_v13, 0 }
 0x65d   : > { %v6592_v9 = vsel %vm6336_vm13, 1.0, %v17284_v29  ;;  %v5878_v22 = vrot.slane %v5877_v58, 4  ;;  %v5898_v28 = vsel %vm4329_vm5, %v4297_v2, 0  ;;  %v6593_v21 = vsel %vm6337_vm4, 1.0, %v17284_v29 }
 0x65e   : > { %v7792_v12 = vsel %vm7608_vm1, %v6592_v9, %v7791_v49  ;;  %v4263_v23 = vsel %vm4007_vm0, 1, %v16629_v3  ;;  %v5854_v8 = vrot.slane %v5853_v4, 1  ;;  %v5845_v24 = vrot.slane %v5844_v47, 2 }
 0x65f   : > { %vm17464_vm12 = vcmask 1047559   ;;  %v5860_v41 = vadd.s32 %v5859_v5, %v5858_v16  ;;  %v5892_v19 = vrot.slane %v5891_v51, 4  ;;  %v5865_v15 = vadd.s32 %v5864_v60, %v5863_v61  ;;  %v3620_v61 = vpop.permute.xlu0 %3619 }
 0x660   : > { %v7793_v33 = vsel %vm17464_vm12, %v6593_v21, %v7792_v12  ;;  %v7335_v0 = vsel %vm15475_vm3, 1.0, %v17284_v29  ;;  %v5899_v32 = vrot.slane %v5898_v28, 4  ;;  %vm17465_vm2 = vcmp.eq.s32.totalorder %v17166_v45, 0 }
 0x661   : > { %v7887_v55 = vsel %vm17465_vm2, %v7335_v0, %v7793_v33  ;;  %vm4039_vm8 = vcmp.eq.s32.totalorder %v3585_v25, %v17166_v45  ;;  %v8073_v38 = vadd.f32 %v15216_v11, %v8072_v37  ;;  %v5873_v7 = vrot.slane %v5872_v53, 2  ;;  %v17467_v37 = vld [vmem:[#allocation48_spill] sm:$0xff]  ;;  %v17469_v33 = vld [vmem:[#allocation38_spill] sm:$0xff] }
 0x662   : > { %v5879_v13 = vadd.s32 %v5878_v22, %v5877_v58  ;;  %8297 = vmatmul.msk.f32.gmra.mxu3 %vm4329_vm5, %v7887_v55  ;;  %v4295_v16 = vsel %vm4039_vm8, 1, %v16629_v3  ;;  %v5846_v54 = vadd.s32 %v5845_v24, %v5844_v47  ;;  %vm4043_vm3 = vcmp.eq.s32.totalorder %v3613_v42, %v17166_v45  ;;  %v17466_v22 = vld [vmem:[#allocation60_spill] sm:$0xff]  ;;  %v17468_v24 = vld [vmem:[#allocation61_spill] sm:$0xff]  ;;  %v3606_v55 = vpop.permute.xlu1 %3605 }
 0x663   : > { %v5884_v44 = vsel %vm4329_vm5, %v4295_v16, 0  ;;  %v8128_v2 = vmax.f32 %v8073_v38, 0.0  ;;  %v5855_v48 = vadd.s32 %v5854_v8, %v5853_v4  ;;  %v5861_v5 = vrot.slane %v5860_v41, 1 }
 0x664   : > { %v5893_v60 = vadd.s32 %v5892_v19, %v5891_v51  ;;  %v5885_v11 = vrot.slane %v5884_v44, 4  ;;  %v15520_v49 = vadd.s32 %v5647_v26, %v15452_v56  ;;  %v5866_v58 = vrot.slane %v5865_v15, 2 }
 0x665   : > { %v5900_v9 = vadd.s32 %v5899_v32, %v5898_v28  ;;  %8160 = vst [vmem:[%s13569_s28 + $0xa0] sm:$0xff] %v8128_v2  ;;  %v6841_v21 = vand.u32 65535, %v17466_v22  ;;  %v5874_v47 = vadd.s32 %v5873_v7, %v5872_v53  ;;  %v4299_v12 = vsel %vm4043_vm3, 1, %v16629_v3  ;;  %v3634_v32 = vpop.permute.xlu2 %3633 }
 0x666   : > { %v5886_v25 = vadd.s32 %v5885_v11, %v5884_v44  ;;  %vm6847_vm10 = vcmp.eq.f32.partialorder %v17468_v24, %v17467_v37  ;;  %v5847_v4 = vrot.slane %v5846_v54, 1  ;;  %v5880_v51 = vrot.slane %v5879_v13, 2  ;;  %v17470_v44 = vld [vmem:[#allocation47_spill] sm:$0xff] }
 0x667   : > { %vm4044_vm14 = vcmp.eq.s32.totalorder %v3620_v61, %v17166_v45  ;;  %v6843_v8 = vcvt.s32.f32 %v6841_v21  ;;  %vm6339_vm15 = vcmp.gt.s32.totalorder %v5855_v48, 0  ;;  %v5862_v56 = vadd.s32 %v5861_v5, %v5860_v41  ;;  %v17471_v61 = vld [vmem:[#allocation62_spill] sm:$0xff]  ;;  %v15539_v21 = vpop.permute.xlu0 %3640 }
 0x668   : > { %v5894_v26 = vrot.slane %v5893_v60, 2  ;;  %v6961_v28 = vand.u32 65535, %v17469_v33  ;;  %v5867_v42 = vadd.s32 %v5866_v58, %v5865_v15  ;;  %v5901_v19 = vrot.slane %v5900_v9, 2 }
 0x669   : > { %v5912_v53 = vsel %vm4329_vm5, %v4299_v12, 0  ;;  %v6848_v0 = vsel %vm6847_vm10, %v6843_v8, -inf  ;;  %v5887_v38 = vrot.slane %v5886_v25, 2  ;;  %v4300_v7 = vsel %vm4044_vm14, 1, %v16629_v3 }
 0x66a   : > { %6849 = vmax.xlane.f32.xlu2 %v6848_v0  ;;  %v6963_v16 = vcvt.s32.f32 %v6961_v28  ;;  %vm6967_vm13 = vcmp.eq.f32.partialorder %v17471_v61, %v17470_v44  ;;  %v15534_v41 = vsel %vm4329_vm5, %v4263_v23, 0  ;;  %v5875_v2 = vrot.slane %v5874_v47, 1 }
 0x66b   : > { %v5848_v5 = vadd.s32 %v5847_v4, %v5846_v54  ;;  %v5881_v15 = vadd.s32 %v5880_v51, %v5879_v13  ;;  %v6595_v11 = vsel %vm6339_vm15, 1.0, %v17284_v29  ;;  %v5913_v58 = vrot.slane %v5912_v53, 4  ;;  %v17472_v13 = vld [vmem:[#allocation14_spill] sm:$0xff] }
 0x66c   : > { %vm4046_vm4 = vcmp.eq.s32.totalorder %v3634_v32, %v17166_v45  ;;  %v6968_v22 = vsel %vm6967_vm13, %v6963_v16, -inf  ;;  %v5868_v12 = vrot.slane %v5867_v42, 1  ;;  %v5902_v37 = vadd.s32 %v5901_v19, %v5900_v9 }
 0x66d   : > { %v5919_v24 = vsel %vm4329_vm5, %v4300_v7, 0  ;;  %vm4042_vm0 = vcmp.eq.s32.totalorder %v3606_v55, %v17166_v45  ;;  %6969 = vmax.xlane.f32.xlu0 %v6968_v22  ;;  %vm6340_vm12 = vcmp.gt.s32.totalorder %v5862_v56, 0  ;;  %v5895_v23 = vadd.s32 %v5894_v26, %v5893_v60  ;;  %v17473_v7 = vld [vmem:[#allocation50_spill] sm:$0xff]  ;;  %v17474_v56 = vld [vmem:[#allocation20_spill] sm:$0xff] }
 0x66e   : > { %v5888_v54 = vadd.s32 %v5887_v38, %v5886_v25  ;;  %v7216_v4 = vand.u32 65535, %v17472_v13  ;;  %v5876_v48 = vadd.s32 %v5875_v2, %v5874_v47  ;;  %vm6338_vm2 = vcmp.gt.s32.totalorder %v5848_v5, 0  ;;  %v17475_v26 = vld [vmem:[#allocation64_spill] sm:$0xff]  ;;  %v3627_v2 = vpop.permute.xlu1 %3626  ;;  %v17476_v13 = vld [vmem:[#allocation42_spill] sm:$0xff] }
 0x66f   : > { %v5882_v51 = vrot.slane %v5881_v15, 1  ;;  %v4302_v8 = vsel %vm4046_vm4, 1, %v16629_v3  ;;  %v5914_v33 = vadd.s32 %v5913_v58, %v5912_v53  ;;  %v5920_v28 = vrot.slane %v5919_v24, 4 }
 0x670   : > { %v4298_v0 = vsel %vm4042_vm0, 1, %v16629_v3  ;;  %v7218_v9 = vcvt.s32.f32 %v7216_v4  ;;  %v6596_v19 = vsel %vm6340_vm12, 1.0, %v17284_v29  ;;  %v5869_v32 = vadd.s32 %v5868_v12, %v5867_v42  ;;  %v17477_v4 = vld [vmem:[#allocation66_spill] sm:$0xff] }
 0x671   : > { %v5903_v55 = vrot.slane %v5902_v37, 1  ;;  %vm7222_vm8 = vcmp.eq.f32.partialorder %v17474_v56, %v17473_v7  ;;  %v5889_v60 = vrot.slane %v5888_v54, 1  ;;  %v5933_v25 = vsel %vm4329_vm5, %v4302_v8, 0  ;;  %v17478_v8 = vld [vmem:[#allocation21_spill] sm:$0xff]  ;;  %v3655_v56 = vpop.permute.xlu2 %3654 }
 0x672   : > { %v7223_v47 = vsel %vm7222_vm8, %v7218_v9, -inf  ;;  %v7096_v38 = vand.u32 65535, %v17475_v26  ;;  %v6594_v16 = vsel %vm6338_vm2, 1.0, %v17284_v29  ;;  %v5883_v53 = vadd.s32 %v5882_v51, %v5881_v15 }
 0x673   : > { %v5896_v44 = vrot.slane %v5895_v23, 1  ;;  %v5905_v61 = vsel %vm4329_vm5, %v4298_v0, 0  ;;  %7224 = vmax.xlane.f32.xlu2 %v7223_v47  ;;  %vm6342_vm3 = vcmp.gt.s32.totalorder %v5876_v48, 0  ;;  %v5915_v42 = vrot.slane %v5914_v33, 2 }
 0x674   : > { %v5921_v5 = vadd.s32 %v5920_v28, %v5919_v24  ;;  %v7098_v58 = vcvt.s32.f32 %v7096_v38  ;;  %vm6341_vm10 = vcmp.gt.s32.totalorder %v5869_v32, 0  ;;  %v5904_v22 = vadd.s32 %v5903_v55, %v5902_v37  ;;  %v3662_v24 = vpop.permute.xlu0 %3661  ;;  %v17483_v37 = vld [vmem:[#allocation32_spill] sm:$0xff] }
 0x675   : > { %v5934_v12 = vrot.slane %v5933_v25, 4  ;;  %vm7102_vm14 = vcmp.eq.f32.partialorder %v17477_v4, %v17476_v13  ;;  %v17479_v9 = vand.u32 1, %v17478_v8  ;;  %vm17482_vm13 = vcmask 1041409  }
 0x676   : > { %v7794_v15 = vsel %vm17482_vm13, %v6595_v11, %v6594_v16  ;;  %v5890_v51 = vadd.s32 %v5889_v60, %v5888_v54  ;;  %v5906_v0 = vrot.slane %v5905_v61, 4  ;;  %v7103_v47 = vsel %vm7102_vm14, %v7098_v58, -inf  ;;  %v17484_v60 = vld [vmem:[#allocation63_spill] sm:$0xff]  ;;  %v17485_v16 = vld [vmem:[#allocation34_spill] sm:$0xff] }
 0x677   : > { %vm15557_vm15 = vcmp.eq.s32.totalorder %v17479_v9, 1  ;;  %vm6343_vm4 = vcmp.gt.s32.totalorder %v5883_v53, 0  ;;  %v5897_v28 = vadd.s32 %v5896_v44, %v5895_v23  ;;  %vm4047_vm0 = vcmp.eq.s32.totalorder %v15539_v21, %v17166_v45  ;;  %7104 = vmax.xlane.f32.xlu1 %v7103_v47  ;;  %v3648_v53 = vpop.permute.xlu1 %3647  ;;  %v17487_v47 = vld [vmem:[#allocation17_spill] sm:$0xff] }
 0x678   : > { %v6856_v55 = vand.u32 65535, %v17483_v37  ;;  %v6597_v26 = vsel %vm6341_vm10, 1.0, %v17284_v29  ;;  %v5916_v38 = vadd.s32 %v5915_v42, %v5914_v33  ;;  %v5922_v13 = vrot.slane %v5921_v5, 2  ;;  %v17488_v37 = vld [vmem:[#allocation13_spill] sm:$0xff] }
 0x679   : > { %vm4045_vm12 = vcmp.eq.s32.totalorder %v3627_v2, %v17166_v45  ;;  %v7795_v11 = vsel %vm7600_vm6, %v6596_v19, %v7794_v15  ;;  %vm6346_vm2 = vcmp.gt.s32.totalorder %v5904_v22, 0  ;;  %v5935_v54 = vadd.s32 %v5934_v12, %v5933_v25  ;;  %v17486_v15 = vld [vmem:[#allocation16_spill] sm:$0xff] }
 0x67a   : > { %vm6862_vm8 = vcmp.eq.f32.partialorder %v17485_v16, %v17484_v60  ;;  %vm6344_vm14 = vcmp.gt.s32.totalorder %v5890_v51, 0  ;;  %v5907_v23 = vadd.s32 %v5906_v0, %v5905_v61  ;;  %v4303_v21 = vsel %vm4047_vm0, 1, %v16629_v3 }
 0x67b   : > { %v6858_v44 = vcvt.s32.f32 %v6856_v55  ;;  %v6598_v32 = vsel %vm6342_vm3, 1.0, %v17284_v29  ;;  %v6599_v33 = vsel %vm6343_vm4, 1.0, %v17284_v29  ;;  %v7796_v2 = vsel %vm7602_vm11, %v6597_v26, %v7795_v11  ;;  %v3676_v26 = vpop.permute.xlu2 %3675 }
 0x67c   : > { %v4301_v19 = vsel %vm4045_vm12, 1, %v16629_v3  ;;  %v15579_v25 = vsel %vm6346_vm2, 1.0, %v17284_v29  ;;  %v5917_v42 = vrot.slane %v5916_v38, 1  ;;  %v15581_v58 = vadd.s32 %v5922_v13, %v5921_v5  ;;  %v17489_v13 = vld [vmem:[#allocation30_spill] sm:$0xff]  ;;  %v3683_v60 = vpop.permute.xlu0 %3682 }
 0x67d   : > { %v6863_v61 = vsel %vm6862_vm8, %v6858_v44, -inf  ;;  %v5936_v22 = vrot.slane %v5935_v54, 2  ;;  %v5940_v12 = vsel %vm4329_vm5, %v4303_v21, 0  ;;  %vm6345_vm10 = vcmp.gt.s32.totalorder %v5897_v28, 0 }
 0x67e   : > { %6864 = vmax.xlane.f32.xlu0 %v6863_v61  ;;  %v6600_v48 = vsel %vm6344_vm14, 1.0, %v17284_v29  ;;  %v5908_v4 = vrot.slane %v5907_v23, 2  ;;  %v5926_v8 = vsel %vm4329_vm5, %v4301_v19, 0  ;;  %v7797_v9 = vsel %vm7604_vm9, %v6598_v32, %v7796_v2 }
 0x67f   : > { %v6976_v0 = vand.u32 65535, %v17486_v15  ;;  %vm4049_vm3 = vcmp.eq.s32.totalorder %v3655_v56, %v17166_v45  ;;  %vm4050_vm13 = vcmp.eq.s32.totalorder %v3662_v24, %v17166_v45  ;;  %v7798_v5 = vsel %vm7606_vm7, %v6599_v33, %v7797_v9  ;;  %v8075_v33 = vpop.f32.mrf.mxu2 }
 0x680   : > { %vm6982_vm4 = vcmp.eq.f32.partialorder %v17488_v37, %v17487_v47  ;;  %v6601_v51 = vsel %vm6345_vm10, 1.0, %v17284_v29  ;;  %v7799_v28 = vsel %vm7608_vm1, %v6600_v48, %v7798_v5  ;;  %v7231_v11 = vand.u32 65535, %v17489_v13 }
 0x681   : > { %v6978_v55 = vcvt.s32.f32 %v6976_v0  ;;  %v5941_v16 = vrot.slane %v5940_v12, 4  ;;  %v5927_v21 = vrot.slane %v5926_v8, 4  ;;  %v7336_v44 = vsel %vm15557_vm15, 1.0, %v17284_v29  ;;  %v17493_v0 = vld [vmem:[#allocation23_spill] sm:$0xff] }
 0x682   : > { %vm17490_vm0 = vcmask 1047559   ;;  %v15601_v2 = vadd.s32 %v5917_v42, %v5916_v38  ;;  %v5924_v19 = vrot.slane %v15581_v58, 1  ;;  %vm17491_vm12 = vcmp.eq.s32.totalorder %v17166_v45, 0  ;;  %v17492_v42 = vld [vmem:[#allocation19_spill] sm:$0xff] }
 0x683   : > { %v7800_v32 = vsel %vm17490_vm0, %v6601_v51, %v7799_v28  ;;  %v6983_v48 = vsel %vm6982_vm4, %v6978_v55, -inf  ;;  %v5909_v9 = vadd.s32 %v5908_v4, %v5907_v23  ;;  %v4305_v15 = vsel %vm4049_vm3, 1, %v16629_v3  ;;  %v15619_v23 = vld [vmem:[%s16215_s3] ss:$0 sm:$0xff]  ;;  %v17494_v4 = vld [vmem:[#allocation6_spill] sm:$0xff] }
 0x684   : > { %v7888_v61 = vsel %vm17491_vm12, %v7336_v44, %v7800_v32  ;;  %v4306_v7 = vsel %vm4050_vm13, 1, %v16629_v3  ;;  %6984 = vmax.xlane.f32.xlu2 %v6983_v48  ;;  %v7233_v38 = vcvt.s32.f32 %v7231_v11  ;;  %vm7237_vm15 = vcmp.eq.f32.partialorder %v17493_v0, %v17492_v42 }
 0x685   : > { %8298 = vmatmul.msk.f32.gmra.mxu3 %vm4329_vm5, %v7888_v61  ;;  %vm4048_vm2 = vcmp.eq.s32.totalorder %v3648_v53, %v17166_v45  ;;  %v8076_v56 = vadd.f32 %v15619_v23, %v8075_v33  ;;  %v7111_v5 = vand.u32 65535, %v17494_v4  ;;  %v15623_v24 = vadd.s32 %v5936_v22, %v5935_v54  ;;  %v17495_v33 = vld [vmem:[#allocation51_spill] sm:$0xff]  ;;  %v3669_v54 = vpop.permute.xlu1 %3668 }
 0x686   : > { %v5942_v47 = vadd.s32 %v5941_v16, %v5940_v12  ;;  %v5928_v37 = vadd.s32 %v5927_v21, %v5926_v8  ;;  %v7238_v51 = vsel %vm7237_vm15, %v7233_v38, -inf  ;;  %v5961_v28 = vsel %vm4329_vm5, %v4306_v7, 0  ;;  %v17496_v61 = vld [vmem:[#allocation11_spill] sm:$0xff] }
 0x687   : > { %7239 = vmax.xlane.f32.xlu1 %v7238_v51  ;;  %v4304_v53 = vsel %vm4048_vm2, 1, %v16629_v3  ;;  %v8129_v55 = vmax.f32 %v8076_v56, 0.0  ;;  %v7113_v13 = vcvt.s32.f32 %v7111_v5  ;;  %v5910_v11 = vrot.slane %v5909_v9, 1  ;;  %v17497_v8 = vld [vmem:[#allocation15_spill] sm:$0xff]  ;;  %v3697_v5 = vpop.permute.xlu2 %3696  ;;  %v3704_v51 = vpop.permute.xlu0 %3703 }
 0x688   : > { %v5954_v44 = vsel %vm4329_vm5, %v4305_v15, 0  ;;  %v5947_v32 = vsel %vm4329_vm5, %v4304_v53, 0  ;;  %vm7117_vm8 = vcmp.eq.f32.partialorder %v17496_v61, %v17495_v33  ;;  %vm4052_vm14 = vcmp.eq.s32.totalorder %v3676_v26, %v17166_v45  ;;  %v17498_v7 = vld [vmem:[#allocation55_spill] sm:$0xff]  ;;  %v17499_v15 = vld [vmem:[#allocation24_spill] sm:$0xff] }
 0x689   : > { %v5948_v22 = vrot.slane %v5947_v32, 4  ;;  %8161 = vst [vmem:[%s13569_s28 + $0xa8] sm:$0xff] %v8129_v55  ;;  %v7118_v12 = vsel %vm7117_vm8, %v7113_v13, -inf  ;;  %v6871_v16 = vand.u32 65535, %v17497_v8  ;;  %v5929_v21 = vrot.slane %v5928_v37, 2  ;;  %v17500_v26 = vld [vmem:[#allocation68_spill] sm:$0xff] }
 0x68a   : > { %v5962_v48 = vrot.slane %v5961_v28, 4  ;;  %7119 = vmax.xlane.f32.xlu0 %v7118_v12  ;;  %vm4053_vm10 = vcmp.eq.s32.totalorder %v3683_v60, %v17166_v45  ;;  %vm6877_vm3 = vcmp.eq.f32.partialorder %v17499_v15, %v17498_v7  ;;  %v15638_v38 = vadd.s32 %v5924_v19, %v15581_v58 }
 0x68b   : > { %v5943_v0 = vrot.slane %v5942_v47, 2  ;;  %v5949_v56 = vadd.s32 %v5948_v22, %v5947_v32  ;;  %v6873_v4 = vcvt.s32.f32 %v6871_v16  ;;  %v5938_v53 = vrot.slane %v15623_v24, 1 }
 0x68c   : > { %v5911_v55 = vadd.s32 %v5910_v11, %v5909_v9  ;;  %v5955_v13 = vrot.slane %v5954_v44, 4  ;;  %v4308_v33 = vsel %vm4052_vm14, 1, %v16629_v3  ;;  %v4309_v61 = vsel %vm4053_vm10, 1, %v16629_v3 }
 0x68d   : > { %v5950_v60 = vrot.slane %v5949_v56, 2  ;;  %v6878_v12 = vsel %vm6877_vm3, %v6873_v4, -inf  ;;  %vm4051_vm13 = vcmp.eq.s32.totalorder %v3669_v54, %v17166_v45  ;;  %v5930_v58 = vadd.s32 %v5929_v21, %v5928_v37  ;;  %v17501_v37 = vld [vmem:[#allocation65_spill] sm:$0xff] }
 0x68e   : > { %v5963_v19 = vadd.s32 %v5962_v48, %v5961_v28  ;;  %6879 = vmax.xlane.f32.xlu2 %v6878_v12  ;;  %vm4055_vm4 = vcmp.eq.s32.totalorder %v3697_v5, %v17166_v45  ;;  %v4307_v32 = vsel %vm4051_vm13, 1, %v16629_v3  ;;  %v5944_v22 = vadd.s32 %v5943_v0, %v5942_v47  ;;  %v17502_v28 = vld [vmem:[#allocation69_spill] sm:$0xff] }
 0x68f   : > { %v5975_v9 = vsel %vm4329_vm5, %v4308_v33, 0  ;;  %v5968_v11 = vsel %vm4329_vm5, %v4307_v32, 0  ;;  %v6991_v8 = vand.u32 65535, %v17500_v26  ;;  %vm6348_vm0 = vcmp.gt.s32.totalorder %v15601_v2, 0  ;;  %v3690_v33 = vpop.permute.xlu1 %3689 }
 0x690   : > { %v5956_v16 = vadd.s32 %v5955_v13, %v5954_v44  ;;  %v5982_v15 = vsel %vm4329_vm5, %v4309_v61, 0  ;;  %v5969_v54 = vrot.slane %v5968_v11, 4  ;;  %vm6997_vm12 = vcmp.eq.f32.partialorder %v17502_v28, %v17501_v37 }
 0x691   : > { %vm6347_vm15 = vcmp.gt.s32.totalorder %v5911_v55, 0  ;;  %v5951_v21 = vadd.s32 %v5950_v60, %v5949_v56  ;;  %v4311_v48 = vsel %vm4055_vm4, 1, %v16629_v3  ;;  %v6993_v47 = vcvt.s32.f32 %v6991_v8 }
 0x692   : > { %v5931_v0 = vrot.slane %v5930_v58, 1  ;;  %v5964_v4 = vrot.slane %v5963_v19, 2  ;;  %v5976_v5 = vrot.slane %v5975_v9, 4  ;;  %vm4056_vm2 = vcmp.eq.s32.totalorder %v3704_v51, %v17166_v45  ;;  %v15663_v51 = vpop.permute.xlu0 %3724 }
 0x693   : > { %v5983_v12 = vrot.slane %v5982_v15, 4  ;;  %v5970_v32 = vadd.s32 %v5969_v54, %v5968_v11  ;;  %v6998_v44 = vsel %vm6997_vm12, %v6993_v47, -inf  ;;  %v4312_v13 = vsel %vm4056_vm2, 1, %v16629_v3 }
 0x694   : > { %v5939_v61 = vadd.s32 %v5938_v53, %v15623_v24  ;;  %v6603_v26 = vsel %vm6347_vm15, 1.0, %v17284_v29  ;;  %v5945_v55 = vrot.slane %v5944_v22, 1  ;;  %v5996_v56 = vsel %vm4329_vm5, %v4311_v48, 0  ;;  %6999 = vmax.xlane.f32.xlu0 %v6998_v44  ;;  %v17503_v48 = vld [vmem:[#allocation22_spill] sm:$0xff] }
 0x695   : > { %v5957_v60 = vrot.slane %v5956_v16, 2  ;;  %v5952_v8 = vrot.slane %v5951_v21, 1  ;;  %v6003_v28 = vsel %vm4329_vm5, %v4312_v13, 0  ;;  %vm4054_vm8 = vcmp.eq.s32.totalorder %v3690_v33, %v17166_v45 }
 0x696   : > { %v5932_v11 = vadd.s32 %v5931_v0, %v5930_v58  ;;  %v5965_v54 = vadd.s32 %v5964_v4, %v5963_v19  ;;  %v5977_v47 = vadd.s32 %v5976_v5, %v5975_v9  ;;  %v4310_v57 = vsel %vm4054_vm8, 1, %v16629_v3  ;;  %v15676_v4 = vpop.permute.xlu2 %3717 }
 0x697   : > { %v5984_v24 = vadd.s32 %v5983_v12, %v5982_v15  ;;  %v5997_v53 = vrot.slane %v5996_v56, 4  ;;  %v5971_v40 = vrot.slane %v5970_v32, 2  ;;  %v5989_v37 = vsel %vm4329_vm5, %v4310_v57, 0 }
 0x698   : > { %v17504_v44 = vand.u32 1, %v17503_v48  ;;  %vm6349_vm10 = vcmp.gt.s32.totalorder %v15638_v38, 0  ;;  %vm6351_vm3 = vcmp.gt.s32.totalorder %v5939_v61, 0  ;;  %v6004_v33 = vrot.slane %v6003_v28, 4 }
 0x699   : > { %v5990_v58 = vrot.slane %v5989_v37, 4  ;;  %vm17507_vm13 = vcmask 1041409   ;;  %v5946_v9 = vadd.s32 %v5945_v55, %v5944_v22  ;;  %v5958_v15 = vadd.s32 %v5957_v60, %v5956_v16 }
 0x69a   : > { %vm15669_vm14 = vcmp.eq.s32.totalorder %v17504_v44, 1  ;;  %v7801_v19 = vsel %vm17507_vm13, %v6603_v26, %v15579_v25  ;;  %v5953_v0 = vadd.s32 %v5952_v8, %v5951_v21  ;;  %vm6350_vm4 = vcmp.gt.s32.totalorder %v5932_v11, 0  ;;  %v15684_v21 = vpop.permute.xlu1 %3710  ;;  %v15693_v11 = vpop.permute.xlu0 %3738 }
 0x69b   : > { %v5966_v57 = vrot.slane %v5965_v54, 1  ;;  %v5978_v5 = vrot.slane %v5977_v47, 2  ;;  %v5991_v12 = vadd.s32 %v5990_v58, %v5989_v37  ;;  %v6604_v13 = vsel %vm6348_vm0, 1.0, %v17284_v29 }
 0x69c   : > { %v5985_v48 = vrot.slane %v5984_v24, 2  ;;  %v5998_v44 = vadd.s32 %v5997_v53, %v5996_v56  ;;  %v5972_v42 = vadd.s32 %v5971_v40, %v5970_v32  ;;  %vm4006_vm12 = vcmp.eq.s32.totalorder %v15144_v35, %v17166_v45 }
 0x69d   : > { %v7802_v25 = vsel %vm7600_vm6, %v6604_v13, %v7801_v19  ;;  %v6005_v22 = vadd.s32 %v6004_v33, %v6003_v28  ;;  %v5992_v16 = vrot.slane %v5991_v12, 2  ;;  %v6605_v37 = vsel %vm6349_vm10, 1.0, %v17284_v29 }
 0x69e   : > { %v6607_v2 = vsel %vm6351_vm3, 1.0, %v17284_v29  ;;  %v6606_v26 = vsel %vm6350_vm4, 1.0, %v17284_v29  ;;  %vm6353_vm0 = vcmp.gt.s32.totalorder %v5953_v0, 0  ;;  %vm6352_vm15 = vcmp.gt.s32.totalorder %v5946_v9, 0  ;;  %v15710_v13 = vpop.permute.xlu2 %3731 }
 0x69f   : > { %v5959_v40 = vrot.slane %v5958_v15, 1  ;;  %v5967_v32 = vadd.s32 %v5966_v57, %v5965_v54  ;;  %v5979_v55 = vadd.s32 %v5978_v5, %v5977_v47  ;;  %v5986_v56 = vadd.s32 %v5985_v48, %v5984_v24 }
 0x6a0   : > { %v5999_v60 = vrot.slane %v5998_v44, 2  ;;  %v5973_v8 = vrot.slane %v5972_v42, 1  ;;  %v7803_v28 = vsel %vm7602_vm11, %v6605_v37, %v7802_v25  ;;  %v6006_v53 = vrot.slane %v6005_v22, 2 }
 0x6a1   : > { %v5993_v38 = vadd.s32 %v5992_v16, %v5991_v12  ;;  %v6609_v33 = vsel %vm6353_vm0, 1.0, %v17284_v29  ;;  %v7804_v61 = vsel %vm7604_vm9, %v6606_v26, %v7803_v28  ;;  %vm4008_vm2 = vcmp.eq.s32.totalorder %v15123_v43, %v17166_v45 }
 0x6a2   : > { %v4262_v54 = vsel %vm4006_vm12, 1, %v16629_v3  ;;  %v6608_v47 = vsel %vm6352_vm15, 1.0, %v17284_v29  ;;  %v7805_v24 = vsel %vm7606_vm7, %v6607_v2, %v7804_v61  ;;  %v5960_v58 = vadd.s32 %v5959_v40, %v5958_v15  ;;  %v17513_v61 = vld [vmem:[#allocation52_spill] sm:$0xff] }
 0x6a3   : > { %vm6355_vm8 = vcmp.gt.s32.totalorder %v5967_v32, 0  ;;  %v5980_v19 = vrot.slane %v5979_v55, 1  ;;  %v7806_v9 = vsel %vm7608_vm1, %v6608_v47, %v7805_v24  ;;  %v6000_v0 = vadd.s32 %v5999_v60, %v5998_v44 }
 0x6a4   : > { %v5974_v57 = vadd.s32 %v5973_v8, %v5972_v42  ;;  %v7337_v5 = vsel %vm15669_vm14, 1.0, %v17284_v29  ;;  %vm17508_vm10 = vcmask 1047559   ;;  %v5987_v35 = vrot.slane %v5986_v56, 1 }
 0x6a5   : > { %v7807_v12 = vsel %vm17508_vm10, %v6609_v33, %v7806_v9  ;;  %v6007_v48 = vadd.s32 %v6006_v53, %v6005_v22  ;;  %v5994_v25 = vrot.slane %v5993_v38, 1  ;;  %vm17509_vm3 = vcmp.eq.s32.totalorder %v17166_v45, 0 }
 0x6a6   : > { %v7889_v15 = vsel %vm17509_vm3, %v7337_v5, %v7807_v12  ;;  %v17510_v16 = vrot.slane %v15448_v31, 2  ;;  %v17511_v42 = vrot.slane %v15463_v1, 2  ;;  %v5649_v7 = vrot.slane %v15520_v49, 2 }
 0x6a7   : > { %v5661_v2 = vrot.slane %v15534_v41, 4  ;;  %8299 = vmatmul.msk.f32.gmra.mxu3 %vm4329_vm5, %v7889_v15  ;;  %v17512_v22 = vrot.slane %v15267_v62, 1  ;;  %v5653_v40 = vsel %vm4329_vm5, %v4262_v54, 0  ;;  %vm6354_vm14 = vcmp.gt.s32.totalorder %v5960_v58, 0 }
 0x6a8   : > { %v5643_v37 = vadd.s32 %v17510_v16, %v15448_v31  ;;  %v15720_v44 = vadd.s32 %v17511_v42, %v15463_v1  ;;  %v4264_v31 = vsel %vm4008_vm2, 1, %v16629_v3  ;;  %v15735_v1 = vpop.permute.xlu1 %3745  ;;  %v6611_v60 = vsel %vm6355_vm8, 1.0, %v17284_v29 }
 0x6a9   : > { %v15728_v26 = vadd.s32 %v17512_v22, %v15267_v62  ;;  %v5981_v8 = vadd.s32 %v5980_v19, %v5979_v55  ;;  %v6001_v28 = vrot.slane %v6000_v0, 1  ;;  %vm6356_vm13 = vcmp.gt.s32.totalorder %v5974_v57, 0 }
 0x6aa   : > { %v5988_v53 = vadd.s32 %v5987_v35, %v5986_v56  ;;  %v6008_v33 = vrot.slane %v6007_v48, 1  ;;  %vm4058_vm4 = vcmp.eq.s32.totalorder %v15676_v4, %v17166_v45  ;;  %v5995_v62 = vadd.s32 %v5994_v25, %v5993_v38  ;;  %v15752_v56 = vpop.permute.xlu0 %3752  ;;  %v3774_v25 = vpop.permute.xlu2 %3773 }
 0x6ab   : > { %v17514_v43 = vand.u32 1, %v17513_v61  ;;  %v5644_v54 = vrot.slane %v5643_v37, 1  ;;  %v5616_v24 = vrot.slane %v15720_v44, 1  ;;  %v5650_v32 = vadd.s32 %v5649_v7, %v15520_v49 }
 0x6ac   : > { %v15750_v55 = vadd.s32 %v5661_v2, %v15534_v41  ;;  %v5667_v19 = vsel %vm4329_vm5, %v4264_v31, 0  ;;  %v5654_v4 = vrot.slane %v5653_v40, 4  ;;  %v6610_v38 = vsel %vm6354_vm14, 1.0, %v17284_v29 }
 0x6ad   : > { %vm15743_vm12 = vcmp.eq.s32.totalorder %v17514_v43, 1  ;;  %v6612_v9 = vsel %vm6356_vm13, 1.0, %v17284_v29  ;;  %vm6302_vm0 = vcmp.gt.s32.totalorder %v15728_v26, 0  ;;  %vm17517_vm15 = vcmask 1041409  }
 0x6ae   : > { %v7808_v57 = vsel %vm17517_vm15, %v6611_v60, %v6610_v38  ;;  %v6002_v5 = vadd.s32 %v6001_v28, %v6000_v0  ;;  %v4314_v49 = vsel %vm4058_vm4, 1, %v16629_v3  ;;  %vm4057_vm2 = vcmp.eq.s32.totalorder %v15684_v21, %v17166_v45 }
 0x6af   : > { %vm6357_vm8 = vcmp.gt.s32.totalorder %v5981_v8, 0  ;;  %vm6358_vm10 = vcmp.gt.s32.totalorder %v5988_v53, 0  ;;  %v6009_v41 = vadd.s32 %v6008_v33, %v6007_v48  ;;  %vm6359_vm3 = vcmp.gt.s32.totalorder %v5995_v62, 0 }
 0x6b0   : > { %v5645_v12 = vadd.s32 %v5644_v54, %v5643_v37  ;;  %v5668_v35 = vrot.slane %v5667_v19, 4  ;;  %v7809_v58 = vsel %vm7600_vm6, %v6612_v9, %v7808_v57  ;;  %vm4059_vm14 = vcmp.eq.s32.totalorder %v15663_v51, %v17166_v45  ;;  %v3767_v2 = vpop.permute.xlu1 %3766 }
 0x6b1   : > { %v5651_v15 = vrot.slane %v5650_v32, 1  ;;  %v5655_v16 = vadd.s32 %v5654_v4, %v5653_v40  ;;  %v6017_v0 = vsel %vm4329_vm5, %v4314_v49, 0  ;;  %v4313_v42 = vsel %vm4057_vm2, 1, %v16629_v3 }
 0x6b2   : > { %v6613_v21 = vsel %vm6357_vm8, 1.0, %v17284_v29  ;;  %v6614_v7 = vsel %vm6358_vm10, 1.0, %v17284_v29  ;;  %vm6360_vm13 = vcmp.gt.s32.totalorder %v6002_v5, 0  ;;  %v6615_v48 = vsel %vm6359_vm3, 1.0, %v17284_v29  ;;  %v15785_v43 = vpop.permute.xlu0 %3759 }
 0x6b3   : > { %v4315_v37 = vsel %vm4059_vm14, 1, %v16629_v3  ;;  %vm4060_vm4 = vcmp.eq.s32.totalorder %v15710_v13, %v17166_v45  ;;  %vm6361_vm15 = vcmp.gt.s32.totalorder %v6009_v41, 0  ;;  %v7810_v51 = vsel %vm7602_vm11, %v6613_v21, %v7809_v58 }
 0x6b4   : > { %v5669_v22 = vadd.s32 %v5668_v35, %v5667_v19  ;;  %v6018_v31 = vrot.slane %v6017_v0, 4  ;;  %v6010_v40 = vsel %vm4329_vm5, %v4313_v42, 0  ;;  %v7811_v60 = vsel %vm7604_vm9, %v6614_v7, %v7810_v51 }
 0x6b5   : > { %v5656_v8 = vrot.slane %v5655_v16, 2  ;;  %vm4061_vm2 = vcmp.eq.s32.totalorder %v15693_v11, %v17166_v45  ;;  %v6616_v28 = vsel %vm6360_vm13, 1.0, %v17284_v29  ;;  %v7812_v53 = vsel %vm7606_vm7, %v6615_v48, %v7811_v60 }
 0x6b6   : > { %v6024_v13 = vsel %vm4329_vm5, %v4315_v37, 0  ;;  %v4316_v33 = vsel %vm4060_vm4, 1, %v16629_v3  ;;  %v6617_v62 = vsel %vm6361_vm15, 1.0, %v17284_v29  ;;  %v7813_v61 = vsel %vm7608_vm1, %v6616_v28, %v7812_v53 }
 0x6b7   : > { %v5663_v54 = vrot.slane %v15750_v55, 2  ;;  %v6011_v19 = vrot.slane %v6010_v40, 4  ;;  %v7338_v11 = vsel %vm15743_vm12, 1.0, %v17284_v29  ;;  %vm17518_vm8 = vcmask 1047559  }
 0x6b8   : > { %v7814_v4 = vsel %vm17518_vm8, %v6617_v62, %v7813_v61  ;;  %v6019_v38 = vadd.s32 %v6018_v31, %v6017_v0  ;;  %v4317_v9 = vsel %vm4061_vm2, 1, %v16629_v3  ;;  %vm4066_vm10 = vcmp.eq.s32.totalorder %v3774_v25, %v17166_v45  ;;  %v3795_v0 = vpop.permute.xlu2 %3794 }
 0x6b9   : > { %vm17519_vm3 = vcmp.eq.s32.totalorder %v17166_v45, 0  ;;  %v15799_v5 = vsel %vm6302_vm0, 1.0, %v17284_v29  ;;  %v5670_v49 = vrot.slane %v5669_v22, 2  ;;  %v6025_v41 = vrot.slane %v6024_v13, 4 }
 0x6ba   : > { %v7890_v57 = vsel %vm17519_vm3, %v7338_v11, %v7814_v4  ;;  %v6031_v47 = vsel %vm4329_vm5, %v4316_v33, 0  ;;  %vm6309_vm12 = vcmp.gt.s32.totalorder %v5645_v12, 0  ;;  %v15804_v35 = vadd.s32 %v5616_v24, %v15720_v44  ;;  %v3788_v12 = vpop.permute.xlu1 %3787 }
 0x6bb   : > { %8300 = vmatmul.msk.f32.gmra.mxu3 %vm4329_vm5, %v7890_v57  ;;  %v5652_v58 = vadd.s32 %v5651_v15, %v5650_v32  ;;  %v5657_v25 = vadd.s32 %v5656_v8, %v5655_v16  ;;  %v6012_v42 = vadd.s32 %v6011_v19, %v6010_v40  ;;  %v6038_v21 = vsel %vm4329_vm5, %v4317_v9, 0  ;;  %v3781_v8 = vpop.permute.xlu0 %3780 }
 0x6bc   : > { %v4322_v26 = vsel %vm4066_vm10, 1, %v16629_v3  ;;  %vm4062_vm0 = vcmp.eq.s32.totalorder %v15735_v1, %v17166_v45  ;;  %v5664_v7 = vadd.s32 %v5663_v54, %v15750_v55  ;;  %v6020_v48 = vrot.slane %v6019_v38, 2 }
 0x6bd   : > { %v6032_v37 = vrot.slane %v6031_v47, 4  ;;  %vm4065_vm14 = vcmp.eq.s32.totalorder %v3767_v2, %v17166_v45  ;;  %v15813_v44 = vsel %vm6309_vm12, 1.0, %v17284_v29  ;;  %v5671_v24 = vadd.s32 %v5670_v49, %v5669_v22 }
 0x6be   : > { %v6026_v32 = vadd.s32 %v6025_v41, %v6024_v13  ;;  %vm4069_vm13 = vcmp.eq.s32.totalorder %v3795_v0, %v17166_v45  ;;  %v6039_v15 = vrot.slane %v6038_v21, 4  ;;  %v6073_v16 = vsel %vm4329_vm5, %v4322_v26, 0 }
 0x6bf   : > { %v4318_v51 = vsel %vm4062_vm0, 1, %v16629_v3  ;;  %vm4063_vm4 = vcmp.eq.s32.totalorder %v15752_v56, %v17166_v45  ;;  %vm6310_vm15 = vcmp.gt.s32.totalorder %v5652_v58, 0  ;;  %v5658_v1 = vrot.slane %v5657_v25, 1 }
 0x6c0   : > { %v6013_v55 = vrot.slane %v6012_v42, 2  ;;  %v4321_v2 = vsel %vm4065_vm14, 1, %v16629_v3  ;;  %v5665_v31 = vrot.slane %v5664_v7, 1  ;;  %v6021_v40 = vadd.s32 %v6020_v48, %v6019_v38 }
 0x6c1   : > { %v6033_v22 = vadd.s32 %v6032_v37, %v6031_v47  ;;  %v4325_v60 = vsel %vm4069_vm13, 1, %v16629_v3  ;;  %v6027_v28 = vrot.slane %v6026_v32, 2  ;;  %v6074_v53 = vrot.slane %v6073_v16, 4 }
 0x6c2   : > { %v6045_v13 = vsel %vm4329_vm5, %v4318_v51, 0  ;;  %v4319_v33 = vsel %vm4063_vm4, 1, %v16629_v3  ;;  %v15825_v62 = vsel %vm6310_vm15, 1.0, %v17284_v29  ;;  %v5672_v56 = vrot.slane %v5671_v24, 1  ;;  %v3809_v37 = vpop.permute.xlu1 %3808 }
 0x6c3   : > { %v6040_v61 = vadd.s32 %v6039_v15, %v6038_v21  ;;  %v6066_v54 = vsel %vm4329_vm5, %v4321_v2, 0  ;;  %v15828_v19 = vadd.s32 %v5658_v1, %v5657_v25  ;;  %v6014_v11 = vadd.s32 %v6013_v55, %v6012_v42 }
 0x6c4   : > { %v6094_v4 = vsel %vm4329_vm5, %v4325_v60, 0  ;;  %vm4064_vm2 = vcmp.eq.s32.totalorder %v15785_v43, %v17166_v45  ;;  %v6022_v38 = vrot.slane %v6021_v40, 1  ;;  %v6034_v9 = vrot.slane %v6033_v22, 2  ;;  %v3802_v60 = vpop.permute.xlu0 %3801 }
 0x6c5   : > { %v6046_v57 = vrot.slane %v6045_v13, 4  ;;  %v6052_v49 = vsel %vm4329_vm5, %v4319_v33, 0  ;;  %v15834_v41 = vadd.s32 %v5665_v31, %v5664_v7  ;;  %v6028_v47 = vadd.s32 %v6027_v28, %v6026_v32  ;;  %v8084_v32 = vpop.f32.mrf.mxu3 }
 0x6c6   : > { %v6075_v58 = vadd.s32 %v6074_v53, %v6073_v16  ;;  %v6067_v0 = vrot.slane %v6066_v54, 4  ;;  %v6041_v21 = vrot.slane %v6040_v61, 2  ;;  %v6095_v26 = vrot.slane %v6094_v4, 4 }
 0x6c7   : > { %v4320_v25 = vsel %vm4064_vm2, 1, %v16629_v3  ;;  %vm4068_vm8 = vcmp.eq.s32.totalorder %v3788_v12, %v17166_v45  ;;  %v15838_v42 = vadd.s32 %v5672_v56, %v5671_v24  ;;  %vm6311_vm10 = vcmp.gt.s32.totalorder %v15828_v19, 0 }
 0x6c8   : > { %v6015_v43 = vrot.slane %v6014_v11, 1  ;;  %v6053_v48 = vrot.slane %v6052_v49, 4  ;;  %v6023_v15 = vadd.s32 %v6022_v38, %v6021_v40  ;;  %v6035_v51 = vadd.s32 %v6034_v9, %v6033_v22 }
 0x6c9   : > { %v6047_v7 = vadd.s32 %v6046_v57, %v6045_v13  ;;  %vm4067_vm3 = vcmp.eq.s32.totalorder %v3781_v8, %v17166_v45  ;;  %v6029_v16 = vrot.slane %v6028_v47, 1  ;;  %v6068_v1 = vadd.s32 %v6067_v0, %v6066_v54 }
 0x6ca   : > { %v6059_v55 = vsel %vm4329_vm5, %v4320_v25, 0  ;;  %v4324_v2 = vsel %vm4068_vm8, 1, %v16629_v3  ;;  %v6042_v12 = vadd.s32 %v6041_v21, %v6040_v61  ;;  %v6076_v24 = vrot.slane %v6075_v58, 2 }
 0x6cb   : > { %v6096_v31 = vadd.s32 %v6095_v26, %v6094_v4  ;;  %vm4071_vm12 = vcmp.eq.s32.totalorder %v3809_v37, %v17166_v45  ;;  %v6016_v28 = vadd.s32 %v6015_v43, %v6014_v11  ;;  %v6054_v53 = vadd.s32 %v6053_v48, %v6052_v49 }
 0x6cc   : > { %v4323_v40 = vsel %vm4067_vm3, 1, %v16629_v3  ;;  %v8085_v22 = vadd.f32 %v15619_v23, %v8084_v32  ;;  %v6036_v8 = vrot.slane %v6035_v51, 1  ;;  %v6048_v13 = vrot.slane %v6047_v7, 2 }
 0x6cd   : > { %v6060_v33 = vrot.slane %v6059_v55, 4  ;;  %v6087_v56 = vsel %vm4329_vm5, %v4324_v2, 0  ;;  %v6069_v54 = vrot.slane %v6068_v1, 2  ;;  %v4327_v61 = vsel %vm4071_vm12, 1, %v16629_v3 }
 0x6ce   : > { %vm4070_vm0 = vcmp.eq.s32.totalorder %v3802_v60, %v17166_v45  ;;  %v8132_v4 = vmax.f32 %v8085_v22, 0.0  ;;  %vm6363_vm14 = vcmp.gt.s32.totalorder %v6023_v15, 0  ;;  %v6077_v38 = vadd.s32 %v6076_v24, %v6075_v58 }
 0x6cf   : > { %v6097_v11 = vrot.slane %v6096_v31, 2  ;;  %v6080_v9 = vsel %vm4329_vm5, %v4323_v40, 0  ;;  %vm6362_vm13 = vcmp.gt.s32.totalorder %v6016_v28, 0  ;;  %v6043_v57 = vrot.slane %v6042_v12, 1 }
 0x6d0   : > { %v6055_v49 = vrot.slane %v6054_v53, 2  ;;  %v6088_v0 = vrot.slane %v6087_v56, 4  ;;  %8164 = vst [vmem:[%s13569_s28 + $0xc0] sm:$0xff] %v8132_v4  ;;  %v6049_v21 = vadd.s32 %v6048_v13, %v6047_v7  ;;  %v6061_v26 = vadd.s32 %v6060_v33, %v6059_v55 }
 0x6d1   : > { %v6108_v25 = vsel %vm4329_vm5, %v4327_v61, 0  ;;  %v4326_v43 = vsel %vm4070_vm0, 1, %v16629_v3  ;;  %v6030_v48 = vadd.s32 %v6029_v16, %v6028_v47  ;;  %v6037_v37 = vadd.s32 %v6036_v8, %v6035_v51  ;;  %v3816_v51 = vpop.permute.xlu1 %3815 }
 0x6d2   : > { %v6070_v32 = vadd.s32 %v6069_v54, %v6068_v1  ;;  %v6081_v2 = vrot.slane %v6080_v9, 4  ;;  %v15857_v58 = vsel %vm6311_vm10, 1.0, %v17284_v29  ;;  %v6619_v24 = vsel %vm6363_vm14, 1.0, %v17284_v29 }
 0x6d3   : > { %v6078_v60 = vrot.slane %v6077_v38, 1  ;;  %v6098_v40 = vadd.s32 %v6097_v11, %v6096_v31  ;;  %v6618_v7 = vsel %vm6362_vm13, 1.0, %v17284_v29  ;;  %v6089_v55 = vadd.s32 %v6088_v0, %v6087_v56  ;;  %v8087_v31 = vpop.f32.mrf.mxu3 }
 0x6d4   : > { %v6109_v22 = vrot.slane %v6108_v25, 4  ;;  %v6101_v47 = vsel %vm4329_vm5, %v4326_v43, 0  ;;  %v6044_v16 = vadd.s32 %v6043_v57, %v6042_v12  ;;  %v6050_v1 = vrot.slane %v6049_v21, 1 }
 0x6d5   : > { %v6056_v8 = vadd.s32 %v6055_v49, %v6054_v53  ;;  %v6062_v13 = vrot.slane %v6061_v26, 2  ;;  %vm6364_vm4 = vcmp.gt.s32.totalorder %v6030_v48, 0  ;;  %vm6365_vm15 = vcmp.gt.s32.totalorder %v6037_v37, 0  ;;  %v17521_v49 = vld [vmem:[#allocation46_spill] sm:$0xff] }
 0x6d6   : > { %v6071_v19 = vrot.slane %v6070_v32, 1  ;;  %v6082_v33 = vadd.s32 %v6081_v2, %v6080_v9  ;;  %v6079_v15 = vadd.s32 %v6078_v60, %v6077_v38  ;;  %v6099_v54 = vrot.slane %v6098_v40, 1 }
 0x6d7   : > { %v6102_v61 = vrot.slane %v6101_v47, 4  ;;  %vm4072_vm2 = vcmp.eq.s32.totalorder %v3816_v51, %v17166_v45  ;;  %vm17520_vm8 = vcmask 1041409   ;;  %v6090_v56 = vrot.slane %v6089_v55, 2  ;;  %v17522_v51 = vld [vmem:[#allocation39_spill] sm:$0xff] }
 0x6d8   : > { %v7815_v28 = vsel %vm17520_vm8, %v6619_v24, %v6618_v7  ;;  %v6110_v4 = vadd.s32 %v6109_v22, %v6108_v25  ;;  %v8088_v11 = vadd.f32 %v15619_v23, %v8087_v31  ;;  %vm6366_vm10 = vcmp.gt.s32.totalorder %v6044_v16, 0  ;;  %v17525_v31 = vld [vmem:[#allocation59_spill] sm:$0xff] }
 0x6d9   : > { %v6051_v12 = vadd.s32 %v6050_v1, %v6049_v21  ;;  %v6057_v53 = vrot.slane %v6056_v8, 1  ;;  %v6063_v57 = vadd.s32 %v6062_v13, %v6061_v26  ;;  %vm6168_vm3 = vcmp.gt.s32.totalorder %v17521_v49, 0 }
 0x6da   : > { %v6072_v9 = vadd.s32 %v6071_v19, %v6070_v32  ;;  %v6083_v38 = vrot.slane %v6082_v33, 2  ;;  %v4328_v0 = vsel %vm4072_vm2, 1, %v16629_v3  ;;  %v8133_v43 = vmax.f32 %v8088_v11, 0.0 }
 0x6db   : > { %v6620_v2 = vsel %vm6364_vm4, 1.0, %v17284_v29  ;;  %vm6371_vm12 = vcmp.gt.s32.totalorder %v6079_v15, 0  ;;  %v6100_v24 = vadd.s32 %v6099_v54, %v6098_v40  ;;  %v6103_v25 = vadd.s32 %v6102_v61, %v6101_v47 }
 0x6dc   : > { %vm6232_vm0 = vcmp.gt.s32.totalorder %v14417_v10, 0  ;;  %v15874_v21 = vsel %vm6365_vm15, 1.0, %v17284_v29  ;;  %v15877_v26 = vsel %vm7600_vm6, %v6620_v2, %v7815_v28  ;;  %v6091_v32 = vadd.s32 %v6090_v56, %v6089_v55  ;;  %8165 = vst [vmem:[%s13569_s28 + $0xc8] sm:$0xff] %v8133_v43  ;;  %v17523_v55 = vld [vmem:[#allocation57_spill] sm:$0xff] }
 0x6dd   : > { %v6111_v60 = vrot.slane %v6110_v4, 2  ;;  %v15882_v3 = vsel %vm6366_vm10, 1.0, %v17284_v29  ;;  %vm6367_vm14 = vcmp.gt.s32.totalorder %v6051_v12, 0  ;;  %v6064_v48 = vrot.slane %v6063_v57, 1  ;;  %v17528_v43 = vld [vmem:[#allocation37_spill] sm:$0xff] }
 0x6de   : > { %v6115_v40 = vsel %vm4329_vm5, %v4328_v0, 0  ;;  %v6627_v7 = vsel %vm6371_vm12, 1.0, %v17284_v29  ;;  %v15886_v22 = vadd.s32 %v6057_v53, %v6056_v8  ;;  %vm6370_vm13 = vcmp.gt.s32.totalorder %v6072_v9, 0  ;;  %v6850_v53 = vpop.xlane.xlu2 %6849 }
 0x6df   : > { %v6084_v37 = vadd.s32 %v6083_v38, %v6082_v33  ;;  %vm6374_vm4 = vcmp.gt.s32.totalorder %v6100_v24, 0  ;;  %v6104_v47 = vrot.slane %v6103_v25, 2  ;;  %v7642_v1 = vsel %vm7602_vm11, %v17523_v55, %v17522_v51 }
 0x6e0   : > { %v17524_v16 = vrot.slane %v14521_v17, 1  ;;  %vm6304_vm15 = vcmp.gt.s32.totalorder %v15270_v6, 0  ;;  %v15896_v19 = vsel %vm6367_vm14, 1.0, %v17284_v29  ;;  %v6092_v15 = vrot.slane %v6091_v32, 1  ;;  %v6970_v55 = vpop.xlane.xlu0 %6969 }
 0x6e1   : > { %v15898_v8 = vadd.s32 %v6111_v60, %v6110_v4  ;;  %v6116_v54 = vrot.slane %v6115_v40, 4  ;;  %v6626_v33 = vsel %vm6370_vm13, 1.0, %v17284_v29  ;;  %v15901_v61 = vadd.s32 %v6064_v48, %v6063_v57  ;;  %v17527_v4 = vld [vmem:[#allocation26_spill] sm:$0xff]  ;;  %v17530_v48 = vld [vmem:[#allocation12_spill] sm:$0xff] }
 0x6e2   : > { %v5113_v13 = vadd.s32 %v17524_v16, %v14521_v17  ;;  %v17526_v28 = vrot.slane %v17525_v31, 1  ;;  %v7698_v17 = vsel %vm7602_vm11, %v14401_v46, %v14446_v63  ;;  %v15910_v11 = vsel %vm6374_vm4, 1.0, %v17284_v29 }
 0x6e3   : > { %v6085_v12 = vrot.slane %v6084_v37, 1  ;;  %v7643_v9 = vsel %vm7604_vm9, %v17527_v4, %v7642_v1  ;;  %v7699_v57 = vsel %vm7604_vm9, %v14488_v36, %v7698_v17  ;;  %v6105_v38 = vadd.s32 %v6104_v47, %v6103_v25 }
 0x6e4   : > { %v4665_v56 = vadd.s32 %v17526_v28, %v17525_v31  ;;  %v6851_v0 = vcvt.f32.s32 %v6850_v53  ;;  %v7644_v2 = vsel %vm7606_vm7, %v17528_v43, %v7643_v9  ;;  %vm6233_vm2 = vcmp.gt.s32.totalorder %v5113_v13, 0  ;;  %v17536_v43 = vld [vmem:[#allocation71_spill] sm:$0xff] }
 0x6e5   : > { %vm6368_vm8 = vcmp.gt.s32.totalorder %v15886_v22, 0  ;;  %vm17529_vm10 = vcmask 1041409   ;;  %v15922_v63 = vadd.s32 %v6092_v15, %v6091_v32  ;;  %v6113_v24 = vrot.slane %v15898_v8, 1  ;;  %v17531_v15 = vld [vmem:[#allocation54_spill] sm:$0xff] }
 0x6e6   : > { %v15920_v46 = vsel %vm17529_vm10, %v6627_v7, %v6626_v33  ;;  %v6117_v60 = vadd.s32 %v6116_v54, %v6115_v40  ;;  %v6854_v51 = vadd.s32 %v17530_v48, %v6851_v0  ;;  %vm6169_vm12 = vcmp.gt.s32.totalorder %v4665_v56, 0  ;;  %v8090_v56 = vpop.f32.mrf.mxu3  ;;  %v7225_v53 = vpop.xlane.xlu2 %7224 }
 0x6e7   : > { %v6424_v36 = vsel %vm6168_vm3, 1.0, %v17284_v29  ;;  %v7700_v25 = vsel %vm7606_vm7, %v14414_v14, %v7699_v57  ;;  %vm6240_vm14 = vcmp.gt.s32.totalorder %v15179_v59, 0  ;;  %v15932_v7 = vadd.s32 %v6085_v12, %v6084_v37 }
 0x6e8   : > { %v6971_v32 = vcvt.f32.s32 %v6970_v55  ;;  %v7645_v47 = vsel %vm7608_vm1, %v6424_v36, %v7644_v2  ;;  %v6489_v40 = vsel %vm6233_vm2, 1.0, %v17284_v29  ;;  %v6106_v1 = vrot.slane %v6105_v38, 1 }
 0x6e9   : > { %v7250_v16 = vand.u32 1, %v6854_v51  ;;  %v6488_v13 = vsel %vm6232_vm0, 1.0, %v17284_v29  ;;  %vm6305_vm3 = vcmp.gt.s32.totalorder %v15804_v35, 0  ;;  %v6118_v49 = vrot.slane %v6117_v60, 2 }
 0x6ea   : > { %v6974_v14 = vadd.s32 %v17531_v15, %v6971_v32  ;;  %v6425_v54 = vsel %vm6169_vm12, 1.0, %v17284_v29  ;;  %v7701_v37 = vsel %vm7608_vm1, %v6488_v13, %v7700_v25  ;;  %vm17532_vm4 = vcmask 1047559   ;;  %v7105_v55 = vpop.xlane.xlu1 %7104 }
 0x6eb   : > { %vm7282_vm13 = vcmp.eq.s32.totalorder %v7250_v16, 1  ;;  %v7646_v33 = vsel %vm17532_vm4, %v6425_v54, %v7645_v47  ;;  %vm17533_vm10 = vmmov %vm17532_vm4  ;;  %v7761_v28 = vsel %vm7602_vm11, %v15252_v27, %v15093_v18  ;;  %v6561_v17 = vsel %vm6305_vm3, 1.0, %v17284_v29 }
 0x6ec   : > { %v7702_v31 = vsel %vm17533_vm10, %v6489_v40, %v7701_v37  ;;  %v7258_v10 = vand.u32 1, %v6974_v14  ;;  %v7314_v35 = vsel %vm7282_vm13, 1.0, %v17284_v29  ;;  %v7762_v12 = vsel %vm7604_vm9, %v15799_v5, %v7761_v28 }
 0x6ed   : > { %vm6176_vm0 = vcmp.gt.s32.totalorder %v14204_v39, 0  ;;  %v8091_v4 = vadd.f32 %v15619_v23, %v8090_v56  ;;  %vm17534_vm2 = vcmp.eq.s32.totalorder %v17166_v45, 0  ;;  %v6560_v18 = vsel %vm6304_vm15, 1.0, %v17284_v29  ;;  %vm17535_vm15 = vmmov %vm17532_vm4 }
 0x6ee   : > { %v7866_v9 = vsel %vm17534_vm2, %v7314_v35, %v7646_v33  ;;  %v7763_v27 = vsel %vm7606_vm7, %v15256_v30, %v7762_v12  ;;  %vm7290_vm12 = vcmp.eq.s32.totalorder %v7258_v10, 1  ;;  %v7226_v57 = vcvt.f32.s32 %v7225_v53  ;;  %v17543_v33 = vld [vmem:[#allocation8_spill] sm:$0xff]  ;;  %v17545_v35 = vld [vmem:[#allocation25_spill] sm:$0xff] }
 0x6ef   : > { %8276 = vmatmul.msk.f32.gmra.mxu0 %vm4329_vm5, %v7866_v9  ;;  %vm6369_vm3 = vcmp.gt.s32.totalorder %v15901_v61, 0  ;;  %v7764_v5 = vsel %vm7608_vm1, %v6560_v18, %v7763_v27  ;;  %vm6312_vm13 = vcmp.gt.s32.totalorder %v15834_v41, 0  ;;  %v8134_v23 = vmax.f32 %v8091_v4, 0.0  ;;  %v17547_v53 = vld [vmem:[#allocation53_spill] sm:$0xff] }
 0x6f0   : > { %v7322_v0 = vsel %vm7290_vm12, 1.0, %v17284_v29  ;;  %v7817_v6 = vsel %vm7602_vm11, %v15874_v21, %v15877_v26  ;;  %v7765_v30 = vsel %vm17535_vm15, %v6561_v17, %v7764_v5  ;;  %vm6373_vm4 = vcmp.gt.s32.totalorder %v15922_v63, 0  ;;  %v17544_v63 = vld [vmem:[#allocation58_spill] sm:$0xff] }
 0x6f1   : > { %vm6372_vm10 = vcmp.gt.s32.totalorder %v15932_v7, 0  ;;  %v7229_v2 = vadd.s32 %v17536_v43, %v7226_v57  ;;  %v7874_v48 = vsel %vm17534_vm2, %v7322_v0, %v7702_v31  ;;  %v6107_v51 = vadd.s32 %v6106_v1, %v6105_v38  ;;  %8166 = vst [vmem:[%s13569_s28 + $0xd0] sm:$0xff] %v8134_v23  ;;  %v17537_v1 = vld [vmem:[#allocation35_spill] sm:$0xff]  ;;  %v6865_v56 = vpop.xlane.xlu0 %6864  ;;  %v17550_v5 = vld [vmem:[#allocation18_spill] sm:$0xff] }
 0x6f2   : > { %8284 = vmatmul.msk.f32.gmra.mxu1 %vm4329_vm5, %v7874_v48  ;;  %v6624_v21 = vsel %vm6368_vm8, 1.0, %v17284_v29  ;;  %v6625_v26 = vsel %vm6369_vm3, 1.0, %v17284_v29  ;;  %v7705_v36 = vsel %vm7602_vm11, %v14570_v50, %v15195_v20  ;;  %vm6248_vm12 = vcmp.gt.s32.totalorder %v15249_v52, 0  ;;  %v17538_v20 = vld [vmem:[#allocation41_spill] sm:$0xff]  ;;  %vm17539_vm3 = vmmov %vm17535_vm15  ;;  %v17558_v52 = vld [vmem:[#allocation76_spill] sm:$0xff] }
 0x6f3   : > { %v7275_v25 = vand.u32 1, %v7229_v2  ;;  %v7106_v38 = vcvt.f32.s32 %v7105_v55  ;;  %v7818_v32 = vsel %vm7604_vm9, %v15882_v3, %v7817_v6  ;;  %v7706_v47 = vsel %vm7604_vm9, %v15176_v34, %v7705_v36  ;;  %v17553_v55 = vld [vmem:[#allocation29_spill] sm:$0xff]  ;;  %v17555_v36 = vld [vmem:[#allocation36_spill] sm:$0xff] }
 0x6f4   : > { %v6119_v22 = vadd.s32 %v6118_v49, %v6117_v60  ;;  %v7819_v40 = vsel %vm7606_vm7, %v15896_v19, %v7818_v32  ;;  %v6496_v61 = vsel %vm6240_vm14, 1.0, %v17284_v29  ;;  %v7707_v50 = vsel %vm7606_vm7, %v17537_v1, %v7706_v47  ;;  %v17540_v60 = vld [vmem:[#allocation31_spill] sm:$0xff]  ;;  %vm17542_vm14 = vmmov %vm17534_vm2  ;;  %v17559_v1 = vld [vmem:[#allocation73_spill] sm:$0xff] }
 0x6f5   : > { %vm7307_vm8 = vcmp.eq.s32.totalorder %v7275_v25, 1  ;;  %v7109_v16 = vadd.s32 %v17538_v20, %v7106_v38  ;;  %v7820_v13 = vsel %vm7608_vm1, %v6624_v21, %v7819_v40  ;;  %v16001_v3 = vsel %vm7608_vm1, %v6496_v61, %v7707_v50  ;;  %v17557_v47 = vld [vmem:[#allocation27_spill] sm:$0xff] }
 0x6f6   : > { %v6629_v34 = vsel %vm6373_vm4, 1.0, %v17284_v29  ;;  %v7339_v19 = vsel %vm7307_vm8, 1.0, %v17284_v29  ;;  %v7821_v59 = vsel %vm17539_vm3, %v6625_v26, %v7820_v13  ;;  %v17541_v49 = vrot.slane %v17540_v60, 1  ;;  %vm17549_vm3 = vmmov %vm17542_vm14  ;;  %v17554_v26 = vld [vmem:[#allocation78_spill] sm:$0xff] }
 0x6f7   : > { %v16014_v14 = vadd.s32 %v6113_v24, %v15898_v8  ;;  %v7267_v54 = vand.u32 1, %v7109_v16  ;;  %v7891_v37 = vsel %vm17542_vm14, %v7339_v19, %v7821_v59  ;;  %v7650_v31 = vsel %vm7604_vm9, %v17544_v63, %v17543_v33  ;;  %v17546_v24 = vld [vmem:[#allocation43_spill] sm:$0xff] }
 0x6f8   : > { %v4721_v15 = vadd.s32 %v17541_v49, %v17540_v60  ;;  %v6628_v28 = vsel %vm6372_vm10, 1.0, %v17284_v29  ;;  %vm6375_vm15 = vcmp.gt.s32.totalorder %v6107_v51, 0  ;;  %v6120_v10 = vrot.slane %v6119_v22, 1  ;;  %8301 = vmatmul.msk.f32.gmra.mxu3 %vm4329_vm5, %v7891_v37  ;;  %v17561_v19 = vld [vmem:[#allocation19_spill] sm:$0xff] }
 0x6f9   : > { %v7768_v8 = vsel %vm7602_vm11, %v15813_v44, %v17545_v35  ;;  %vm6182_vm4 = vcmp.gt.s32.totalorder %v17546_v24, 0  ;;  %vm7299_vm2 = vcmp.eq.s32.totalorder %v7267_v54, 1  ;;  %v6866_v17 = vcvt.f32.s32 %v6865_v56  ;;  %v17548_v44 = vld [vmem:[#allocation72_spill] sm:$0xff] }
 0x6fa   : > { %v6432_v12 = vsel %vm6176_vm0, 1.0, %v17284_v29  ;;  %vm6313_vm8 = vcmp.gt.s32.totalorder %v15838_v42, 0  ;;  %v7331_v7 = vsel %vm7299_vm2, 1.0, %v17284_v29  ;;  %vm6177_vm10 = vcmp.gt.s32.totalorder %v4721_v15, 0  ;;  %v7240_v20 = vpop.xlane.xlu1 %7239  ;;  %v17564_v15 = vld [vmem:[#allocation33_spill] sm:$0xff]  ;;  %v17565_v54 = vld [vmem:[#allocation40_spill] sm:$0xff] }
 0x6fb   : > { %v7651_v4 = vsel %vm7606_vm7, %v17547_v53, %v7650_v31  ;;  %v7769_v9 = vsel %vm7604_vm9, %v15825_v62, %v7768_v8  ;;  %v6869_v18 = vadd.s32 %v17548_v44, %v6866_v17  ;;  %v7883_v27 = vsel %vm17549_vm3, %v7331_v7, %v7765_v30  ;;  %v17567_v7 = vld [vmem:[#allocation74_spill] sm:$0xff] }
 0x6fc   : > { %v6568_v39 = vsel %vm6312_vm13, 1.0, %v17284_v29  ;;  %v7770_v42 = vsel %vm7606_vm7, %v15857_v58, %v7769_v9  ;;  %8293 = vmatmul.msk.f32.gmra.mxu2 %vm4329_vm5, %v7883_v27  ;;  %v7652_v57 = vsel %vm7608_vm1, %v6432_v12, %v7651_v4  ;;  %v17551_v23 = vrot.slane %v17550_v5, 1  ;;  %v6985_v58 = vpop.xlane.xlu2 %6984  ;;  %v17569_v9 = vld [vmem:[#allocation28_spill] sm:$0xff]  ;;  %v17571_v27 = vld [vmem:[#allocation75_spill] sm:$0xff] }
 0x6fd   : > { %v6569_v0 = vsel %vm6313_vm8, 1.0, %v17284_v29  ;;  %v7771_v6 = vsel %vm7608_vm1, %v6568_v39, %v7770_v42  ;;  %v7823_v30 = vsel %vm7600_vm6, %v6628_v28, %v15920_v46  ;;  %v6121_v41 = vadd.s32 %v6120_v10, %v6119_v22  ;;  %v7120_v10 = vpop.xlane.xlu0 %7119 }
 0x6fe   : > { %v5169_v62 = vadd.s32 %v17551_v23, %v17550_v5  ;;  %v7251_v43 = vand.u32 1, %v6869_v18  ;;  %vm17552_vm0 = vcmask 1047559   ;;  %v6433_v48 = vsel %vm6177_vm10, 1.0, %v17284_v29 }
 0x6ff   : > { %v16056_v2 = vsel %vm17552_vm0, %v6569_v0, %v7771_v6  ;;  %vm6249_vm13 = vcmp.gt.s32.totalorder %v17553_v55, 0  ;;  %v6504_v21 = vsel %vm6248_vm12, 1.0, %v17284_v29  ;;  %v7713_v25 = vsel %vm7604_vm9, %v17555_v36, %v17554_v26  ;;  %vm17556_vm2 = vmmov %vm17552_vm0  ;;  %v17575_v6 = vld [vmem:[#allocation44_spill] sm:$0xff]  ;;  %v17576_v55 = vld [vmem:[#allocation65_spill] sm:$0xff] }
 0x700   : > { %v6631_v46 = vsel %vm6375_vm15, 1.0, %v17284_v29  ;;  %vm7283_vm14 = vcmp.eq.s32.totalorder %v7251_v43, 1  ;;  %v6986_v38 = vcvt.f32.s32 %v6985_v58  ;;  %v7653_v32 = vsel %vm17556_vm2, %v6433_v48, %v7652_v57  ;;  %vm17560_vm12 = vmmov %vm17549_vm3  ;;  %v17573_v57 = vld [vmem:[#allocation55_spill] sm:$0xff] }
 0x701   : > { %vm6183_vm8 = vcmp.gt.s32.totalorder %v17557_v47, 0  ;;  %v7315_v22 = vsel %vm7283_vm14, 1.0, %v17284_v29  ;;  %vm6241_vm10 = vcmp.gt.s32.totalorder %v5169_v62, 0  ;;  %v7824_v40 = vsel %vm7602_vm11, %v6629_v34, %v7823_v30  ;;  %vm17563_vm3 = vmmov %vm17552_vm0 }
 0x702   : > { %v7714_v61 = vsel %vm7606_vm7, %v17558_v52, %v7713_v25  ;;  %v6989_v50 = vadd.s32 %v17559_v1, %v6986_v38  ;;  %v7867_v51 = vsel %vm17560_vm12, %v7315_v22, %v7653_v32  ;;  %v6505_v16 = vsel %vm6249_vm13, 1.0, %v17284_v29 }
 0x703   : > { %v7715_v13 = vsel %vm7608_vm1, %v6504_v21, %v7714_v61  ;;  %v17562_v59 = vcvt.f32.s32 %v17561_v19  ;;  %v7241_v49 = vcvt.f32.s32 %v7240_v20  ;;  %8277 = vmatmul.msk.f32.gmra.mxu0 %vm4329_vm5, %v7867_v51  ;;  %vm6377_vm15 = vcmp.gt.s32.totalorder %v6121_v41, 0  ;;  %v16139_v20 = vld [vmem:[%s16215_s3] ss:$0 sm:$0xff] }
 0x704   : > { %v16084_v34 = vsel %vm17563_vm3, %v6505_v16, %v7715_v13  ;;  %v7655_v37 = vsel %vm7600_vm6, %v17565_v54, %v17564_v15  ;;  %vm6376_vm0 = vcmp.gt.s32.totalorder %v16014_v14, 0  ;;  %v7259_v33 = vand.u32 1, %v6989_v50  ;;  %vm17566_vm6 = vmmov %vm17556_vm2  ;;  %v6880_v62 = vpop.xlane.xlu2 %6879 }
 0x705   : > { %v7243_v60 = vshll.u32 %v17562_v59, 16  ;;  %v7825_v63 = vsel %vm7604_vm9, %v15910_v11, %v7824_v40  ;;  %v6438_v31 = vsel %vm6182_vm4, 1.0, %v17284_v29  ;;  %v6497_v56 = vsel %vm6241_vm10, 1.0, %v17284_v29  ;;  %vm17572_vm4 = vmmov %vm17560_vm12 }
 0x706   : > { %v7826_v35 = vsel %vm7606_vm7, %v6631_v46, %v7825_v63  ;;  %vm7291_vm13 = vcmp.eq.s32.totalorder %v7259_v33, 1  ;;  %v7121_v8 = vcvt.f32.s32 %v7120_v10  ;;  %v7709_v14 = vsel %vm17566_vm6, %v6497_v56, %v16001_v3  ;;  %vm17577_vm10 = vmmov %vm17572_vm4 }
 0x707   : > { %v7244_v28 = vadd.s32 %v7243_v60, %v7241_v49  ;;  %v6633_v17 = vsel %vm6377_vm15, 1.0, %v17284_v29  ;;  %v7323_v11 = vsel %vm7291_vm13, 1.0, %v17284_v29  ;;  %v6632_v24 = vsel %vm6376_vm0, 1.0, %v17284_v29  ;;  %v7000_v61 = vpop.xlane.xlu0 %6999 }
 0x708   : > { %v17568_v53 = vrot.slane %v17567_v7, 1  ;;  %v17570_v44 = vrot.slane %v17569_v9, 1  ;;  %v7124_v39 = vadd.s32 %v17571_v27, %v7121_v8  ;;  %v7875_v3 = vsel %vm17572_vm4, %v7323_v11, %v7709_v14  ;;  %v8093_v47 = vpop.f32.mrf.mxu3 }
 0x709   : > { %v7276_v12 = vand.u32 1, %v7244_v28  ;;  %v7827_v42 = vsel %vm7608_vm1, %v6632_v24, %v7826_v35  ;;  %v17574_v5 = vcvt.f32.s32 %v17573_v57  ;;  %8285 = vmatmul.msk.f32.gmra.mxu1 %vm4329_vm5, %v7875_v3  ;;  %v7656_v30 = vsel %vm7602_vm11, %v17575_v6, %v7655_v37  ;;  %vm17578_vm11 = vmmov %vm17572_vm4 }
 0x70a   : > { %v4777_v4 = vadd.s32 %v17568_v53, %v17567_v7  ;;  %v4770_v18 = vadd.s32 %v17570_v44, %v17569_v9  ;;  %v7828_v0 = vsel %vm17556_vm2, %v6633_v17, %v7827_v42  ;;  %v7268_v43 = vand.u32 1, %v7124_v39 }
 0x70b   : > { %vm7308_vm14 = vcmp.eq.s32.totalorder %v7276_v12, 1  ;;  %v6883_v23 = vshll.u32 %v17574_v5, 16  ;;  %v6881_v58 = vcvt.f32.s32 %v6880_v62  ;;  %v7657_v48 = vsel %vm7604_vm9, %v6438_v31, %v7656_v30 }
 0x70c   : > { %v7340_v41 = vsel %vm7308_vm14, 1.0, %v17284_v29  ;;  %v7002_v21 = vcvt.f32.s32 %v17576_v55  ;;  %vm6185_vm12 = vcmp.gt.s32.totalorder %v4777_v4, 0  ;;  %v6439_v36 = vsel %vm6183_vm8, 1.0, %v17284_v29  ;;  %vm17580_vm8 = vmmov %vm17572_vm4 }
 0x70d   : > { %v7892_v26 = vsel %vm17577_vm10, %v7340_v41, %v7828_v0  ;;  %vm6184_vm15 = vcmp.gt.s32.totalorder %v4770_v18, 0  ;;  %vm7300_vm3 = vcmp.eq.s32.totalorder %v7268_v43, 1  ;;  %v6884_v25 = vadd.s32 %v6883_v23, %v6881_v58 }
 0x70e   : > { %8302 = vmatmul.msk.f32.gmra.mxu3 %vm4329_vm5, %v7892_v26  ;;  %v7332_v46 = vsel %vm7300_vm3, 1.0, %v17284_v29  ;;  %v7658_v38 = vsel %vm7606_vm7, %v6439_v36, %v7657_v48  ;;  %v6441_v40 = vsel %vm6185_vm12, 1.0, %v17284_v29  ;;  %v7003_v52 = vshll.u32 %v7002_v21, 16  ;;  %vm17579_vm7 = vmmov %vm17556_vm2 }
 0x70f   : > { %v7252_v32 = vand.u32 1, %v6884_v25  ;;  %v7884_v22 = vsel %vm17578_vm11, %v7332_v46, %v16056_v2  ;;  %v6440_v1 = vsel %vm6184_vm15, 1.0, %v17284_v29  ;;  %v7001_v50 = vcvt.f32.s32 %v7000_v61 }
 0x710   : > { %8294 = vmatmul.msk.f32.gmra.mxu2 %vm4329_vm5, %v7884_v22  ;;  %v8094_v51 = vadd.f32 %v16139_v20, %v8093_v47  ;;  %v7659_v2 = vsel %vm7608_vm1, %v6440_v1, %v7658_v38  ;;  %vm17581_vm1 = vmmov %vm17572_vm4 }
 0x711   : > { %vm7284_vm9 = vcmp.eq.s32.totalorder %v7252_v32, 1  ;;  %v7660_v13 = vsel %vm17579_vm7, %v6441_v40, %v7659_v2  ;;  %v7004_v19 = vadd.s32 %v7003_v52, %v7001_v50 }
 0x712   : > { %v7316_v16 = vsel %vm7284_vm9, 1.0, %v17284_v29  ;;  %v8135_v59 = vmax.f32 %v8094_v51, 0.0 }
 0x713   : > { %v7868_v60 = vsel %vm17580_vm8, %v7316_v16, %v7660_v13  ;;  %v7260_v49 = vand.u32 1, %v7004_v19 }
 0x714   : > { %8278 = vmatmul.msk.f32.gmra.mxu0 %vm4329_vm5, %v7868_v60  ;;  %8167 = vst [vmem:[%s13569_s28 + $0xd8] sm:$0xff] %v8135_v59 }
 0x715   : > { %vm7292_vm0 = vcmp.eq.s32.totalorder %v7260_v49, 1 }
 0x716   : > { %v7324_v15 = vsel %vm7292_vm0, 1.0, %v17284_v29 }
 0x717   : > { %v7876_v54 = vsel %vm17581_vm1, %v7324_v15, %v16084_v34 }
 0x718   : > { %8286 = vmatmul.msk.f32.gmra.mxu1 %vm4329_vm5, %v7876_v54 }
 0x72a   : > { %v8096_v37 = vpop.f32.mrf.mxu3 }
 0x72b   : > { %v8097_v33 = vadd.f32 %v16139_v20, %v8096_v37 }
 0x72d   : > { %v8136_v63 = vmax.f32 %v8097_v33, 0.0 }
 0x72f   : > { %8168 = vst [vmem:[%s13569_s28 + $0xe0] sm:$0xff] %v8136_v63 }
 0x73e   : > { %v8099_v31 = vpop.f32.mrf.mxu3 }
 0x73f   : > { %v8100_v28 = vadd.f32 %v16139_v20, %v8099_v31 }
 0x741   : > { %v8137_v10 = vmax.f32 %v8100_v28, 0.0 }
 0x743   : > { %8169 = vst [vmem:[%s13569_s28 + $0xe8] sm:$0xff] %v8137_v10 }
 0x76c   : > { %v8027_v29 = vpop.f32.mrf.mxu0 }
 0x76d   : > { %v8028_v56 = vadd.f32 %v16139_v20, %v8027_v29 }
 0x76f   : > { %v8113_v45 = vmax.f32 %v8028_v56, 0.0  ;;  %v8051_v34 = vpop.f32.mrf.mxu1 }
 0x770   : > { %v8052_v35 = vadd.f32 %v16139_v20, %v8051_v34 }
 0x771   : > { %8145 = vst [vmem:[%s13569_s28 + $0x28] sm:$0xff] %v8113_v45 }
 0x772   : > { %v8121_v8 = vmax.f32 %v8052_v35, 0.0 }
 0x774   : > { %8153 = vst [vmem:[%s13569_s28 + $0x68] sm:$0xff] %v8121_v8 }
 0x77b   : > { %v8102_v14 = vpop.f32.mrf.mxu3 }
 0x77c   : > { %v8103_v17 = vadd.f32 %v16139_v20, %v8102_v14 }
 0x77e   : > { %v8138_v12 = vmax.f32 %v8103_v17, 0.0 }
 0x77f   : > { %v8078_v24 = vpop.f32.mrf.mxu2 }
 0x780   : > { %v8030_v11 = vpop.f32.mrf.mxu0  ;;  %8170 = vst [vmem:[%s13569_s28 + $0xf0] sm:$0xff] %v8138_v12  ;;  %v8079_v53 = vadd.f32 %v16139_v20, %v8078_v24 }
 0x781   : > { %v8031_v7 = vadd.f32 %v16139_v20, %v8030_v11 }
 0x782   : > { %v8130_v9 = vmax.f32 %v8079_v53, 0.0 }
 0x783   : > { %v8114_v4 = vmax.f32 %v8031_v7, 0.0 }
 0x784   : > { %8162 = vst [vmem:[%s13569_s28 + $0xb0] sm:$0xff] %v8130_v9 }
 0x785   : > { %8146 = vst [vmem:[%s13569_s28 + $0x30] sm:$0xff] %v8114_v4 }
 0x786   : > { %v8054_v44 = vpop.f32.mrf.mxu1 }
 0x787   : > { %v8055_v18 = vadd.f32 %v16139_v20, %v8054_v44 }
 0x789   : > { %v8122_v27 = vmax.f32 %v8055_v18, 0.0 }
 0x78b   : > { %8154 = vst [vmem:[%s13569_s28 + $0x70] sm:$0xff] %v8122_v27 }
 0x791   : > { %v8105_v39 = vpop.f32.mrf.mxu3  ;;  %v8033_v3 = vpop.f32.mrf.mxu0 }
 0x792   : > { %v8106_v42 = vadd.f32 %v16139_v20, %v8105_v39  ;;  %v8034_v57 = vadd.f32 %v16139_v20, %v8033_v3 }
 0x793   : > { %v8081_v23 = vpop.f32.mrf.mxu2 }
 0x794   : > { %v8139_v5 = vmax.f32 %v8106_v42, 0.0  ;;  %v8115_v62 = vmax.f32 %v8034_v57, 0.0  ;;  %v8082_v0 = vadd.f32 %v16139_v20, %v8081_v23 }
 0x795   : > { %v8057_v30 = vpop.f32.mrf.mxu1 }
 0x796   : > { %8171 = vst [vmem:[%s13569_s28 + $0xf8] sm:$0xff] %v8139_v5  ;;  %v8131_v6 = vmax.f32 %v8082_v0, 0.0  ;;  %v8058_v41 = vadd.f32 %v16139_v20, %v8057_v30 }
 0x797   : > { %8147 = vst [vmem:[%s13569_s28 + $0x38] sm:$0xff] %v8115_v62 }
 0x798   : > { %8163 = vst [vmem:[%s13569_s28 + $0xb8] sm:$0xff] %v8131_v6  ;;  %v8123_v43 = vmax.f32 %v8058_v41, 0.0 }
 0x79a   : > { %8155 = vst [vmem:[%s13569_s28 + $0x78] sm:$0xff] %v8123_v43 }
 0x79b   : > { %8729 = shalt.err (!%p8726_p3)
}
 0x79c   : > { %s8770_s20 = smov 128   ;;  %s8771_s28 = smov 8  }
 0x79d   : > { %8635 = dma.vmem_to_hbm [thread:$0]  (%p8835_p5), %s8186_s19, 4096, %s8188_s22, %s8173_s23, %s8770_s20, %s8770_s20, %s8771_s28  }
 0x79e PF: > { %p8641_p4 = scmp.ge.s32.totalorder %s8764_s18, 2  ;;  %s8202_s9 = sand.u32 1, %s8752_s15  }
 0x79f   : > { %s8203_s10 = scalar_lea.sflag [#allocation3], %s8202_s9 }
 0x7a0   : > { %p8638_p7 = pnand %p8641_p4, %p8839_p6 }
 0x7a2   : > { %p8639_p8 = pneg %p8638_p7 }
 0x7a4   : > { %8747 = dma.done.wait (%p8639_p8), %s8203_s10, 4096  }
 0x7a5   : > { %8749 = vsyncadd (%p8639_p8), %s8203_s10, 4294963200  ;;  %p14_p9 = scmp.ge.s32.totalorder %s8822_s21, 4   ;;  %s17582_s15 = smov %s8756_s16 }
 0x7a6   : > { %s17583_s16 = smov %s8760_s17  ;;  %s17584_s17 = smov %s8833_s24 }
 0x7a7   : > { %s17585_s18 = smov %s8822_s21  ;;  %16 = sbr.rel (!%p14_p9) target bundleno = 3 (0x3), region = 74 }
 0x7ac   :  { %8209 = vsyncpa [#allocation3], 1 }
 0x7ad   :  { %8211 = vsyncpa [#allocation3 + $0x1], 1 }

</bundles_post_ra>
